<compile_context>
chip_gen: v7x
topology: tpu7x:2x2x1
jax: 0.10.0
libtpu: 0.0.40
codegen_flags: <defaults>
</compile_context>

<pallas_src>
import functools
import math

import jax
import jax.numpy as jnp
from jax import lax
from jax.experimental import pallas as pl
from jax.experimental.pallas import tpu as pltpu


# --------------------------------------------------------------------------
# Conv (+ folded BatchNorm): one pallas_call per layer, taps unrolled in-kernel
# --------------------------------------------------------------------------
def _conv_bn_kernel(x_ref, w_ref, b_ref, o_ref, *, H, W, kh, kw, dh, dw):
    """x_ref: (Hp, Wp, Cin) bf16 haloed block.  w_ref: (kh*kw, Cin, Cout) bf16.
    b_ref: (1, Cout) f32.  o_ref: (H*W, Cout) bf16."""
    cin = x_ref.shape[-1]
    acc = None
    for t in range(kh * kw):                      # static unroll over taps
        i, j = divmod(t, kw)
        tap = x_ref[pl.ds(i * dh, H), pl.ds(j * dw, W), :].reshape(H * W, cin)
        part = jnp.dot(tap, w_ref[t], preferred_element_type=jnp.float32)
        acc = part if acc is None else acc + part
    o_ref[...] = (acc + b_ref[...]).astype(o_ref.dtype)


def conv_bn(x_nhwc, p):
    """NHWC -> NHWC bf16 conv + folded BN; f32 accumulate, no im2col in HBM."""
    B, H, W, Cin = x_nhwc.shape
    kh, kw, dh, dw, ph, pw = p['kh'], p['kw'], p['dh'], p['dw'], p['ph'], p['pw']
    Cout = p['w_taps'].shape[-1]

    xb = x_nhwc.astype(jnp.bfloat16)
    if ph or pw:
        xb = jnp.pad(xb, ((0, 0), (ph, ph), (pw, pw), (0, 0)))
    Hp, Wp = H + 2 * ph, W + 2 * pw

    kernel = functools.partial(_conv_bn_kernel, H=H, W=W, kh=kh, kw=kw, dh=dh, dw=dw)
    # TODO(synk): tile H (with halo rows) onto the grid for production-size
    # feature maps; one whole image per grid step only fits VMEM at demo scale.
    out = pl.pallas_call(
        kernel,
        out_shape=jax.ShapeDtypeStruct((B, H * W, Cout), jnp.bfloat16),
        grid=(B,),
        in_specs=[
            pl.BlockSpec((None, Hp, Wp, Cin), lambda b: (b, 0, 0, 0)),
            pl.BlockSpec((kh * kw, Cin, Cout), lambda b: (0, 0, 0)),
            pl.BlockSpec((1, Cout), lambda b: (0, 0)),
        ],
        out_specs=pl.BlockSpec((None, H * W, Cout), lambda b: (b, 0, 0)),
        compiler_params=pltpu.CompilerParams(
            dimension_semantics=("parallel",),
            vmem_limit_bytes=32 * 1024 * 1024),
        cost_estimate=pl.CostEstimate(
            flops=2 * B * H * W * kh * kw * Cin * Cout,
            transcendentals=0,
            bytes_accessed=B * Hp * Wp * Cin * 2 + kh * kw * Cin * Cout * 2
                           + Cout * 4 + B * H * W * Cout * 2),
    )(xb, p['w_taps'], p['b'].reshape(1, Cout))
    return out.reshape(B, H, W, Cout)


def make_conv_params(key, cin, cout, ksize, dilation=1):
    kh, kw = (ksize, ksize) if isinstance(ksize, int) else ksize
    dh = dw = dilation
    ks = jax.random.split(key, 5)
    fan_in = cin * kh * kw
    w = jax.random.normal(ks[0], (cout, cin, kh, kw), jnp.float32) / math.sqrt(fan_in)
    bn_gamma = 1.0 + 0.1 * jax.random.normal(ks[1], (cout,), jnp.float32)
    bn_beta = 0.1 * jax.random.normal(ks[2], (cout,), jnp.float32)
    bn_mean = 0.1 * jax.random.normal(ks[3], (cout,), jnp.float32)
    bn_var = jax.random.uniform(ks[4], (cout,), jnp.float32, 0.5, 1.5)
    # Fold eval-mode BatchNorm into the conv (per-output-channel scale + shift).
    scale = bn_gamma / jnp.sqrt(bn_var + 1e-5)
    w_fold = w * scale[:, None, None, None]
    b_fold = bn_beta - bn_mean * scale
    # (kh*kw, Cin, Cout) taps, in t = i*kw + j order matching the kernel unroll.
    w_taps = jnp.transpose(w_fold, (2, 3, 1, 0)).reshape(kh * kw, cin, cout)
    return dict(
        w_oihw=w_fold,                                  # f32, pure-JAX reference
        w_taps=w_taps.astype(jnp.bfloat16),
        b=b_fold,
        kh=kh, kw=kw, dh=dh, dw=dw,
        ph=((kh - 1) * dh) // 2, pw=((kw - 1) * dw) // 2,
    )


# --------------------------------------------------------------------------
# Axial attention: grid over batch, bf16 operands, lane-dense (A, Mv) output
# --------------------------------------------------------------------------
def _axial_attn_kernel(*refs):
    """refs = (qT_0, k_0, vT_0, ..., qT_{n-1}, k_{n-1}, vT_{n-1}, gamma_smem, o).
    Per batch item:  o = sum_i gamma_i * softmax(qT_i @ k_i) @ vT_i   (A, Mv)."""
    *in_refs, gamma_ref, o_ref = refs
    acc = None
    for i in range(len(in_refs) // 3):
        qT_ref, k_ref, vT_ref = in_refs[3 * i:3 * i + 3]
        s = jnp.dot(qT_ref[...], k_ref[...], preferred_element_type=jnp.float32)
        s = s - jnp.max(s, axis=-1, keepdims=True)
        e = jnp.exp(s)
        attn = (e * pl.reciprocal(jnp.sum(e, axis=-1, keepdims=True),
                                  approx=True)).astype(jnp.bfloat16)
        out = gamma_ref[i] * jnp.dot(attn, vT_ref[...],
                                     preferred_element_type=jnp.float32)
        acc = out if acc is None else acc + out
    o_ref[...] = acc.astype(o_ref.dtype)


def axial_attention(branches, gammas):
    """branches: list of (qT (B,A,Mq), k (B,Mq,A), vT (B,A,Mv)) bf16 triples.
    Returns sum_i gamma_i * attention_i(v_i) as (B, A, Mv) bf16 (Mv lane-dense)."""
    B, A, Mq = branches[0][0].shape
    Mv = branches[0][2].shape[-1]
    flat, in_specs = [], []
    for (qT, k, vT) in branches:
        flat += [qT.astype(jnp.bfloat16), k.astype(jnp.bfloat16),
                 vT.astype(jnp.bfloat16)]
        in_specs += [pl.BlockSpec((None, A, Mq), lambda b: (b, 0, 0)),
                     pl.BlockSpec((None, Mq, A), lambda b: (b, 0, 0)),
                     pl.BlockSpec((None, A, Mv), lambda b: (b, 0, 0))]
    in_specs.append(pl.BlockSpec(memory_space=pltpu.MemorySpace.SMEM))
    gam = jnp.stack([jnp.asarray(g, dtype=jnp.float32) for g in gammas])
    return pl.pallas_call(
        _axial_attn_kernel,
        out_shape=jax.ShapeDtypeStruct((B, A, Mv), jnp.bfloat16),
        grid=(B,),
        in_specs=in_specs,
        out_specs=pl.BlockSpec((None, A, Mv), lambda b: (b, 0, 0)),
        compiler_params=pltpu.CompilerParams(
            dimension_semantics=("parallel",),
            vmem_limit_bytes=32 * 1024 * 1024),
    )(*flat, gam)


def make_self_attn_params(key, channels):
    k1, k2, k3 = jax.random.split(key, 3)
    return dict(
        query=make_conv_params(k1, channels, channels // 8, 1),
        key=make_conv_params(k2, channels, channels // 8, 1),
        value=make_conv_params(k3, channels, channels, 1),
        # NOTE: the PyTorch module initializes gamma to 0 (attention branch is a
        # no-op at init); use a deterministic nonzero value to exercise the kernel.
        gamma=jnp.float32(0.5),
    )


def self_attn_pair(x_nhwc, pH, pW):
    """Hattn(x) + Wattn(x) in NHWC.  Six 1x1 projections fused into one
    lane-padded matmul; for H == W both branches share one attention call and
    the gammaH*outH + gammaW*outW sum is fused into the kernel epilogue."""
    B, H, W, C = x_nhwc.shape
    Cq = C // 8
    # Fused projection columns: [vH(C) | vW(C) | qH | kH | qW | kW | zero-pad].
    n_real = 2 * C + 4 * Cq
    n_pad = pl.cdiv(n_real, 128) * 128
    w_fused = jnp.concatenate(
        [pH['value']['w_taps'], pW['value']['w_taps'],
         pH['query']['w_taps'], pH['key']['w_taps'],
         pW['query']['w_taps'], pW['key']['w_taps']], axis=-1)
    b_fused = jnp.concatenate(
        [pH['value']['b'], pW['value']['b'], pH['query']['b'], pH['key']['b'],
         pW['query']['b'], pW['key']['b']])
    if n_pad != n_real:
        w_fused = jnp.pad(w_fused, ((0, 0), (0, 0), (0, n_pad - n_real)))
        b_fused = jnp.pad(b_fused, (0, n_pad - n_real))
    proj_p = dict(w_taps=w_fused, b=b_fused, kh=1, kw=1, dh=1, dw=1, ph=0, pw=0)
    proj = conv_bn(x_nhwc, proj_p)                       # (B, H, W, n_pad) bf16

    vH, vW = proj[..., :C], proj[..., C:2 * C]
    qH, kH = proj[..., 2 * C:2 * C + Cq], proj[..., 2 * C + Cq:2 * C + 2 * Cq]
    qW, kW = (proj[..., 2 * C + 2 * Cq:2 * C + 3 * Cq],
              proj[..., 2 * C + 3 * Cq:n_real])

    if H == W:
        # torch .view(B, -1, axis) of the NCHW tensor reduces, when H == W, to
        # rows m = c*H + h and columns a = w for BOTH the 'h' and 'w' modes.
        A = W

        def qT_view(c):   # (B, H, W, Cp) -> (B, A, Cp*H)   (one copy)
            return jnp.transpose(c, (0, 2, 3, 1)).reshape(B, A, -1)

        def k_view(c):    # (B, H, W, Cp) -> (B, Cp*H, A)   (one copy)
            return jnp.transpose(c, (0, 3, 1, 2)).reshape(B, -1, A)

        oT = axial_attention(
            [(qT_view(qH), k_view(kH), qT_view(vH)),
             (qT_view(qW), k_view(kW), qT_view(vW))],
            [pH['gamma'], pW['gamma']])                  # (B, A, C*H) bf16
        o_nhwc = jnp.transpose(oT.reshape(B, A, C, H), (0, 3, 1, 2))
        return o_nhwc + 2.0 * x_nhwc                     # the two residual adds

    # General H != W: faithful NCHW flat-view path, one attention call per branch.
    def branch(qc, kc, vc, gamma, axis):
        def flat(c):      # NCHW .view(B, -1, axis)
            return jnp.transpose(c, (0, 3, 1, 2)).reshape(B, -1, axis)
        oT = axial_attention(
            [(flat(qc).transpose(0, 2, 1), flat(kc), flat(vc).transpose(0, 2, 1))],
            [gamma])
        o_nchw = jnp.transpose(oT, (0, 2, 1)).reshape(B, C, H, W)
        return jnp.transpose(o_nchw, (0, 2, 3, 1))

    Hx = branch(qH, kH, vH, pH['gamma'], H)
    Wx = branch(qW, kW, vW, pW['gamma'], W)
    return Hx + Wx + 2.0 * x_nhwc


# --------------------------------------------------------------------------
# PAA_kernel
# --------------------------------------------------------------------------
def make_paa_kernel_params(key, in_channel, out_channel, receptive_size=3):
    ks = jax.random.split(key, 6)
    return dict(
        conv0=make_conv_params(ks[0], in_channel, out_channel, 1),
        conv1=make_conv_params(ks[1], out_channel, out_channel, (1, receptive_size)),
        conv2=make_conv_params(ks[2], out_channel, out_channel, (receptive_size, 1)),
        conv3=make_conv_params(ks[3], out_channel, out_channel, 3, dilation=receptive_size),
        Hattn=make_self_attn_params(ks[4], out_channel),
        Wattn=make_self_attn_params(ks[5], out_channel),
    )


def paa_kernel_forward(x_nchw, params):
    # NCHW -> NHWC + bf16 once at the module boundary; activations stay bf16.
    x = x_nchw.transpose(0, 2, 3, 1).astype(jnp.bfloat16)
    x = conv_bn(x, params['conv0'])
    x = conv_bn(x, params['conv1'])
    x = conv_bn(x, params['conv2'])
    hw = self_attn_pair(x, params['Hattn'], params['Wattn'])
    y = conv_bn(hw, params['conv3'])
    return y.transpose(0, 3, 1, 2).astype(jnp.float32)   # back to NCHW, f32


# --------------------------------------------------------------------------
# Pure-JAX f32 reference (for correctness check)
# --------------------------------------------------------------------------
def _conv_ref(x, p):
    out = lax.conv_general_dilated(
        x, p['w_oihw'], window_strides=(1, 1),
        padding=[(p['ph'], p['ph']), (p['pw'], p['pw'])],
        rhs_dilation=(p['dh'], p['dw']),
        dimension_numbers=('NCHW', 'OIHW', 'NCHW'))
    return out + p['b'][None, :, None, None]


def _self_attn_ref(x, p, mode):
    B, C, H, W = x.shape
    axis = 1
    if 'h' in mode:
        axis *= H
    if 'w' in mode:
        axis *= W
    q = _conv_ref(x, p['query']).reshape(B, -1, axis)
    k = _conv_ref(x, p['key']).reshape(B, -1, axis)
    v = _conv_ref(x, p['value']).reshape(B, -1, axis)
    attn = jax.nn.softmax(jnp.einsum('bma,bmc->bac', q, k), axis=-1)
    out = jnp.einsum('bmj,baj->bma', v, attn).reshape(B, C, H, W)
    return p['gamma'] * out + x


def _paa_ref(x, params):
    x = _conv_ref(x, params['conv0'])
    x = _conv_ref(x, params['conv1'])
    x = _conv_ref(x, params['conv2'])
    Hx = _self_attn_ref(x, params['Hattn'], 'h')
    Wx = _self_attn_ref(x, params['Wattn'], 'w')
    return _conv_ref(Hx + Wx, params['conv3'])


if __name__ == "__main__":
    key = jax.random.PRNGKey(0)
    kx, kp = jax.random.split(key)

    B, Cin, H, W = 2, 16, 16, 16
    Cout = 32  # out_channel // 8 must be >= 1 for the attention q/k projections

    x = jax.random.normal(kx, (B, Cin, H, W), jnp.float32)
    params = make_paa_kernel_params(kp, Cin, Cout, receptive_size=3)

    fwd = jax.jit(lambda inp: paa_kernel_forward(inp, params))
    out = jax.block_until_ready(fwd(x))

    ref = _paa_ref(x, params)
    rel_l2 = jnp.linalg.norm(out.astype(jnp.float32) - ref) / (jnp.linalg.norm(ref) + 1e-6)

    assert out.shape == (B, Cout, H, W)
    assert bool(jnp.isfinite(out).all())
    assert float(rel_l2) < 5e-2, f"mismatch vs f32 reference: rel L2 err {float(rel_l2)}"
    print("KERNEL_OK")
</pallas_src>

<mosaic_0001>
module attributes {stable_mosaic.version = 11 : i64} {
  func.func @_conv_bn_kernel(%arg0: i32, %arg1: memref<1x16x16x16xbf16, #tpu.memory_space<vmem>>, %arg2: memref<1x16x32xbf16, #tpu.memory_space<vmem>>, %arg3: memref<1x32xf32, #tpu.memory_space<vmem>>, %arg4: memref<1x256x32xbf16, #tpu.memory_space<vmem>>) attributes {dimension_semantics = [#tpu.dimension_semantics<parallel>], iteration_bounds = array<i64: 2>, scalar_prefetch = 0 : i64, scratch_operands = 0 : i64, tpu.core_type = #tpu.core_type<tc>, window_params = [{transform_indices = @transform_0, window_bounds = array<i64: 1, 16, 16, 16>}, {pipeline_mode = #tpu.pipeline_mode<synchronous>, transform_indices = @transform_1, window_bounds = array<i64: 1, 16, 32>}, {pipeline_mode = #tpu.pipeline_mode<synchronous>, transform_indices = @transform_2, window_bounds = array<i64: 1, 32>}, {transform_indices = @transform_3, window_bounds = array<i64: 1, 256, 32>}]} {
    %c0 = arith.constant 0 : index
    %c0_0 = arith.constant 0 : index
    %c0_1 = arith.constant 0 : index
    %c0_2 = arith.constant 0 : index
    %0 = vector.load %arg1[%c0, %c0_0, %c0_1, %c0_2] : memref<1x16x16x16xbf16, #tpu.memory_space<vmem>>, vector<1x16x16x16xbf16>
    %1 = vector.shape_cast %0 : vector<1x16x16x16xbf16> to vector<16x16x16xbf16>
    %2 = vector.shape_cast %1 : vector<16x16x16xbf16> to vector<256x16xbf16>
    %c0_3 = arith.constant 0 : index
    %c0_4 = arith.constant 0 : index
    %c0_5 = arith.constant 0 : index
    %3 = vector.load %arg2[%c0_3, %c0_4, %c0_5] : memref<1x16x32xbf16, #tpu.memory_space<vmem>>, vector<1x16x32xbf16>
    %4 = vector.shape_cast %3 : vector<1x16x32xbf16> to vector<16x32xbf16>
    %cst = arith.constant dense<0.000000e+00> : vector<256x32xf32>
    %5 = tpu.matmul %2, %4, %cst {dimension_numbers = #tpu.dot_dimension_numbers<[1], [0], [0], [1], [0, 0, 1, 1], [], []>} : vector<256x16xbf16>, vector<16x32xbf16>, vector<256x32xf32> -> vector<256x32xf32>
    %c0_6 = arith.constant 0 : index
    %c0_7 = arith.constant 0 : index
    %6 = vector.load %arg3[%c0_6, %c0_7] : memref<1x32xf32, #tpu.memory_space<vmem>>, vector<1x32xf32>
    %7 = vector.broadcast %6 : vector<1x32xf32> to vector<256x32xf32>
    %8 = arith.addf %5, %7 : vector<256x32xf32>
    %9 = arith.truncf %8 : vector<256x32xf32> to vector<256x32xbf16>
    %c0_8 = arith.constant 0 : index
    %c0_9 = arith.constant 0 : index
    %c0_10 = arith.constant 0 : index
    %10 = vector.load %arg4[%c0_8, %c0_9, %c0_10] : memref<1x256x32xbf16, #tpu.memory_space<vmem>>, vector<1x256x32xbf16>
    %11 = vector.shape_cast %10 : vector<1x256x32xbf16> to vector<256x32xbf16>
    %12 = vector.shape_cast %9 : vector<256x32xbf16> to vector<1x256x32xbf16>
    tpu.vector_store %arg4[%c0_8, %c0_9, %c0_10], %12 {strides = array<i32>} : memref<1x256x32xbf16, #tpu.memory_space<vmem>>, vector<1x256x32xbf16>,
    return
  }
  func.func @transform_0(%arg0: i32) -> (i32, i32, i32, i32) {
    %c0_i32 = arith.constant 0 : i32
    %c0_i32_0 = arith.constant 0 : i32
    %c0_i32_1 = arith.constant 0 : i32
    %c0_i32_2 = arith.constant 0 : i32
    return %arg0, %c0_i32, %c0_i32_0, %c0_i32_1 : i32, i32, i32, i32
  }
  func.func @transform_1(%arg0: i32) -> (i32, i32, i32) {
    %c0_i32 = arith.constant 0 : i32
    %c0_i32_0 = arith.constant 0 : i32
    %c0_i32_1 = arith.constant 0 : i32
    %c0_i32_2 = arith.constant 0 : i32
    return %c0_i32, %c0_i32_0, %c0_i32_1 : i32, i32, i32
  }
  func.func @transform_2(%arg0: i32) -> (i32, i32) {
    %c0_i32 = arith.constant 0 : i32
    %c0_i32_0 = arith.constant 0 : i32
    %c0_i32_1 = arith.constant 0 : i32
    return %c0_i32, %c0_i32_0 : i32, i32
  }
  func.func @transform_3(%arg0: i32) -> (i32, i32, i32) {
    %c0_i32 = arith.constant 0 : i32
    %c0_i32_0 = arith.constant 0 : i32
    %c0_i32_1 = arith.constant 0 : i32
    return %arg0, %c0_i32, %c0_i32_0 : i32, i32, i32
  }
}

module attributes {stable_mosaic.version = 11 : i64} {
  func.func @_conv_bn_kernel(%arg0: i32, %arg1: memref<1x16x18x32xbf16, #tpu.memory_space<vmem>>, %arg2: memref<3x32x32xbf16, #tpu.memory_space<vmem>>, %arg3: memref<1x32xf32, #tpu.memory_space<vmem>>, %arg4: memref<1x256x32xbf16, #tpu.memory_space<vmem>>) attributes {dimension_semantics = [#tpu.dimension_semantics<parallel>], iteration_bounds = array<i64: 2>, scalar_prefetch = 0 : i64, scratch_operands = 0 : i64, tpu.core_type = #tpu.core_type<tc>, window_params = [{transform_indices = @transform_0, window_bounds = array<i64: 1, 16, 18, 32>}, {pipeline_mode = #tpu.pipeline_mode<synchronous>, transform_indices = @transform_1, window_bounds = array<i64: 3, 32, 32>}, {pipeline_mode = #tpu.pipeline_mode<synchronous>, transform_indices = @transform_2, window_bounds = array<i64: 1, 32>}, {transform_indices = @transform_3, window_bounds = array<i64: 1, 256, 32>}]} {
    %c0 = arith.constant 0 : index
    %c0_0 = arith.constant 0 : index
    %c0_1 = arith.constant 0 : index
    %c0_2 = arith.constant 0 : index
    %0 = vector.load %arg1[%c0, %c0_0, %c0_1, %c0_2] : memref<1x16x18x32xbf16, #tpu.memory_space<vmem>>, vector<1x16x16x32xbf16>
    %1 = vector.shape_cast %0 : vector<1x16x16x32xbf16> to vector<16x16x32xbf16>
    %2 = vector.shape_cast %1 : vector<16x16x32xbf16> to vector<256x32xbf16>
    %c0_3 = arith.constant 0 : index
    %c0_4 = arith.constant 0 : index
    %c0_5 = arith.constant 0 : index
    %3 = vector.load %arg2[%c0_3, %c0_4, %c0_5] : memref<3x32x32xbf16, #tpu.memory_space<vmem>>, vector<1x32x32xbf16>
    %4 = vector.shape_cast %3 : vector<1x32x32xbf16> to vector<32x32xbf16>
    %cst = arith.constant dense<0.000000e+00> : vector<256x32xf32>
    %5 = tpu.matmul %2, %4, %cst {dimension_numbers = #tpu.dot_dimension_numbers<[1], [0], [0], [1], [0, 0, 1, 1], [], []>} : vector<256x32xbf16>, vector<32x32xbf16>, vector<256x32xf32> -> vector<256x32xf32>
    %c0_6 = arith.constant 0 : index
    %c0_7 = arith.constant 0 : index
    %c1 = arith.constant 1 : index
    %c0_8 = arith.constant 0 : index
    %6 = vector.load %arg1[%c0_6, %c0_7, %c1, %c0_8] : memref<1x16x18x32xbf16, #tpu.memory_space<vmem>>, vector<1x16x16x32xbf16>
    %7 = vector.shape_cast %6 : vector<1x16x16x32xbf16> to vector<16x16x32xbf16>
    %8 = vector.shape_cast %7 : vector<16x16x32xbf16> to vector<256x32xbf16>
    %c1_9 = arith.constant 1 : index
    %c0_10 = arith.constant 0 : index
    %c0_11 = arith.constant 0 : index
    %9 = vector.load %arg2[%c1_9, %c0_10, %c0_11] : memref<3x32x32xbf16, #tpu.memory_space<vmem>>, vector<1x32x32xbf16>
    %10 = vector.shape_cast %9 : vector<1x32x32xbf16> to vector<32x32xbf16>
    %cst_12 = arith.constant dense<0.000000e+00> : vector<256x32xf32>
    %11 = tpu.matmul %8, %10, %cst_12 {dimension_numbers = #tpu.dot_dimension_numbers<[1], [0], [0], [1], [0, 0, 1, 1], [], []>} : vector<256x32xbf16>, vector<32x32xbf16>, vector<256x32xf32> -> vector<256x32xf32>
    %12 = arith.addf %5, %11 : vector<256x32xf32>
    %c0_13 = arith.constant 0 : index
    %c0_14 = arith.constant 0 : index
    %c2 = arith.constant 2 : index
    %c0_15 = arith.constant 0 : index
    %13 = vector.load %arg1[%c0_13, %c0_14, %c2, %c0_15] : memref<1x16x18x32xbf16, #tpu.memory_space<vmem>>, vector<1x16x16x32xbf16>
    %14 = vector.shape_cast %13 : vector<1x16x16x32xbf16> to vector<16x16x32xbf16>
    %15 = vector.shape_cast %14 : vector<16x16x32xbf16> to vector<256x32xbf16>
    %c2_16 = arith.constant 2 : index
    %c0_17 = arith.constant 0 : index
    %c0_18 = arith.constant 0 : index
    %16 = vector.load %arg2[%c2_16, %c0_17, %c0_18] : memref<3x32x32xbf16, #tpu.memory_space<vmem>>, vector<1x32x32xbf16>
    %17 = vector.shape_cast %16 : vector<1x32x32xbf16> to vector<32x32xbf16>
    %cst_19 = arith.constant dense<0.000000e+00> : vector<256x32xf32>
    %18 = tpu.matmul %15, %17, %cst_19 {dimension_numbers = #tpu.dot_dimension_numbers<[1], [0], [0], [1], [0, 0, 1, 1], [], []>} : vector<256x32xbf16>, vector<32x32xbf16>, vector<256x32xf32> -> vector<256x32xf32>
    %19 = arith.addf %12, %18 : vector<256x32xf32>
    %c0_20 = arith.constant 0 : index
    %c0_21 = arith.constant 0 : index
    %20 = vector.load %arg3[%c0_20, %c0_21] : memref<1x32xf32, #tpu.memory_space<vmem>>, vector<1x32xf32>
    %21 = vector.broadcast %20 : vector<1x32xf32> to vector<256x32xf32>
    %22 = arith.addf %19, %21 : vector<256x32xf32>
    %23 = arith.truncf %22 : vector<256x32xf32> to vector<256x32xbf16>
    %c0_22 = arith.constant 0 : index
    %c0_23 = arith.constant 0 : index
    %c0_24 = arith.constant 0 : index
    %24 = vector.load %arg4[%c0_22, %c0_23, %c0_24] : memref<1x256x32xbf16, #tpu.memory_space<vmem>>, vector<1x256x32xbf16>
    %25 = vector.shape_cast %24 : vector<1x256x32xbf16> to vector<256x32xbf16>
    %26 = vector.shape_cast %23 : vector<256x32xbf16> to vector<1x256x32xbf16>
    tpu.vector_store %arg4[%c0_22, %c0_23, %c0_24], %26 {strides = array<i32>} : memref<1x256x32xbf16, #tpu.memory_space<vmem>>, vector<1x256x32xbf16>,
    return
  }
  func.func @transform_0(%arg0: i32) -> (i32, i32, i32, i32) {
    %c0_i32 = arith.constant 0 : i32
    %c0_i32_0 = arith.constant 0 : i32
    %c0_i32_1 = arith.constant 0 : i32
    %c0_i32_2 = arith.constant 0 : i32
    return %arg0, %c0_i32, %c0_i32_0, %c0_i32_1 : i32, i32, i32, i32
  }
  func.func @transform_1(%arg0: i32) -> (i32, i32, i32) {
    %c0_i32 = arith.constant 0 : i32
    %c0_i32_0 = arith.constant 0 : i32
    %c0_i32_1 = arith.constant 0 : i32
    %c0_i32_2 = arith.constant 0 : i32
    return %c0_i32, %c0_i32_0, %c0_i32_1 : i32, i32, i32
  }
  func.func @transform_2(%arg0: i32) -> (i32, i32) {
    %c0_i32 = arith.constant 0 : i32
    %c0_i32_0 = arith.constant 0 : i32
    %c0_i32_1 = arith.constant 0 : i32
    return %c0_i32, %c0_i32_0 : i32, i32
  }
  func.func @transform_3(%arg0: i32) -> (i32, i32, i32) {
    %c0_i32 = arith.constant 0 : i32
    %c0_i32_0 = arith.constant 0 : i32
    %c0_i32_1 = arith.constant 0 : i32
    return %arg0, %c0_i32, %c0_i32_0 : i32, i32, i32
  }
}

module attributes {stable_mosaic.version = 11 : i64} {
  func.func @_conv_bn_kernel(%arg0: i32, %arg1: memref<1x18x16x32xbf16, #tpu.memory_space<vmem>>, %arg2: memref<3x32x32xbf16, #tpu.memory_space<vmem>>, %arg3: memref<1x32xf32, #tpu.memory_space<vmem>>, %arg4: memref<1x256x32xbf16, #tpu.memory_space<vmem>>) attributes {dimension_semantics = [#tpu.dimension_semantics<parallel>], iteration_bounds = array<i64: 2>, scalar_prefetch = 0 : i64, scratch_operands = 0 : i64, tpu.core_type = #tpu.core_type<tc>, window_params = [{transform_indices = @transform_0, window_bounds = array<i64: 1, 18, 16, 32>}, {pipeline_mode = #tpu.pipeline_mode<synchronous>, transform_indices = @transform_1, window_bounds = array<i64: 3, 32, 32>}, {pipeline_mode = #tpu.pipeline_mode<synchronous>, transform_indices = @transform_2, window_bounds = array<i64: 1, 32>}, {transform_indices = @transform_3, window_bounds = array<i64: 1, 256, 32>}]} {
    %c0 = arith.constant 0 : index
    %c0_0 = arith.constant 0 : index
    %c0_1 = arith.constant 0 : index
    %c0_2 = arith.constant 0 : index
    %0 = vector.load %arg1[%c0, %c0_0, %c0_1, %c0_2] : memref<1x18x16x32xbf16, #tpu.memory_space<vmem>>, vector<1x16x16x32xbf16>
    %1 = vector.shape_cast %0 : vector<1x16x16x32xbf16> to vector<16x16x32xbf16>
    %2 = vector.shape_cast %1 : vector<16x16x32xbf16> to vector<256x32xbf16>
    %c0_3 = arith.constant 0 : index
    %c0_4 = arith.constant 0 : index
    %c0_5 = arith.constant 0 : index
    %3 = vector.load %arg2[%c0_3, %c0_4, %c0_5] : memref<3x32x32xbf16, #tpu.memory_space<vmem>>, vector<1x32x32xbf16>
    %4 = vector.shape_cast %3 : vector<1x32x32xbf16> to vector<32x32xbf16>
    %cst = arith.constant dense<0.000000e+00> : vector<256x32xf32>
    %5 = tpu.matmul %2, %4, %cst {dimension_numbers = #tpu.dot_dimension_numbers<[1], [0], [0], [1], [0, 0, 1, 1], [], []>} : vector<256x32xbf16>, vector<32x32xbf16>, vector<256x32xf32> -> vector<256x32xf32>
    %c0_6 = arith.constant 0 : index
    %c1 = arith.constant 1 : index
    %c0_7 = arith.constant 0 : index
    %c0_8 = arith.constant 0 : index
    %6 = vector.load %arg1[%c0_6, %c1, %c0_7, %c0_8] : memref<1x18x16x32xbf16, #tpu.memory_space<vmem>>, vector<1x16x16x32xbf16>
    %7 = vector.shape_cast %6 : vector<1x16x16x32xbf16> to vector<16x16x32xbf16>
    %8 = vector.shape_cast %7 : vector<16x16x32xbf16> to vector<256x32xbf16>
    %c1_9 = arith.constant 1 : index
    %c0_10 = arith.constant 0 : index
    %c0_11 = arith.constant 0 : index
    %9 = vector.load %arg2[%c1_9, %c0_10, %c0_11] : memref<3x32x32xbf16, #tpu.memory_space<vmem>>, vector<1x32x32xbf16>
    %10 = vector.shape_cast %9 : vector<1x32x32xbf16> to vector<32x32xbf16>
    %cst_12 = arith.constant dense<0.000000e+00> : vector<256x32xf32>
    %11 = tpu.matmul %8, %10, %cst_12 {dimension_numbers = #tpu.dot_dimension_numbers<[1], [0], [0], [1], [0, 0, 1, 1], [], []>} : vector<256x32xbf16>, vector<32x32xbf16>, vector<256x32xf32> -> vector<256x32xf32>
    %12 = arith.addf %5, %11 : vector<256x32xf32>
    %c0_13 = arith.constant 0 : index
    %c2 = arith.constant 2 : index
    %c0_14 = arith.constant 0 : index
    %c0_15 = arith.constant 0 : index
    %13 = vector.load %arg1[%c0_13, %c2, %c0_14, %c0_15] : memref<1x18x16x32xbf16, #tpu.memory_space<vmem>>, vector<1x16x16x32xbf16>
    %14 = vector.shape_cast %13 : vector<1x16x16x32xbf16> to vector<16x16x32xbf16>
    %15 = vector.shape_cast %14 : vector<16x16x32xbf16> to vector<256x32xbf16>
    %c2_16 = arith.constant 2 : index
    %c0_17 = arith.constant 0 : index
    %c0_18 = arith.constant 0 : index
    %16 = vector.load %arg2[%c2_16, %c0_17, %c0_18] : memref<3x32x32xbf16, #tpu.memory_space<vmem>>, vector<1x32x32xbf16>
    %17 = vector.shape_cast %16 : vector<1x32x32xbf16> to vector<32x32xbf16>
    %cst_19 = arith.constant dense<0.000000e+00> : vector<256x32xf32>
    %18 = tpu.matmul %15, %17, %cst_19 {dimension_numbers = #tpu.dot_dimension_numbers<[1], [0], [0], [1], [0, 0, 1, 1], [], []>} : vector<256x32xbf16>, vector<32x32xbf16>, vector<256x32xf32> -> vector<256x32xf32>
    %19 = arith.addf %12, %18 : vector<256x32xf32>
    %c0_20 = arith.constant 0 : index
    %c0_21 = arith.constant 0 : index
    %20 = vector.load %arg3[%c0_20, %c0_21] : memref<1x32xf32, #tpu.memory_space<vmem>>, vector<1x32xf32>
    %21 = vector.broadcast %20 : vector<1x32xf32> to vector<256x32xf32>
    %22 = arith.addf %19, %21 : vector<256x32xf32>
    %23 = arith.truncf %22 : vector<256x32xf32> to vector<256x32xbf16>
    %c0_22 = arith.constant 0 : index
    %c0_23 = arith.constant 0 : index
    %c0_24 = arith.constant 0 : index
    %24 = vector.load %arg4[%c0_22, %c0_23, %c0_24] : memref<1x256x32xbf16, #tpu.memory_space<vmem>>, vector<1x256x32xbf16>
    %25 = vector.shape_cast %24 : vector<1x256x32xbf16> to vector<256x32xbf16>
    %26 = vector.shape_cast %23 : vector<256x32xbf16> to vector<1x256x32xbf16>
    tpu.vector_store %arg4[%c0_22, %c0_23, %c0_24], %26 {strides = array<i32>} : memref<1x256x32xbf16, #tpu.memory_space<vmem>>, vector<1x256x32xbf16>,
    return
  }
  func.func @transform_0(%arg0: i32) -> (i32, i32, i32, i32) {
    %c0_i32 = arith.constant 0 : i32
    %c0_i32_0 = arith.constant 0 : i32
    %c0_i32_1 = arith.constant 0 : i32
    %c0_i32_2 = arith.constant 0 : i32
    return %arg0, %c0_i32, %c0_i32_0, %c0_i32_1 : i32, i32, i32, i32
  }
  func.func @transform_1(%arg0: i32) -> (i32, i32, i32) {
    %c0_i32 = arith.constant 0 : i32
    %c0_i32_0 = arith.constant 0 : i32
    %c0_i32_1 = arith.constant 0 : i32
    %c0_i32_2 = arith.constant 0 : i32
    return %c0_i32, %c0_i32_0, %c0_i32_1 : i32, i32, i32
  }
  func.func @transform_2(%arg0: i32) -> (i32, i32) {
    %c0_i32 = arith.constant 0 : i32
    %c0_i32_0 = arith.constant 0 : i32
    %c0_i32_1 = arith.constant 0 : i32
    return %c0_i32, %c0_i32_0 : i32, i32
  }
  func.func @transform_3(%arg0: i32) -> (i32, i32, i32) {
    %c0_i32 = arith.constant 0 : i32
    %c0_i32_0 = arith.constant 0 : i32
    %c0_i32_1 = arith.constant 0 : i32
    return %arg0, %c0_i32, %c0_i32_0 : i32, i32, i32
  }
}

module attributes {stable_mosaic.version = 11 : i64} {
  func.func @_conv_bn_kernel(%arg0: i32, %arg1: memref<1x16x16x32xbf16, #tpu.memory_space<vmem>>, %arg2: memref<1x32x128xbf16, #tpu.memory_space<vmem>>, %arg3: memref<1x128xf32, #tpu.memory_space<vmem>>, %arg4: memref<1x256x128xbf16, #tpu.memory_space<vmem>>) attributes {dimension_semantics = [#tpu.dimension_semantics<parallel>], iteration_bounds = array<i64: 2>, scalar_prefetch = 0 : i64, scratch_operands = 0 : i64, tpu.core_type = #tpu.core_type<tc>, window_params = [{transform_indices = @transform_0, window_bounds = array<i64: 1, 16, 16, 32>}, {pipeline_mode = #tpu.pipeline_mode<synchronous>, transform_indices = @transform_1, window_bounds = array<i64: 1, 32, 128>}, {pipeline_mode = #tpu.pipeline_mode<synchronous>, transform_indices = @transform_2, window_bounds = array<i64: 1, 128>}, {transform_indices = @transform_3, window_bounds = array<i64: 1, 256, 128>}]} {
    %c0 = arith.constant 0 : index
    %c0_0 = arith.constant 0 : index
    %c0_1 = arith.constant 0 : index
    %c0_2 = arith.constant 0 : index
    %0 = vector.load %arg1[%c0, %c0_0, %c0_1, %c0_2] : memref<1x16x16x32xbf16, #tpu.memory_space<vmem>>, vector<1x16x16x32xbf16>
    %1 = vector.shape_cast %0 : vector<1x16x16x32xbf16> to vector<16x16x32xbf16>
    %2 = vector.shape_cast %1 : vector<16x16x32xbf16> to vector<256x32xbf16>
    %c0_3 = arith.constant 0 : index
    %c0_4 = arith.constant 0 : index
    %c0_5 = arith.constant 0 : index
    %3 = vector.load %arg2[%c0_3, %c0_4, %c0_5] : memref<1x32x128xbf16, #tpu.memory_space<vmem>>, vector<1x32x128xbf16>
    %4 = vector.shape_cast %3 : vector<1x32x128xbf16> to vector<32x128xbf16>
    %cst = arith.constant dense<0.000000e+00> : vector<256x128xf32>
    %5 = tpu.matmul %2, %4, %cst {dimension_numbers = #tpu.dot_dimension_numbers<[1], [0], [0], [1], [0, 0, 1, 1], [], []>} : vector<256x32xbf16>, vector<32x128xbf16>, vector<256x128xf32> -> vector<256x128xf32>
    %c0_6 = arith.constant 0 : index
    %c0_7 = arith.constant 0 : index
    %6 = vector.load %arg3[%c0_6, %c0_7] : memref<1x128xf32, #tpu.memory_space<vmem>>, vector<1x128xf32>
    %7 = vector.broadcast %6 : vector<1x128xf32> to vector<256x128xf32>
    %8 = arith.addf %5, %7 : vector<256x128xf32>
    %9 = arith.truncf %8 : vector<256x128xf32> to vector<256x128xbf16>
    %c0_8 = arith.constant 0 : index
    %c0_9 = arith.constant 0 : index
    %c0_10 = arith.constant 0 : index
    %10 = vector.load %arg4[%c0_8, %c0_9, %c0_10] : memref<1x256x128xbf16, #tpu.memory_space<vmem>>, vector<1x256x128xbf16>
    %11 = vector.shape_cast %10 : vector<1x256x128xbf16> to vector<256x128xbf16>
    %12 = vector.shape_cast %9 : vector<256x128xbf16> to vector<1x256x128xbf16>
    tpu.vector_store %arg4[%c0_8, %c0_9, %c0_10], %12 {strides = array<i32>} : memref<1x256x128xbf16, #tpu.memory_space<vmem>>, vector<1x256x128xbf16>,
    return
  }
  func.func @transform_0(%arg0: i32) -> (i32, i32, i32, i32) {
    %c0_i32 = arith.constant 0 : i32
    %c0_i32_0 = arith.constant 0 : i32
    %c0_i32_1 = arith.constant 0 : i32
    %c0_i32_2 = arith.constant 0 : i32
    return %arg0, %c0_i32, %c0_i32_0, %c0_i32_1 : i32, i32, i32, i32
  }
  func.func @transform_1(%arg0: i32) -> (i32, i32, i32) {
    %c0_i32 = arith.constant 0 : i32
    %c0_i32_0 = arith.constant 0 : i32
    %c0_i32_1 = arith.constant 0 : i32
    %c0_i32_2 = arith.constant 0 : i32
    return %c0_i32, %c0_i32_0, %c0_i32_1 : i32, i32, i32
  }
  func.func @transform_2(%arg0: i32) -> (i32, i32) {
    %c0_i32 = arith.constant 0 : i32
    %c0_i32_0 = arith.constant 0 : i32
    %c0_i32_1 = arith.constant 0 : i32
    return %c0_i32, %c0_i32_0 : i32, i32
  }
  func.func @transform_3(%arg0: i32) -> (i32, i32, i32) {
    %c0_i32 = arith.constant 0 : i32
    %c0_i32_0 = arith.constant 0 : i32
    %c0_i32_1 = arith.constant 0 : i32
    return %arg0, %c0_i32, %c0_i32_0 : i32, i32, i32
  }
}

module attributes {stable_mosaic.version = 11 : i64} {
  func.func @_axial_attn_kernel(%arg0: i32, %arg1: memref<1x16x64xbf16, #tpu.memory_space<vmem>>, %arg2: memref<1x64x16xbf16, #tpu.memory_space<vmem>>, %arg3: memref<1x16x512xbf16, #tpu.memory_space<vmem>>, %arg4: memref<1x16x64xbf16, #tpu.memory_space<vmem>>, %arg5: memref<1x64x16xbf16, #tpu.memory_space<vmem>>, %arg6: memref<1x16x512xbf16, #tpu.memory_space<vmem>>, %arg7: memref<2xf32, #tpu.memory_space<smem>>, %arg8: memref<1x16x512xbf16, #tpu.memory_space<vmem>>) attributes {dimension_semantics = [#tpu.dimension_semantics<parallel>], iteration_bounds = array<i64: 2>, scalar_prefetch = 0 : i64, scratch_operands = 0 : i64, tpu.core_type = #tpu.core_type<tc>, window_params = [{transform_indices = @transform_0, window_bounds = array<i64: 1, 16, 64>}, {transform_indices = @transform_1, window_bounds = array<i64: 1, 64, 16>}, {transform_indices = @transform_2, window_bounds = array<i64: 1, 16, 512>}, {transform_indices = @transform_3, window_bounds = array<i64: 1, 16, 64>}, {transform_indices = @transform_4, window_bounds = array<i64: 1, 64, 16>}, {transform_indices = @transform_5, window_bounds = array<i64: 1, 16, 512>}, {transform_indices = @transform_6, window_bounds = array<i64: 2>}, {transform_indices = @transform_7, window_bounds = array<i64: 1, 16, 512>}]} {
    %c0 = arith.constant 0 : index
    %c0_0 = arith.constant 0 : index
    %c0_1 = arith.constant 0 : index
    %0 = vector.load %arg1[%c0, %c0_0, %c0_1] : memref<1x16x64xbf16, #tpu.memory_space<vmem>>, vector<1x16x64xbf16>
    %1 = vector.shape_cast %0 : vector<1x16x64xbf16> to vector<16x64xbf16>
    %c0_2 = arith.constant 0 : index
    %c0_3 = arith.constant 0 : index
    %c0_4 = arith.constant 0 : index
    %2 = vector.load %arg2[%c0_2, %c0_3, %c0_4] : memref<1x64x16xbf16, #tpu.memory_space<vmem>>, vector<1x64x16xbf16>
    %3 = vector.shape_cast %2 : vector<1x64x16xbf16> to vector<64x16xbf16>
    %cst = arith.constant dense<0.000000e+00> : vector<16x16xf32>
    %4 = tpu.matmul %1, %3, %cst {dimension_numbers = #tpu.dot_dimension_numbers<[1], [0], [0], [1], [0, 0, 1, 1], [], []>} : vector<16x64xbf16>, vector<64x16xbf16>, vector<16x16xf32> -> vector<16x16xf32>
    %cst_5 = arith.constant dense<0xFF800000> : vector<16xf32>
    %5 = vector.multi_reduction <maximumf>, %4, %cst_5 [1] : vector<16x16xf32> to vector<16xf32>
    %6 = vector.shape_cast %5 : vector<16xf32> to vector<16x1xf32>
    %7 = vector.broadcast %6 : vector<16x1xf32> to vector<16x16xf32>
    %8 = arith.subf %4, %7 : vector<16x16xf32>
    %9 = math.exp %8 : vector<16x16xf32>
    %cst_6 = arith.constant dense<0.000000e+00> : vector<16xf32>
    %10 = vector.multi_reduction <add>, %9, %cst_6 [1] : vector<16x16xf32> to vector<16xf32>
    %11 = vector.shape_cast %10 : vector<16xf32> to vector<16x1xf32>
    %12 = tpu.reciprocal %11 {approx = true} : vector<16x1xf32> -> vector<16x1xf32>
    %13 = vector.broadcast %12 : vector<16x1xf32> to vector<16x16xf32>
    %14 = arith.mulf %9, %13 : vector<16x16xf32>
    %15 = arith.truncf %14 : vector<16x16xf32> to vector<16x16xbf16>
    %c0_7 = arith.constant 0 : index
    %16 = memref.load %arg7[%c0_7] : memref<2xf32, #tpu.memory_space<smem>>
    %c0_8 = arith.constant 0 : index
    %c0_9 = arith.constant 0 : index
    %c0_10 = arith.constant 0 : index
    %17 = vector.load %arg3[%c0_8, %c0_9, %c0_10] : memref<1x16x512xbf16, #tpu.memory_space<vmem>>, vector<1x16x512xbf16>
    %18 = vector.shape_cast %17 : vector<1x16x512xbf16> to vector<16x512xbf16>
    %cst_11 = arith.constant dense<0.000000e+00> : vector<16x512xf32>
    %19 = tpu.matmul %15, %18, %cst_11 {dimension_numbers = #tpu.dot_dimension_numbers<[1], [0], [0], [1], [0, 0, 1, 1], [], []>} : vector<16x16xbf16>, vector<16x512xbf16>, vector<16x512xf32> -> vector<16x512xf32>
    %20 = vector.broadcast %16 : f32 to vector<16x512xf32>
    %21 = arith.mulf %20, %19 : vector<16x512xf32>
    %c0_12 = arith.constant 0 : index
    %c0_13 = arith.constant 0 : index
    %c0_14 = arith.constant 0 : index
    %22 = vector.load %arg4[%c0_12, %c0_13, %c0_14] : memref<1x16x64xbf16, #tpu.memory_space<vmem>>, vector<1x16x64xbf16>
    %23 = vector.shape_cast %22 : vector<1x16x64xbf16> to vector<16x64xbf16>
    %c0_15 = arith.constant 0 : index
    %c0_16 = arith.constant 0 : index
    %c0_17 = arith.constant 0 : index
    %24 = vector.load %arg5[%c0_15, %c0_16, %c0_17] : memref<1x64x16xbf16, #tpu.memory_space<vmem>>, vector<1x64x16xbf16>
    %25 = vector.shape_cast %24 : vector<1x64x16xbf16> to vector<64x16xbf16>
    %cst_18 = arith.constant dense<0.000000e+00> : vector<16x16xf32>
    %26 = tpu.matmul %23, %25, %cst_18 {dimension_numbers = #tpu.dot_dimension_numbers<[1], [0], [0], [1], [0, 0, 1, 1], [], []>} : vector<16x64xbf16>, vector<64x16xbf16>, vector<16x16xf32> -> vector<16x16xf32>
    %cst_19 = arith.constant dense<0xFF800000> : vector<16xf32>
    %27 = vector.multi_reduction <maximumf>, %26, %cst_19 [1] : vector<16x16xf32> to vector<16xf32>
    %28 = vector.shape_cast %27 : vector<16xf32> to vector<16x1xf32>
    %29 = vector.broadcast %28 : vector<16x1xf32> to vector<16x16xf32>
    %30 = arith.subf %26, %29 : vector<16x16xf32>
    %31 = math.exp %30 : vector<16x16xf32>
    %cst_20 = arith.constant dense<0.000000e+00> : vector<16xf32>
    %32 = vector.multi_reduction <add>, %31, %cst_20 [1] : vector<16x16xf32> to vector<16xf32>
    %33 = vector.shape_cast %32 : vector<16xf32> to vector<16x1xf32>
    %34 = tpu.reciprocal %33 {approx = true} : vector<16x1xf32> -> vector<16x1xf32>
    %35 = vector.broadcast %34 : vector<16x1xf32> to vector<16x16xf32>
    %36 = arith.mulf %31, %35 : vector<16x16xf32>
    %37 = arith.truncf %36 : vector<16x16xf32> to vector<16x16xbf16>
    %c1 = arith.constant 1 : index
    %38 = memref.load %arg7[%c1] : memref<2xf32, #tpu.memory_space<smem>>
    %c0_21 = arith.constant 0 : index
    %c0_22 = arith.constant 0 : index
    %c0_23 = arith.constant 0 : index
    %39 = vector.load %arg6[%c0_21, %c0_22, %c0_23] : memref<1x16x512xbf16, #tpu.memory_space<vmem>>, vector<1x16x512xbf16>
    %40 = vector.shape_cast %39 : vector<1x16x512xbf16> to vector<16x512xbf16>
    %cst_24 = arith.constant dense<0.000000e+00> : vector<16x512xf32>
    %41 = tpu.matmul %37, %40, %cst_24 {dimension_numbers = #tpu.dot_dimension_numbers<[1], [0], [0], [1], [0, 0, 1, 1], [], []>} : vector<16x16xbf16>, vector<16x512xbf16>, vector<16x512xf32> -> vector<16x512xf32>
    %42 = vector.broadcast %38 : f32 to vector<16x512xf32>
    %43 = arith.mulf %42, %41 : vector<16x512xf32>
    %44 = arith.addf %21, %43 : vector<16x512xf32>
    %45 = arith.truncf %44 : vector<16x512xf32> to vector<16x512xbf16>
    %c0_25 = arith.constant 0 : index
    %c0_26 = arith.constant 0 : index
    %c0_27 = arith.constant 0 : index
    %46 = vector.load %arg8[%c0_25, %c0_26, %c0_27] : memref<1x16x512xbf16, #tpu.memory_space<vmem>>, vector<1x16x512xbf16>
    %47 = vector.shape_cast %46 : vector<1x16x512xbf16> to vector<16x512xbf16>
    %48 = vector.shape_cast %45 : vector<16x512xbf16> to vector<1x16x512xbf16>
    tpu.vector_store %arg8[%c0_25, %c0_26, %c0_27], %48 {strides = array<i32>} : memref<1x16x512xbf16, #tpu.memory_space<vmem>>, vector<1x16x512xbf16>,
    return
  }
  func.func @transform_0(%arg0: i32) -> (i32, i32, i32) {
    %c0_i32 = arith.constant 0 : i32
    %c0_i32_0 = arith.constant 0 : i32
    %c0_i32_1 = arith.constant 0 : i32
    return %arg0, %c0_i32, %c0_i32_0 : i32, i32, i32
  }
  func.func @transform_1(%arg0: i32) -> (i32, i32, i32) {
    %c0_i32 = arith.constant 0 : i32
    %c0_i32_0 = arith.constant 0 : i32
    %c0_i32_1 = arith.constant 0 : i32
    return %arg0, %c0_i32, %c0_i32_0 : i32, i32, i32
  }
  func.func @transform_2(%arg0: i32) -> (i32, i32, i32) {
    %c0_i32 = arith.constant 0 : i32
    %c0_i32_0 = arith.constant 0 : i32
    %c0_i32_1 = arith.constant 0 : i32
    return %arg0, %c0_i32, %c0_i32_0 : i32, i32, i32
  }
  func.func @transform_3(%arg0: i32) -> (i32, i32, i32) {
    %c0_i32 = arith.constant 0 : i32
    %c0_i32_0 = arith.constant 0 : i32
    %c0_i32_1 = arith.constant 0 : i32
    return %arg0, %c0_i32, %c0_i32_0 : i32, i32, i32
  }
  func.func @transform_4(%arg0: i32) -> (i32, i32, i32) {
    %c0_i32 = arith.constant 0 : i32
    %c0_i32_0 = arith.constant 0 : i32
    %c0_i32_1 = arith.constant 0 : i32
    return %arg0, %c0_i32, %c0_i32_0 : i32, i32, i32
  }
  func.func @transform_5(%arg0: i32) -> (i32, i32, i32) {
    %c0_i32 = arith.constant 0 : i32
    %c0_i32_0 = arith.constant 0 : i32
    %c0_i32_1 = arith.constant 0 : i32
    return %arg0, %c0_i32, %c0_i32_0 : i32, i32, i32
  }
  func.func @transform_6(%arg0: i32) -> i32 {
    %c0_i32 = arith.constant 0 : i32
    %c0_i32_0 = arith.constant 0 : i32
    return %c0_i32 : i32
  }
  func.func @transform_7(%arg0: i32) -> (i32, i32, i32) {
    %c0_i32 = arith.constant 0 : i32
    %c0_i32_0 = arith.constant 0 : i32
    %c0_i32_1 = arith.constant 0 : i32
    return %arg0, %c0_i32, %c0_i32_0 : i32, i32, i32
  }
}

module attributes {stable_mosaic.version = 11 : i64} {
  func.func @_conv_bn_kernel(%arg0: i32, %arg1: memref<1x22x22x32xbf16, #tpu.memory_space<vmem>>, %arg2: memref<9x32x32xbf16, #tpu.memory_space<vmem>>, %arg3: memref<1x32xf32, #tpu.memory_space<vmem>>, %arg4: memref<1x256x32xbf16, #tpu.memory_space<vmem>>) attributes {dimension_semantics = [#tpu.dimension_semantics<parallel>], iteration_bounds = array<i64: 2>, scalar_prefetch = 0 : i64, scratch_operands = 0 : i64, tpu.core_type = #tpu.core_type<tc>, window_params = [{transform_indices = @transform_0, window_bounds = array<i64: 1, 22, 22, 32>}, {pipeline_mode = #tpu.pipeline_mode<synchronous>, transform_indices = @transform_1, window_bounds = array<i64: 9, 32, 32>}, {pipeline_mode = #tpu.pipeline_mode<synchronous>, transform_indices = @transform_2, window_bounds = array<i64: 1, 32>}, {transform_indices = @transform_3, window_bounds = array<i64: 1, 256, 32>}]} {
    %c0 = arith.constant 0 : index
    %c0_0 = arith.constant 0 : index
    %c0_1 = arith.constant 0 : index
    %c0_2 = arith.constant 0 : index
    %0 = vector.load %arg1[%c0, %c0_0, %c0_1, %c0_2] : memref<1x22x22x32xbf16, #tpu.memory_space<vmem>>, vector<1x16x16x32xbf16>
    %1 = vector.shape_cast %0 : vector<1x16x16x32xbf16> to vector<16x16x32xbf16>
    %2 = vector.shape_cast %1 : vector<16x16x32xbf16> to vector<256x32xbf16>
    %c0_3 = arith.constant 0 : index
    %c0_4 = arith.constant 0 : index
    %c0_5 = arith.constant 0 : index
    %3 = vector.load %arg2[%c0_3, %c0_4, %c0_5] : memref<9x32x32xbf16, #tpu.memory_space<vmem>>, vector<1x32x32xbf16>
    %4 = vector.shape_cast %3 : vector<1x32x32xbf16> to vector<32x32xbf16>
    %cst = arith.constant dense<0.000000e+00> : vector<256x32xf32>
    %5 = tpu.matmul %2, %4, %cst {dimension_numbers = #tpu.dot_dimension_numbers<[1], [0], [0], [1], [0, 0, 1, 1], [], []>} : vector<256x32xbf16>, vector<32x32xbf16>, vector<256x32xf32> -> vector<256x32xf32>
    %c0_6 = arith.constant 0 : index
    %c0_7 = arith.constant 0 : index
    %c3 = arith.constant 3 : index
    %c0_8 = arith.constant 0 : index
    %6 = vector.load %arg1[%c0_6, %c0_7, %c3, %c0_8] : memref<1x22x22x32xbf16, #tpu.memory_space<vmem>>, vector<1x16x16x32xbf16>
    %7 = vector.shape_cast %6 : vector<1x16x16x32xbf16> to vector<16x16x32xbf16>
    %8 = vector.shape_cast %7 : vector<16x16x32xbf16> to vector<256x32xbf16>
    %c1 = arith.constant 1 : index
    %c0_9 = arith.constant 0 : index
    %c0_10 = arith.constant 0 : index
    %9 = vector.load %arg2[%c1, %c0_9, %c0_10] : memref<9x32x32xbf16, #tpu.memory_space<vmem>>, vector<1x32x32xbf16>
    %10 = vector.shape_cast %9 : vector<1x32x32xbf16> to vector<32x32xbf16>
    %cst_11 = arith.constant dense<0.000000e+00> : vector<256x32xf32>
    %11 = tpu.matmul %8, %10, %cst_11 {dimension_numbers = #tpu.dot_dimension_numbers<[1], [0], [0], [1], [0, 0, 1, 1], [], []>} : vector<256x32xbf16>, vector<32x32xbf16>, vector<256x32xf32> -> vector<256x32xf32>
    %12 = arith.addf %5, %11 : vector<256x32xf32>
    %c0_12 = arith.constant 0 : index
    %c0_13 = arith.constant 0 : index
    %c6 = arith.constant 6 : index
    %c0_14 = arith.constant 0 : index
    %13 = vector.load %arg1[%c0_12, %c0_13, %c6, %c0_14] : memref<1x22x22x32xbf16, #tpu.memory_space<vmem>>, vector<1x16x16x32xbf16>
    %14 = vector.shape_cast %13 : vector<1x16x16x32xbf16> to vector<16x16x32xbf16>
    %15 = vector.shape_cast %14 : vector<16x16x32xbf16> to vector<256x32xbf16>
    %c2 = arith.constant 2 : index
    %c0_15 = arith.constant 0 : index
    %c0_16 = arith.constant 0 : index
    %16 = vector.load %arg2[%c2, %c0_15, %c0_16] : memref<9x32x32xbf16, #tpu.memory_space<vmem>>, vector<1x32x32xbf16>
    %17 = vector.shape_cast %16 : vector<1x32x32xbf16> to vector<32x32xbf16>
    %cst_17 = arith.constant dense<0.000000e+00> : vector<256x32xf32>
    %18 = tpu.matmul %15, %17, %cst_17 {dimension_numbers = #tpu.dot_dimension_numbers<[1], [0], [0], [1], [0, 0, 1, 1], [], []>} : vector<256x32xbf16>, vector<32x32xbf16>, vector<256x32xf32> -> vector<256x32xf32>
    %19 = arith.addf %12, %18 : vector<256x32xf32>
    %c0_18 = arith.constant 0 : index
    %c3_19 = arith.constant 3 : index
    %c0_20 = arith.constant 0 : index
    %c0_21 = arith.constant 0 : index
    %20 = vector.load %arg1[%c0_18, %c3_19, %c0_20, %c0_21] : memref<1x22x22x32xbf16, #tpu.memory_space<vmem>>, vector<1x16x16x32xbf16>
    %21 = vector.shape_cast %20 : vector<1x16x16x32xbf16> to vector<16x16x32xbf16>
    %22 = vector.shape_cast %21 : vector<16x16x32xbf16> to vector<256x32xbf16>
    %c3_22 = arith.constant 3 : index
    %c0_23 = arith.constant 0 : index
    %c0_24 = arith.constant 0 : index
    %23 = vector.load %arg2[%c3_22, %c0_23, %c0_24] : memref<9x32x32xbf16, #tpu.memory_space<vmem>>, vector<1x32x32xbf16>
    %24 = vector.shape_cast %23 : vector<1x32x32xbf16> to vector<32x32xbf16>
    %cst_25 = arith.constant dense<0.000000e+00> : vector<256x32xf32>
    %25 = tpu.matmul %22, %24, %cst_25 {dimension_numbers = #tpu.dot_dimension_numbers<[1], [0], [0], [1], [0, 0, 1, 1], [], []>} : vector<256x32xbf16>, vector<32x32xbf16>, vector<256x32xf32> -> vector<256x32xf32>
    %26 = arith.addf %19, %25 : vector<256x32xf32>
    %c0_26 = arith.constant 0 : index
    %c3_27 = arith.constant 3 : index
    %c3_28 = arith.constant 3 : index
    %c0_29 = arith.constant 0 : index
    %27 = vector.load %arg1[%c0_26, %c3_27, %c3_28, %c0_29] : memref<1x22x22x32xbf16, #tpu.memory_space<vmem>>, vector<1x16x16x32xbf16>
    %28 = vector.shape_cast %27 : vector<1x16x16x32xbf16> to vector<16x16x32xbf16>
    %29 = vector.shape_cast %28 : vector<16x16x32xbf16> to vector<256x32xbf16>
    %c4 = arith.constant 4 : index
    %c0_30 = arith.constant 0 : index
    %c0_31 = arith.constant 0 : index
    %30 = vector.load %arg2[%c4, %c0_30, %c0_31] : memref<9x32x32xbf16, #tpu.memory_space<vmem>>, vector<1x32x32xbf16>
    %31 = vector.shape_cast %30 : vector<1x32x32xbf16> to vector<32x32xbf16>
    %cst_32 = arith.constant dense<0.000000e+00> : vector<256x32xf32>
    %32 = tpu.matmul %29, %31, %cst_32 {dimension_numbers = #tpu.dot_dimension_numbers<[1], [0], [0], [1], [0, 0, 1, 1], [], []>} : vector<256x32xbf16>, vector<32x32xbf16>, vector<256x32xf32> -> vector<256x32xf32>
    %33 = arith.addf %26, %32 : vector<256x32xf32>
    %c0_33 = arith.constant 0 : index
    %c3_34 = arith.constant 3 : index
    %c6_35 = arith.constant 6 : index
    %c0_36 = arith.constant 0 : index
    %34 = vector.load %arg1[%c0_33, %c3_34, %c6_35, %c0_36] : memref<1x22x22x32xbf16, #tpu.memory_space<vmem>>, vector<1x16x16x32xbf16>
    %35 = vector.shape_cast %34 : vector<1x16x16x32xbf16> to vector<16x16x32xbf16>
    %36 = vector.shape_cast %35 : vector<16x16x32xbf16> to vector<256x32xbf16>
    %c5 = arith.constant 5 : index
    %c0_37 = arith.constant 0 : index
    %c0_38 = arith.constant 0 : index
    %37 = vector.load %arg2[%c5, %c0_37, %c0_38] : memref<9x32x32xbf16, #tpu.memory_space<vmem>>, vector<1x32x32xbf16>
    %38 = vector.shape_cast %37 : vector<1x32x32xbf16> to vector<32x32xbf16>
    %cst_39 = arith.constant dense<0.000000e+00> : vector<256x32xf32>
    %39 = tpu.matmul %36, %38, %cst_39 {dimension_numbers = #tpu.dot_dimension_numbers<[1], [0], [0], [1], [0, 0, 1, 1], [], []>} : vector<256x32xbf16>, vector<32x32xbf16>, vector<256x32xf32> -> vector<256x32xf32>
    %40 = arith.addf %33, %39 : vector<256x32xf32>
    %c0_40 = arith.constant 0 : index
    %c6_41 = arith.constant 6 : index
    %c0_42 = arith.constant 0 : index
    %c0_43 = arith.constant 0 : index
    %41 = vector.load %arg1[%c0_40, %c6_41, %c0_42, %c0_43] : memref<1x22x22x32xbf16, #tpu.memory_space<vmem>>, vector<1x16x16x32xbf16>
    %42 = vector.shape_cast %41 : vector<1x16x16x32xbf16> to vector<16x16x32xbf16>
    %43 = vector.shape_cast %42 : vector<16x16x32xbf16> to vector<256x32xbf16>
    %c6_44 = arith.constant 6 : index
    %c0_45 = arith.constant 0 : index
    %c0_46 = arith.constant 0 : index
    %44 = vector.load %arg2[%c6_44, %c0_45, %c0_46] : memref<9x32x32xbf16, #tpu.memory_space<vmem>>, vector<1x32x32xbf16>
    %45 = vector.shape_cast %44 : vector<1x32x32xbf16> to vector<32x32xbf16>
    %cst_47 = arith.constant dense<0.000000e+00> : vector<256x32xf32>
    %46 = tpu.matmul %43, %45, %cst_47 {dimension_numbers = #tpu.dot_dimension_numbers<[1], [0], [0], [1], [0, 0, 1, 1], [], []>} : vector<256x32xbf16>, vector<32x32xbf16>, vector<256x32xf32> -> vector<256x32xf32>
    %47 = arith.addf %40, %46 : vector<256x32xf32>
    %c0_48 = arith.constant 0 : index
    %c6_49 = arith.constant 6 : index
    %c3_50 = arith.constant 3 : index
    %c0_51 = arith.constant 0 : index
    %48 = vector.load %arg1[%c0_48, %c6_49, %c3_50, %c0_51] : memref<1x22x22x32xbf16, #tpu.memory_space<vmem>>, vector<1x16x16x32xbf16>
    %49 = vector.shape_cast %48 : vector<1x16x16x32xbf16> to vector<16x16x32xbf16>
    %50 = vector.shape_cast %49 : vector<16x16x32xbf16> to vector<256x32xbf16>
    %c7 = arith.constant 7 : index
    %c0_52 = arith.constant 0 : index
    %c0_53 = arith.constant 0 : index
    %51 = vector.load %arg2[%c7, %c0_52, %c0_53] : memref<9x32x32xbf16, #tpu.memory_space<vmem>>, vector<1x32x32xbf16>
    %52 = vector.shape_cast %51 : vector<1x32x32xbf16> to vector<32x32xbf16>
    %cst_54 = arith.constant dense<0.000000e+00> : vector<256x32xf32>
    %53 = tpu.matmul %50, %52, %cst_54 {dimension_numbers = #tpu.dot_dimension_numbers<[1], [0], [0], [1], [0, 0, 1, 1], [], []>} : vector<256x32xbf16>, vector<32x32xbf16>, vector<256x32xf32> -> vector<256x32xf32>
    %54 = arith.addf %47, %53 : vector<256x32xf32>
    %c0_55 = arith.constant 0 : index
    %c6_56 = arith.constant 6 : index
    %c6_57 = arith.constant 6 : index
    %c0_58 = arith.constant 0 : index
    %55 = vector.load %arg1[%c0_55, %c6_56, %c6_57, %c0_58] : memref<1x22x22x32xbf16, #tpu.memory_space<vmem>>, vector<1x16x16x32xbf16>
    %56 = vector.shape_cast %55 : vector<1x16x16x32xbf16> to vector<16x16x32xbf16>
    %57 = vector.shape_cast %56 : vector<16x16x32xbf16> to vector<256x32xbf16>
    %c8 = arith.constant 8 : index
    %c0_59 = arith.constant 0 : index
    %c0_60 = arith.constant 0 : index
    %58 = vector.load %arg2[%c8, %c0_59, %c0_60] : memref<9x32x32xbf16, #tpu.memory_space<vmem>>, vector<1x32x32xbf16>
    %59 = vector.shape_cast %58 : vector<1x32x32xbf16> to vector<32x32xbf16>
    %cst_61 = arith.constant dense<0.000000e+00> : vector<256x32xf32>
    %60 = tpu.matmul %57, %59, %cst_61 {dimension_numbers = #tpu.dot_dimension_numbers<[1], [0], [0], [1], [0, 0, 1, 1], [], []>} : vector<256x32xbf16>, vector<32x32xbf16>, vector<256x32xf32> -> vector<256x32xf32>
    %61 = arith.addf %54, %60 : vector<256x32xf32>
    %c0_62 = arith.constant 0 : index
    %c0_63 = arith.constant 0 : index
    %62 = vector.load %arg3[%c0_62, %c0_63] : memref<1x32xf32, #tpu.memory_space<vmem>>, vector<1x32xf32>
    %63 = vector.broadcast %62 : vector<1x32xf32> to vector<256x32xf32>
    %64 = arith.addf %61, %63 : vector<256x32xf32>
    %65 = arith.truncf %64 : vector<256x32xf32> to vector<256x32xbf16>
    %c0_64 = arith.constant 0 : index
    %c0_65 = arith.constant 0 : index
    %c0_66 = arith.constant 0 : index
    %66 = vector.load %arg4[%c0_64, %c0_65, %c0_66] : memref<1x256x32xbf16, #tpu.memory_space<vmem>>, vector<1x256x32xbf16>
    %67 = vector.shape_cast %66 : vector<1x256x32xbf16> to vector<256x32xbf16>
    %68 = vector.shape_cast %65 : vector<256x32xbf16> to vector<1x256x32xbf16>
    tpu.vector_store %arg4[%c0_64, %c0_65, %c0_66], %68 {strides = array<i32>} : memref<1x256x32xbf16, #tpu.memory_space<vmem>>, vector<1x256x32xbf16>,
    return
  }
  func.func @transform_0(%arg0: i32) -> (i32, i32, i32, i32) {
    %c0_i32 = arith.constant 0 : i32
    %c0_i32_0 = arith.constant 0 : i32
    %c0_i32_1 = arith.constant 0 : i32
    %c0_i32_2 = arith.constant 0 : i32
    return %arg0, %c0_i32, %c0_i32_0, %c0_i32_1 : i32, i32, i32, i32
  }
  func.func @transform_1(%arg0: i32) -> (i32, i32, i32) {
    %c0_i32 = arith.constant 0 : i32
    %c0_i32_0 = arith.constant 0 : i32
    %c0_i32_1 = arith.constant 0 : i32
    %c0_i32_2 = arith.constant 0 : i32
    return %c0_i32, %c0_i32_0, %c0_i32_1 : i32, i32, i32
  }
  func.func @transform_2(%arg0: i32) -> (i32, i32) {
    %c0_i32 = arith.constant 0 : i32
    %c0_i32_0 = arith.constant 0 : i32
    %c0_i32_1 = arith.constant 0 : i32
    return %c0_i32, %c0_i32_0 : i32, i32
  }
  func.func @transform_3(%arg0: i32) -> (i32, i32, i32) {
    %c0_i32 = arith.constant 0 : i32
    %c0_i32_0 = arith.constant 0 : i32
    %c0_i32_1 = arith.constant 0 : i32
    return %arg0, %c0_i32, %c0_i32_0 : i32, i32, i32
  }
}

</mosaic_0001>

<bundles_post_ra>
// kernel: _lambda_.6
= control target key start
LH: loop header
LB: loop body
LE: loop exit
PB: predicated region body
PF: predicated region fallthrough
CT: control target
= control target key end

     0   :  { %s942_s12 = smov 0   ;;  %s1106_s0 = inlined_call_operand.vmem [shape: bf16[2,16,16,16], index: 0, kind: input, shape index: {}]   ;;  %s1107_s1 = inlined_call_operand.vmem [shape: bf16[1,16,32], index: 1, kind: input, shape index: {}]   ;;  %s1108_s2 = inlined_call_operand.vmem [shape: f32[1,32], index: 2, kind: input, shape index: {}]   ;;  %s1109_s3 = inlined_call_operand.vmem [shape: bf16[2,256,32], index: 3, kind: output, shape index: {}]  }
   0x1 LB: > { %s725_s13 = sadd.s32 4294967295, %s920_s12   ;;  %p729_p0 = scmp.ge.s32.totalorder %s920_s12, 1  ;;  %s920_s12 = sphi %s942_s12, %s13_s12  }
   0x2   : > { %p137_p1 = scmp.lt.s32.totalorder %s920_s12, 3 }
   0x4   : > { %p138_p2 = pnand %p729_p0, %p137_p1 }
   0x5   : > { %v897_v0 = vld [vmem:[%s1107_s1] sm:$0xff] (!%p138_p2)   ;;  %p161_p3 = scmp.lt.s32.totalorder (!%p138_p2), %s725_s13, 1  ;;  %vm299_vm0 = vcmask (!%p138_p2), 130048   ;;  %vm637_vm1 = vcmask (!%p138_p2), 257024  }
   0x6   : > { %141 = sbr.rel (%p138_p2) target bundleno = 263 (0x107), region = 32  ;;  %853 = vmatprep.subr.bf16.mxu0 (!%p138_p2), %v897_v0  ;;  %887 = vmatprep.subr.bf16.mxu1 (!%p138_p2), %v897_v0  ;;  %v998_v17 = vld [vmem:[%s1108_s2] ss:$0 sm:$0xff] (!%p138_p2) }
   0x7   : > { %854 = vmatpush3.bf16.msra.mxu0 (!%p138_p2), %v897_v0  ;;  %888 = vmatpush3.bf16.msra.mxu1 (!%p138_p2), %v897_v0 }
   0xd   : > { %s1111_s13 = smov (!%p161_p3, %s725_s13), 1 }
   0xe   : > { %s802_s16 = sshll.u32 %s1111_s13, 7 }
   0xf   : > { %s961_s19 = scalar_lea.vmem %s1106_s0, %s802_s16  ;;  %s1006_s24 = scalar_lea.vmem %s1109_s3, %s802_s16 }
  0x10   : > { %v898_v1 = vld [vmem:[%s961_s19] sm:$0xff]   ;;  %v900_v3 = vld [vmem:[%s961_s19 + $0x8] sm:$0xff]   ;;  %v902_v5 = vld [vmem:[%s961_s19 + $0x10] sm:$0xff]  }
  0x11   : > { %v899_v2 = vld [vmem:[%s961_s19 + $0x40] sm:$0xff]   ;;  %855 = vmatprep.mubr.msk.bf16.mxu0 %vm299_vm0, %v898_v1  ;;  %v901_v4 = vld [vmem:[%s961_s19 + $0x48] sm:$0xff]   ;;  %v903_v6 = vld [vmem:[%s961_s19 + $0x50] sm:$0xff]  }
  0x12   : > { %871 = vmatprep.mubr.msk.bf16.mxu1 %vm299_vm0, %v899_v2  ;;  %856 = vmatmul.mubr.msk.bf16.vlgmr.msra.gmra.mrb[0].mxu0 %vm299_vm0, %v900_v3  ;;  %v904_v7 = vld [vmem:[%s961_s19 + $0x18] sm:$0xff]   ;;  %v906_v9 = vld [vmem:[%s961_s19 + $0x20] sm:$0xff]   ;;  %v908_v11 = vld [vmem:[%s961_s19 + $0x28] sm:$0xff]  }
  0x13   : > { %872 = vmatmul.mubr.msk.bf16.vlgmr.msra.gmra.mrb[0].mxu1 %vm299_vm0, %v901_v4  ;;  %859 = vmatprep.mubr.msk.bf16.mxu0 %vm299_vm0, %v902_v5  ;;  %v905_v8 = vld [vmem:[%s961_s19 + $0x58] sm:$0xff]   ;;  %v907_v10 = vld [vmem:[%s961_s19 + $0x60] sm:$0xff]   ;;  %v909_v12 = vld [vmem:[%s961_s19 + $0x68] sm:$0xff]  }
  0x14   : > { %875 = vmatprep.mubr.msk.bf16.mxu1 %vm299_vm0, %v903_v6  ;;  %v910_v13 = vld [vmem:[%s961_s19 + $0x30] sm:$0xff]   ;;  %v912_v15 = vld [vmem:[%s961_s19 + $0x38] sm:$0xff]  }
  0x15   : > { %v911_v14 = vld [vmem:[%s961_s19 + $0x70] sm:$0xff]   ;;  %v913_v16 = vld [vmem:[%s961_s19 + $0x78] sm:$0xff]  }
  0x1a   : > { %860 = vmatmul.mubr.msk.bf16.gmra.mrb[4].mxu0 %vm299_vm0, %v904_v7 }
  0x1b   : > { %876 = vmatmul.mubr.msk.bf16.gmra.mrb[4].mxu1 %vm299_vm0, %v905_v8  ;;  %863 = vmatprep.mubr.msk.bf16.mxu0 %vm299_vm0, %v906_v9 }
  0x1c   : > { %879 = vmatprep.mubr.msk.bf16.mxu1 %vm299_vm0, %v907_v10 }
  0x22   : > { %864 = vmatmul.mubr.msk.bf16.gmra.mrb[8].mxu0 %vm299_vm0, %v908_v11 }
  0x23   : > { %880 = vmatmul.mubr.msk.bf16.gmra.mrb[8].mxu1 %vm299_vm0, %v909_v12  ;;  %867 = vmatprep.mubr.msk.bf16.mxu0 %vm299_vm0, %v910_v13 }
  0x24   : > { %883 = vmatprep.mubr.msk.bf16.mxu1 %vm299_vm0, %v911_v14 }
  0x2a   : > { %868 = vmatmul.mubr.msk.bf16.gmra.mrb[12].mxu0 %vm299_vm0, %v912_v15 }
  0x2b   : > { %884 = vmatmul.mubr.msk.bf16.gmra.mrb[12].mxu1 %vm299_vm0, %v913_v16 }
  0xe5   : > { %v857_v18 = vpop.f32.mrb[0].mxu0 }
  0xe6   : > { %v391_v19 = vadd.f32 %v857_v18, %v998_v17  ;;  %v873_v20 = vpop.f32.mrb[0].mxu1  ;;  %v382_v21 = vpop.f32.mrb[1].mxu0 }
  0xe7   : > { %v455_v22 = vadd.f32 %v873_v20, %v998_v17  ;;  %v383_v23 = vadd.f32 %v998_v17, %v382_v21  ;;  %v446_v24 = vpop.f32.mrb[1].mxu1  ;;  %v858_v25 = vpop.f32.mrb[2].mxu0 }
  0xe8   : > { %v806_v26 = vpack.c.bf16 %v391_v19, %v391_v19  ;;  %v447_v27 = vadd.f32 %v998_v17, %v446_v24  ;;  %v394_v28 = vadd.f32 %v858_v25, %v998_v17  ;;  %v874_v29 = vpop.f32.mrb[2].mxu1  ;;  %v385_v30 = vpop.f32.mrb[3].mxu0 }
  0xe9   : > { %v822_v31 = vpack.c.bf16 %v455_v22, %v455_v22  ;;  %v804_v32 = vpack.c.bf16 %v383_v23, %v383_v23  ;;  %v458_v33 = vadd.f32 %v874_v29, %v998_v17  ;;  %v386_v34 = vadd.f32 %v998_v17, %v385_v30  ;;  %v449_v35 = vpop.f32.mrb[3].mxu1 }
  0xea   : > { %640 = vst.msk [vmem:[%s1006_s24 + $0x8] sm:$0xf] %vm637_vm1, %v806_v26  ;;  %v820_v36 = vpack.c.bf16 %v447_v27, %v447_v27  ;;  %v807_v37 = vpack.c.bf16 %v394_v28, %v394_v28  ;;  %v450_v38 = vadd.f32 %v998_v17, %v449_v35 }
  0xeb   : > { %656 = vst.msk [vmem:[%s1006_s24 + $0x48] sm:$0xf] %vm637_vm1, %v822_v31  ;;  %638 = vst.msk [vmem:[%s1006_s24] sm:$0xf] %vm637_vm1, %v804_v32  ;;  %v823_v39 = vpack.c.bf16 %v458_v33, %v458_v33  ;;  %v805_v40 = vpack.c.bf16 %v386_v34, %v386_v34 }
  0xec   : > { %654 = vst.msk [vmem:[%s1006_s24 + $0x40] sm:$0xf] %vm637_vm1, %v820_v36  ;;  %641 = vst.msk [vmem:[%s1006_s24 + $0xc] sm:$0xf] %vm637_vm1, %v807_v37  ;;  %v821_v41 = vpack.c.bf16 %v450_v38, %v450_v38 }
  0xed   : > { %657 = vst.msk [vmem:[%s1006_s24 + $0x4c] sm:$0xf] %vm637_vm1, %v823_v39  ;;  %639 = vst.msk [vmem:[%s1006_s24 + $0x4] sm:$0xf] %vm637_vm1, %v805_v40  ;;  %v861_v42 = vpop.f32.mrb[4].mxu0 }
  0xee   : > { %655 = vst.msk [vmem:[%s1006_s24 + $0x44] sm:$0xf] %vm637_vm1, %v821_v41  ;;  %v407_v43 = vadd.f32 %v861_v42, %v998_v17  ;;  %v877_v44 = vpop.f32.mrb[4].mxu1  ;;  %v398_v45 = vpop.f32.mrb[5].mxu0 }
  0xef   : > { %v471_v46 = vadd.f32 %v877_v44, %v998_v17  ;;  %v399_v47 = vadd.f32 %v998_v17, %v398_v45  ;;  %v462_v48 = vpop.f32.mrb[5].mxu1  ;;  %v862_v49 = vpop.f32.mrb[6].mxu0 }
  0xf0   : > { %v810_v50 = vpack.c.bf16 %v407_v43, %v407_v43  ;;  %v463_v51 = vadd.f32 %v998_v17, %v462_v48  ;;  %v410_v52 = vadd.f32 %v862_v49, %v998_v17  ;;  %v878_v53 = vpop.f32.mrb[6].mxu1  ;;  %v401_v54 = vpop.f32.mrb[7].mxu0 }
  0xf1   : > { %v826_v55 = vpack.c.bf16 %v471_v46, %v471_v46  ;;  %v808_v56 = vpack.c.bf16 %v399_v47, %v399_v47  ;;  %v474_v57 = vadd.f32 %v878_v53, %v998_v17  ;;  %v402_v58 = vadd.f32 %v998_v17, %v401_v54  ;;  %v465_v59 = vpop.f32.mrb[7].mxu1 }
  0xf2   : > { %644 = vst.msk [vmem:[%s1006_s24 + $0x18] sm:$0xf] %vm637_vm1, %v810_v50  ;;  %v824_v60 = vpack.c.bf16 %v463_v51, %v463_v51  ;;  %v811_v61 = vpack.c.bf16 %v410_v52, %v410_v52  ;;  %v466_v62 = vadd.f32 %v998_v17, %v465_v59 }
  0xf3   : > { %660 = vst.msk [vmem:[%s1006_s24 + $0x58] sm:$0xf] %vm637_vm1, %v826_v55  ;;  %642 = vst.msk [vmem:[%s1006_s24 + $0x10] sm:$0xf] %vm637_vm1, %v808_v56  ;;  %v827_v63 = vpack.c.bf16 %v474_v57, %v474_v57  ;;  %v809_v0 = vpack.c.bf16 %v402_v58, %v402_v58 }
  0xf4   : > { %658 = vst.msk [vmem:[%s1006_s24 + $0x50] sm:$0xf] %vm637_vm1, %v824_v60  ;;  %645 = vst.msk [vmem:[%s1006_s24 + $0x1c] sm:$0xf] %vm637_vm1, %v811_v61  ;;  %v825_v1 = vpack.c.bf16 %v466_v62, %v466_v62 }
  0xf5   : > { %661 = vst.msk [vmem:[%s1006_s24 + $0x5c] sm:$0xf] %vm637_vm1, %v827_v63  ;;  %643 = vst.msk [vmem:[%s1006_s24 + $0x14] sm:$0xf] %vm637_vm1, %v809_v0  ;;  %v865_v2 = vpop.f32.mrb[8].mxu0 }
  0xf6   : > { %659 = vst.msk [vmem:[%s1006_s24 + $0x54] sm:$0xf] %vm637_vm1, %v825_v1  ;;  %v423_v3 = vadd.f32 %v865_v2, %v998_v17  ;;  %v881_v4 = vpop.f32.mrb[8].mxu1  ;;  %v414_v5 = vpop.f32.mrb[9].mxu0 }
  0xf7   : > { %v487_v6 = vadd.f32 %v881_v4, %v998_v17  ;;  %v415_v7 = vadd.f32 %v998_v17, %v414_v5  ;;  %v478_v8 = vpop.f32.mrb[9].mxu1  ;;  %v866_v9 = vpop.f32.mrb[10].mxu0 }
  0xf8   : > { %v814_v10 = vpack.c.bf16 %v423_v3, %v423_v3  ;;  %v479_v11 = vadd.f32 %v998_v17, %v478_v8  ;;  %v426_v12 = vadd.f32 %v866_v9, %v998_v17  ;;  %v882_v13 = vpop.f32.mrb[10].mxu1  ;;  %v417_v14 = vpop.f32.mrb[11].mxu0 }
  0xf9   : > { %v830_v15 = vpack.c.bf16 %v487_v6, %v487_v6  ;;  %v812_v16 = vpack.c.bf16 %v415_v7, %v415_v7  ;;  %v490_v18 = vadd.f32 %v882_v13, %v998_v17  ;;  %v418_v19 = vadd.f32 %v998_v17, %v417_v14  ;;  %v481_v20 = vpop.f32.mrb[11].mxu1 }
  0xfa   : > { %648 = vst.msk [vmem:[%s1006_s24 + $0x28] sm:$0xf] %vm637_vm1, %v814_v10  ;;  %v828_v21 = vpack.c.bf16 %v479_v11, %v479_v11  ;;  %v815_v22 = vpack.c.bf16 %v426_v12, %v426_v12  ;;  %v482_v23 = vadd.f32 %v998_v17, %v481_v20 }
  0xfb   : > { %664 = vst.msk [vmem:[%s1006_s24 + $0x68] sm:$0xf] %vm637_vm1, %v830_v15  ;;  %646 = vst.msk [vmem:[%s1006_s24 + $0x20] sm:$0xf] %vm637_vm1, %v812_v16  ;;  %v831_v24 = vpack.c.bf16 %v490_v18, %v490_v18  ;;  %v813_v25 = vpack.c.bf16 %v418_v19, %v418_v19 }
  0xfc   : > { %662 = vst.msk [vmem:[%s1006_s24 + $0x60] sm:$0xf] %vm637_vm1, %v828_v21  ;;  %649 = vst.msk [vmem:[%s1006_s24 + $0x2c] sm:$0xf] %vm637_vm1, %v815_v22  ;;  %v829_v26 = vpack.c.bf16 %v482_v23, %v482_v23 }
  0xfd   : > { %665 = vst.msk [vmem:[%s1006_s24 + $0x6c] sm:$0xf] %vm637_vm1, %v831_v24  ;;  %647 = vst.msk [vmem:[%s1006_s24 + $0x24] sm:$0xf] %vm637_vm1, %v813_v25  ;;  %v869_v27 = vpop.f32.mrb[12].mxu0 }
  0xfe   : > { %663 = vst.msk [vmem:[%s1006_s24 + $0x64] sm:$0xf] %vm637_vm1, %v829_v26  ;;  %v439_v28 = vadd.f32 %v869_v27, %v998_v17  ;;  %v885_v29 = vpop.f32.mrb[12].mxu1  ;;  %v430_v30 = vpop.f32.mrb[13].mxu0 }
  0xff   : > { %v503_v31 = vadd.f32 %v885_v29, %v998_v17  ;;  %v431_v32 = vadd.f32 %v998_v17, %v430_v30  ;;  %v494_v33 = vpop.f32.mrb[13].mxu1  ;;  %v870_v34 = vpop.f32.mrb[14].mxu0 }
 0x100   : > { %v818_v35 = vpack.c.bf16 %v439_v28, %v439_v28  ;;  %v495_v36 = vadd.f32 %v998_v17, %v494_v33  ;;  %v442_v37 = vadd.f32 %v870_v34, %v998_v17  ;;  %v886_v38 = vpop.f32.mrb[14].mxu1  ;;  %v433_v39 = vpop.f32.mrb[15].mxu0 }
 0x101   : > { %v834_v40 = vpack.c.bf16 %v503_v31, %v503_v31  ;;  %v816_v41 = vpack.c.bf16 %v431_v32, %v431_v32  ;;  %v506_v42 = vadd.f32 %v886_v38, %v998_v17  ;;  %v434_v43 = vadd.f32 %v998_v17, %v433_v39  ;;  %v497_v44 = vpop.f32.mrb[15].mxu1 }
 0x102   : > { %652 = vst.msk [vmem:[%s1006_s24 + $0x38] sm:$0xf] %vm637_vm1, %v818_v35  ;;  %v832_v45 = vpack.c.bf16 %v495_v36, %v495_v36  ;;  %v819_v46 = vpack.c.bf16 %v442_v37, %v442_v37  ;;  %v498_v47 = vadd.f32 %v998_v17, %v497_v44 }
 0x103   : > { %668 = vst.msk [vmem:[%s1006_s24 + $0x78] sm:$0xf] %vm637_vm1, %v834_v40  ;;  %650 = vst.msk [vmem:[%s1006_s24 + $0x30] sm:$0xf] %vm637_vm1, %v816_v41  ;;  %v835_v48 = vpack.c.bf16 %v506_v42, %v506_v42  ;;  %v817_v49 = vpack.c.bf16 %v434_v43, %v434_v43 }
 0x104   : > { %666 = vst.msk [vmem:[%s1006_s24 + $0x70] sm:$0xf] %vm637_vm1, %v832_v45  ;;  %653 = vst.msk [vmem:[%s1006_s24 + $0x3c] sm:$0xf] %vm637_vm1, %v819_v46  ;;  %v833_v50 = vpack.c.bf16 %v498_v47, %v498_v47 }
 0x105   : > { %669 = vst.msk [vmem:[%s1006_s24 + $0x7c] sm:$0xf] %vm637_vm1, %v835_v48  ;;  %651 = vst.msk [vmem:[%s1006_s24 + $0x34] sm:$0xf] %vm637_vm1, %v817_v49 }
 0x106   : > { %667 = vst.msk [vmem:[%s1006_s24 + $0x74] sm:$0xf] %vm637_vm1, %v833_v50 }
 0x107 PF: > { %s13_s12 = sadd.s32 1, %s920_s12  }
 0x108   : > { %p10_p4 = scmp.ge.s32.totalorder %s13_s12, 4  }
 0x10a   :  { %12 = sbr.rel (!%p10_p4) target bundleno = 1 (0x1), region = 62 }

// kernel: _lambda_.7
= control target key start
LH: loop header
LB: loop body
LE: loop exit
PB: predicated region body
PF: predicated region fallthrough
CT: control target
= control target key end

     0   :  { %s2402_s12 = smov 0   ;;  %s3032_s0 = inlined_call_operand.vmem [shape: bf16[2,16,18,32], index: 0, kind: input, shape index: {}]   ;;  %s3033_s1 = inlined_call_operand.vmem [shape: bf16[3,32,32], index: 1, kind: input, shape index: {}]   ;;  %s3034_s2 = inlined_call_operand.vmem [shape: f32[1,32], index: 2, kind: input, shape index: {}]   ;;  %s3035_s3 = inlined_call_operand.vmem [shape: bf16[2,256,32], index: 3, kind: output, shape index: {}]  }
   0x1 LB: > { %s1911_s13 = sadd.s32 4294967295, %s2380_s12   ;;  %p1915_p0 = scmp.ge.s32.totalorder %s2380_s12, 1  ;;  %s2380_s12 = sphi %s2402_s12, %s13_s12  }
   0x2   : > { %p137_p1 = scmp.lt.s32.totalorder %s2380_s12, 3 }
   0x4   : > { %p138_p2 = pnand %p1915_p0, %p137_p1 }
   0x5   : > { %v2413_v0 = vld [vmem:[%s3033_s1] sm:$0xff] (!%p138_p2)   ;;  %p161_p3 = scmp.lt.s32.totalorder (!%p138_p2), %s1911_s13, 1  ;;  %v2418_v1 = vld [vmem:[%s3033_s1 + $0x8] sm:$0xff] (!%p138_p2)   ;;  %v2355_v2 = vld [vmem:[%s3033_s1 + $0x10] sm:$0xff] (!%p138_p2)   ;;  %vm676_vm0 = vcmask (!%p138_p2), 261120   ;;  %vm1235_vm4 = vcmask (!%p138_p2), 1042432  }
   0x6   : > { %141 = sbr.rel (%p138_p2) target bundleno = 362 (0x16a), region = 32  ;;  %2203 = vmatprep.subr.bf16.mxu0 (!%p138_p2), %v2413_v0  ;;  %v2357_v3 = vld [vmem:[%s3033_s1 + $0x18] sm:$0xff] (!%p138_p2)   ;;  %2167 = vmatprep.subr.bf16.mxu1 (!%p138_p2), %v2355_v2  ;;  %v2360_v4 = vld [vmem:[%s3033_s1 + $0x20] sm:$0xff] (!%p138_p2)   ;;  %vm224_vm1 = vsmask.f32 (!%p138_p2), 3328  ;;  %v2365_v23 = vld [vmem:[%s3033_s1 + $0x28] sm:$0xff] (!%p138_p2)  }
   0x7   : > { %2204 = vmatpush3.bf16.msra.mxu0 (!%p138_p2), %v2413_v0  ;;  %2168 = vmatpush3.bf16.msra.mxu1 (!%p138_p2), %v2355_v2  ;;  %vm225_vm2 = vsmask.f32 (!%p138_p2), 7440  ;;  %vm1236_vm5 = vcmask (!%p138_p2), 1046532   ;;  %vm1823_vm7 = vcmask (!%p138_p2), 257024  }
   0x8   : > { %2205 = vmatprep.subr.bf16.mxu0 (!%p138_p2), %v2418_v1  ;;  %2169 = vmatprep.subr.bf16.mxu1 (!%p138_p2), %v2357_v3  ;;  %vm2486_vm3 = vmor (!%p138_p2), %vm224_vm1, %vm225_vm2 }
   0x9   : > { %vm2573_vm6 = vmor (!%p138_p2), %vm1235_vm4, %vm1236_vm5 }
   0xb   : > { %2206 = vmatpush3.bf16.msra.mxu0 (!%p138_p2), %v2418_v1  ;;  %2170 = vmatpush3.bf16.msra.mxu1 (!%p138_p2), %v2357_v3 }
   0xc   : > { %2239 = vmatprep.subr.bf16.mxu0 (!%p138_p2), %v2360_v4  ;;  %2275 = vmatprep.subr.bf16.mxu1 (!%p138_p2), %v2413_v0 }
   0xd   : > { %s3041_s13 = smov (!%p161_p3, %s1911_s13), 1 }
   0xe   : > { %s2343_s22 = smul.u32 192, %s3041_s13  ;;  %s2080_s5 = sshll.u32 %s3041_s13, 7 }
   0xf   : > { %s2932_s8 = scalar_lea.vmem %s3035_s3, %s2080_s5 }
  0x10   : > { %s2438_s27 = scalar_lea.vmem %s3032_s0, %s2343_s22 }
  0x11   : > { %v172_v5 = vld [vmem:[%s2438_s27] sm:$0xf]  ;;  %v2443_v6 = vld [vmem:[%s2438_s27 + $0x4] sm:$0xf]  ;;  %v174_v7 = vld [vmem:[%s2438_s27 + $0xc] sm:$0xf] }
  0x12   : > { %v228_v8 = vshrl.u32 %v172_v5, 16  ;;  %v231_v9 = vshll.u32 %v172_v5, 16  ;;  %v241_v10 = vshrl.u32 %v2443_v6, 16  ;;  %v1957_v11 = vcombine.low %v172_v5, %v2443_v6  ;;  %v2449_v12 = vld [vmem:[%s2438_s27 + $0x10] sm:$0xf] }
  0x13   : > { %v1240_v13 = vrot.slane %v2443_v6, 5  ;;  %v252_v14 = vshrl.u32 %v174_v7, 16  ;;  %v255_v15 = vshll.u32 %v174_v7, 16  ;;  %v265_v16 = vshrl.u32 %v2449_v12, 16  ;;  %v176_v17 = vld [vmem:[%s2438_s27 + $0x18] sm:$0xf] }
  0x14   : > { %v230_v18 = vrot.slane %v228_v8, 4  ;;  %v233_v19 = vrot.slane %v231_v9, 5  ;;  %2207 = vmatprep.mubr.msk.bf16.mxu0 %vm676_vm0, %v1957_v11  ;;  %v1958_v20 = vcombine.low %v174_v7, %v2449_v12  ;;  %v1247_v21 = vrot.slane %v2449_v12, 5  ;;  %v2458_v22 = vld [vmem:[%s2438_s27 + $0x1c] sm:$0xf] }
  0x15   : > { %v2466_v24 = vrot.slane %v1240_v13, 4  ;;  %v254_v25 = vrot.slane %v252_v14, 4  ;;  %v257_v26 = vrot.slane %v255_v15, 5  ;;  %v276_v27 = vshrl.u32 %v176_v17, 16  ;;  %v2469_v28 = vld [vmem:[%s2438_s27 + $0x8] sm:$0x1] }
  0x16   : > { %2208 = vmatmul.mubr.msk.bf16.vlgmr.msra.gmra.mrb[0].mxu0 %vm676_vm0, %v1958_v20  ;;  %v2474_v29 = vrot.slane %v1247_v21, 4  ;;  %v279_v30 = vshll.u32 %v176_v17, 16  ;;  %v289_v31 = vshrl.u32 %v2458_v22, 16  ;;  %v1959_v32 = vcombine.low %v176_v17, %v2458_v22  ;;  %v178_v33 = vld [vmem:[%s2438_s27 + $0x24] sm:$0xf] }
  0x17   : > { %v278_v34 = vrot.slane %v276_v27, 4  ;;  %v234_v35 = vor.u32 %v233_v19, %v230_v18  ;;  %v237_v36 = vshll.u32 %v2443_v6, 16  ;;  %v243_v37 = vrot.slane %v241_v10, 4  ;;  %v2481_v38 = vld [vmem:[%s2438_s27 + $0x28] sm:$0xf]  ;;  %2240 = vmatpush3.bf16.msra.mxu0 %v2360_v4 }
  0x18   : > { %v281_v39 = vrot.slane %v279_v30, 5  ;;  %2211 = vmatprep.mubr.msk.bf16.mxu0 %vm676_vm0, %v1959_v32  ;;  %v247_v41 = vshll.u32 %v2469_v28, 16  ;;  %v1243_v42 = vrot.slane %v2469_v28, 5  ;;  %v300_v43 = vshrl.u32 %v178_v33, 16  ;;  %2241 = vmatprep.subr.bf16.mxu0 %v2365_v23  ;;  %v2494_v48 = vld [vmem:[%s2438_s27 + $0x14] sm:$0x1] }
  0x19   : > { %v235_v44 = vrot.slane %v234_v35, 4  ;;  %v239_v45 = vrot.slane %v237_v36, 5  ;;  %v303_v46 = vshll.u32 %v178_v33, 16  ;;  %v313_v47 = vshrl.u32 %v2481_v38, 16  ;;  %v180_v53 = vld [vmem:[%s2438_s27 + $0x30] sm:$0xf] }
  0x1a   : > { %v249_v49 = vrot.slane %v247_v41, 5  ;;  %v302_v50 = vrot.slane %v300_v43, 4  ;;  %v1960_v51 = vcombine.low %v178_v33, %v2481_v38  ;;  %v258_v52 = vor.u32 %v257_v26, %v254_v25  ;;  %v2502_v58 = vld [vmem:[%s2438_s27 + $0x34] sm:$0xf]  ;;  %v2510_v9 = vld [vmem:[%s2438_s27 + $0x20] sm:$0x1] }
  0x1b   : > { %v240_v54 = vsel %vm2486_vm3, %v235_v44, %v239_v45  ;;  %v244_v55 = vor.u32 %v243_v37, %v239_v45  ;;  %v305_v56 = vrot.slane %v303_v46, 5  ;;  %v261_v57 = vshll.u32 %v2449_v12, 16  ;;  %2242 = vmatpush3.bf16.msra.mxu0 %v2365_v23  ;;  %v182_v11 = vld [vmem:[%s2438_s27 + $0x3c] sm:$0xf]  ;;  %v2518_v18 = vld [vmem:[%s2438_s27 + $0x40] sm:$0xf] }
  0x1c   : > { %v259_v59 = vrot.slane %v258_v52, 4  ;;  %v267_v60 = vrot.slane %v265_v16, 4  ;;  %v271_v61 = vshll.u32 %v2494_v48, 16  ;;  %v1250_v62 = vrot.slane %v2494_v48, 5  ;;  %v2527_v37 = vld [vmem:[%s2438_s27 + $0x2c] sm:$0x1] }
  0x1d   : > { %v245_v63 = vrot.slane %v244_v55, 4  ;;  %v263_v2 = vrot.slane %v261_v57, 5  ;;  %v324_v3 = vshrl.u32 %v180_v53, 16  ;;  %v327_v4 = vshll.u32 %v180_v53, 16  ;;  %v184_v44 = vld [vmem:[%s2438_s27 + $0x48] sm:$0xf] }
  0x1e   : > { %2212 = vmatmul.mubr.msk.bf16.gmra.mrb[4].mxu0 %vm676_vm0, %v1960_v51  ;;  %v273_v5 = vrot.slane %v271_v61, 5  ;;  %v337_v7 = vshrl.u32 %v2502_v58, 16  ;;  %v1961_v8 = vcombine.low %v180_v53, %v2502_v58  ;;  %v282_v10 = vor.u32 %v281_v39, %v278_v34  ;;  %v2533_v45 = vld [vmem:[%s2438_s27 + $0x4c] sm:$0xf] }
  0x1f   : > { %v250_v14 = vsel %vm2486_vm3, %v245_v63, %v249_v49  ;;  %v264_v15 = vsel %vm2486_vm3, %v259_v59, %v263_v2  ;;  %v268_v16 = vor.u32 %v267_v60, %v263_v2  ;;  %v326_v17 = vrot.slane %v324_v3, 4  ;;  %v2545_v3 = vld [vmem:[%s2438_s27 + $0x38] sm:$0x1] }
  0x20   : > { %v1923_v19 = vcombine.low %v240_v54, %v250_v14  ;;  %v329_v20 = vrot.slane %v327_v4, 5  ;;  %2215 = vmatprep.mubr.msk.bf16.mxu0 %vm676_vm0, %v1961_v8  ;;  %v283_v23 = vrot.slane %v282_v10, 4  ;;  %v285_v25 = vshll.u32 %v2458_v22, 16  ;;  %v186_v4 = vld [vmem:[%s2438_s27 + $0x54] sm:$0xf] }
  0x21   : > { %v269_v26 = vrot.slane %v268_v16, 4  ;;  %v291_v27 = vrot.slane %v289_v31, 4  ;;  %v295_v30 = vshll.u32 %v2510_v9, 16  ;;  %v348_v32 = vshrl.u32 %v182_v11, 16  ;;  %v2552_v14 = vld [vmem:[%s2438_s27 + $0x58] sm:$0xf] }
  0x22   : > { %2171 = vmatprep.mubr.msk.bf16.mxu1 %vm676_vm0, %v1923_v19  ;;  %v287_v33 = vrot.slane %v285_v25, 5  ;;  %v351_v34 = vshll.u32 %v182_v11, 16  ;;  %v361_v35 = vshrl.u32 %v2518_v18, 16  ;;  %v1962_v36 = vcombine.low %v182_v11, %v2518_v18 }
  0x23   : > { %v274_v39 = vsel %vm2486_vm3, %v269_v26, %v273_v5  ;;  %v297_v31 = vrot.slane %v295_v30, 5  ;;  %v350_v41 = vrot.slane %v348_v32, 4  ;;  %v306_v43 = vor.u32 %v305_v56, %v302_v50 }
  0x24   : > { %v1924_v46 = vcombine.low %v264_v15, %v274_v39  ;;  %v288_v49 = vsel %vm2486_vm3, %v283_v23, %v287_v33  ;;  %v292_v51 = vor.u32 %v291_v27, %v287_v33  ;;  %v353_v52 = vrot.slane %v351_v34, 5  ;;  %v2565_v33 = vld [vmem:[%s2438_s27 + $0x44] sm:$0x1] }
  0x25   : > { %v307_v53 = vrot.slane %v306_v43, 4  ;;  %v309_v54 = vshll.u32 %v2481_v38, 16  ;;  %v315_v55 = vrot.slane %v313_v47, 4  ;;  %v319_v57 = vshll.u32 %v2527_v37, 16 }
  0x26   : > { %2172 = vmatmul.mubr.msk.bf16.vlgmr.msra.gmra.mrb[0].mxu1 %vm676_vm0, %v1924_v46  ;;  %v293_v50 = vrot.slane %v292_v51, 4  ;;  %2216 = vmatmul.mubr.msk.bf16.gmra.mrb[8].mxu0 %vm676_vm0, %v1962_v36  ;;  %v372_v56 = vshrl.u32 %v184_v44, 16  ;;  %v375_v59 = vshll.u32 %v184_v44, 16  ;;  %v385_v60 = vshrl.u32 %v2533_v45, 16 }
  0x27   : > { %2277 = vmatpush3.bf16.msra.mxu1 %v2413_v0  ;;  %v311_v61 = vrot.slane %v309_v54, 5  ;;  %v321_v63 = vrot.slane %v319_v57, 5  ;;  %v1963_v2 = vcombine.low %v184_v44, %v2533_v45  ;;  %v330_v47 = vor.u32 %v329_v20, %v326_v17 }
  0x28   : > { %v298_v5 = vsel %vm2486_vm3, %v293_v50, %v297_v31  ;;  %v374_v8 = vrot.slane %v372_v56, 4  ;;  %v377_v10 = vrot.slane %v375_v59, 5  ;;  %v333_v11 = vshll.u32 %v2502_v58, 16  ;;  %2276 = vmatprep.subr.bf16.mxu1 %v2418_v1  ;;  %v1187_v31 = vld [vmem:[%s2438_s27] sm:$0xe] }
  0x29   : > { %v1925_v0 = vcombine.low %v288_v49, %v298_v5  ;;  %v312_v15 = vsel %vm2486_vm3, %v307_v53, %v311_v61  ;;  %v316_v16 = vor.u32 %v315_v55, %v311_v61  ;;  %2219 = vmatprep.mubr.msk.bf16.mxu0 %vm676_vm0, %v1963_v2  ;;  %v331_v17 = vrot.slane %v330_v47, 4  ;;  %v2593_v61 = vld [vmem:[%s2438_s27 + $0x50] sm:$0x1]  ;;  %v1188_v2 = vld [vmem:[%s2438_s27 + $0xc] sm:$0xe] }
  0x2a   : > { %v335_v19 = vrot.slane %v333_v11, 5  ;;  %v339_v20 = vrot.slane %v337_v7, 4  ;;  %v343_v23 = vshll.u32 %v2545_v3, 16  ;;  %v396_v25 = vshrl.u32 %v186_v4, 16 }
  0x2b   : > { %2175 = vmatprep.mubr.msk.bf16.mxu1 %vm676_vm0, %v1925_v0  ;;  %v317_v26 = vrot.slane %v316_v16, 4  ;;  %v399_v27 = vshll.u32 %v186_v4, 16  ;;  %v409_v30 = vshrl.u32 %v2552_v14, 16  ;;  %v1964_v32 = vcombine.low %v186_v4, %v2552_v14  ;;  %2278 = vmatpush3.bf16.msra.mxu1 %v2418_v1 }
  0x2c   : > { %v336_v34 = vsel %vm2486_vm3, %v331_v17, %v335_v19  ;;  %v340_v36 = vor.u32 %v339_v20, %v335_v19  ;;  %v345_v7 = vrot.slane %v343_v23, 5  ;;  %v398_v39 = vrot.slane %v396_v25, 4  ;;  %v1189_v20 = vld [vmem:[%s2438_s27 + $0x18] sm:$0xe]  ;;  %v2625_v25 = vld [vmem:[%s2438_s27 + $0x60] sm:$0xf] }
  0x2d   : > { %v322_v44 = vsel %vm2486_vm3, %v317_v26, %v321_v63  ;;  %v401_v46 = vrot.slane %v399_v27, 5  ;;  %v354_v49 = vor.u32 %v353_v52, %v350_v41  ;;  %v357_v1 = vshll.u32 %v2518_v18, 16 }
  0x2e   : > { %v1926_v51 = vcombine.low %v312_v15, %v322_v44  ;;  %v341_v53 = vrot.slane %v340_v36, 4  ;;  %2220 = vmatmul.mubr.msk.bf16.gmra.mrb[12].mxu0 %vm676_vm0, %v1964_v32  ;;  %v363_v54 = vrot.slane %v361_v35, 4  ;;  %v367_v55 = vshll.u32 %v2565_v33, 16  ;;  %v2630_v44 = vld [vmem:[%s2438_s27 + $0x64] sm:$0xf] }
  0x2f   : > { %v355_v57 = vrot.slane %v354_v49, 4  ;;  %v359_v50 = vrot.slane %v357_v1, 5  ;;  %v1991_v56 = vrot.slane %v1187_v31, 9  ;;  %v1244_v41 = vsel %vm2573_vm6, %v2466_v24, %v1243_v42 }
  0x30   : > { %2176 = vmatmul.mubr.msk.bf16.gmra.mrb[4].mxu1 %vm676_vm0, %v1926_v51  ;;  %v346_v52 = vsel %vm2486_vm3, %v341_v53, %v345_v7  ;;  %v369_v59 = vrot.slane %v367_v55, 5  ;;  %v378_v35 = vor.u32 %v377_v10, %v374_v8  ;;  %v381_v63 = vshll.u32 %v2533_v45, 16 }
  0x31   : > { %v1927_v47 = vcombine.low %v336_v34, %v346_v52  ;;  %v360_v28 = vsel %vm2486_vm3, %v355_v57, %v359_v50  ;;  %v364_v4 = vor.u32 %v363_v54, %v359_v50  ;;  %v1241_v24 = vsel %vm2573_vm6, %v1991_v56, %v1240_v13  ;;  %v1190_v54 = vld [vmem:[%s2438_s27 + $0x24] sm:$0xe] }
  0x32   : > { %v2011_v42 = vcombine.low %v1241_v24, %v1244_v41  ;;  %v379_v5 = vrot.slane %v378_v35, 4  ;;  %v383_v11 = vrot.slane %v381_v63, 5  ;;  %v387_v0 = vrot.slane %v385_v60, 4  ;;  %v2614_v60 = vld [vmem:[%s2438_s27 + $0x5c] sm:$0x1] }
  0x33   : > { %2179 = vmatprep.mubr.msk.bf16.mxu1 %vm676_vm0, %v1927_v47  ;;  %v365_v8 = vrot.slane %v364_v4, 4  ;;  %v391_v10 = vshll.u32 %v2593_v61, 16  ;;  %v1992_v15 = vrot.slane %v1188_v2, 9  ;;  %v1251_v6 = vsel %vm2573_vm6, %v2474_v29, %v1250_v62 }
  0x34   : > { %2243 = vmatprep.mubr.msk.bf16.mxu0 %vm676_vm0, %v2011_v42  ;;  %v384_v13 = vsel %vm2486_vm3, %v379_v5, %v383_v11  ;;  %v388_v16 = vor.u32 %v387_v0, %v383_v11  ;;  %v402_v17 = vor.u32 %v401_v46, %v398_v39  ;;  %v405_v19 = vshll.u32 %v2552_v14, 16  ;;  %v2660_v11 = vld [vmem:[%s2438_s27 + $0x70] sm:$0xf] }
  0x35   : > { %v370_v48 = vsel %vm2486_vm3, %v365_v8, %v369_v59  ;;  %v393_v23 = vrot.slane %v391_v10, 5  ;;  %v1248_v29 = vsel %vm2573_vm6, %v1992_v15, %v1247_v21  ;;  %v411_v62 = vrot.slane %v409_v30, 4  ;;  %v2638_v30 = vld [vmem:[%s2438_s27 + $0x68] sm:$0x1] }
  0x36   : > { %v1928_v26 = vcombine.low %v360_v28, %v370_v48  ;;  %v389_v27 = vrot.slane %v388_v16, 4  ;;  %v2012_v32 = vcombine.low %v1248_v29, %v1251_v6  ;;  %v403_v34 = vrot.slane %v402_v17, 4  ;;  %v2655_v28 = vld [vmem:[%s2438_s27 + $0x6c] sm:$0xf]  ;;  %v2665_v6 = vld [vmem:[%s2438_s27 + $0x74] sm:$0x1] }
  0x37   : > { %v407_v36 = vrot.slane %v405_v19, 5  ;;  %v415_v7 = vshll.u32 %v2614_v60, 16  ;;  %v1993_v39 = vrot.slane %v1189_v20, 9  ;;  %v1254_v31 = vrot.slane %v2458_v22, 5  ;;  %v1191_v29 = vld [vmem:[%s2438_s27 + $0x30] sm:$0xe] }
  0x38   : > { %2180 = vmatmul.mubr.msk.bf16.gmra.mrb[8].mxu1 %vm676_vm0, %v1928_v26  ;;  %v394_v12 = vsel %vm2486_vm3, %v389_v27, %v393_v23  ;;  %2244 = vmatmul.mubr.msk.bf16.vlgmr.msra.gmra.mrb[0].mxu0 %vm676_vm0, %v2012_v32  ;;  %v1257_v21 = vrot.slane %v2510_v9, 5  ;;  %v420_v46 = vshrl.u32 %v2625_v25, 16  ;;  %v423_v49 = vshll.u32 %v2625_v25, 16 }
  0x39   : > { %v1929_v1 = vcombine.low %v384_v13, %v394_v12  ;;  %v408_v22 = vsel %vm2486_vm3, %v403_v34, %v407_v36  ;;  %v412_v51 = vor.u32 %v411_v62, %v407_v36  ;;  %v417_v53 = vrot.slane %v415_v7, 5 }
  0x3a   : > { %v1255_v55 = vsel %vm2573_vm6, %v1993_v39, %v1254_v31  ;;  %v1256_v57 = vrot.slane %v1254_v31, 4  ;;  %v422_v50 = vrot.slane %v420_v46, 4  ;;  %v425_v9 = vrot.slane %v423_v49, 5  ;;  %v2681_v39 = vld [vmem:[%s2438_s27 + $0x78] sm:$0xf] }
  0x3b   : > { %2183 = vmatprep.mubr.msk.bf16.mxu1 %vm676_vm0, %v1929_v1  ;;  %v413_v56 = vrot.slane %v412_v51, 4  ;;  %v429_v41 = vshll.u32 %v2630_v44, 16  ;;  %v433_v52 = vshrl.u32 %v2630_v44, 16  ;;  %v439_v59 = vshll.u32 %v2638_v30, 16  ;;  %v2687_v49 = vld [vmem:[%s2438_s27 + $0x7c] sm:$0xf] }
  0x3c   : > { %v1258_v35 = vsel %vm2573_vm6, %v1256_v57, %v1257_v21  ;;  %v426_v63 = vor.u32 %v425_v9, %v422_v50  ;;  %v1994_v2 = vrot.slane %v1190_v54, 9  ;;  %v1261_v47 = vrot.slane %v2481_v38, 5  ;;  %v2692_v54 = vld [vmem:[%s2438_s27 + $0x80] sm:$0x1] }
  0x3d   : > { %v418_v4 = vsel %vm2486_vm3, %v413_v56, %v417_v53  ;;  %v2013_v24 = vcombine.low %v1255_v55, %v1258_v35  ;;  %v431_v42 = vrot.slane %v429_v41, 5  ;;  %v435_v5 = vrot.slane %v433_v52, 4  ;;  %v1192_v52 = vld [vmem:[%s2438_s27 + $0x3c] sm:$0xe] }
  0x3e   : > { %v1930_v0 = vcombine.low %v408_v22, %v418_v4  ;;  %v427_v8 = vrot.slane %v426_v63, 4  ;;  %v441_v10 = vrot.slane %v439_v59, 5  ;;  %v1262_v15 = vsel %vm2573_vm6, %v1994_v2, %v1261_v47 }
  0x3f   : > { %2247 = vmatprep.mubr.msk.bf16.mxu0 %vm676_vm0, %v2013_v24  ;;  %v436_v38 = vor.u32 %v435_v5, %v431_v42  ;;  %v1263_v13 = vrot.slane %v1261_v47, 4  ;;  %v1264_v16 = vrot.slane %v2527_v37, 5  ;;  %v444_v17 = vshrl.u32 %v2655_v28, 16  ;;  %v2706_v47 = vld [vmem:[%s2438_s27 + $0x84] sm:$0xf] }
  0x40   : > { %2184 = vmatmul.mubr.msk.bf16.gmra.mrb[12].mxu1 %vm676_vm0, %v1930_v0  ;;  %v432_v19 = vsel %vm2486_vm3, %v427_v8, %v431_v42  ;;  %v447_v20 = vshll.u32 %v2655_v28, 16  ;;  %v453_v48 = vshll.u32 %v2660_v11, 16  ;;  %v457_v23 = vshrl.u32 %v2660_v11, 16  ;;  %v2713_v0 = vld [vmem:[%s2438_s27 + $0x88] sm:$0xf] }
  0x41   : > { %v437_v62 = vrot.slane %v436_v38, 4  ;;  %v1265_v37 = vsel %vm2573_vm6, %v1263_v13, %v1264_v16  ;;  %v446_v26 = vrot.slane %v444_v17, 4  ;;  %v463_v27 = vshll.u32 %v2665_v6, 16 }
  0x42   : > { %v2014_v32 = vcombine.low %v1262_v15, %v1265_v37  ;;  %v449_v34 = vrot.slane %v447_v20, 5  ;;  %v455_v36 = vrot.slane %v453_v48, 5  ;;  %v459_v7 = vrot.slane %v457_v23, 4  ;;  %v1193_v37 = vld [vmem:[%s2438_s27 + $0x48] sm:$0xe] }
  0x43   : > { %v442_v31 = vsel %vm2486_vm3, %v437_v62, %v441_v10  ;;  %v465_v12 = vrot.slane %v463_v27, 5  ;;  %v1995_v21 = vrot.slane %v1191_v29, 9  ;;  %v1268_v46 = vrot.slane %v2502_v58, 5 }
  0x44   : > { %v1931_v1 = vcombine.low %v432_v19, %v442_v31  ;;  %2248 = vmatmul.mubr.msk.bf16.gmra.mrb[4].mxu0 %vm676_vm0, %v2014_v32  ;;  %v450_v22 = vor.u32 %v449_v34, %v446_v26  ;;  %v460_v51 = vor.u32 %v459_v7, %v455_v36  ;;  %v1271_v53 = vrot.slane %v2545_v3, 5  ;;  %v2719_v19 = vld [vmem:[%s2438_s27 + $0x8c] sm:$0x1] }
  0x45   : > { %v1269_v55 = vsel %vm2573_vm6, %v1995_v21, %v1268_v46  ;;  %v1270_v57 = vrot.slane %v1268_v46, 4  ;;  %v468_v50 = vshrl.u32 %v2681_v39, 16  ;;  %v471_v58 = vshll.u32 %v2681_v39, 16 }
  0x46   : > { %2187 = vmatprep.mubr.msk.bf16.mxu1 %vm676_vm0, %v1931_v1  ;;  %v451_v9 = vrot.slane %v450_v22, 4  ;;  %v461_v56 = vrot.slane %v460_v51, 4  ;;  %v477_v41 = vshll.u32 %v2687_v49, 16  ;;  %v481_v3 = vshrl.u32 %v2687_v49, 16  ;;  %v2735_v1 = vld [vmem:[%s2438_s27 + $0x90] sm:$0xf] }
  0x47   : > { %v1272_v59 = vsel %vm2573_vm6, %v1270_v57, %v1271_v53  ;;  %v470_v35 = vrot.slane %v468_v50, 4  ;;  %v473_v63 = vrot.slane %v471_v58, 5  ;;  %v487_v2 = vshll.u32 %v2692_v54, 16  ;;  %v2741_v57 = vld [vmem:[%s2438_s27 + $0x94] sm:$0xf] }
  0x48   : > { %v456_v4 = vsel %vm2486_vm3, %v451_v9, %v455_v36  ;;  %v466_v24 = vsel %vm2486_vm3, %v461_v56, %v465_v12  ;;  %v2015_v42 = vcombine.low %v1269_v55, %v1272_v59  ;;  %v479_v5 = vrot.slane %v477_v41, 5  ;;  %v2745_v41 = vld [vmem:[%s2438_s27 + $0x98] sm:$0x1] }
  0x49   : > { %v1932_v8 = vcombine.low %v456_v4, %v466_v24  ;;  %v474_v10 = vor.u32 %v473_v63, %v470_v35  ;;  %v483_v15 = vrot.slane %v481_v3, 4  ;;  %v489_v38 = vrot.slane %v487_v2, 5  ;;  %v1194_v4 = vld [vmem:[%s2438_s27 + $0x54] sm:$0xe] }
  0x4a   : > { %2251 = vmatprep.mubr.msk.bf16.mxu0 %vm676_vm0, %v2015_v42  ;;  %v1996_v13 = vrot.slane %v1192_v52, 9  ;;  %v1275_v16 = vrot.slane %v2518_v18, 5  ;;  %v1278_v17 = vrot.slane %v2565_v33, 5  ;;  %v492_v20 = vshrl.u32 %v2706_v47, 16 }
  0x4b   : > { %2188 = vmatmul.mubr.msk.bf16.gmra.mrb[16].mxu1 %vm676_vm0, %v1932_v8  ;;  %v475_v48 = vrot.slane %v474_v10, 4  ;;  %v484_v23 = vor.u32 %v483_v15, %v479_v5  ;;  %v495_v29 = vshll.u32 %v2706_v47, 16  ;;  %v501_v62 = vshll.u32 %v2713_v0, 16  ;;  %v2762_v10 = vld [vmem:[%s2438_s27 + $0x9c] sm:$0xf] }
  0x4c   : > { %v1276_v26 = vsel %vm2573_vm6, %v1996_v13, %v1275_v16  ;;  %v1277_v18 = vrot.slane %v1275_v16, 4  ;;  %v494_v33 = vrot.slane %v492_v20, 4  ;;  %v505_v27 = vshrl.u32 %v2713_v0, 16 }
  0x4d   : > { %v480_v32 = vsel %vm2486_vm3, %v475_v48, %v479_v5  ;;  %v485_v34 = vrot.slane %v484_v23, 4  ;;  %v497_v36 = vrot.slane %v495_v29, 5  ;;  %v503_v7 = vrot.slane %v501_v62, 5 }
  0x4e   : > { %v1279_v31 = vsel %vm2573_vm6, %v1277_v18, %v1278_v17  ;;  %v507_v12 = vrot.slane %v505_v27, 4  ;;  %v511_v21 = vshll.u32 %v2719_v19, 16  ;;  %v1997_v46 = vrot.slane %v1193_v37, 9  ;;  %v2767_v17 = vld [vmem:[%s2438_s27 + $0xa0] sm:$0xf] }
  0x4f   : > { %v490_v22 = vsel %vm2486_vm3, %v485_v34, %v489_v38  ;;  %v2016_v51 = vcombine.low %v1276_v26, %v1279_v31  ;;  %v498_v53 = vor.u32 %v497_v36, %v494_v33  ;;  %v1282_v55 = vrot.slane %v2533_v45, 5  ;;  %v2773_v18 = vld [vmem:[%s2438_s27 + $0xa4] sm:$0x1] }
  0x50   : > { %v1933_v50 = vcombine.low %v480_v32, %v490_v22  ;;  %v508_v58 = vor.u32 %v507_v12, %v503_v7  ;;  %v513_v9 = vrot.slane %v511_v21, 5  ;;  %v1285_v56 = vrot.slane %v2593_v61, 5 }
  0x51   : > { %2252 = vmatmul.mubr.msk.bf16.gmra.mrb[8].mxu0 %vm676_vm0, %v2016_v51  ;;  %v499_v3 = vrot.slane %v498_v53, 4  ;;  %v1283_v52 = vsel %vm2573_vm6, %v1997_v46, %v1282_v55  ;;  %v1284_v59 = vrot.slane %v1282_v55, 4  ;;  %v516_v45 = vshrl.u32 %v2735_v1, 16 }
  0x52   : > { %2191 = vmatprep.mubr.msk.bf16.mxu1 %vm676_vm0, %v1933_v50  ;;  %v509_v35 = vrot.slane %v508_v58, 4  ;;  %v519_v63 = vshll.u32 %v2735_v1, 16  ;;  %v525_v61 = vshll.u32 %v2741_v57, 16  ;;  %v529_v2 = vshrl.u32 %v2741_v57, 16  ;;  %v2791_v58 = vld [vmem:[%s2438_s27 + $0xac] sm:$0xf] }
  0x53   : > { %v504_v24 = vsel %vm2486_vm3, %v499_v3, %v503_v7  ;;  %v1286_v42 = vsel %vm2573_vm6, %v1284_v59, %v1285_v56  ;;  %v518_v5 = vrot.slane %v516_v45, 4  ;;  %v535_v8 = vshll.u32 %v2745_v41, 16  ;;  %v2781_v7 = vld [vmem:[%s2438_s27 + $0xa8] sm:$0xf]  ;;  %v2797_v45 = vld [vmem:[%s2438_s27 + $0xb0] sm:$0x1] }
  0x54   : > { %v514_v15 = vsel %vm2486_vm3, %v509_v35, %v513_v9  ;;  %v2017_v38 = vcombine.low %v1283_v52, %v1286_v42  ;;  %v521_v13 = vrot.slane %v519_v63, 5  ;;  %v527_v16 = vrot.slane %v525_v61, 5  ;;  %v2800_v35 = vld [vmem:[%s2438_s27 + $0xb4] sm:$0xf] }
  0x55   : > { %v1934_v20 = vcombine.low %v504_v24, %v514_v15  ;;  %v531_v48 = vrot.slane %v529_v2, 4  ;;  %v537_v23 = vrot.slane %v535_v8, 5  ;;  %v1998_v29 = vrot.slane %v1194_v4, 9 }
  0x56   : > { %2255 = vmatprep.mubr.msk.bf16.mxu0 %vm676_vm0, %v2017_v38  ;;  %v522_v62 = vor.u32 %v521_v13, %v518_v5  ;;  %v1289_v37 = vrot.slane %v2552_v14, 5  ;;  %v1292_v26 = vrot.slane %v2614_v60, 5  ;;  %v540_v33 = vshrl.u32 %v2762_v10, 16  ;;  %v2809_v13 = vld [vmem:[%s2438_s27 + $0xb8] sm:$0xf] }
  0x57   : > { %2192 = vmatmul.mubr.msk.bf16.gmra.mrb[20].mxu1 %vm676_vm0, %v1934_v20  ;;  %v532_v27 = vor.u32 %v531_v48, %v527_v16  ;;  %v543_v32 = vshll.u32 %v2762_v10, 16  ;;  %v549_v34 = vshll.u32 %v2767_v17, 16  ;;  %v553_v36 = vshrl.u32 %v2767_v17, 16 }
  0x58   : > { %v523_v31 = vrot.slane %v522_v62, 4  ;;  %v1290_v14 = vsel %vm2573_vm6, %v1998_v29, %v1289_v37  ;;  %v1291_v60 = vrot.slane %v1289_v37, 4  ;;  %v542_v12 = vrot.slane %v540_v33, 4  ;;  %v2818_v37 = vld [vmem:[%s2438_s27 + $0xbc] sm:$0x1] }
  0x59   : > { %v533_v21 = vrot.slane %v532_v27, 4  ;;  %v545_v46 = vrot.slane %v543_v32, 5  ;;  %v551_v22 = vrot.slane %v549_v34, 5  ;;  %v555_v51 = vrot.slane %v553_v36, 4 }
  0x5a   : > { %v528_v53 = vsel %vm2486_vm3, %v523_v31, %v527_v16  ;;  %v1293_v55 = vsel %vm2573_vm6, %v1291_v60, %v1292_v26  ;;  %v559_v50 = vshll.u32 %v2773_v18, 16  ;;  %v564_v9 = vshrl.u32 %v2781_v7, 16  ;;  %v1195_v26 = vld [vmem:[%s2438_s27 + $0x60] sm:$0xe] }
  0x5b   : > { %v538_v56 = vsel %vm2486_vm3, %v533_v21, %v537_v23  ;;  %v2018_v3 = vcombine.low %v1290_v14, %v1293_v55  ;;  %v546_v52 = vor.u32 %v545_v46, %v542_v12  ;;  %v556_v59 = vor.u32 %v555_v51, %v551_v22 }
  0x5c   : > { %v1935_v63 = vcombine.low %v528_v53, %v538_v56  ;;  %v561_v61 = vrot.slane %v559_v50, 5  ;;  %v566_v2 = vrot.slane %v564_v9, 4  ;;  %v567_v4 = vshll.u32 %v2781_v7, 16  ;;  %v1196_v9 = vld [vmem:[%s2438_s27 + $0x6c] sm:$0xe] }
  0x5d   : > { %2256 = vmatmul.mubr.msk.bf16.gmra.mrb[12].mxu0 %vm676_vm0, %v2018_v3  ;;  %v547_v24 = vrot.slane %v546_v52, 4  ;;  %v557_v42 = vrot.slane %v556_v59, 4  ;;  %v573_v5 = vshll.u32 %v2791_v58, 16  ;;  %v577_v8 = vshrl.u32 %v2791_v58, 16 }
  0x5e   : > { %2195 = vmatprep.mubr.msk.bf16.mxu1 %vm676_vm0, %v1935_v63  ;;  %v569_v15 = vrot.slane %v567_v4, 5  ;;  %v583_v38 = vshll.u32 %v2797_v45, 16  ;;  %v588_v16 = vshrl.u32 %v2800_v35, 16  ;;  %v591_v20 = vshll.u32 %v2800_v35, 16 }
  0x5f   : > { %v552_v48 = vsel %vm2486_vm3, %v547_v24, %v551_v22  ;;  %v562_v23 = vsel %vm2486_vm3, %v557_v42, %v561_v61  ;;  %v575_v29 = vrot.slane %v573_v5, 5  ;;  %v579_v62 = vrot.slane %v577_v8, 4 }
  0x60   : > { %v1936_v33 = vcombine.low %v552_v48, %v562_v23  ;;  %v570_v27 = vor.u32 %v569_v15, %v566_v2  ;;  %v585_v32 = vrot.slane %v583_v38, 5  ;;  %v590_v34 = vrot.slane %v588_v16, 4  ;;  %v1197_v15 = vld [vmem:[%s2438_s27 + $0x78] sm:$0xe]  ;;  %v1198_v48 = vld [vmem:[%s2438_s27 + $0x84] sm:$0xe] }
  0x61   : > { %v580_v36 = vor.u32 %v579_v62, %v575_v29  ;;  %v593_v31 = vrot.slane %v591_v20, 5  ;;  %v597_v14 = vshll.u32 %v2809_v13, 16  ;;  %v601_v60 = vshrl.u32 %v2809_v13, 16 }
  0x62   : > { %2196 = vmatmul.mubr.msk.bf16.gmra.mrb[24].mxu1 %vm676_vm0, %v1936_v33  ;;  %v571_v12 = vrot.slane %v570_v27, 4  ;;  %v607_v21 = vshll.u32 %v2818_v37, 16  ;;  %v1999_v46 = vrot.slane %v1195_v26, 9  ;;  %v1296_v22 = vrot.slane %v2630_v44, 5 }
  0x63   : > { %v581_v51 = vrot.slane %v580_v36, 4  ;;  %v594_v53 = vor.u32 %v593_v31, %v590_v34  ;;  %v599_v55 = vrot.slane %v597_v14, 5  ;;  %v603_v50 = vrot.slane %v601_v60, 4  ;;  %v1199_v14 = vld [vmem:[%s2438_s27 + $0x90] sm:$0xe] }
  0x64   : > { %v576_v56 = vsel %vm2486_vm3, %v571_v12, %v575_v29  ;;  %v609_v3 = vrot.slane %v607_v21, 5  ;;  %v1297_v52 = vsel %vm2573_vm6, %v1999_v46, %v1296_v22  ;;  %v1298_v59 = vrot.slane %v1296_v22, 4 }
  0x65   : > { %v586_v63 = vsel %vm2486_vm3, %v581_v51, %v585_v32  ;;  %v595_v61 = vrot.slane %v594_v53, 4  ;;  %v604_v2 = vor.u32 %v603_v50, %v599_v55  ;;  %v1299_v4 = vrot.slane %v2638_v30, 5 }
  0x66   : > { %v1937_v24 = vcombine.low %v576_v56, %v586_v63  ;;  %v2000_v42 = vrot.slane %v1196_v9, 9  ;;  %v1303_v5 = vrot.slane %v2660_v11, 5  ;;  %v1306_v8 = vrot.slane %v2665_v6, 5  ;;  %v1200_v56 = vld [vmem:[%s2438_s27 + $0x9c] sm:$0xe] }
  0x67   : > { %v600_v38 = vsel %vm2486_vm3, %v595_v61, %v599_v55  ;;  %v605_v16 = vrot.slane %v604_v2, 4  ;;  %v1300_v20 = vsel %vm2573_vm6, %v1298_v59, %v1299_v4  ;;  %v1965_v6 = vcombine.low %v2625_v25, %v2630_v44 }
  0x68   : > { %2199 = vmatprep.mubr.msk.bf16.mxu1 %vm676_vm0, %v1937_v24  ;;  %v2019_v23 = vcombine.low %v1297_v52, %v1300_v20  ;;  %v1304_v30 = vsel %vm2573_vm6, %v2000_v42, %v1303_v5  ;;  %v1305_v29 = vrot.slane %v1303_v5, 4  ;;  %v2001_v26 = vrot.slane %v1197_v15, 9  ;;  %v1202_v15 = vld [vmem:[%s2438_s27 + $0xb4] sm:$0xe] }
  0x69   : > { %v610_v62 = vsel %vm2486_vm3, %v605_v16, %v609_v3  ;;  %v1310_v33 = vrot.slane %v2687_v49, 5  ;;  %v1313_v27 = vrot.slane %v2692_v54, 5  ;;  %v2002_v36 = vrot.slane %v1198_v48, 9 }
  0x6a   : > { %v1938_v32 = vcombine.low %v600_v38, %v610_v62  ;;  %2259 = vmatprep.mubr.msk.bf16.mxu0 %vm676_vm0, %v2019_v23  ;;  %v1307_v34 = vsel %vm2573_vm6, %v1305_v29, %v1306_v8  ;;  %v1317_v31 = vrot.slane %v2713_v0, 5  ;;  %v1320_v44 = vrot.slane %v2719_v19, 5 }
  0x6b   : > { %v2020_v60 = vcombine.low %v1304_v30, %v1307_v34  ;;  %v1311_v40 = vsel %vm2573_vm6, %v2001_v26, %v1310_v33  ;;  %v1312_v25 = vrot.slane %v1310_v33, 4  ;;  %v2003_v21 = vrot.slane %v1199_v14, 9  ;;  %v2925_v34 = vld [vmem:[%s3034_s2] ss:$0 sm:$0xff] }
  0x6c   : > { %2200 = vmatmul.mubr.msk.bf16.gmra.mrb[28].mxu1 %vm676_vm0, %v1938_v32  ;;  %v1319_v54 = vrot.slane %v1317_v31, 4  ;;  %v1324_v46 = vrot.slane %v2741_v57, 5  ;;  %v1327_v22 = vrot.slane %v2745_v41, 5  ;;  %v1318_v19 = vsel %vm2573_vm6, %v2002_v36, %v1317_v31  ;;  %v1201_v41 = vld [vmem:[%s2438_s27 + $0xa8] sm:$0xe] }
  0x6d   : > { %2260 = vmatmul.mubr.msk.bf16.gmra.mrb[16].mxu0 %vm676_vm0, %v2020_v60  ;;  %2223 = vmatprep.mubr.msk.bf16.mxu1 %vm676_vm0, %v1965_v6  ;;  %v1314_v12 = vsel %vm2573_vm6, %v1312_v25, %v1313_v27  ;;  %v1331_v55 = vrot.slane %v2767_v17, 5  ;;  %v1966_v3 = vcombine.low %v2655_v28, %v2660_v11  ;;  %v1967_v59 = vcombine.low %v2681_v39, %v2687_v49 }
  0x6e   : > { %v2021_v51 = vcombine.low %v1311_v40, %v1314_v12  ;;  %v1321_v53 = vsel %vm2573_vm6, %v1319_v54, %v1320_v44  ;;  %v1325_v50 = vsel %vm2573_vm6, %v2003_v21, %v1324_v46  ;;  %v1326_v9 = vrot.slane %v1324_v46, 4 }
  0x6f   : > { %v2022_v52 = vcombine.low %v1318_v19, %v1321_v53  ;;  %v1338_v61 = vrot.slane %v2791_v58, 5  ;;  %v2004_v4 = vrot.slane %v1200_v56, 9  ;;  %v1333_v24 = vrot.slane %v1331_v55, 4 }
  0x70   : > { %2263 = vmatprep.mubr.msk.bf16.mxu0 %vm676_vm0, %v2021_v51  ;;  %v1328_v63 = vsel %vm2573_vm6, %v1326_v9, %v1327_v22  ;;  %v1334_v42 = vrot.slane %v2773_v18, 5  ;;  %v2005_v5 = vrot.slane %v1201_v41, 9  ;;  %v1341_v11 = vrot.slane %v2797_v45, 5 }
  0x71   : > { %v2023_v2 = vcombine.low %v1325_v50, %v1328_v63  ;;  %v1340_v28 = vrot.slane %v1338_v61, 4  ;;  %v1332_v39 = vsel %vm2573_vm6, %v2004_v4, %v1331_v55  ;;  %v1345_v18 = vrot.slane %v2809_v13, 5 }
  0x72   : > { %v1335_v49 = vsel %vm2573_vm6, %v1333_v24, %v1334_v42  ;;  %v1339_v8 = vsel %vm2573_vm6, %v2005_v5, %v1338_v61  ;;  %v1968_v38 = vcombine.low %v2706_v47, %v2713_v0  ;;  %v1969_v20 = vcombine.low %v2735_v1, %v2741_v57 }
  0x73   : > { %v1342_v45 = vsel %vm2573_vm6, %v1340_v28, %v1341_v11  ;;  %v2024_v16 = vcombine.low %v1332_v39, %v1335_v49  ;;  %v2006_v23 = vrot.slane %v1202_v15, 9  ;;  %v1347_v30 = vrot.slane %v1345_v18, 4 }
  0x74   : > { %2224 = vmatmul.mubr.msk.bf16.vlgmr.msra.gmra.mrb[16].mxu1 %vm676_vm0, %v1966_v3  ;;  %v2025_v48 = vcombine.low %v1339_v8, %v1342_v45  ;;  %v1348_v29 = vrot.slane %v2818_v37, 5  ;;  %v1970_v1 = vcombine.low %v2762_v10, %v2767_v17  ;;  %v1971_v37 = vcombine.low %v2781_v7, %v2791_v58 }
  0x75   : > { %2264 = vmatmul.mubr.msk.bf16.gmra.mrb[20].mxu0 %vm676_vm0, %v2022_v52  ;;  %2227 = vmatprep.mubr.msk.bf16.mxu1 %vm676_vm0, %v1967_v59  ;;  %v1346_v47 = vsel %vm2573_vm6, %v2006_v23, %v1345_v18  ;;  %v1972_v6 = vcombine.low %v2800_v35, %v2809_v13 }
  0x76   : > { %2267 = vmatprep.mubr.msk.bf16.mxu0 %vm676_vm0, %v2023_v2  ;;  %v1349_v0 = vsel %vm2573_vm6, %v1347_v30, %v1348_v29 }
  0x77   : > { %v2026_v57 = vcombine.low %v1346_v47, %v1349_v0 }
  0x7c   : > { %2228 = vmatmul.mubr.msk.bf16.gmra.mrb[20].mxu1 %vm676_vm0, %v1968_v38 }
  0x7d   : > { %2268 = vmatmul.mubr.msk.bf16.gmra.mrb[24].mxu0 %vm676_vm0, %v2024_v16  ;;  %2231 = vmatprep.mubr.msk.bf16.mxu1 %vm676_vm0, %v1969_v20 }
  0x7e   : > { %2271 = vmatprep.mubr.msk.bf16.mxu0 %vm676_vm0, %v2025_v48 }
  0x84   : > { %2232 = vmatmul.mubr.msk.bf16.gmra.mrb[24].mxu1 %vm676_vm0, %v1970_v1 }
  0x85   : > { %2272 = vmatmul.mubr.msk.bf16.gmra.mrb[28].mxu0 %vm676_vm0, %v2026_v57  ;;  %2235 = vmatprep.mubr.msk.bf16.mxu1 %vm676_vm0, %v1971_v37 }
  0x8c   : > { %2236 = vmatmul.mubr.msk.bf16.gmra.mrb[28].mxu1 %vm676_vm0, %v1972_v6 }
  0xf9   : > { %v2173_v43 = vpop.f32.mrb[0].mxu1 }
  0xfa   : > { %v759_v62 = vpop.f32.mrb[1].mxu1 }
  0xfb   : > { %v2174_v26 = vpop.f32.mrb[2].mxu1 }
  0xfc   : > { %v762_v10 = vpop.f32.mrb[3].mxu1 }
 0x103   : > { %v2177_v17 = vpop.f32.mrb[4].mxu1 }
 0x104   : > { %v775_v33 = vpop.f32.mrb[5].mxu1 }
 0x105   : > { %v2178_v27 = vpop.f32.mrb[6].mxu1 }
 0x106   : > { %v778_v7 = vpop.f32.mrb[7].mxu1 }
 0x10b   : > { %v2181_v58 = vpop.f32.mrb[8].mxu1  ;;  %v2245_v32 = vpop.f32.mrb[0].mxu0 }
 0x10c   : > { %v791_v36 = vpop.f32.mrb[9].mxu1  ;;  %v2279_v35 = vadd.f32 %v2245_v32, %v2173_v43  ;;  %v1497_v13 = vpop.f32.mrb[1].mxu0 }
 0x10d   : > { %v2182_v31 = vpop.f32.mrb[10].mxu1  ;;  %v2280_v14 = vadd.f32 %v1497_v13, %v759_v62  ;;  %v2246_v60 = vpop.f32.mrb[2].mxu0 }
 0x10e   : > { %v794_v40 = vpop.f32.mrb[11].mxu1  ;;  %v1665_v25 = vadd.f32 %v2279_v35, %v2925_v34  ;;  %v2281_v44 = vadd.f32 %v2246_v60, %v2174_v26  ;;  %v1500_v54 = vpop.f32.mrb[3].mxu0 }
 0x10f   : > { %v1663_v12 = vadd.f32 %v2280_v14, %v2925_v34  ;;  %v2282_v21 = vadd.f32 %v1500_v54, %v762_v10 }
 0x110   : > { %v2083_v46 = vpack.c.bf16 %v1665_v25, %v1665_v25  ;;  %v1666_v22 = vadd.f32 %v2281_v44, %v2925_v34 }
 0x111   : > { %v2081_v51 = vpack.c.bf16 %v1663_v12, %v1663_v12  ;;  %v1664_v19 = vadd.f32 %v2282_v21, %v2925_v34 }
 0x112   : > { %1826 = vst.msk [vmem:[%s2932_s8 + $0x8] sm:$0xf] %vm1823_vm7, %v2083_v46  ;;  %v2084_v53 = vpack.c.bf16 %v1666_v22, %v1666_v22 }
 0x113   : > { %v2185_v55 = vpop.f32.mrb[12].mxu1  ;;  %1824 = vst.msk [vmem:[%s2932_s8] sm:$0xf] %vm1823_vm7, %v2081_v51  ;;  %v2082_v50 = vpack.c.bf16 %v1664_v19, %v1664_v19 }
 0x114   : > { %v807_v9 = vpop.f32.mrb[13].mxu1  ;;  %1827 = vst.msk [vmem:[%s2932_s8 + $0xc] sm:$0xf] %vm1823_vm7, %v2084_v53 }
 0x115   : > { %v2186_v56 = vpop.f32.mrb[14].mxu1  ;;  %1825 = vst.msk [vmem:[%s2932_s8 + $0x4] sm:$0xf] %vm1823_vm7, %v2082_v50 }
 0x116   : > { %v810_v3 = vpop.f32.mrb[15].mxu1 }
 0x117   : > { %v2249_v41 = vpop.f32.mrb[4].mxu0 }
 0x118   : > { %v2283_v52 = vadd.f32 %v2249_v41, %v2177_v17  ;;  %v1513_v59 = vpop.f32.mrb[5].mxu0 }
 0x119   : > { %v2284_v63 = vadd.f32 %v1513_v59, %v775_v33  ;;  %v2250_v61 = vpop.f32.mrb[6].mxu0 }
 0x11a   : > { %v1669_v2 = vadd.f32 %v2283_v52, %v2925_v34  ;;  %v2285_v4 = vadd.f32 %v2250_v61, %v2178_v27  ;;  %v1516_v24 = vpop.f32.mrb[7].mxu0 }
 0x11b   : > { %v1667_v42 = vadd.f32 %v2284_v63, %v2925_v34  ;;  %v2286_v5 = vadd.f32 %v1516_v24, %v778_v7 }
 0x11c   : > { %v2087_v28 = vpack.c.bf16 %v1669_v2, %v1669_v2  ;;  %v1670_v11 = vadd.f32 %v2285_v4, %v2925_v34 }
 0x11d   : > { %v2085_v39 = vpack.c.bf16 %v1667_v42, %v1667_v42  ;;  %v1668_v49 = vadd.f32 %v2286_v5, %v2925_v34 }
 0x11e   : > { %1830 = vst.msk [vmem:[%s2932_s8 + $0x18] sm:$0xf] %vm1823_vm7, %v2087_v28  ;;  %v2088_v18 = vpack.c.bf16 %v1670_v11, %v1670_v11 }
 0x11f   : > { %1828 = vst.msk [vmem:[%s2932_s8 + $0x10] sm:$0xf] %vm1823_vm7, %v2085_v39  ;;  %v2086_v8 = vpack.c.bf16 %v1668_v49, %v1668_v49 }
 0x120   : > { %1831 = vst.msk [vmem:[%s2932_s8 + $0x1c] sm:$0xf] %vm1823_vm7, %v2088_v18 }
 0x121   : > { %1829 = vst.msk [vmem:[%s2932_s8 + $0x14] sm:$0xf] %vm1823_vm7, %v2086_v8 }
 0x124   : > { %v2253_v45 = vpop.f32.mrb[8].mxu0 }
 0x125   : > { %v2287_v15 = vadd.f32 %v2253_v45, %v2181_v58  ;;  %v1529_v38 = vpop.f32.mrb[9].mxu0 }
 0x126   : > { %v2288_v16 = vadd.f32 %v1529_v38, %v791_v36  ;;  %v2254_v20 = vpop.f32.mrb[10].mxu0 }
 0x127   : > { %v1673_v48 = vadd.f32 %v2287_v15, %v2925_v34  ;;  %v2289_v23 = vadd.f32 %v2254_v20, %v2182_v31  ;;  %v1532_v30 = vpop.f32.mrb[11].mxu0 }
 0x128   : > { %v1671_v29 = vadd.f32 %v2288_v16, %v2925_v34  ;;  %v2290_v47 = vadd.f32 %v1532_v30, %v794_v40 }
 0x129   : > { %v2091_v0 = vpack.c.bf16 %v1673_v48, %v1673_v48  ;;  %v1674_v1 = vadd.f32 %v2289_v23, %v2925_v34 }
 0x12a   : > { %v2089_v57 = vpack.c.bf16 %v1671_v29, %v1671_v29  ;;  %v1672_v37 = vadd.f32 %v2290_v47, %v2925_v34 }
 0x12b   : > { %1834 = vst.msk [vmem:[%s2932_s8 + $0x28] sm:$0xf] %vm1823_vm7, %v2091_v0  ;;  %v2092_v6 = vpack.c.bf16 %v1674_v1, %v1674_v1 }
 0x12c   : > { %1832 = vst.msk [vmem:[%s2932_s8 + $0x20] sm:$0xf] %vm1823_vm7, %v2089_v57  ;;  %v2090_v43 = vpack.c.bf16 %v1672_v37, %v1672_v37 }
 0x12d   : > { %1835 = vst.msk [vmem:[%s2932_s8 + $0x2c] sm:$0xf] %vm1823_vm7, %v2092_v6 }
 0x12e   : > { %1833 = vst.msk [vmem:[%s2932_s8 + $0x24] sm:$0xf] %vm1823_vm7, %v2090_v43 }
 0x130   : > { %v2257_v62 = vpop.f32.mrb[12].mxu0 }
 0x131   : > { %v2291_v26 = vadd.f32 %v2257_v62, %v2185_v55  ;;  %v1545_v10 = vpop.f32.mrb[13].mxu0 }
 0x132   : > { %v2292_v17 = vadd.f32 %v1545_v10, %v807_v9  ;;  %v2258_v33 = vpop.f32.mrb[14].mxu0 }
 0x133   : > { %v1677_v27 = vadd.f32 %v2291_v26, %v2925_v34  ;;  %v2293_v7 = vadd.f32 %v2258_v33, %v2186_v56  ;;  %v1548_v58 = vpop.f32.mrb[15].mxu0 }
 0x134   : > { %v1675_v32 = vadd.f32 %v2292_v17, %v2925_v34  ;;  %v2294_v36 = vadd.f32 %v1548_v58, %v810_v3 }
 0x135   : > { %v2095_v35 = vpack.c.bf16 %v1677_v27, %v1677_v27  ;;  %v1678_v13 = vadd.f32 %v2293_v7, %v2925_v34 }
 0x136   : > { %v2093_v31 = vpack.c.bf16 %v1675_v32, %v1675_v32  ;;  %v1676_v14 = vadd.f32 %v2294_v36, %v2925_v34 }
 0x137   : > { %1838 = vst.msk [vmem:[%s2932_s8 + $0x38] sm:$0xf] %vm1823_vm7, %v2095_v35  ;;  %v2096_v60 = vpack.c.bf16 %v1678_v13, %v1678_v13 }
 0x138   : > { %1836 = vst.msk [vmem:[%s2932_s8 + $0x30] sm:$0xf] %vm1823_vm7, %v2093_v31  ;;  %v2094_v40 = vpack.c.bf16 %v1676_v14, %v1676_v14 }
 0x139   : > { %1839 = vst.msk [vmem:[%s2932_s8 + $0x3c] sm:$0xf] %vm1823_vm7, %v2096_v60 }
 0x13a   : > { %1837 = vst.msk [vmem:[%s2932_s8 + $0x34] sm:$0xf] %vm1823_vm7, %v2094_v40 }
 0x140   : > { %v2261_v25 = vpop.f32.mrb[16].mxu0 }
 0x141   : > { %v1561_v44 = vpop.f32.mrb[17].mxu0 }
 0x142   : > { %v2262_v54 = vpop.f32.mrb[18].mxu0 }
 0x143   : > { %v1564_v12 = vpop.f32.mrb[19].mxu0 }
 0x147   : > { %v2225_v21 = vpop.f32.mrb[16].mxu1 }
 0x148   : > { %v2295_v46 = vadd.f32 %v2261_v25, %v2225_v21  ;;  %v1124_v22 = vpop.f32.mrb[17].mxu1  ;;  %v2265_v51 = vpop.f32.mrb[20].mxu0 }
 0x149   : > { %v2296_v19 = vadd.f32 %v1561_v44, %v1124_v22  ;;  %v2226_v53 = vpop.f32.mrb[18].mxu1  ;;  %v1577_v55 = vpop.f32.mrb[21].mxu0 }
 0x14a   : > { %v1681_v50 = vadd.f32 %v2295_v46, %v2925_v34  ;;  %v2297_v9 = vadd.f32 %v2262_v54, %v2226_v53  ;;  %v1127_v56 = vpop.f32.mrb[19].mxu1  ;;  %v2266_v3 = vpop.f32.mrb[22].mxu0 }
 0x14b   : > { %v1679_v41 = vadd.f32 %v2296_v19, %v2925_v34  ;;  %v2298_v52 = vadd.f32 %v1564_v12, %v1127_v56  ;;  %v1580_v59 = vpop.f32.mrb[23].mxu0 }
 0x14c   : > { %v2099_v63 = vpack.c.bf16 %v1681_v50, %v1681_v50  ;;  %v1682_v61 = vadd.f32 %v2297_v9, %v2925_v34 }
 0x14d   : > { %v2097_v2 = vpack.c.bf16 %v1679_v41, %v1679_v41  ;;  %v1680_v4 = vadd.f32 %v2298_v52, %v2925_v34 }
 0x14e   : > { %1842 = vst.msk [vmem:[%s2932_s8 + $0x48] sm:$0xf] %vm1823_vm7, %v2099_v63  ;;  %v2100_v24 = vpack.c.bf16 %v1682_v61, %v1682_v61 }
 0x14f   : > { %1840 = vst.msk [vmem:[%s2932_s8 + $0x40] sm:$0xf] %vm1823_vm7, %v2097_v2  ;;  %v2098_v42 = vpack.c.bf16 %v1680_v4, %v1680_v4  ;;  %v2229_v5 = vpop.f32.mrb[20].mxu1 }
 0x150   : > { %1843 = vst.msk [vmem:[%s2932_s8 + $0x4c] sm:$0xf] %vm1823_vm7, %v2100_v24  ;;  %v2299_v28 = vadd.f32 %v2265_v51, %v2229_v5  ;;  %v1140_v11 = vpop.f32.mrb[21].mxu1  ;;  %v2269_v39 = vpop.f32.mrb[24].mxu0 }
 0x151   : > { %1841 = vst.msk [vmem:[%s2932_s8 + $0x44] sm:$0xf] %vm1823_vm7, %v2098_v42  ;;  %v2300_v49 = vadd.f32 %v1577_v55, %v1140_v11  ;;  %v2230_v18 = vpop.f32.mrb[22].mxu1  ;;  %v1593_v8 = vpop.f32.mrb[25].mxu0 }
 0x152   : > { %v1685_v45 = vadd.f32 %v2299_v28, %v2925_v34  ;;  %v2301_v15 = vadd.f32 %v2266_v3, %v2230_v18  ;;  %v1143_v38 = vpop.f32.mrb[23].mxu1  ;;  %v2270_v16 = vpop.f32.mrb[26].mxu0 }
 0x153   : > { %v1683_v20 = vadd.f32 %v2300_v49, %v2925_v34  ;;  %v2302_v48 = vadd.f32 %v1580_v59, %v1143_v38  ;;  %v1596_v23 = vpop.f32.mrb[27].mxu0 }
 0x154   : > { %v2103_v30 = vpack.c.bf16 %v1685_v45, %v1685_v45  ;;  %v1686_v29 = vadd.f32 %v2301_v15, %v2925_v34 }
 0x155   : > { %v2101_v47 = vpack.c.bf16 %v1683_v20, %v1683_v20  ;;  %v1684_v0 = vadd.f32 %v2302_v48, %v2925_v34 }
 0x156   : > { %1846 = vst.msk [vmem:[%s2932_s8 + $0x58] sm:$0xf] %vm1823_vm7, %v2103_v30  ;;  %v2104_v1 = vpack.c.bf16 %v1686_v29, %v1686_v29 }
 0x157   : > { %1844 = vst.msk [vmem:[%s2932_s8 + $0x50] sm:$0xf] %vm1823_vm7, %v2101_v47  ;;  %v2102_v57 = vpack.c.bf16 %v1684_v0, %v1684_v0  ;;  %v2233_v37 = vpop.f32.mrb[24].mxu1 }
 0x158   : > { %1847 = vst.msk [vmem:[%s2932_s8 + $0x5c] sm:$0xf] %vm1823_vm7, %v2104_v1  ;;  %v2303_v6 = vadd.f32 %v2269_v39, %v2233_v37  ;;  %v1156_v43 = vpop.f32.mrb[25].mxu1  ;;  %v2273_v62 = vpop.f32.mrb[28].mxu0 }
 0x159   : > { %1845 = vst.msk [vmem:[%s2932_s8 + $0x54] sm:$0xf] %vm1823_vm7, %v2102_v57  ;;  %v2304_v26 = vadd.f32 %v1593_v8, %v1156_v43  ;;  %v2234_v10 = vpop.f32.mrb[26].mxu1  ;;  %v1609_v17 = vpop.f32.mrb[29].mxu0 }
 0x15a   : > { %v1689_v33 = vadd.f32 %v2303_v6, %v2925_v34  ;;  %v2305_v27 = vadd.f32 %v2270_v16, %v2234_v10  ;;  %v1159_v7 = vpop.f32.mrb[27].mxu1  ;;  %v2274_v58 = vpop.f32.mrb[30].mxu0 }
 0x15b   : > { %v1687_v32 = vadd.f32 %v2304_v26, %v2925_v34  ;;  %v2306_v36 = vadd.f32 %v1596_v23, %v1159_v7  ;;  %v1612_v35 = vpop.f32.mrb[31].mxu0 }
 0x15c   : > { %v2107_v13 = vpack.c.bf16 %v1689_v33, %v1689_v33  ;;  %v1690_v31 = vadd.f32 %v2305_v27, %v2925_v34 }
 0x15d   : > { %v2105_v14 = vpack.c.bf16 %v1687_v32, %v1687_v32  ;;  %v1688_v60 = vadd.f32 %v2306_v36, %v2925_v34 }
 0x15e   : > { %1850 = vst.msk [vmem:[%s2932_s8 + $0x68] sm:$0xf] %vm1823_vm7, %v2107_v13  ;;  %v2108_v40 = vpack.c.bf16 %v1690_v31, %v1690_v31 }
 0x15f   : > { %1848 = vst.msk [vmem:[%s2932_s8 + $0x60] sm:$0xf] %vm1823_vm7, %v2105_v14  ;;  %v2106_v25 = vpack.c.bf16 %v1688_v60, %v1688_v60  ;;  %v2237_v44 = vpop.f32.mrb[28].mxu1 }
 0x160   : > { %1851 = vst.msk [vmem:[%s2932_s8 + $0x6c] sm:$0xf] %vm1823_vm7, %v2108_v40  ;;  %v2307_v54 = vadd.f32 %v2273_v62, %v2237_v44  ;;  %v1172_v12 = vpop.f32.mrb[29].mxu1 }
 0x161   : > { %1849 = vst.msk [vmem:[%s2932_s8 + $0x64] sm:$0xf] %vm1823_vm7, %v2106_v25  ;;  %v2308_v21 = vadd.f32 %v1609_v17, %v1172_v12  ;;  %v2238_v46 = vpop.f32.mrb[30].mxu1 }
 0x162   : > { %v1693_v22 = vadd.f32 %v2307_v54, %v2925_v34  ;;  %v2309_v51 = vadd.f32 %v2274_v58, %v2238_v46  ;;  %v1175_v19 = vpop.f32.mrb[31].mxu1 }
 0x163   : > { %v1691_v53 = vadd.f32 %v2308_v21, %v2925_v34  ;;  %v2310_v55 = vadd.f32 %v1612_v35, %v1175_v19 }
 0x164   : > { %v2111_v50 = vpack.c.bf16 %v1693_v22, %v1693_v22  ;;  %v1694_v9 = vadd.f32 %v2309_v51, %v2925_v34 }
 0x165   : > { %v2109_v56 = vpack.c.bf16 %v1691_v53, %v1691_v53  ;;  %v1692_v3 = vadd.f32 %v2310_v55, %v2925_v34 }
 0x166   : > { %1854 = vst.msk [vmem:[%s2932_s8 + $0x78] sm:$0xf] %vm1823_vm7, %v2111_v50  ;;  %v2112_v41 = vpack.c.bf16 %v1694_v9, %v1694_v9 }
 0x167   : > { %1852 = vst.msk [vmem:[%s2932_s8 + $0x70] sm:$0xf] %vm1823_vm7, %v2109_v56  ;;  %v2110_v52 = vpack.c.bf16 %v1692_v3, %v1692_v3 }
 0x168   : > { %1855 = vst.msk [vmem:[%s2932_s8 + $0x7c] sm:$0xf] %vm1823_vm7, %v2112_v41 }
 0x169   : > { %1853 = vst.msk [vmem:[%s2932_s8 + $0x74] sm:$0xf] %vm1823_vm7, %v2110_v52 }
 0x16a PF: > { %s13_s12 = sadd.s32 1, %s2380_s12  }
 0x16b   : > { %p10_p4 = scmp.ge.s32.totalorder %s13_s12, 4  }
 0x16d   :  { %12 = sbr.rel (!%p10_p4) target bundleno = 1 (0x1), region = 64 }

// kernel: _lambda_.9
= control target key start
LH: loop header
LB: loop body
LE: loop exit
PB: predicated region body
PF: predicated region fallthrough
CT: control target
= control target key end

     0   :  { %s1051_s12 = smov 0   ;;  %s1170_s0 = inlined_call_operand.vmem [shape: bf16[2,16,16,32], index: 0, kind: input, shape index: {}]   ;;  %s1171_s1 = inlined_call_operand.vmem [shape: bf16[1,32,128], index: 1, kind: input, shape index: {}]   ;;  %s1172_s2 = inlined_call_operand.vmem [shape: f32[1,128], index: 2, kind: input, shape index: {}]   ;;  %s1173_s3 = inlined_call_operand.vmem [shape: bf16[2,256,128], index: 3, kind: output, shape index: {}]  }
   0x1 LB: > { %s732_s13 = sadd.s32 4294967295, %s1029_s12   ;;  %p736_p0 = scmp.ge.s32.totalorder %s1029_s12, 1  ;;  %s1029_s12 = sphi %s1051_s12, %s13_s12  }
   0x2   : > { %p137_p1 = scmp.lt.s32.totalorder %s1029_s12, 3 }
   0x4   : > { %p138_p2 = pnand %p736_p0, %p137_p1 }
   0x5   : > { %v1005_v0 = vld [vmem:[%s1171_s1] sm:$0xff] (!%p138_p2)   ;;  %p161_p3 = scmp.lt.s32.totalorder (!%p138_p2), %s732_s13, 1  ;;  %v1006_v1 = vld [vmem:[%s1171_s1 + $0x8] sm:$0xff] (!%p138_p2)   ;;  %vm307_vm0 = vcmask (!%p138_p2), 261120  }
   0x6   : > { %141 = sbr.rel (%p138_p2) target bundleno = 263 (0x107), region = 32  ;;  %957 = vmatprep.subr.bf16.mxu0 (!%p138_p2), %v1005_v0  ;;  %993 = vmatprep.subr.bf16.mxu1 (!%p138_p2), %v1005_v0  ;;  %v1110_v19 = vld [vmem:[%s1172_s2] ss:$0 sm:$0xff] (!%p138_p2) }
   0x7   : > { %958 = vmatpush3.bf16.msra.mxu0 (!%p138_p2), %v1005_v0  ;;  %995 = vmatpush3.bf16.msra.mxu1 (!%p138_p2), %v1005_v0 }
   0x8   : > { %959 = vmatprep.subr.bf16.mxu0 (!%p138_p2), %v1006_v1  ;;  %994 = vmatprep.subr.bf16.mxu1 (!%p138_p2), %v1006_v1 }
   0xb   : > { %960 = vmatpush3.bf16.msra.mxu0 (!%p138_p2), %v1006_v1  ;;  %996 = vmatpush3.bf16.msra.mxu1 (!%p138_p2), %v1006_v1 }
   0xd   : > { %s1175_s13 = smov (!%p161_p3, %s732_s13), 1 }
   0xe   : > { %s810_s18 = sshll.u32 %s1175_s13, 7 }
   0xf   : > { %s1073_s21 = scalar_lea.vmem %s1170_s0, %s810_s18  ;;  %s1121_s26 = scalar_lea.vmem %s1173_s3, %s810_s18 }
  0x10   : > { %v1007_v2 = vld [vmem:[%s1073_s21] sm:$0xff]   ;;  %v1009_v4 = vld [vmem:[%s1073_s21 + $0x8] sm:$0xff]   ;;  %v1011_v6 = vld [vmem:[%s1073_s21 + $0x10] sm:$0xff]  }
  0x11   : > { %v1008_v3 = vld [vmem:[%s1073_s21 + $0x40] sm:$0xff]   ;;  %961 = vmatprep.mubr.msk.bf16.mxu0 %vm307_vm0, %v1007_v2  ;;  %v1010_v5 = vld [vmem:[%s1073_s21 + $0x48] sm:$0xff]   ;;  %v1012_v7 = vld [vmem:[%s1073_s21 + $0x50] sm:$0xff]  }
  0x12   : > { %977 = vmatprep.mubr.msk.bf16.mxu1 %vm307_vm0, %v1008_v3  ;;  %962 = vmatmul.mubr.msk.bf16.vlgmr.msra.gmra.mrb[0].mxu0 %vm307_vm0, %v1009_v4  ;;  %v1013_v8 = vld [vmem:[%s1073_s21 + $0x18] sm:$0xff]   ;;  %v1015_v10 = vld [vmem:[%s1073_s21 + $0x20] sm:$0xff]   ;;  %v1017_v12 = vld [vmem:[%s1073_s21 + $0x28] sm:$0xff]  }
  0x13   : > { %978 = vmatmul.mubr.msk.bf16.vlgmr.msra.gmra.mrb[0].mxu1 %vm307_vm0, %v1010_v5  ;;  %965 = vmatprep.mubr.msk.bf16.mxu0 %vm307_vm0, %v1011_v6  ;;  %v1014_v9 = vld [vmem:[%s1073_s21 + $0x58] sm:$0xff]   ;;  %v1016_v11 = vld [vmem:[%s1073_s21 + $0x60] sm:$0xff]   ;;  %v1018_v13 = vld [vmem:[%s1073_s21 + $0x68] sm:$0xff]  }
  0x14   : > { %981 = vmatprep.mubr.msk.bf16.mxu1 %vm307_vm0, %v1012_v7  ;;  %v1019_v14 = vld [vmem:[%s1073_s21 + $0x30] sm:$0xff]   ;;  %v1021_v16 = vld [vmem:[%s1073_s21 + $0x38] sm:$0xff]  }
  0x15   : > { %v1020_v15 = vld [vmem:[%s1073_s21 + $0x70] sm:$0xff]   ;;  %v1022_v17 = vld [vmem:[%s1073_s21 + $0x78] sm:$0xff]  }
  0x1a   : > { %966 = vmatmul.mubr.msk.bf16.gmra.mrb[4].mxu0 %vm307_vm0, %v1013_v8 }
  0x1b   : > { %982 = vmatmul.mubr.msk.bf16.gmra.mrb[4].mxu1 %vm307_vm0, %v1014_v9  ;;  %969 = vmatprep.mubr.msk.bf16.mxu0 %vm307_vm0, %v1015_v10 }
  0x1c   : > { %985 = vmatprep.mubr.msk.bf16.mxu1 %vm307_vm0, %v1016_v11 }
  0x22   : > { %970 = vmatmul.mubr.msk.bf16.gmra.mrb[8].mxu0 %vm307_vm0, %v1017_v12 }
  0x23   : > { %986 = vmatmul.mubr.msk.bf16.gmra.mrb[8].mxu1 %vm307_vm0, %v1018_v13  ;;  %973 = vmatprep.mubr.msk.bf16.mxu0 %vm307_vm0, %v1019_v14 }
  0x24   : > { %989 = vmatprep.mubr.msk.bf16.mxu1 %vm307_vm0, %v1020_v15 }
  0x2a   : > { %974 = vmatmul.mubr.msk.bf16.gmra.mrb[12].mxu0 %vm307_vm0, %v1021_v16 }
  0x2b   : > { %990 = vmatmul.mubr.msk.bf16.gmra.mrb[12].mxu1 %vm307_vm0, %v1022_v17 }
  0xe5   : > { %v963_v18 = vpop.f32.mrb[0].mxu0 }
  0xe6   : > { %v979_v20 = vpop.f32.mrb[0].mxu1  ;;  %v390_v21 = vpop.f32.mrb[1].mxu0  ;;  %v399_v24 = vadd.f32 %v963_v18, %v1110_v19 }
  0xe7   : > { %v454_v22 = vpop.f32.mrb[1].mxu1  ;;  %v964_v23 = vpop.f32.mrb[2].mxu0  ;;  %v463_v28 = vadd.f32 %v979_v20, %v1110_v19  ;;  %v391_v29 = vadd.f32 %v1110_v19, %v390_v21 }
  0xe8   : > { %v402_v25 = vadd.f32 %v964_v23, %v1110_v19  ;;  %v980_v26 = vpop.f32.mrb[2].mxu1  ;;  %v393_v27 = vpop.f32.mrb[3].mxu0  ;;  %v455_v33 = vadd.f32 %v1110_v19, %v454_v22 }
  0xe9   : > { %v466_v30 = vadd.f32 %v980_v26, %v1110_v19  ;;  %v394_v31 = vadd.f32 %v1110_v19, %v393_v27  ;;  %v457_v32 = vpop.f32.mrb[3].mxu1 }
  0xea   : > { %v852_v34 = vpack.c.bf16 %v402_v25, %v399_v24  ;;  %v458_v35 = vadd.f32 %v1110_v19, %v457_v32 }
  0xeb   : > { %v892_v36 = vpack.c.bf16 %v466_v30, %v463_v28  ;;  %v847_v37 = vpack.c.bf16 %v394_v31, %v391_v29 }
  0xec   : > { %924 = vst [vmem:[%s1121_s26 + $0x8] sm:$0xff] %v852_v34   ;;  %v887_v38 = vpack.c.bf16 %v458_v35, %v455_v33 }
  0xed   : > { %932 = vst [vmem:[%s1121_s26 + $0x48] sm:$0xff] %v892_v36   ;;  %848 = vst [vmem:[%s1121_s26] sm:$0xff] %v847_v37   ;;  %v967_v39 = vpop.f32.mrb[4].mxu0 }
  0xee   : > { %931 = vst [vmem:[%s1121_s26 + $0x40] sm:$0xff] %v887_v38   ;;  %v983_v40 = vpop.f32.mrb[4].mxu1  ;;  %v406_v41 = vpop.f32.mrb[5].mxu0  ;;  %v415_v44 = vadd.f32 %v967_v39, %v1110_v19 }
  0xef   : > { %v470_v42 = vpop.f32.mrb[5].mxu1  ;;  %v968_v43 = vpop.f32.mrb[6].mxu0  ;;  %v479_v48 = vadd.f32 %v983_v40, %v1110_v19  ;;  %v407_v49 = vadd.f32 %v1110_v19, %v406_v41 }
  0xf0   : > { %v418_v45 = vadd.f32 %v968_v43, %v1110_v19  ;;  %v984_v46 = vpop.f32.mrb[6].mxu1  ;;  %v409_v47 = vpop.f32.mrb[7].mxu0  ;;  %v471_v53 = vadd.f32 %v1110_v19, %v470_v42 }
  0xf1   : > { %v482_v50 = vadd.f32 %v984_v46, %v1110_v19  ;;  %v410_v51 = vadd.f32 %v1110_v19, %v409_v47  ;;  %v473_v52 = vpop.f32.mrb[7].mxu1 }
  0xf2   : > { %v862_v54 = vpack.c.bf16 %v418_v45, %v415_v44  ;;  %v474_v55 = vadd.f32 %v1110_v19, %v473_v52 }
  0xf3   : > { %v902_v56 = vpack.c.bf16 %v482_v50, %v479_v48  ;;  %v857_v57 = vpack.c.bf16 %v410_v51, %v407_v49 }
  0xf4   : > { %926 = vst [vmem:[%s1121_s26 + $0x18] sm:$0xff] %v862_v54   ;;  %v897_v58 = vpack.c.bf16 %v474_v55, %v471_v53 }
  0xf5   : > { %934 = vst [vmem:[%s1121_s26 + $0x58] sm:$0xff] %v902_v56   ;;  %925 = vst [vmem:[%s1121_s26 + $0x10] sm:$0xff] %v857_v57   ;;  %v971_v59 = vpop.f32.mrb[8].mxu0 }
  0xf6   : > { %933 = vst [vmem:[%s1121_s26 + $0x50] sm:$0xff] %v897_v58   ;;  %v987_v60 = vpop.f32.mrb[8].mxu1  ;;  %v422_v61 = vpop.f32.mrb[9].mxu0  ;;  %v431_v0 = vadd.f32 %v971_v59, %v1110_v19 }
  0xf7   : > { %v486_v62 = vpop.f32.mrb[9].mxu1  ;;  %v972_v63 = vpop.f32.mrb[10].mxu0  ;;  %v495_v4 = vadd.f32 %v987_v60, %v1110_v19  ;;  %v423_v5 = vadd.f32 %v1110_v19, %v422_v61 }
  0xf8   : > { %v434_v1 = vadd.f32 %v972_v63, %v1110_v19  ;;  %v988_v2 = vpop.f32.mrb[10].mxu1  ;;  %v425_v3 = vpop.f32.mrb[11].mxu0  ;;  %v487_v9 = vadd.f32 %v1110_v19, %v486_v62 }
  0xf9   : > { %v498_v6 = vadd.f32 %v988_v2, %v1110_v19  ;;  %v426_v7 = vadd.f32 %v1110_v19, %v425_v3  ;;  %v489_v8 = vpop.f32.mrb[11].mxu1 }
  0xfa   : > { %v872_v10 = vpack.c.bf16 %v434_v1, %v431_v0  ;;  %v490_v11 = vadd.f32 %v1110_v19, %v489_v8 }
  0xfb   : > { %v912_v12 = vpack.c.bf16 %v498_v6, %v495_v4  ;;  %v867_v13 = vpack.c.bf16 %v426_v7, %v423_v5 }
  0xfc   : > { %928 = vst [vmem:[%s1121_s26 + $0x28] sm:$0xff] %v872_v10   ;;  %v907_v14 = vpack.c.bf16 %v490_v11, %v487_v9 }
  0xfd   : > { %936 = vst [vmem:[%s1121_s26 + $0x68] sm:$0xff] %v912_v12   ;;  %927 = vst [vmem:[%s1121_s26 + $0x20] sm:$0xff] %v867_v13   ;;  %v975_v15 = vpop.f32.mrb[12].mxu0 }
  0xfe   : > { %935 = vst [vmem:[%s1121_s26 + $0x60] sm:$0xff] %v907_v14   ;;  %v991_v16 = vpop.f32.mrb[12].mxu1  ;;  %v438_v17 = vpop.f32.mrb[13].mxu0  ;;  %v447_v21 = vadd.f32 %v975_v15, %v1110_v19 }
  0xff   : > { %v502_v18 = vpop.f32.mrb[13].mxu1  ;;  %v976_v20 = vpop.f32.mrb[14].mxu0  ;;  %v511_v25 = vadd.f32 %v991_v16, %v1110_v19  ;;  %v439_v26 = vadd.f32 %v1110_v19, %v438_v17 }
 0x100   : > { %v450_v22 = vadd.f32 %v976_v20, %v1110_v19  ;;  %v992_v23 = vpop.f32.mrb[14].mxu1  ;;  %v441_v24 = vpop.f32.mrb[15].mxu0  ;;  %v503_v30 = vadd.f32 %v1110_v19, %v502_v18 }
 0x101   : > { %v514_v27 = vadd.f32 %v992_v23, %v1110_v19  ;;  %v442_v28 = vadd.f32 %v1110_v19, %v441_v24  ;;  %v505_v29 = vpop.f32.mrb[15].mxu1 }
 0x102   : > { %v882_v31 = vpack.c.bf16 %v450_v22, %v447_v21  ;;  %v506_v32 = vadd.f32 %v1110_v19, %v505_v29 }
 0x103   : > { %v922_v33 = vpack.c.bf16 %v514_v27, %v511_v25  ;;  %v877_v34 = vpack.c.bf16 %v442_v28, %v439_v26 }
 0x104   : > { %930 = vst [vmem:[%s1121_s26 + $0x38] sm:$0xff] %v882_v31   ;;  %v917_v35 = vpack.c.bf16 %v506_v32, %v503_v30 }
 0x105   : > { %938 = vst [vmem:[%s1121_s26 + $0x78] sm:$0xff] %v922_v33   ;;  %929 = vst [vmem:[%s1121_s26 + $0x30] sm:$0xff] %v877_v34  }
 0x106   : > { %937 = vst [vmem:[%s1121_s26 + $0x70] sm:$0xff] %v917_v35  }
 0x107 PF: > { %s13_s12 = sadd.s32 1, %s1029_s12  }
 0x108   : > { %p10_p4 = scmp.ge.s32.totalorder %s13_s12, 4  }
 0x10a   :  { %12 = sbr.rel (!%p10_p4) target bundleno = 1 (0x1), region = 62 }

// kernel: _lambda_.8
= control target key start
LH: loop header
LB: loop body
LE: loop exit
PB: predicated region body
PF: predicated region fallthrough
CT: control target
= control target key end

     0   :  { %s2046_s12 = smov 0   ;;  %s2298_s0 = inlined_call_operand.vmem [shape: bf16[2,18,16,32], index: 0, kind: input, shape index: {}]   ;;  %s2299_s1 = inlined_call_operand.vmem [shape: bf16[3,32,32], index: 1, kind: input, shape index: {}]   ;;  %s2300_s2 = inlined_call_operand.vmem [shape: f32[1,32], index: 2, kind: input, shape index: {}]   ;;  %s2301_s3 = inlined_call_operand.vmem [shape: bf16[2,256,32], index: 3, kind: output, shape index: {}]  }
   0x1 LB: > { %s1475_s13 = sadd.s32 4294967295, %s2024_s12   ;;  %p1479_p0 = scmp.ge.s32.totalorder %s2024_s12, 1  ;;  %s2024_s12 = sphi %s2046_s12, %s13_s12  }
   0x2   : > { %p137_p1 = scmp.lt.s32.totalorder %s2024_s12, 3 }
   0x4   : > { %p138_p2 = pnand %p1479_p0, %p137_p1 }
   0x5   : > { %v1964_v0 = vld [vmem:[%s2299_s1 + $0x10] sm:$0xff] (!%p138_p2)   ;;  %p161_p3 = scmp.lt.s32.totalorder (!%p138_p2), %s1475_s13, 1  ;;  %v1965_v1 = vld [vmem:[%s2299_s1] sm:$0xff] (!%p138_p2)   ;;  %v1966_v2 = vld [vmem:[%s2299_s1 + $0x18] sm:$0xff] (!%p138_p2)   ;;  %vm338_vm0 = vcmask (!%p138_p2), 261120   ;;  %vm1387_vm1 = vcmask (!%p138_p2), 257024  }
   0x6   : > { %141 = sbr.rel (%p138_p2) target bundleno = 329 (0x149), region = 32  ;;  %1779 = vmatprep.subr.bf16.mxu1 (!%p138_p2), %v1964_v0  ;;  %1815 = vmatprep.subr.bf16.mxu0 (!%p138_p2), %v1965_v1  ;;  %v1967_v3 = vld [vmem:[%s2299_s1 + $0x8] sm:$0xff] (!%p138_p2)   ;;  %v1972_v4 = vld [vmem:[%s2299_s1 + $0x20] sm:$0xff] (!%p138_p2)  }
   0x7   : > { %1780 = vmatpush3.bf16.msra.mxu1 (!%p138_p2), %v1964_v0  ;;  %1816 = vmatpush3.bf16.msra.mxu0 (!%p138_p2), %v1965_v1  ;;  %v1981_v7 = vld [vmem:[%s2299_s1 + $0x28] sm:$0xff] (!%p138_p2)  }
   0x8   : > { %1781 = vmatprep.subr.bf16.mxu1 (!%p138_p2), %v1966_v2  ;;  %1817 = vmatprep.subr.bf16.mxu0 (!%p138_p2), %v1967_v3 }
   0xb   : > { %1782 = vmatpush3.bf16.msra.mxu1 (!%p138_p2), %v1966_v2  ;;  %1818 = vmatpush3.bf16.msra.mxu0 (!%p138_p2), %v1967_v3 }
   0xc   : > { %1887 = vmatprep.subr.bf16.mxu1 (!%p138_p2), %v1965_v1  ;;  %1851 = vmatprep.subr.bf16.mxu0 (!%p138_p2), %v1972_v4 }
   0xd   : > { %s2303_s13 = smov (!%p161_p3, %s1475_s13), 1 }
   0xe   : > { %s1955_s22 = smul.u32 144, %s2303_s13  ;;  %s1692_s5 = sshll.u32 %s2303_s13, 7 }
   0xf   : > { %s2194_s8 = scalar_lea.vmem %s2301_s3, %s1692_s5 }
  0x10   : > { %s2075_s27 = scalar_lea.vmem %s2298_s0, %s1955_s22 }
  0x11   : > { %v1968_v5 = vld [vmem:[%s2075_s27 + $0x8] sm:$0xff]   ;;  %v1969_v6 = vld [vmem:[%s2075_s27] sm:$0xff]   ;;  %v1970_v8 = vld [vmem:[%s2075_s27 + $0x10] sm:$0xff]  }
  0x12   : > { %1783 = vmatprep.mubr.msk.bf16.mxu1 %vm338_vm0, %v1968_v5  ;;  %1819 = vmatprep.mubr.msk.bf16.mxu0 %vm338_vm0, %v1969_v6  ;;  %v1971_v9 = vld [vmem:[%s2075_s27 + $0x8] sm:$0xff]   ;;  %v1973_v10 = vld [vmem:[%s2075_s27 + $0x18] sm:$0xff]   ;;  %v1974_v11 = vld [vmem:[%s2075_s27 + $0x10] sm:$0xff]  }
  0x13   : > { %1784 = vmatmul.mubr.msk.bf16.vlgmr.msra.gmra.mrb[0].mxu1 %vm338_vm0, %v1970_v8  ;;  %1820 = vmatmul.mubr.msk.bf16.vlgmr.msra.gmra.mrb[0].mxu0 %vm338_vm0, %v1971_v9  ;;  %v1975_v12 = vld [vmem:[%s2075_s27 + $0x20] sm:$0xff]   ;;  %v1976_v13 = vld [vmem:[%s2075_s27 + $0x18] sm:$0xff]   ;;  %v1977_v14 = vld [vmem:[%s2075_s27 + $0x28] sm:$0xff]  }
  0x14   : > { %1889 = vmatpush3.bf16.msra.mxu1 %v1965_v1  ;;  %1852 = vmatpush3.bf16.msra.mxu0 %v1972_v4  ;;  %v1978_v15 = vld [vmem:[%s2075_s27 + $0x20] sm:$0xff]   ;;  %v1979_v16 = vld [vmem:[%s2075_s27 + $0x30] sm:$0xff]   ;;  %v1980_v17 = vld [vmem:[%s2075_s27 + $0x28] sm:$0xff]  }
  0x15   : > { %1787 = vmatprep.mubr.msk.bf16.mxu1 %vm338_vm0, %v1973_v10  ;;  %1823 = vmatprep.mubr.msk.bf16.mxu0 %vm338_vm0, %v1974_v11  ;;  %v1982_v18 = vld [vmem:[%s2075_s27 + $0x38] sm:$0xff]   ;;  %v1983_v19 = vld [vmem:[%s2075_s27 + $0x30] sm:$0xff]   ;;  %v1984_v20 = vld [vmem:[%s2075_s27 + $0x40] sm:$0xff]  }
  0x16   : > { %1853 = vmatprep.subr.bf16.mxu0 %v1981_v7  ;;  %1888 = vmatprep.subr.bf16.mxu1 %v1967_v3  ;;  %v1985_v21 = vld [vmem:[%s2075_s27 + $0x38] sm:$0xff]   ;;  %v1986_v22 = vld [vmem:[%s2075_s27 + $0x48] sm:$0xff]   ;;  %v1987_v23 = vld [vmem:[%s2075_s27 + $0x10] sm:$0xff]  }
  0x17   : > { %v1988_v24 = vld [vmem:[%s2075_s27 + $0x50] sm:$0xff]   ;;  %v1989_v25 = vld [vmem:[%s2075_s27 + $0x18] sm:$0xff]   ;;  %v1991_v27 = vld [vmem:[%s2075_s27 + $0x20] sm:$0xff]  }
  0x18   : > { %1890 = vmatpush3.bf16.msra.mxu1 %v1967_v3  ;;  %1854 = vmatpush3.bf16.msra.mxu0 %v1981_v7  ;;  %v1990_v26 = vld [vmem:[%s2075_s27 + $0x58] sm:$0xff]   ;;  %v1992_v28 = vld [vmem:[%s2075_s27 + $0x60] sm:$0xff]   ;;  %v1993_v29 = vld [vmem:[%s2075_s27 + $0x28] sm:$0xff]  }
  0x19   : > { %v1994_v30 = vld [vmem:[%s2075_s27 + $0x68] sm:$0xff]   ;;  %v1995_v31 = vld [vmem:[%s2075_s27 + $0x30] sm:$0xff]   ;;  %v1997_v33 = vld [vmem:[%s2075_s27 + $0x38] sm:$0xff]  }
  0x1a   : > { %v1996_v32 = vld [vmem:[%s2075_s27 + $0x70] sm:$0xff]   ;;  %v1998_v34 = vld [vmem:[%s2075_s27 + $0x78] sm:$0xff]   ;;  %v1999_v35 = vld [vmem:[%s2075_s27 + $0x40] sm:$0xff]  }
  0x1b   : > { %1788 = vmatmul.mubr.msk.bf16.gmra.mrb[4].mxu1 %vm338_vm0, %v1975_v12  ;;  %1824 = vmatmul.mubr.msk.bf16.gmra.mrb[4].mxu0 %vm338_vm0, %v1976_v13  ;;  %v2000_v36 = vld [vmem:[%s2075_s27 + $0x80] sm:$0xff]   ;;  %v2001_v37 = vld [vmem:[%s2075_s27 + $0x48] sm:$0xff]   ;;  %v2003_v39 = vld [vmem:[%s2075_s27 + $0x50] sm:$0xff]  }
  0x1c   : > { %1791 = vmatprep.mubr.msk.bf16.mxu1 %vm338_vm0, %v1977_v14  ;;  %1827 = vmatprep.mubr.msk.bf16.mxu0 %vm338_vm0, %v1978_v15  ;;  %v2002_v38 = vld [vmem:[%s2075_s27 + $0x40] sm:$0xff]   ;;  %v2004_v40 = vld [vmem:[%s2075_s27 + $0x48] sm:$0xff]   ;;  %v2005_v41 = vld [vmem:[%s2075_s27 + $0x58] sm:$0xff]  }
  0x1d   : > { %v2006_v42 = vld [vmem:[%s2075_s27 + $0x50] sm:$0xff]   ;;  %v2007_v43 = vld [vmem:[%s2075_s27 + $0x60] sm:$0xff]   ;;  %v2008_v44 = vld [vmem:[%s2075_s27 + $0x58] sm:$0xff]  }
  0x1e   : > { %v2009_v45 = vld [vmem:[%s2075_s27 + $0x68] sm:$0xff]   ;;  %v2010_v46 = vld [vmem:[%s2075_s27 + $0x60] sm:$0xff]   ;;  %v2011_v47 = vld [vmem:[%s2075_s27 + $0x70] sm:$0xff]  }
  0x1f   : > { %v2012_v48 = vld [vmem:[%s2075_s27 + $0x68] sm:$0xff]   ;;  %v2013_v49 = vld [vmem:[%s2075_s27 + $0x78] sm:$0xff]   ;;  %v2014_v50 = vld [vmem:[%s2075_s27 + $0x70] sm:$0xff]  }
  0x20   : > { %v2015_v51 = vld [vmem:[%s2075_s27 + $0x80] sm:$0xff]   ;;  %v2016_v52 = vld [vmem:[%s2075_s27 + $0x78] sm:$0xff]   ;;  %v2017_v53 = vld [vmem:[%s2075_s27 + $0x88] sm:$0xff]  }
  0x21   : > { %v2187_v7 = vld [vmem:[%s2300_s2] ss:$0 sm:$0xff] }
  0x23   : > { %1792 = vmatmul.mubr.msk.bf16.gmra.mrb[8].mxu1 %vm338_vm0, %v1979_v16  ;;  %1828 = vmatmul.mubr.msk.bf16.gmra.mrb[8].mxu0 %vm338_vm0, %v1980_v17 }
  0x24   : > { %1795 = vmatprep.mubr.msk.bf16.mxu1 %vm338_vm0, %v1982_v18  ;;  %1831 = vmatprep.mubr.msk.bf16.mxu0 %vm338_vm0, %v1983_v19 }
  0x2b   : > { %1796 = vmatmul.mubr.msk.bf16.gmra.mrb[12].mxu1 %vm338_vm0, %v1984_v20  ;;  %1832 = vmatmul.mubr.msk.bf16.gmra.mrb[12].mxu0 %vm338_vm0, %v1985_v21 }
  0x2c   : > { %1799 = vmatprep.mubr.msk.bf16.mxu1 %vm338_vm0, %v1986_v22  ;;  %1855 = vmatprep.mubr.msk.bf16.mxu0 %vm338_vm0, %v1987_v23 }
  0x33   : > { %1800 = vmatmul.mubr.msk.bf16.gmra.mrb[16].mxu1 %vm338_vm0, %v1988_v24  ;;  %1856 = vmatmul.mubr.msk.bf16.vlgmr.msra.gmra.mrb[0].mxu0 %vm338_vm0, %v1989_v25 }
  0x34   : > { %1803 = vmatprep.mubr.msk.bf16.mxu1 %vm338_vm0, %v1990_v26  ;;  %1859 = vmatprep.mubr.msk.bf16.mxu0 %vm338_vm0, %v1991_v27 }
  0x3b   : > { %1804 = vmatmul.mubr.msk.bf16.gmra.mrb[20].mxu1 %vm338_vm0, %v1992_v28  ;;  %1860 = vmatmul.mubr.msk.bf16.gmra.mrb[4].mxu0 %vm338_vm0, %v1993_v29 }
  0x3c   : > { %1807 = vmatprep.mubr.msk.bf16.mxu1 %vm338_vm0, %v1994_v30  ;;  %1863 = vmatprep.mubr.msk.bf16.mxu0 %vm338_vm0, %v1995_v31 }
  0x43   : > { %1808 = vmatmul.mubr.msk.bf16.gmra.mrb[24].mxu1 %vm338_vm0, %v1996_v32  ;;  %1864 = vmatmul.mubr.msk.bf16.gmra.mrb[8].mxu0 %vm338_vm0, %v1997_v33 }
  0x44   : > { %1811 = vmatprep.mubr.msk.bf16.mxu1 %vm338_vm0, %v1998_v34  ;;  %1867 = vmatprep.mubr.msk.bf16.mxu0 %vm338_vm0, %v1999_v35 }
  0x4b   : > { %1812 = vmatmul.mubr.msk.bf16.gmra.mrb[28].mxu1 %vm338_vm0, %v2000_v36  ;;  %1868 = vmatmul.mubr.msk.bf16.gmra.mrb[12].mxu0 %vm338_vm0, %v2001_v37 }
  0x4c   : > { %1835 = vmatprep.mubr.msk.bf16.mxu1 %vm338_vm0, %v2002_v38  ;;  %1871 = vmatprep.mubr.msk.bf16.mxu0 %vm338_vm0, %v2003_v39 }
  0x53   : > { %1836 = vmatmul.mubr.msk.bf16.vlgmr.msra.gmra.mrb[16].mxu1 %vm338_vm0, %v2004_v40  ;;  %1872 = vmatmul.mubr.msk.bf16.gmra.mrb[16].mxu0 %vm338_vm0, %v2005_v41 }
  0x54   : > { %1839 = vmatprep.mubr.msk.bf16.mxu1 %vm338_vm0, %v2006_v42  ;;  %1875 = vmatprep.mubr.msk.bf16.mxu0 %vm338_vm0, %v2007_v43 }
  0x5b   : > { %1840 = vmatmul.mubr.msk.bf16.gmra.mrb[20].mxu1 %vm338_vm0, %v2008_v44  ;;  %1876 = vmatmul.mubr.msk.bf16.gmra.mrb[20].mxu0 %vm338_vm0, %v2009_v45 }
  0x5c   : > { %1843 = vmatprep.mubr.msk.bf16.mxu1 %vm338_vm0, %v2010_v46  ;;  %1879 = vmatprep.mubr.msk.bf16.mxu0 %vm338_vm0, %v2011_v47 }
  0x63   : > { %1844 = vmatmul.mubr.msk.bf16.gmra.mrb[24].mxu1 %vm338_vm0, %v2012_v48  ;;  %1880 = vmatmul.mubr.msk.bf16.gmra.mrb[24].mxu0 %vm338_vm0, %v2013_v49 }
  0x64   : > { %1847 = vmatprep.mubr.msk.bf16.mxu1 %vm338_vm0, %v2014_v50  ;;  %1883 = vmatprep.mubr.msk.bf16.mxu0 %vm338_vm0, %v2015_v51 }
  0x6b   : > { %1848 = vmatmul.mubr.msk.bf16.gmra.mrb[28].mxu1 %vm338_vm0, %v2016_v52  ;;  %1884 = vmatmul.mubr.msk.bf16.gmra.mrb[28].mxu0 %vm338_vm0, %v2017_v53 }
  0xe6   : > { %v1785_v54 = vpop.f32.mrb[0].mxu1 }
  0xe7   : > { %v421_v55 = vpop.f32.mrb[1].mxu1 }
  0xe8   : > { %v1786_v56 = vpop.f32.mrb[2].mxu1 }
  0xe9   : > { %v424_v57 = vpop.f32.mrb[3].mxu1 }
  0xee   : > { %v1789_v58 = vpop.f32.mrb[4].mxu1 }
  0xef   : > { %v437_v59 = vpop.f32.mrb[5].mxu1 }
  0xf0   : > { %v1790_v60 = vpop.f32.mrb[6].mxu1 }
  0xf1   : > { %v440_v61 = vpop.f32.mrb[7].mxu1 }
  0xf6   : > { %v1793_v62 = vpop.f32.mrb[8].mxu1 }
  0xf7   : > { %v453_v63 = vpop.f32.mrb[9].mxu1 }
  0xf8   : > { %v1794_v0 = vpop.f32.mrb[10].mxu1 }
  0xf9   : > { %v456_v1 = vpop.f32.mrb[11].mxu1 }
  0xfe   : > { %v2176_v2 = vpop.f32.mrb[12].mxu1 }
  0xff   : > { %v2178_v3 = vpop.f32.mrb[13].mxu1 }
 0x100   : > { %v2180_v4 = vpop.f32.mrb[14].mxu1 }
 0x101   : > { %v2182_v5 = vpop.f32.mrb[15].mxu1 }
 0x106   : > { %v1857_v6 = vpop.f32.mrb[0].mxu0 }
 0x107   : > { %v1891_v8 = vadd.f32 %v1857_v6, %v1785_v54  ;;  %v1061_v9 = vpop.f32.mrb[1].mxu0 }
 0x108   : > { %v1892_v10 = vadd.f32 %v1061_v9, %v421_v55  ;;  %v1858_v11 = vpop.f32.mrb[2].mxu0 }
 0x109   : > { %v1229_v12 = vadd.f32 %v1891_v8, %v2187_v7  ;;  %v1893_v13 = vadd.f32 %v1858_v11, %v1786_v56  ;;  %v1064_v14 = vpop.f32.mrb[3].mxu0 }
 0x10a   : > { %v1227_v15 = vadd.f32 %v1892_v10, %v2187_v7  ;;  %v1894_v16 = vadd.f32 %v1064_v14, %v424_v57 }
 0x10b   : > { %v1695_v17 = vpack.c.bf16 %v1229_v12, %v1229_v12  ;;  %v1230_v18 = vadd.f32 %v1893_v13, %v2187_v7 }
 0x10c   : > { %v1693_v19 = vpack.c.bf16 %v1227_v15, %v1227_v15  ;;  %v1228_v20 = vadd.f32 %v1894_v16, %v2187_v7 }
 0x10d   : > { %1390 = vst.msk [vmem:[%s2194_s8 + $0x8] sm:$0xf] %vm1387_vm1, %v1695_v17  ;;  %v1696_v21 = vpack.c.bf16 %v1230_v18, %v1230_v18 }
 0x10e   : > { %1388 = vst.msk [vmem:[%s2194_s8] sm:$0xf] %vm1387_vm1, %v1693_v19  ;;  %v1694_v22 = vpack.c.bf16 %v1228_v20, %v1228_v20  ;;  %v1861_v23 = vpop.f32.mrb[4].mxu0 }
 0x10f   : > { %1391 = vst.msk [vmem:[%s2194_s8 + $0xc] sm:$0xf] %vm1387_vm1, %v1696_v21  ;;  %v1895_v24 = vadd.f32 %v1861_v23, %v1789_v58  ;;  %v1077_v25 = vpop.f32.mrb[5].mxu0 }
 0x110   : > { %1389 = vst.msk [vmem:[%s2194_s8 + $0x4] sm:$0xf] %vm1387_vm1, %v1694_v22  ;;  %v1896_v26 = vadd.f32 %v1077_v25, %v437_v59  ;;  %v1862_v27 = vpop.f32.mrb[6].mxu0 }
 0x111   : > { %v1233_v28 = vadd.f32 %v1895_v24, %v2187_v7  ;;  %v1897_v29 = vadd.f32 %v1862_v27, %v1790_v60  ;;  %v1080_v30 = vpop.f32.mrb[7].mxu0 }
 0x112   : > { %v1231_v31 = vadd.f32 %v1896_v26, %v2187_v7  ;;  %v1898_v32 = vadd.f32 %v1080_v30, %v440_v61 }
 0x113   : > { %v1699_v33 = vpack.c.bf16 %v1233_v28, %v1233_v28  ;;  %v1234_v34 = vadd.f32 %v1897_v29, %v2187_v7 }
 0x114   : > { %v1697_v35 = vpack.c.bf16 %v1231_v31, %v1231_v31  ;;  %v1232_v36 = vadd.f32 %v1898_v32, %v2187_v7 }
 0x115   : > { %1394 = vst.msk [vmem:[%s2194_s8 + $0x18] sm:$0xf] %vm1387_vm1, %v1699_v33  ;;  %v1700_v37 = vpack.c.bf16 %v1234_v34, %v1234_v34 }
 0x116   : > { %1392 = vst.msk [vmem:[%s2194_s8 + $0x10] sm:$0xf] %vm1387_vm1, %v1697_v35  ;;  %v1698_v38 = vpack.c.bf16 %v1232_v36, %v1232_v36  ;;  %v1865_v39 = vpop.f32.mrb[8].mxu0 }
 0x117   : > { %1395 = vst.msk [vmem:[%s2194_s8 + $0x1c] sm:$0xf] %vm1387_vm1, %v1700_v37  ;;  %v1899_v40 = vadd.f32 %v1865_v39, %v1793_v62  ;;  %v1093_v41 = vpop.f32.mrb[9].mxu0 }
 0x118   : > { %1393 = vst.msk [vmem:[%s2194_s8 + $0x14] sm:$0xf] %vm1387_vm1, %v1698_v38  ;;  %v1900_v42 = vadd.f32 %v1093_v41, %v453_v63  ;;  %v1866_v43 = vpop.f32.mrb[10].mxu0 }
 0x119   : > { %v1237_v44 = vadd.f32 %v1899_v40, %v2187_v7  ;;  %v1901_v45 = vadd.f32 %v1866_v43, %v1794_v0  ;;  %v1096_v46 = vpop.f32.mrb[11].mxu0 }
 0x11a   : > { %v1235_v47 = vadd.f32 %v1900_v42, %v2187_v7  ;;  %v1902_v48 = vadd.f32 %v1096_v46, %v456_v1 }
 0x11b   : > { %v1703_v49 = vpack.c.bf16 %v1237_v44, %v1237_v44  ;;  %v1238_v50 = vadd.f32 %v1901_v45, %v2187_v7 }
 0x11c   : > { %v1701_v51 = vpack.c.bf16 %v1235_v47, %v1235_v47  ;;  %v1236_v52 = vadd.f32 %v1902_v48, %v2187_v7 }
 0x11d   : > { %1398 = vst.msk [vmem:[%s2194_s8 + $0x28] sm:$0xf] %vm1387_vm1, %v1703_v49  ;;  %v1704_v53 = vpack.c.bf16 %v1238_v50, %v1238_v50 }
 0x11e   : > { %1396 = vst.msk [vmem:[%s2194_s8 + $0x20] sm:$0xf] %vm1387_vm1, %v1701_v51  ;;  %v1702_v54 = vpack.c.bf16 %v1236_v52, %v1236_v52  ;;  %v1869_v55 = vpop.f32.mrb[12].mxu0 }
 0x11f   : > { %1399 = vst.msk [vmem:[%s2194_s8 + $0x2c] sm:$0xf] %vm1387_vm1, %v1704_v53  ;;  %v1903_v56 = vadd.f32 %v1869_v55, %v2176_v2  ;;  %v1109_v57 = vpop.f32.mrb[13].mxu0 }
 0x120   : > { %1397 = vst.msk [vmem:[%s2194_s8 + $0x24] sm:$0xf] %vm1387_vm1, %v1702_v54  ;;  %v1904_v58 = vadd.f32 %v1109_v57, %v2178_v3  ;;  %v1870_v59 = vpop.f32.mrb[14].mxu0 }
 0x121   : > { %v1241_v60 = vadd.f32 %v1903_v56, %v2187_v7  ;;  %v1905_v61 = vadd.f32 %v1870_v59, %v2180_v4  ;;  %v1112_v62 = vpop.f32.mrb[15].mxu0 }
 0x122   : > { %v1239_v63 = vadd.f32 %v1904_v58, %v2187_v7  ;;  %v1906_v0 = vadd.f32 %v1112_v62, %v2182_v5 }
 0x123   : > { %v1707_v1 = vpack.c.bf16 %v1241_v60, %v1241_v60  ;;  %v1242_v2 = vadd.f32 %v1905_v61, %v2187_v7 }
 0x124   : > { %v1705_v6 = vpack.c.bf16 %v1239_v63, %v1239_v63  ;;  %v1240_v8 = vadd.f32 %v1906_v0, %v2187_v7 }
 0x125   : > { %1402 = vst.msk [vmem:[%s2194_s8 + $0x38] sm:$0xf] %vm1387_vm1, %v1707_v1  ;;  %v1708_v3 = vpack.c.bf16 %v1242_v2, %v1242_v2 }
 0x126   : > { %v1837_v9 = vpop.f32.mrb[16].mxu1  ;;  %1400 = vst.msk [vmem:[%s2194_s8 + $0x30] sm:$0xf] %vm1387_vm1, %v1705_v6  ;;  %v1706_v10 = vpack.c.bf16 %v1240_v8, %v1240_v8  ;;  %v1873_v4 = vpop.f32.mrb[16].mxu0 }
 0x127   : > { %v786_v11 = vpop.f32.mrb[17].mxu1  ;;  %1403 = vst.msk [vmem:[%s2194_s8 + $0x3c] sm:$0xf] %vm1387_vm1, %v1708_v3  ;;  %v1907_v12 = vadd.f32 %v1873_v4, %v1837_v9  ;;  %v1125_v5 = vpop.f32.mrb[17].mxu0 }
 0x128   : > { %v1838_v13 = vpop.f32.mrb[18].mxu1  ;;  %1401 = vst.msk [vmem:[%s2194_s8 + $0x34] sm:$0xf] %vm1387_vm1, %v1706_v10  ;;  %v1908_v14 = vadd.f32 %v1125_v5, %v786_v11  ;;  %v1874_v15 = vpop.f32.mrb[18].mxu0 }
 0x129   : > { %v789_v16 = vpop.f32.mrb[19].mxu1  ;;  %v1245_v17 = vadd.f32 %v1907_v12, %v2187_v7  ;;  %v1909_v18 = vadd.f32 %v1874_v15, %v1838_v13  ;;  %v1128_v19 = vpop.f32.mrb[19].mxu0 }
 0x12a   : > { %v1243_v20 = vadd.f32 %v1908_v14, %v2187_v7  ;;  %v1910_v21 = vadd.f32 %v1128_v19, %v789_v16 }
 0x12b   : > { %v1711_v22 = vpack.c.bf16 %v1245_v17, %v1245_v17  ;;  %v1246_v23 = vadd.f32 %v1909_v18, %v2187_v7 }
 0x12c   : > { %v1709_v24 = vpack.c.bf16 %v1243_v20, %v1243_v20  ;;  %v1244_v25 = vadd.f32 %v1910_v21, %v2187_v7 }
 0x12d   : > { %1406 = vst.msk [vmem:[%s2194_s8 + $0x48] sm:$0xf] %vm1387_vm1, %v1711_v22  ;;  %v1712_v26 = vpack.c.bf16 %v1246_v23, %v1246_v23 }
 0x12e   : > { %v1841_v27 = vpop.f32.mrb[20].mxu1  ;;  %1404 = vst.msk [vmem:[%s2194_s8 + $0x40] sm:$0xf] %vm1387_vm1, %v1709_v24  ;;  %v1710_v28 = vpack.c.bf16 %v1244_v25, %v1244_v25  ;;  %v1877_v29 = vpop.f32.mrb[20].mxu0 }
 0x12f   : > { %v802_v30 = vpop.f32.mrb[21].mxu1  ;;  %1407 = vst.msk [vmem:[%s2194_s8 + $0x4c] sm:$0xf] %vm1387_vm1, %v1712_v26  ;;  %v1911_v31 = vadd.f32 %v1877_v29, %v1841_v27  ;;  %v1141_v32 = vpop.f32.mrb[21].mxu0 }
 0x130   : > { %v1842_v33 = vpop.f32.mrb[22].mxu1  ;;  %1405 = vst.msk [vmem:[%s2194_s8 + $0x44] sm:$0xf] %vm1387_vm1, %v1710_v28  ;;  %v1912_v34 = vadd.f32 %v1141_v32, %v802_v30  ;;  %v1878_v35 = vpop.f32.mrb[22].mxu0 }
 0x131   : > { %v805_v36 = vpop.f32.mrb[23].mxu1  ;;  %v1249_v37 = vadd.f32 %v1911_v31, %v2187_v7  ;;  %v1913_v38 = vadd.f32 %v1878_v35, %v1842_v33  ;;  %v1144_v39 = vpop.f32.mrb[23].mxu0 }
 0x132   : > { %v1247_v40 = vadd.f32 %v1912_v34, %v2187_v7  ;;  %v1914_v41 = vadd.f32 %v1144_v39, %v805_v36 }
 0x133   : > { %v1715_v42 = vpack.c.bf16 %v1249_v37, %v1249_v37  ;;  %v1250_v43 = vadd.f32 %v1913_v38, %v2187_v7 }
 0x134   : > { %v1713_v44 = vpack.c.bf16 %v1247_v40, %v1247_v40  ;;  %v1248_v45 = vadd.f32 %v1914_v41, %v2187_v7 }
 0x135   : > { %1410 = vst.msk [vmem:[%s2194_s8 + $0x58] sm:$0xf] %vm1387_vm1, %v1715_v42  ;;  %v1716_v46 = vpack.c.bf16 %v1250_v43, %v1250_v43 }
 0x136   : > { %v1845_v47 = vpop.f32.mrb[24].mxu1  ;;  %1408 = vst.msk [vmem:[%s2194_s8 + $0x50] sm:$0xf] %vm1387_vm1, %v1713_v44  ;;  %v1714_v48 = vpack.c.bf16 %v1248_v45, %v1248_v45  ;;  %v1881_v49 = vpop.f32.mrb[24].mxu0 }
 0x137   : > { %v818_v50 = vpop.f32.mrb[25].mxu1  ;;  %1411 = vst.msk [vmem:[%s2194_s8 + $0x5c] sm:$0xf] %vm1387_vm1, %v1716_v46  ;;  %v1915_v51 = vadd.f32 %v1881_v49, %v1845_v47  ;;  %v1157_v52 = vpop.f32.mrb[25].mxu0 }
 0x138   : > { %v1846_v53 = vpop.f32.mrb[26].mxu1  ;;  %1409 = vst.msk [vmem:[%s2194_s8 + $0x54] sm:$0xf] %vm1387_vm1, %v1714_v48  ;;  %v1916_v54 = vadd.f32 %v1157_v52, %v818_v50  ;;  %v1882_v55 = vpop.f32.mrb[26].mxu0 }
 0x139   : > { %v821_v56 = vpop.f32.mrb[27].mxu1  ;;  %v1253_v57 = vadd.f32 %v1915_v51, %v2187_v7  ;;  %v1917_v58 = vadd.f32 %v1882_v55, %v1846_v53  ;;  %v1160_v59 = vpop.f32.mrb[27].mxu0 }
 0x13a   : > { %v1251_v60 = vadd.f32 %v1916_v54, %v2187_v7  ;;  %v1918_v61 = vadd.f32 %v1160_v59, %v821_v56 }
 0x13b   : > { %v1719_v62 = vpack.c.bf16 %v1253_v57, %v1253_v57  ;;  %v1254_v63 = vadd.f32 %v1917_v58, %v2187_v7 }
 0x13c   : > { %v1717_v0 = vpack.c.bf16 %v1251_v60, %v1251_v60  ;;  %v1252_v1 = vadd.f32 %v1918_v61, %v2187_v7 }
 0x13d   : > { %1414 = vst.msk [vmem:[%s2194_s8 + $0x68] sm:$0xf] %vm1387_vm1, %v1719_v62  ;;  %v1720_v2 = vpack.c.bf16 %v1254_v63, %v1254_v63 }
 0x13e   : > { %v1849_v6 = vpop.f32.mrb[28].mxu1  ;;  %1412 = vst.msk [vmem:[%s2194_s8 + $0x60] sm:$0xf] %vm1387_vm1, %v1717_v0  ;;  %v1718_v8 = vpack.c.bf16 %v1252_v1, %v1252_v1  ;;  %v1885_v3 = vpop.f32.mrb[28].mxu0 }
 0x13f   : > { %v834_v9 = vpop.f32.mrb[29].mxu1  ;;  %1415 = vst.msk [vmem:[%s2194_s8 + $0x6c] sm:$0xf] %vm1387_vm1, %v1720_v2  ;;  %v1919_v10 = vadd.f32 %v1885_v3, %v1849_v6  ;;  %v1173_v4 = vpop.f32.mrb[29].mxu0 }
 0x140   : > { %v1850_v11 = vpop.f32.mrb[30].mxu1  ;;  %1413 = vst.msk [vmem:[%s2194_s8 + $0x64] sm:$0xf] %vm1387_vm1, %v1718_v8  ;;  %v1920_v12 = vadd.f32 %v1173_v4, %v834_v9  ;;  %v1886_v5 = vpop.f32.mrb[30].mxu0 }
 0x141   : > { %v837_v13 = vpop.f32.mrb[31].mxu1  ;;  %v1257_v14 = vadd.f32 %v1919_v10, %v2187_v7  ;;  %v1921_v15 = vadd.f32 %v1886_v5, %v1850_v11  ;;  %v1176_v16 = vpop.f32.mrb[31].mxu0 }
 0x142   : > { %v1255_v17 = vadd.f32 %v1920_v12, %v2187_v7  ;;  %v1922_v18 = vadd.f32 %v1176_v16, %v837_v13 }
 0x143   : > { %v1723_v19 = vpack.c.bf16 %v1257_v14, %v1257_v14  ;;  %v1258_v20 = vadd.f32 %v1921_v15, %v2187_v7 }
 0x144   : > { %v1721_v21 = vpack.c.bf16 %v1255_v17, %v1255_v17  ;;  %v1256_v22 = vadd.f32 %v1922_v18, %v2187_v7 }
 0x145   : > { %1418 = vst.msk [vmem:[%s2194_s8 + $0x78] sm:$0xf] %vm1387_vm1, %v1723_v19  ;;  %v1724_v23 = vpack.c.bf16 %v1258_v20, %v1258_v20 }
 0x146   : > { %1416 = vst.msk [vmem:[%s2194_s8 + $0x70] sm:$0xf] %vm1387_vm1, %v1721_v21  ;;  %v1722_v24 = vpack.c.bf16 %v1256_v22, %v1256_v22 }
 0x147   : > { %1419 = vst.msk [vmem:[%s2194_s8 + $0x7c] sm:$0xf] %vm1387_vm1, %v1724_v23 }
 0x148   : > { %1417 = vst.msk [vmem:[%s2194_s8 + $0x74] sm:$0xf] %vm1387_vm1, %v1722_v24 }
 0x149 PF: > { %s13_s12 = sadd.s32 1, %s2024_s12  }
 0x14a   : > { %p10_p4 = scmp.ge.s32.totalorder %s13_s12, 4  }
 0x14c   :  { %12 = sbr.rel (!%p10_p4) target bundleno = 1 (0x1), region = 66 }

// kernel: _lambda_.10
= control target key start
LH: loop header
LB: loop body
LE: loop exit
PB: predicated region body
PF: predicated region fallthrough
CT: control target
= control target key end

     0   :  { %12 = vsyncpa [#allocation3], 0  ;;  %s1245_s24 = smov 0   ;;  %s1354_s0 = inlined_call_operand.vmem [shape: bf16[2,16,64], index: 0, kind: input, shape index: {}]   ;;  %s1355_s1 = inlined_call_operand.vmem [shape: bf16[2,64,16], index: 1, kind: input, shape index: {}]   ;;  %s1356_s2 = inlined_call_operand.vmem [shape: bf16[2,16,512], index: 2, kind: input, shape index: {}]   ;;  %s1357_s3 = inlined_call_operand.vmem [shape: bf16[2,16,64], index: 3, kind: input, shape index: {}]   ;;  %s1358_s4 = inlined_call_operand.vmem [shape: bf16[2,64,16], index: 4, kind: input, shape index: {}]   ;;  %s1359_s5 = inlined_call_operand.vmem [shape: bf16[2,16,512], index: 5, kind: input, shape index: {}]   ;;  %s1360_s6 = inlined_call_operand.vmem [shape: f32[2], index: 6, kind: input, shape index: {}]   ;;  %s1361_s7 = inlined_call_operand.vmem [shape: bf16[2,16,512], index: 7, kind: output, shape index: {}]  }
   0x1 LB: > { %s1251_s25 = sadd.s32 4294967295, %s1199_s24   ;;  %p1019_p0 = scmp.ge.s32.totalorder %s1199_s24, 1  ;;  %s1199_s24 = sphi %s1245_s24, %s18_s24  }
   0x2   : > { %p226_p1 = scmp.lt.s32.totalorder %s1199_s24, 3  ;;  %s239_s28 = sshll.u32 %s1360_s6, 4  ;;  %s240_s28 = int_to_ptr.vmem [resolvable:$true] %s239_s28 }
   0x3   : > { %p1122_p3 = scmp.eq.s32.totalorder %s1251_s25, 0  ;;  %s1174_s30 = scalar_lea.vmem %s240_s28, 16 }
   0x4   : > { %p1258_p2 = pnand %p1019_p0, %p226_p1  ;;  %p1175_p6 = scmp.ne.s32.totalorder %s240_s28, %s1174_s30 }
   0x5   : > { %p1182_p10 = scmp.lt.s32.totalorder %s240_s28, %s240_s28  ;;  %p1183_p11 = scmp.lt.s32.totalorder %s1174_s30, %s1174_s30 }
   0x6   : > { %p1118_p4 = pneg %p1258_p2 }
   0x7   : > { %p1184_p12 = por %p1183_p11, %p1182_p10 }
   0x8   : > { %p1119_p5 = pnand %p1122_p3, %p1118_p4 }
   0xa   : > { %p1176_p7 = pneg %p1119_p5 }
   0xc   : > { %p1177_p8 = pnand %p1176_p7, %p1175_p6 }
   0xe   : > { %p1178_p9 = pneg %p1177_p8 }
  0x10   : > { %p1185_p13 = pnand %p1184_p12, %p1178_p9 }
  0x12   : > { %1188 = shalt.err (!%p1185_p13)
}
  0x13   : > { %s1201_s8 = smov [#allocation2]   ;;  %300 = sbr.rel (%p1258_p2) target bundleno = 1366 (0x556), region = 48 }
  0x14   : > { %1121 = dma.vmem_to_smem (!%p1119_p5), %s240_s28, 16, %s1201_s8, [#allocation3]  }
  0x1a   : > { %1194 = dma.done.wait (%p1122_p3), [#allocation3], 16  }
  0x1b   : > { %1196 = vsyncadd (%p1122_p3), [#allocation3], 4294967280 }
  0x1c   : > { %306 = sfence }
  0x1d   : > { %p358_p0 = scmp.lt.s32.totalorder %s1251_s25, 1  ;;  %v1202_v0 = vmov 0.0   ;;  %vm1203_vm0 = vmmov 0   ;;  %vm433_vm1 = vcmask 523264   ;;  %vm478_vm2 = vcmask 130048   ;;  %s502_s30 = sld [smem:[#allocation2]] }
  0x1e   : > { %1090 = vmatprep.subr.bf16.mxu0 %v1202_v0  ;;  %1098 = vmatprep.mubr.msk.bf16.mxu0 %vm1203_vm0, %v1202_v0  ;;  %v1204_v23 = vmov 0   ;;  %s1056_s8 = sld [smem:[#allocation2 + $0x1]] }
  0x1f   : > { %s1364_s25 = smov (!%p358_p0, %s1251_s25), 1  ;;  %562 = vmatprep.mubr.bf16.mxu1 %v1204_v23 }
  0x20   : > { %s1278_s9 = sshll.u32 %s1364_s25, 5  ;;  %s1069_s13 = sshll.u32 %s1364_s25, 3 }
  0x21   : > { %s367_s12 = scalar_lea.vmem %s1355_s1, %s1278_s9  ;;  %s362_s16 = scalar_lea.vmem %s1354_s0, %s1069_s13 }
  0x22   : > { %v1136_v1 = vld [vmem:[%s367_s12] sm:$0xff]   ;;  %v1137_v2 = vld [vmem:[%s367_s12 + $0x8] sm:$0xff]   ;;  %s1291_s19 = scalar_lea.vmem %s1357_s3, %s1069_s13  ;;  %v1138_v3 = vld [vmem:[%s367_s12 + $0x10] sm:$0xff]   ;;  %s372_s22 = scalar_lea.vmem %s1356_s2, %s1278_s9 }
  0x23   : > { %1091 = vmatpush3.bf16.msra.mxu0 %v1136_v1  ;;  %v1139_v4 = vld [vmem:[%s367_s12 + $0x18] sm:$0xff]   ;;  %v1140_v5 = vld [vmem:[%s362_s16] sm:$0xff]   ;;  %s382_s26 = scalar_lea.vmem %s1358_s4, %s1278_s9  ;;  %s387_s29 = scalar_lea.vmem %s1359_s5, %s1278_s9 }
  0x24   : > { %1092 = vmatprep.subr.bf16.mxu0 %v1202_v0  ;;  %v1141_v22 = vld [vmem:[%s372_s22 + $0x4] ss:$16 sps:$4 sm:$0xff]   ;;  %v1143_v24 = vld [vmem:[%s372_s22] ss:$16 sps:$4 sm:$0xff]   ;;  %v1146_v25 = vld [vmem:[%s372_s22 + $0xc] ss:$16 sps:$4 sm:$0xff]   ;;  %s392_s12 = scalar_lea.vmem %s1361_s7, %s1278_s9 }
  0x25   : > { %530 = vmatprep.subr.bf16.mxu1 %v1141_v22  ;;  %v1144_v32 = vld [vmem:[%s372_s22 + $0x8] ss:$16 sps:$4 sm:$0xff]   ;;  %v1147_v34 = vld [vmem:[%s382_s26] sm:$0xff]   ;;  %v1149_v36 = vld [vmem:[%s382_s26 + $0x10] sm:$0xff]  }
  0x26   : > { %531 = vmatpush1.bf16.msra.mxu1 %v1143_v24  ;;  %v1148_v35 = vld [vmem:[%s382_s26 + $0x8] sm:$0xff]   ;;  %v1150_v37 = vld [vmem:[%s382_s26 + $0x18] sm:$0xff]   ;;  %v1151_v38 = vld [vmem:[%s1291_s19] sm:$0xff]  }
  0x27   : > { %1093 = vmatpush3.bf16.msra.mxu0 %v1137_v2  ;;  %573 = vmatprep.subr.bf16.mxu1 %v1146_v25  ;;  %v1154_v63 = vld [vmem:[%s387_s29 + $0x4] ss:$16 sps:$4 sm:$0xff]   ;;  %v1157_v1 = vld [vmem:[%s387_s29 + $0xc] ss:$16 sps:$4 sm:$0xff]  }
  0x28   : > { %1094 = vmatprep.subr.bf16.mxu0 %v1202_v0 }
  0x2b   : > { %1095 = vmatpush3.bf16.msra.mxu0 %v1138_v3 }
  0x2c   : > { %1096 = vmatprep.subr.bf16.mxu0 %v1202_v0 }
  0x2f   : > { %1097 = vmatpush3.bf16.msra.mxu0 %v1139_v4 }
  0x30   : > { %759 = vmatprep.subr.bf16.mxu0 %v1154_v63 }
  0x32   : > { %1099 = vmatmul.mubr.msk.bf16.vlgmr.msra.gmra.mrb[0].mxu0 %vm433_vm1, %v1140_v5 }
  0x33   : > { %791 = vmatprep.mubr.bf16.mxu0 %v1204_v23 }
 0x105   : > { %v471_v6 = vpop.f32.mrb[0].mxu0 }
 0x106   : > { %v1100_v7 = vpop.f32.mrb[1].mxu0  ;;  %v479_v8 = vsel %vm478_vm2, %v471_v6, -inf }
 0x107   : > { %480 = vmax.xlane.f32.xlu0 %v479_v8  ;;  %v474_v9 = vpop.f32.mrb[2].mxu0  ;;  %v1155_v8 = vld [vmem:[%s387_s29 + $0x8] ss:$16 sps:$4 sm:$0xff]  }
 0x108   : > { %v1101_v10 = vpop.f32.mrb[3].mxu0  ;;  %v482_v11 = vsel %vm478_vm2, %v474_v9, -inf }
 0x109   : > { %v616_v10 = vstv %s502_s30 }
 0x10b   : > { %483 = vmax.xlane.f32.xlu0 %v482_v11  ;;  %v845_v11 = vstv %s1056_s8 }
 0x194   : > { %v481_v12 = vpop.xlane.xlu0 %480 }
 0x195   : > { %v485_v13 = vsub.f32 %v471_v6, %v481_v12 }
 0x197   : > { %v487_v14 = vmul.f32 1.442695, %v485_v13 }
 0x198   : > { %v484_v15 = vpop.xlane.xlu0 %483 }
 0x199   : > { %1158 = vpow2.f32 %v487_v14  ;;  %v486_v16 = vsub.f32 %v474_v9, %v484_v15 }
 0x19b   : > { %v489_v17 = vmul.f32 1.442695, %v486_v16 }
 0x19d   : > { %1160 = vpow2.f32 %v489_v17 }
 0x1a3   : > { %v1159_v18 = vpop.eup %1158 }
 0x1a4   : > { %v491_v19 = vsel %vm478_vm2, %v1159_v18, 0.0 }
 0x1a5   : > { %492 = vadd.xlane.f32.xlu1 %v491_v19 }
 0x1a7   : > { %v1161_v20 = vpop.eup %1160 }
 0x1a8   : > { %v494_v21 = vsel %vm478_vm2, %v1161_v20, 0.0 }
 0x1a9   : > { %495 = vadd.xlane.f32.xlu1 %v494_v21 }
 0x232   : > { %v493_v26 = vpop.xlane.xlu1 %492 }
 0x233   : > { %1162 = vrcp.f32 %v493_v26 }
 0x236   : > { %v496_v27 = vpop.xlane.xlu1 %495 }
 0x237   : > { %1164 = vrcp.f32 %v496_v27 }
 0x23d   : > { %v1163_v28 = vpop.eup %1162 }
 0x23e   : > { %v499_v30 = vmul.f32 %v1163_v28, %v1159_v18 }
 0x241   : > { %v1165_v29 = vpop.eup %1164 }
 0x242   : > { %v500_v31 = vmul.f32 %v1165_v29, %v1161_v20 }
 0x244   : > { %v501_v33 = vpack.c.bf16 %v500_v31, %v499_v30 }
 0x246   : > { %1048 = vmatmul.mubr.msk.bf16.vlgmr.msra.gmra.mrb[0].mxu1 %vm478_vm2, %v501_v33 }
 0x247   : > { %574 = vmatpush1.bf16.msra.mxu1 %v1144_v32  ;;  %605 = vmatprep.mubr.bf16.mxu1 %v1204_v23 }
 0x248   : > { %1102 = vmatprep.subr.bf16.mxu1 %v1202_v0 }
 0x24e   : > { %1049 = vmatmul.mubr.msk.bf16.vlgmr.msra.gmra.mrb[4].mxu1 %vm478_vm2, %v501_v33 }
 0x24f   : > { %1103 = vmatpush3.bf16.msra.mxu1 %v1147_v34  ;;  %1110 = vmatprep.mubr.msk.bf16.mxu1 %vm1203_vm0, %v1202_v0 }
 0x250   : > { %1104 = vmatprep.subr.bf16.mxu1 %v1202_v0 }
 0x253   : > { %1105 = vmatpush3.bf16.msra.mxu1 %v1148_v35 }
 0x254   : > { %1106 = vmatprep.subr.bf16.mxu1 %v1202_v0 }
 0x257   : > { %1107 = vmatpush3.bf16.msra.mxu1 %v1149_v36 }
 0x258   : > { %1108 = vmatprep.subr.bf16.mxu1 %v1202_v0  ;;  %v1152_v0 = vld [vmem:[%s387_s29] ss:$16 sps:$4 sm:$0xff]  }
 0x259   : > { %760 = vmatpush1.bf16.msra.mxu0 %v1152_v0 }
 0x25a   : > { %802 = vmatprep.subr.bf16.mxu0 %v1157_v1 }
 0x25b   : > { %1109 = vmatpush3.bf16.msra.mxu1 %v1150_v37 }
 0x25e   : > { %1111 = vmatmul.mubr.msk.bf16.vlgmr.msra.gmra.mrb[8].mxu1 %vm433_vm1, %v1151_v38 }
 0x319   : > { %v564_v39 = vpop.f32.mrb[0].mxu1 }
 0x31a   : > { %v566_v40 = vpop.f32.mrb[1].mxu1  ;;  %v617_v13 = vmul.f32 %v616_v10, %v564_v39 }
 0x31b   : > { %v568_v41 = vpop.f32.mrb[2].mxu1  ;;  %v618_v16 = vmul.f32 %v616_v10, %v566_v40 }
 0x31c   : > { %v1321_v42 = vpop.f32.mrb[3].mxu1  ;;  %v621_v19 = vmul.f32 %v616_v10, %v568_v41 }
 0x321   : > { %v1323_v43 = vpop.f32.mrb[4].mxu1 }
 0x322   : > { %v1325_v44 = vpop.f32.mrb[5].mxu1  ;;  %v619_v31 = vmul.f32 %v616_v10, %v1323_v43 }
 0x323   : > { %v1327_v45 = vpop.f32.mrb[6].mxu1  ;;  %v620_v34 = vmul.f32 %v616_v10, %v1325_v44 }
 0x324   : > { %v1329_v46 = vpop.f32.mrb[7].mxu1  ;;  %v623_v37 = vmul.f32 %v616_v10, %v1327_v45 }
 0x325   : > { %v624_v41 = vmul.f32 %v616_v10, %v1329_v46 }
 0x331   : > { %v701_v47 = vpop.f32.mrb[8].mxu1 }
 0x332   : > { %v1112_v48 = vpop.f32.mrb[9].mxu1  ;;  %v708_v49 = vsel %vm478_vm2, %v701_v47, -inf }
 0x333   : > { %709 = vmax.xlane.f32.xlu0 %v708_v49  ;;  %v704_v50 = vpop.f32.mrb[10].mxu1 }
 0x334   : > { %v1113_v51 = vpop.f32.mrb[11].mxu1  ;;  %v711_v52 = vsel %vm478_vm2, %v704_v50, -inf }
 0x335   : > { %712 = vmax.xlane.f32.xlu1 %v711_v52 }
 0x3c0   : > { %v710_v53 = vpop.xlane.xlu0 %709 }
 0x3c1   : > { %v714_v54 = vsub.f32 %v701_v47, %v710_v53 }
 0x3c2   : > { %v713_v55 = vpop.xlane.xlu1 %712 }
 0x3c3   : > { %v716_v56 = vmul.f32 1.442695, %v714_v54  ;;  %v715_v57 = vsub.f32 %v704_v50, %v713_v55 }
 0x3c5   : > { %1166 = vpow2.f32 %v716_v56  ;;  %v718_v58 = vmul.f32 1.442695, %v715_v57 }
 0x3c7   : > { %1168 = vpow2.f32 %v718_v58 }
 0x3cf   : > { %v1167_v59 = vpop.eup %1166 }
 0x3d0   : > { %v720_v60 = vsel %vm478_vm2, %v1167_v59, 0.0 }
 0x3d1   : > { %v1169_v61 = vpop.eup %1168  ;;  %721 = vadd.xlane.f32.xlu0 %v720_v60 }
 0x3d2   : > { %v723_v62 = vsel %vm478_vm2, %v1169_v61, 0.0 }
 0x3d3   : > { %724 = vadd.xlane.f32.xlu1 %v723_v62 }
 0x45e   : > { %v722_v2 = vpop.xlane.xlu0 %721 }
 0x45f   : > { %1170 = vrcp.f32 %v722_v2 }
 0x460   : > { %v725_v3 = vpop.xlane.xlu1 %724 }
 0x461   : > { %1172 = vrcp.f32 %v725_v3 }
 0x469   : > { %v1171_v4 = vpop.eup %1170 }
 0x46a   : > { %v728_v6 = vmul.f32 %v1171_v4, %v1167_v59 }
 0x46b   : > { %v1173_v5 = vpop.eup %1172 }
 0x46c   : > { %v729_v7 = vmul.f32 %v1173_v5, %v1169_v61 }
 0x46e   : > { %v730_v9 = vpack.c.bf16 %v729_v7, %v728_v6 }
 0x470   : > { %1061 = vmatmul.mubr.msk.bf16.vlgmr.msra.gmra.mrb[4].mxu0 %vm478_vm2, %v730_v9 }
 0x471   : > { %803 = vmatpush1.bf16.msra.mxu0 %v1155_v8  ;;  %834 = vmatprep.mubr.bf16.mxu0 %v1204_v23  ;;  %v622_v23 = vmul.f32 %v616_v10, %v1321_v42 }
 0x478   : > { %1062 = vmatmul.mubr.msk.bf16.vlgmr.msra.gmra.mrb[8].mxu0 %vm478_vm2, %v730_v9 }
 0x543   : > { %v793_v12 = vpop.f32.mrb[4].mxu0 }
 0x544   : > { %v846_v14 = vmul.f32 %v845_v11, %v793_v12  ;;  %v795_v15 = vpop.f32.mrb[5].mxu0 }
 0x545   : > { %v847_v17 = vmul.f32 %v845_v11, %v795_v15  ;;  %v797_v18 = vpop.f32.mrb[6].mxu0 }
 0x546   : > { %v854_v20 = vadd.f32 %v846_v14, %v617_v13  ;;  %v850_v21 = vmul.f32 %v845_v11, %v797_v18  ;;  %v799_v22 = vpop.f32.mrb[7].mxu0 }
 0x547   : > { %v855_v24 = vadd.f32 %v847_v17, %v618_v16  ;;  %v851_v25 = vmul.f32 %v845_v11, %v799_v22 }
 0x548   : > { %v858_v26 = vadd.f32 %v850_v21, %v621_v19 }
 0x549   : > { %v1076_v27 = vpack.c.bf16 %v855_v24, %v854_v20  ;;  %v859_v28 = vadd.f32 %v851_v25, %v622_v23 }
 0x54b   : > { %886 = vst [vmem:[%s392_s12] sm:$0xff] %v1076_v27  ;;  %v1078_v29 = vpack.c.bf16 %v859_v28, %v858_v26  ;;  %v836_v30 = vpop.f32.mrb[8].mxu0 }
 0x54c   : > { %v848_v32 = vmul.f32 %v845_v11, %v836_v30  ;;  %v838_v33 = vpop.f32.mrb[9].mxu0 }
 0x54d   : > { %888 = vst [vmem:[%s392_s12 + $0x10] sm:$0xff] %v1078_v29  ;;  %v849_v35 = vmul.f32 %v845_v11, %v838_v33  ;;  %v840_v36 = vpop.f32.mrb[10].mxu0 }
 0x54e   : > { %v856_v38 = vadd.f32 %v848_v32, %v619_v31  ;;  %v852_v39 = vmul.f32 %v845_v11, %v840_v36  ;;  %v842_v40 = vpop.f32.mrb[11].mxu0 }
 0x54f   : > { %v857_v42 = vadd.f32 %v849_v35, %v620_v34  ;;  %v853_v47 = vmul.f32 %v845_v11, %v842_v40 }
 0x550   : > { %v860_v48 = vadd.f32 %v852_v39, %v623_v37 }
 0x551   : > { %v1077_v49 = vpack.c.bf16 %v857_v42, %v856_v38  ;;  %v861_v50 = vadd.f32 %v853_v47, %v624_v41 }
 0x553   : > { %887 = vst [vmem:[%s392_s12 + $0x8] sm:$0xff] %v1077_v49  ;;  %v1079_v43 = vpack.c.bf16 %v861_v50, %v860_v48 }
 0x555   : > { %889 = vst [vmem:[%s392_s12 + $0x18] sm:$0xff] %v1079_v43 }
 0x556 PF: > { %s18_s24 = sadd.s32 1, %s1199_s24  }
 0x557   : > { %p15_p1 = scmp.ge.s32.totalorder %s18_s24, 4  }
 0x559   :  { %17 = sbr.rel (!%p15_p1) target bundleno = 1 (0x1), region = 98 }
 0x560   :  { %911 = vsyncpa [#allocation3], 1 }
 0x561   :  { %913 = vsyncpa [#allocation3 + $0x1], 1 }

// kernel: _lambda_.11
= control target key start
LH: loop header
LB: loop body
LE: loop exit
PB: predicated region body
PF: predicated region fallthrough
CT: control target
= control target key end

     0   :  { %s6914_s12 = smov 0   ;;  %s8571_s0 = inlined_call_operand.vmem [shape: bf16[2,22,22,32], index: 0, kind: input, shape index: {}]   ;;  %s8572_s1 = inlined_call_operand.vmem [shape: bf16[9,32,32], index: 1, kind: input, shape index: {}]   ;;  %s8573_s2 = inlined_call_operand.vmem [shape: f32[1,32], index: 2, kind: input, shape index: {}]   ;;  %s8574_s3 = inlined_call_operand.vmem [shape: bf16[2,256,32], index: 3, kind: output, shape index: {}]  }
   0x1 LB: > { %s5349_s13 = sadd.s32 4294967295, %s6892_s12   ;;  %p5353_p0 = scmp.ge.s32.totalorder %s6892_s12, 1  ;;  %s6892_s12 = sphi %s6914_s12, %s13_s12  }
   0x2   : > { %p137_p1 = scmp.lt.s32.totalorder %s6892_s12, 3 }
   0x4   : > { %p138_p2 = pnand %p5353_p0, %p137_p1 }
   0x5   : > { %v6790_v0 = vld [vmem:[%s8572_s1 + $0x10] sm:$0xff] (!%p138_p2)   ;;  %p161_p3 = scmp.lt.s32.totalorder (!%p138_p2), %s5349_s13, 1  ;;  %v6791_v1 = vld [vmem:[%s8572_s1 + $0x40] sm:$0xff] (!%p138_p2)   ;;  %v6792_v2 = vld [vmem:[%s8572_s1 + $0x18] sm:$0xff] (!%p138_p2)   ;;  %vm240_vm0 = vsmask.f32 (!%p138_p2), 2304 }
   0x6   : > { %141 = sbr.rel (%p138_p2) target bundleno = 603 (0x25b), region = 32  ;;  %6197 = vmatprep.subr.bf16.mxu1 (!%p138_p2), %v6790_v0  ;;  %6341 = vmatprep.subr.bf16.mxu0 (!%p138_p2), %v6791_v1  ;;  %v6793_v3 = vld [vmem:[%s8572_s1 + $0x48] sm:$0xff] (!%p138_p2)   ;;  %v6940_v4 = vld [vmem:[%s8572_s1] sm:$0xff] (!%p138_p2)   ;;  %v6950_v5 = vld [vmem:[%s8572_s1 + $0x50] sm:$0xff] (!%p138_p2)   ;;  %vm756_vm1 = vcmask (!%p138_p2), 261120   ;;  %vm1331_vm4 = vcmask (!%p138_p2), 1040384  }
   0x7   : > { %6198 = vmatpush3.bf16.msra.mxu1 (!%p138_p2), %v6790_v0  ;;  %6342 = vmatpush3.bf16.msra.mxu0 (!%p138_p2), %v6791_v1  ;;  %vm241_vm2 = vsmask.f32 (!%p138_p2), 6416  ;;  %vm1332_vm5 = vcmask (!%p138_p2), 1044484   ;;  %vm5261_vm7 = vcmask (!%p138_p2), 257024  }
   0x8   : > { %6199 = vmatprep.subr.bf16.mxu1 (!%p138_p2), %v6792_v2  ;;  %6343 = vmatprep.subr.bf16.mxu0 (!%p138_p2), %v6793_v3  ;;  %vm6967_vm3 = vmor (!%p138_p2), %vm240_vm0, %vm241_vm2 }
   0x9   : > { %vm7154_vm6 = vmor (!%p138_p2), %vm1331_vm4, %vm1332_vm5 }
   0xb   : > { %6200 = vmatpush3.bf16.msra.mxu1 (!%p138_p2), %v6792_v2  ;;  %6344 = vmatpush3.bf16.msra.mxu0 (!%p138_p2), %v6793_v3 }
   0xc   : > { %6233 = vmatprep.subr.bf16.mxu1 (!%p138_p2), %v6940_v4  ;;  %6377 = vmatprep.subr.bf16.mxu0 (!%p138_p2), %v6950_v5 }
   0xd   : > { %s8586_s13 = smov (!%p161_p3, %s5349_s13), 1 }
   0xe   : > { %s6781_s22 = smul.u32 264, %s8586_s13  ;;  %s6002_s10 = sshll.u32 %s8586_s13, 7 }
   0xf   : > { %s8467_s15 = scalar_lea.vmem %s8574_s3, %s6002_s10 }
  0x10   : > { %s6945_s27 = scalar_lea.vmem %s8571_s0, %s6781_s22 }
  0x11   : > { %v173_v6 = vld [vmem:[%s6945_s27 + $0x4] sm:$0xf]  ;;  %v208_v7 = vld [vmem:[%s6945_s27] sm:$0xe]  ;;  %v209_v8 = vld [vmem:[%s6945_s27 + $0x8] sm:$0x3] }
  0x12   : > { %v244_v9 = vshrl.u32 %v208_v7, 16  ;;  %v247_v10 = vshll.u32 %v208_v7, 16  ;;  %v253_v11 = vshrl.u32 %v173_v6, 16  ;;  %v256_v12 = vshll.u32 %v173_v6, 16  ;;  %v5553_v13 = vld [vmem:[%s6945_s27 + $0x24] sm:$0xe] }
  0x13   : > { %v263_v14 = vshrl.u32 %v209_v8, 16  ;;  %v266_v15 = vshll.u32 %v209_v8, 16  ;;  %v6958_v16 = vld [vmem:[%s6945_s27 + $0x28] sm:$0xf]  ;;  %v5555_v21 = vld [vmem:[%s6945_s27 + $0x2c] sm:$0x3] }
  0x14   : > { %v246_v17 = vrot.slane %v244_v9, 5  ;;  %v249_v18 = vrot.slane %v247_v10, 6  ;;  %v255_v19 = vrot.slane %v253_v11, 5  ;;  %v258_v20 = vrot.slane %v256_v12, 6  ;;  %v210_v30 = vld [vmem:[%s6945_s27 + $0xc] sm:$0xe] }
  0x15   : > { %v265_v22 = vrot.slane %v263_v14, 5  ;;  %v268_v23 = vrot.slane %v266_v15, 6  ;;  %v2172_v24 = vshrl.u32 %v5553_v13, 16  ;;  %v2175_v25 = vshll.u32 %v5553_v13, 16  ;;  %v175_v43 = vld [vmem:[%s6945_s27 + $0x10] sm:$0xf] }
  0x16   : > { %v250_v26 = vor.u32 %v249_v18, %v246_v17  ;;  %v259_v27 = vor.u32 %v258_v20, %v255_v19  ;;  %v2181_v28 = vshrl.u32 %v6958_v16, 16  ;;  %v2184_v29 = vshll.u32 %v6958_v16, 16  ;;  %v211_v48 = vld [vmem:[%s6945_s27 + $0x14] sm:$0x3]  ;;  %v5556_v54 = vld [vmem:[%s6945_s27 + $0x30] sm:$0xe] }
  0x17   : > { %v269_v32 = vor.u32 %v268_v23, %v265_v22  ;;  %v2174_v33 = vrot.slane %v2172_v24, 5  ;;  %v2177_v34 = vrot.slane %v2175_v25, 6  ;;  %v2191_v35 = vshrl.u32 %v5555_v21, 16  ;;  %v6982_v2 = vld [vmem:[%s6945_s27 + $0x34] sm:$0xf] }
  0x18   : > { %v251_v36 = vrot.slane %v250_v26, 4  ;;  %v261_v37 = vrot.slane %v259_v27, 4  ;;  %v2183_v38 = vrot.slane %v2181_v28, 5  ;;  %v2186_v39 = vrot.slane %v2184_v29, 6  ;;  %v5558_v9 = vld [vmem:[%s6945_s27 + $0x38] sm:$0x3] }
  0x19   : > { %v2178_v40 = vor.u32 %v2177_v34, %v2174_v33  ;;  %v2193_v41 = vrot.slane %v2191_v35, 5  ;;  %v2194_v42 = vshll.u32 %v5555_v21, 16  ;;  %v272_v44 = vshrl.u32 %v210_v30, 16  ;;  %v212_v20 = vld [vmem:[%s6945_s27 + $0x18] sm:$0xe] }
  0x1a   : > { %v260_v45 = vsel %vm6967_vm3, %v251_v36, %v259_v27  ;;  %v270_v46 = vsel %vm6967_vm3, %v261_v37, %v269_v32  ;;  %v2187_v47 = vor.u32 %v2186_v39, %v2183_v38  ;;  %v275_v49 = vshll.u32 %v210_v30, 16  ;;  %v177_v29 = vld [vmem:[%s6945_s27 + $0x1c] sm:$0xf]  ;;  %v213_v34 = vld [vmem:[%s6945_s27 + $0x20] sm:$0x3] }
  0x1b   : > { %v5361_v50 = vcombine.low %v260_v45, %v270_v46  ;;  %v2179_v51 = vrot.slane %v2178_v40, 4  ;;  %v2196_v52 = vrot.slane %v2194_v42, 6  ;;  %v274_v53 = vrot.slane %v272_v44, 5  ;;  %v5559_v40 = vld [vmem:[%s6945_s27 + $0x3c] sm:$0xe] }
  0x1c   : > { %v2189_v55 = vrot.slane %v2187_v47, 4  ;;  %v277_v56 = vrot.slane %v275_v49, 6  ;;  %v281_v57 = vshrl.u32 %v175_v43, 16  ;;  %v284_v58 = vshll.u32 %v175_v43, 16  ;;  %v7007_v46 = vld [vmem:[%s6945_s27 + $0x40] sm:$0xf] }
  0x1d   : > { %6201 = vmatprep.mubr.msk.bf16.mxu1 %vm756_vm1, %v5361_v50  ;;  %v2188_v59 = vsel %vm6967_vm3, %v2179_v51, %v2187_v47  ;;  %v2197_v60 = vor.u32 %v2196_v52, %v2193_v41  ;;  %v291_v61 = vshrl.u32 %v211_v48, 16  ;;  %v294_v62 = vshll.u32 %v211_v48, 16  ;;  %v6797_v41 = vld [vmem:[%s8572_s1 + $0x8] sm:$0xff]  }
  0x1e   : > { %v278_v63 = vor.u32 %v277_v56, %v274_v53  ;;  %v283_v0 = vrot.slane %v281_v57, 5  ;;  %v286_v1 = vrot.slane %v284_v58, 6  ;;  %v2200_v3 = vshrl.u32 %v5556_v54, 16  ;;  %v5561_v58 = vld [vmem:[%s6945_s27 + $0x44] sm:$0x3] }
  0x1f   : > { %v2198_v6 = vsel %vm6967_vm3, %v2189_v55, %v2197_v60  ;;  %v293_v7 = vrot.slane %v291_v61, 5  ;;  %v296_v8 = vrot.slane %v294_v62, 6  ;;  %v2203_v10 = vshll.u32 %v5556_v54, 16  ;;  %v6800_v60 = vld [vmem:[%s8572_s1 + $0x20] sm:$0xff]  }
  0x20   : > { %v5605_v11 = vcombine.low %v2188_v59, %v2198_v6  ;;  %v279_v12 = vrot.slane %v278_v63, 4  ;;  %v287_v13 = vor.u32 %v286_v1, %v283_v0  ;;  %v2202_v14 = vrot.slane %v2200_v3, 5  ;;  %v6796_v0 = vld [vmem:[%s8572_s1 + $0x58] sm:$0xff]  }
  0x21   : > { %v297_v15 = vor.u32 %v296_v8, %v293_v7  ;;  %v2205_v17 = vrot.slane %v2203_v10, 6  ;;  %v2209_v18 = vshrl.u32 %v6982_v2, 16  ;;  %v2212_v19 = vshll.u32 %v6982_v2, 16  ;;  %v214_v8 = vld [vmem:[%s6945_s27 + $0x24] sm:$0xe] }
  0x22   : > { %6345 = vmatprep.mubr.msk.bf16.mxu0 %vm756_vm1, %v5605_v11  ;;  %v288_v21 = vsel %vm6967_vm3, %v279_v12, %v287_v13  ;;  %v289_v22 = vrot.slane %v287_v13, 4  ;;  %v2219_v23 = vshrl.u32 %v5558_v9, 16  ;;  %v2222_v24 = vshll.u32 %v5558_v9, 16 }
  0x23   : > { %v2206_v25 = vor.u32 %v2205_v17, %v2202_v14  ;;  %v2211_v26 = vrot.slane %v2209_v18, 5  ;;  %v2214_v27 = vrot.slane %v2212_v19, 6  ;;  %v3014_v28 = vrot.slane %v6982_v2, 7  ;;  %v179_v18 = vld [vmem:[%s6945_s27 + $0x28] sm:$0xf] }
  0x24   : > { %v298_v30 = vsel %vm6967_vm3, %v289_v22, %v297_v15  ;;  %v2221_v32 = vrot.slane %v2219_v23, 5  ;;  %v2224_v33 = vrot.slane %v2222_v24, 6  ;;  %v300_v35 = vshrl.u32 %v212_v20, 16  ;;  %v7033_v23 = vld [vmem:[%s8572_s1 + $0x60] sm:$0xff]   ;;  %v6801_v2 = vld [vmem:[%s8572_s1 + $0x68] sm:$0xff]  }
  0x25   : > { %v5362_v36 = vcombine.low %v288_v21, %v298_v30  ;;  %v2207_v37 = vrot.slane %v2206_v25, 4  ;;  %v2215_v38 = vor.u32 %v2214_v27, %v2211_v26  ;;  %v7000_v39 = vrot.slane %v3014_v28, 4  ;;  %v215_v26 = vld [vmem:[%s6945_s27 + $0x2c] sm:$0x3] }
  0x26   : > { %v2225_v42 = vor.u32 %v2224_v33, %v2221_v32  ;;  %v302_v43 = vrot.slane %v300_v35, 5  ;;  %v303_v44 = vshll.u32 %v212_v20, 16  ;;  %v309_v45 = vshrl.u32 %v177_v29, 16 }
  0x27   : > { %6202 = vmatmul.mubr.msk.bf16.vlgmr.msra.gmra.mrb[0].mxu1 %vm756_vm1, %v5362_v36  ;;  %v2216_v47 = vsel %vm6967_vm3, %v2207_v37, %v2215_v38  ;;  %v2217_v48 = vrot.slane %v2215_v38, 4  ;;  %v312_v49 = vshll.u32 %v177_v29, 16  ;;  %v319_v50 = vshrl.u32 %v213_v34, 16  ;;  %v5562_v29 = vld [vmem:[%s6945_s27 + $0x48] sm:$0xe] }
  0x28   : > { %6234 = vmatpush3.bf16.msra.mxu1 %v6940_v4  ;;  %v305_v51 = vrot.slane %v303_v44, 6  ;;  %v311_v52 = vrot.slane %v309_v45, 5  ;;  %v322_v53 = vshll.u32 %v213_v34, 16  ;;  %v2228_v54 = vshrl.u32 %v5559_v40, 16 }
  0x29   : > { %v2226_v55 = vsel %vm6967_vm3, %v2217_v48, %v2225_v42  ;;  %v314_v56 = vrot.slane %v312_v49, 6  ;;  %v321_v57 = vrot.slane %v319_v50, 5  ;;  %v2231_v59 = vshll.u32 %v5559_v40, 16  ;;  %6235 = vmatprep.subr.bf16.mxu1 %v6797_v41  ;;  %v5564_v49 = vld [vmem:[%s6945_s27 + $0x50] sm:$0x3] }
  0x2a   : > { %v5606_v61 = vcombine.low %v2216_v47, %v2226_v55  ;;  %v306_v62 = vor.u32 %v305_v51, %v302_v43  ;;  %v324_v4 = vrot.slane %v322_v53, 6  ;;  %v2230_v63 = vrot.slane %v2228_v54, 5  ;;  %v7043_v43 = vld [vmem:[%s6945_s27 + $0x4c] sm:$0xf] }
  0x2b   : > { %v315_v1 = vor.u32 %v314_v56, %v311_v52  ;;  %v2233_v3 = vrot.slane %v2231_v59, 6  ;;  %v2237_v6 = vshrl.u32 %v7007_v46, 16  ;;  %v2240_v7 = vshll.u32 %v7007_v46, 16  ;;  %v216_v59 = vld [vmem:[%s6945_s27 + $0x30] sm:$0xe] }
  0x2c   : > { %6346 = vmatmul.mubr.msk.bf16.vlgmr.msra.gmra.mrb[0].mxu0 %vm756_vm1, %v5606_v61  ;;  %v307_v9 = vrot.slane %v306_v62, 4  ;;  %v325_v10 = vor.u32 %v324_v4, %v321_v57  ;;  %v2247_v11 = vshrl.u32 %v5561_v58, 16  ;;  %v2250_v12 = vshll.u32 %v5561_v58, 16  ;;  %6236 = vmatpush3.bf16.msra.mxu1 %v6797_v41 }
  0x2d   : > { %6378 = vmatpush3.bf16.msra.mxu0 %v6950_v5  ;;  %v317_v13 = vrot.slane %v315_v1, 4  ;;  %v2234_v14 = vor.u32 %v2233_v3, %v2230_v63  ;;  %v2239_v15 = vrot.slane %v2237_v6, 5  ;;  %v2242_v17 = vrot.slane %v2240_v7, 6  ;;  %6269 = vmatprep.subr.bf16.mxu1 %v6800_v60  ;;  %v181_v63 = vld [vmem:[%s6945_s27 + $0x34] sm:$0xf] }
  0x2e   : > { %v316_v19 = vsel %vm6967_vm3, %v307_v9, %v315_v1  ;;  %v2249_v20 = vrot.slane %v2247_v11, 5  ;;  %v2252_v21 = vrot.slane %v2250_v12, 6  ;;  %v328_v22 = vshrl.u32 %v214_v8, 16  ;;  %6379 = vmatprep.subr.bf16.mxu0 %v6796_v0  ;;  %v217_v7 = vld [vmem:[%s6945_s27 + $0x38] sm:$0x3] }
  0x2f   : > { %v326_v5 = vsel %vm6967_vm3, %v317_v13, %v325_v10  ;;  %v2235_v24 = vrot.slane %v2234_v14, 4  ;;  %v2243_v25 = vor.u32 %v2242_v17, %v2239_v15  ;;  %v331_v27 = vshll.u32 %v214_v8, 16  ;;  %v5565_v12 = vld [vmem:[%s6945_s27 + $0x54] sm:$0xe] }
  0x30   : > { %v5363_v30 = vcombine.low %v316_v19, %v326_v5  ;;  %v2253_v32 = vor.u32 %v2252_v21, %v2249_v20  ;;  %v330_v33 = vrot.slane %v328_v22, 5  ;;  %v337_v34 = vshrl.u32 %v179_v18, 16  ;;  %v7061_v22 = vld [vmem:[%s6945_s27 + $0x58] sm:$0xf] }
  0x31   : > { %v2244_v35 = vsel %vm6967_vm3, %v2235_v24, %v2243_v25  ;;  %v2245_v36 = vrot.slane %v2243_v25, 4  ;;  %v333_v37 = vrot.slane %v331_v27, 6  ;;  %v340_v38 = vshll.u32 %v179_v18, 16  ;;  %6380 = vmatpush3.bf16.msra.mxu0 %v6796_v0  ;;  %v5567_v27 = vld [vmem:[%s6945_s27 + $0x5c] sm:$0x3] }
  0x32   : > { %6205 = vmatprep.mubr.msk.bf16.mxu1 %vm756_vm1, %v5363_v30  ;;  %v339_v40 = vrot.slane %v337_v34, 5  ;;  %v347_v41 = vshrl.u32 %v215_v26, 16  ;;  %v350_v42 = vshll.u32 %v215_v26, 16  ;;  %v2256_v44 = vshrl.u32 %v5562_v29, 16  ;;  %6413 = vmatprep.subr.bf16.mxu0 %v7033_v23 }
  0x33   : > { %v2254_v45 = vsel %vm6967_vm3, %v2245_v36, %v2253_v32  ;;  %v334_v47 = vor.u32 %v333_v37, %v330_v33  ;;  %v342_v48 = vrot.slane %v340_v38, 6  ;;  %v2259_v50 = vshll.u32 %v5562_v29, 16 }
  0x34   : > { %v5607_v51 = vcombine.low %v2244_v35, %v2254_v45  ;;  %v349_v52 = vrot.slane %v347_v41, 5  ;;  %v352_v53 = vrot.slane %v350_v42, 6  ;;  %v2258_v54 = vrot.slane %v2256_v44, 5 }
  0x35   : > { %v335_v55 = vrot.slane %v334_v47, 4  ;;  %v343_v56 = vor.u32 %v342_v48, %v339_v40  ;;  %v2261_v57 = vrot.slane %v2259_v50, 6  ;;  %v2265_v58 = vshrl.u32 %v7043_v43, 16 }
  0x36   : > { %6349 = vmatprep.mubr.msk.bf16.mxu0 %vm756_vm1, %v5607_v51  ;;  %v353_v60 = vor.u32 %v352_v53, %v349_v52  ;;  %v2268_v61 = vshll.u32 %v7043_v43, 16  ;;  %v2275_v62 = vshrl.u32 %v5564_v49, 16  ;;  %v2278_v4 = vshll.u32 %v5564_v49, 16  ;;  %v218_v49 = vld [vmem:[%s6945_s27 + $0x3c] sm:$0xe] }
  0x37   : > { %v344_v0 = vsel %vm6967_vm3, %v335_v55, %v343_v56  ;;  %v345_v1 = vrot.slane %v343_v56, 4  ;;  %v2262_v3 = vor.u32 %v2261_v57, %v2258_v54  ;;  %v2267_v6 = vrot.slane %v2265_v58, 5  ;;  %v183_v54 = vld [vmem:[%s6945_s27 + $0x40] sm:$0xf] }
  0x38   : > { %v2270_v8 = vrot.slane %v2268_v61, 6  ;;  %v2277_v9 = vrot.slane %v2275_v62, 5  ;;  %v2280_v10 = vrot.slane %v2278_v4, 6  ;;  %v356_v11 = vshrl.u32 %v216_v59, 16  ;;  %v219_v61 = vld [vmem:[%s6945_s27 + $0x44] sm:$0x3] }
  0x39   : > { %v354_v13 = vsel %vm6967_vm3, %v345_v1, %v353_v60  ;;  %v2263_v14 = vrot.slane %v2262_v3, 4  ;;  %v359_v15 = vshll.u32 %v216_v59, 16  ;;  %v365_v17 = vshrl.u32 %v181_v63, 16 }
  0x3a   : > { %v5364_v18 = vcombine.low %v344_v0, %v354_v13  ;;  %v2271_v19 = vor.u32 %v2270_v8, %v2267_v6  ;;  %v2281_v20 = vor.u32 %v2280_v10, %v2277_v9  ;;  %v358_v21 = vrot.slane %v356_v11, 5  ;;  %v5568_v10 = vld [vmem:[%s6945_s27 + $0x60] sm:$0xe] }
  0x3b   : > { %v361_v5 = vrot.slane %v359_v15, 6  ;;  %v367_v24 = vrot.slane %v365_v17, 5  ;;  %v368_v25 = vshll.u32 %v181_v63, 16  ;;  %v375_v26 = vshrl.u32 %v217_v7, 16  ;;  %v7081_v15 = vld [vmem:[%s6945_s27 + $0x64] sm:$0xf] }
  0x3c   : > { %6206 = vmatmul.mubr.msk.bf16.gmra.mrb[4].mxu1 %vm756_vm1, %v5364_v18  ;;  %v2272_v29 = vsel %vm6967_vm3, %v2263_v14, %v2271_v19  ;;  %v2273_v30 = vrot.slane %v2271_v19, 4  ;;  %v378_v32 = vshll.u32 %v217_v7, 16  ;;  %v2284_v33 = vshrl.u32 %v5565_v12, 16 }
  0x3d   : > { %v362_v34 = vor.u32 %v361_v5, %v358_v21  ;;  %v370_v35 = vrot.slane %v368_v25, 6  ;;  %v377_v36 = vrot.slane %v375_v26, 5  ;;  %v2287_v37 = vshll.u32 %v5565_v12, 16 }
  0x3e   : > { %v2282_v38 = vsel %vm6967_vm3, %v2273_v30, %v2281_v20  ;;  %v380_v40 = vrot.slane %v378_v32, 6  ;;  %v2286_v41 = vrot.slane %v2284_v33, 5  ;;  %v2293_v42 = vshrl.u32 %v7061_v22, 16 }
  0x3f   : > { %v5608_v44 = vcombine.low %v2272_v29, %v2282_v38  ;;  %v363_v45 = vrot.slane %v362_v34, 4  ;;  %v371_v47 = vor.u32 %v370_v35, %v367_v24  ;;  %v2289_v48 = vrot.slane %v2287_v37, 6  ;;  %v5570_v24 = vld [vmem:[%s6945_s27 + $0x68] sm:$0x3] }
  0x40   : > { %v381_v50 = vor.u32 %v380_v40, %v377_v36  ;;  %v2295_v51 = vrot.slane %v2293_v42, 5  ;;  %v2296_v52 = vshll.u32 %v7061_v22, 16  ;;  %v2303_v53 = vshrl.u32 %v5567_v27, 16  ;;  %v220_v37 = vld [vmem:[%s6945_s27 + $0x48] sm:$0xe] }
  0x41   : > { %6350 = vmatmul.mubr.msk.bf16.gmra.mrb[4].mxu0 %vm756_vm1, %v5608_v44  ;;  %v372_v55 = vsel %vm6967_vm3, %v363_v45, %v371_v47  ;;  %v373_v56 = vrot.slane %v371_v47, 4  ;;  %v2290_v57 = vor.u32 %v2289_v48, %v2286_v41  ;;  %v2306_v58 = vshll.u32 %v5567_v27, 16  ;;  %v185_v44 = vld [vmem:[%s6945_s27 + $0x4c] sm:$0xf] }
  0x42   : > { %v2298_v59 = vrot.slane %v2296_v52, 6  ;;  %v2305_v60 = vrot.slane %v2303_v53, 5  ;;  %v384_v62 = vshrl.u32 %v218_v49, 16  ;;  %v387_v4 = vshll.u32 %v218_v49, 16  ;;  %v221_v52 = vld [vmem:[%s6945_s27 + $0x50] sm:$0x3] }
  0x43   : > { %v382_v63 = vsel %vm6967_vm3, %v373_v56, %v381_v50  ;;  %v2291_v0 = vrot.slane %v2290_v57, 4  ;;  %v2308_v1 = vrot.slane %v2306_v58, 6  ;;  %v393_v3 = vshrl.u32 %v183_v54, 16 }
  0x44   : > { %v5365_v6 = vcombine.low %v372_v55, %v382_v63  ;;  %v2299_v7 = vor.u32 %v2298_v59, %v2295_v51  ;;  %v386_v8 = vrot.slane %v384_v62, 5  ;;  %v389_v9 = vrot.slane %v387_v4, 6  ;;  %v5571_v4 = vld [vmem:[%s6945_s27 + $0x6c] sm:$0xe] }
  0x45   : > { %v2309_v11 = vor.u32 %v2308_v1, %v2305_v60  ;;  %v395_v12 = vrot.slane %v393_v3, 5  ;;  %v396_v13 = vshll.u32 %v183_v54, 16  ;;  %v403_v14 = vshrl.u32 %v219_v61, 16 }
  0x46   : > { %6209 = vmatprep.mubr.msk.bf16.mxu1 %vm756_vm1, %v5365_v6  ;;  %v2300_v17 = vsel %vm6967_vm3, %v2291_v0, %v2299_v7  ;;  %v2301_v18 = vrot.slane %v2299_v7, 4  ;;  %v390_v19 = vor.u32 %v389_v9, %v386_v8  ;;  %v406_v20 = vshll.u32 %v219_v61, 16  ;;  %v7101_v6 = vld [vmem:[%s6945_s27 + $0x70] sm:$0xf] }
  0x47   : > { %v398_v21 = vrot.slane %v396_v13, 6  ;;  %v405_v5 = vrot.slane %v403_v14, 5  ;;  %v2312_v25 = vshrl.u32 %v5568_v10, 16  ;;  %v2315_v26 = vshll.u32 %v5568_v10, 16  ;;  %v5573_v13 = vld [vmem:[%s6945_s27 + $0x74] sm:$0x3] }
  0x48   : > { %v2310_v27 = vsel %vm6967_vm3, %v2301_v18, %v2309_v11  ;;  %v391_v29 = vrot.slane %v390_v19, 4  ;;  %v408_v30 = vrot.slane %v406_v20, 6  ;;  %v2321_v32 = vshrl.u32 %v7081_v15, 16 }
  0x49   : > { %v5609_v33 = vcombine.low %v2300_v17, %v2310_v27  ;;  %v399_v34 = vor.u32 %v398_v21, %v395_v12  ;;  %v2314_v35 = vrot.slane %v2312_v25, 5  ;;  %v2317_v36 = vrot.slane %v2315_v26, 6  ;;  %v222_v27 = vld [vmem:[%s6945_s27 + $0x54] sm:$0xe] }
  0x4a   : > { %v409_v38 = vor.u32 %v408_v30, %v405_v5  ;;  %v2323_v40 = vrot.slane %v2321_v32, 5  ;;  %v2324_v41 = vshll.u32 %v7081_v15, 16  ;;  %v2331_v42 = vshrl.u32 %v5570_v24, 16 }
  0x4b   : > { %6353 = vmatprep.mubr.msk.bf16.mxu0 %vm756_vm1, %v5609_v33  ;;  %v400_v45 = vsel %vm6967_vm3, %v391_v29, %v399_v34  ;;  %v401_v47 = vrot.slane %v399_v34, 4  ;;  %v2318_v48 = vor.u32 %v2317_v36, %v2314_v35  ;;  %v2334_v49 = vshll.u32 %v5570_v24, 16  ;;  %v7113_v34 = vld [vmem:[%s6945_s27 + $0x58] sm:$0xf] }
  0x4c   : > { %v2326_v50 = vrot.slane %v2324_v41, 6  ;;  %v2333_v51 = vrot.slane %v2331_v42, 5  ;;  %v412_v53 = vshrl.u32 %v220_v37, 16  ;;  %v415_v54 = vshll.u32 %v220_v37, 16  ;;  %v223_v42 = vld [vmem:[%s6945_s27 + $0x5c] sm:$0x3] }
  0x4d   : > { %v410_v55 = vsel %vm6967_vm3, %v401_v47, %v409_v38  ;;  %v2319_v56 = vrot.slane %v2318_v48, 4  ;;  %v2336_v57 = vrot.slane %v2334_v49, 6  ;;  %v421_v58 = vshrl.u32 %v185_v44, 16 }
  0x4e   : > { %v5366_v59 = vcombine.low %v400_v45, %v410_v55  ;;  %v2327_v60 = vor.u32 %v2326_v50, %v2323_v40  ;;  %v414_v61 = vrot.slane %v412_v53, 5  ;;  %v417_v62 = vrot.slane %v415_v54, 6 }
  0x4f   : > { %v2337_v63 = vor.u32 %v2336_v57, %v2333_v51  ;;  %v423_v0 = vrot.slane %v421_v58, 5  ;;  %v424_v1 = vshll.u32 %v185_v44, 16  ;;  %v431_v3 = vshrl.u32 %v221_v52, 16  ;;  %v5574_v51 = vld [vmem:[%s6945_s27 + $0x78] sm:$0xe] }
  0x50   : > { %6210 = vmatmul.mubr.msk.bf16.gmra.mrb[8].mxu1 %vm756_vm1, %v5366_v59  ;;  %v2328_v7 = vsel %vm6967_vm3, %v2319_v56, %v2327_v60  ;;  %v2329_v8 = vrot.slane %v2327_v60, 4  ;;  %v418_v9 = vor.u32 %v417_v62, %v414_v61  ;;  %v434_v10 = vshll.u32 %v221_v52, 16  ;;  %v7125_v60 = vld [vmem:[%s6945_s27 + $0x7c] sm:$0xf] }
  0x51   : > { %v426_v11 = vrot.slane %v424_v1, 6  ;;  %v433_v12 = vrot.slane %v431_v3, 5  ;;  %v2340_v14 = vshrl.u32 %v5571_v4, 16  ;;  %v2343_v17 = vshll.u32 %v5571_v4, 16 }
  0x52   : > { %v2338_v18 = vsel %vm6967_vm3, %v2329_v8, %v2337_v63  ;;  %v419_v19 = vrot.slane %v418_v9, 4  ;;  %v436_v20 = vrot.slane %v434_v10, 6  ;;  %v2349_v21 = vshrl.u32 %v7101_v6, 16 }
  0x53   : > { %v5610_v5 = vcombine.low %v2328_v7, %v2338_v18  ;;  %v427_v24 = vor.u32 %v426_v11, %v423_v0  ;;  %v2342_v25 = vrot.slane %v2340_v14, 5  ;;  %v2345_v26 = vrot.slane %v2343_v17, 6  ;;  %v5576_v0 = vld [vmem:[%s6945_s27 + $0x80] sm:$0x3] }
  0x54   : > { %v437_v29 = vor.u32 %v436_v20, %v433_v12  ;;  %v2351_v30 = vrot.slane %v2349_v21, 5  ;;  %v2352_v32 = vshll.u32 %v7101_v6, 16  ;;  %v2359_v33 = vshrl.u32 %v5573_v13, 16 }
  0x55   : > { %6354 = vmatmul.mubr.msk.bf16.gmra.mrb[8].mxu0 %vm756_vm1, %v5610_v5  ;;  %v428_v35 = vsel %vm6967_vm3, %v419_v19, %v427_v24  ;;  %v429_v36 = vrot.slane %v427_v24, 4  ;;  %v2346_v37 = vor.u32 %v2345_v26, %v2342_v25  ;;  %v2362_v38 = vshll.u32 %v5573_v13, 16  ;;  %v224_v19 = vld [vmem:[%s6945_s27 + $0x60] sm:$0xe]  ;;  %v7137_v25 = vld [vmem:[%s6945_s27 + $0x64] sm:$0xf] }
  0x56   : > { %v2354_v40 = vrot.slane %v2352_v32, 6  ;;  %v2361_v41 = vrot.slane %v2359_v33, 5  ;;  %v440_v44 = vshrl.u32 %v222_v27, 16  ;;  %v443_v45 = vshll.u32 %v222_v27, 16 }
  0x57   : > { %v438_v47 = vsel %vm6967_vm3, %v429_v36, %v437_v29  ;;  %v2347_v48 = vrot.slane %v2346_v37, 4  ;;  %v2364_v49 = vrot.slane %v2362_v38, 6  ;;  %v449_v50 = vshrl.u32 %v7113_v34, 16 }
  0x58   : > { %v5367_v52 = vcombine.low %v428_v35, %v438_v47  ;;  %v2355_v53 = vor.u32 %v2354_v40, %v2351_v30  ;;  %v442_v54 = vrot.slane %v440_v44, 5  ;;  %v445_v55 = vrot.slane %v443_v45, 6  ;;  %v225_v35 = vld [vmem:[%s6945_s27 + $0x68] sm:$0x3] }
  0x59   : > { %v2365_v56 = vor.u32 %v2364_v49, %v2361_v41  ;;  %v451_v57 = vrot.slane %v449_v50, 5  ;;  %v452_v58 = vshll.u32 %v7113_v34, 16  ;;  %v459_v59 = vshrl.u32 %v223_v42, 16  ;;  %v5639_v49 = vld [vmem:[%s6945_s27 + $0x24] sm:$0x8] }
  0x5a   : > { %6213 = vmatprep.mubr.msk.bf16.mxu1 %vm756_vm1, %v5367_v52  ;;  %v2356_v61 = vsel %vm6967_vm3, %v2347_v48, %v2355_v53  ;;  %v2357_v62 = vrot.slane %v2355_v53, 4  ;;  %v446_v4 = vor.u32 %v445_v55, %v442_v54  ;;  %v462_v63 = vshll.u32 %v223_v42, 16  ;;  %v5640_v54 = vld [vmem:[%s6945_s27 + $0x2c] sm:$0x7] }
  0x5b   : > { %v454_v1 = vrot.slane %v452_v58, 6  ;;  %v461_v3 = vrot.slane %v459_v59, 5  ;;  %v2368_v7 = vshrl.u32 %v5574_v51, 16  ;;  %v2371_v8 = vshll.u32 %v5574_v51, 16 }
  0x5c   : > { %v2366_v9 = vsel %vm6967_vm3, %v2357_v62, %v2365_v56  ;;  %v447_v10 = vrot.slane %v446_v4, 4  ;;  %v464_v11 = vrot.slane %v462_v63, 6  ;;  %v2377_v12 = vshrl.u32 %v7125_v60, 16 }
  0x5d   : > { %v5611_v13 = vcombine.low %v2356_v61, %v2366_v9  ;;  %v455_v14 = vor.u32 %v454_v1, %v451_v57  ;;  %v2370_v17 = vrot.slane %v2368_v7, 5  ;;  %v2373_v18 = vrot.slane %v2371_v8, 6  ;;  %v7159_v61 = vld [vmem:[%s6945_s27 + $0x70] sm:$0xf]  ;;  %v226_v1 = vld [vmem:[%s6945_s27 + $0x6c] sm:$0xe] }
  0x5e   : > { %v465_v20 = vor.u32 %v464_v11, %v461_v3  ;;  %v2379_v21 = vrot.slane %v2377_v12, 5  ;;  %v2380_v5 = vshll.u32 %v7125_v60, 16  ;;  %v2387_v24 = vshrl.u32 %v5576_v0, 16 }
  0x5f   : > { %6357 = vmatprep.mubr.msk.bf16.mxu0 %vm756_vm1, %v5611_v13  ;;  %v456_v26 = vsel %vm6967_vm3, %v447_v10, %v455_v14  ;;  %v457_v27 = vrot.slane %v455_v14, 4  ;;  %v2374_v29 = vor.u32 %v2373_v18, %v2370_v17  ;;  %v2390_v30 = vshll.u32 %v5576_v0, 16  ;;  %v227_v17 = vld [vmem:[%s6945_s27 + $0x74] sm:$0x3] }
  0x60   : > { %v2382_v32 = vrot.slane %v2380_v5, 6  ;;  %v2389_v33 = vrot.slane %v2387_v24, 5  ;;  %v468_v36 = vshrl.u32 %v224_v19, 16  ;;  %v471_v37 = vshll.u32 %v224_v19, 16 }
  0x61   : > { %v466_v38 = vsel %vm6967_vm3, %v457_v27, %v465_v20  ;;  %v2375_v40 = vrot.slane %v2374_v29, 4  ;;  %v2392_v41 = vrot.slane %v2390_v30, 6  ;;  %v477_v42 = vshrl.u32 %v7137_v25, 16  ;;  %v5642_v27 = vld [vmem:[%s6945_s27 + $0x38] sm:$0x7] }
  0x62   : > { %v5368_v44 = vcombine.low %v456_v26, %v466_v38  ;;  %v2383_v45 = vor.u32 %v2382_v32, %v2379_v21  ;;  %v470_v47 = vrot.slane %v468_v36, 5  ;;  %v473_v48 = vrot.slane %v471_v37, 6  ;;  %v5641_v26 = vld [vmem:[%s6945_s27 + $0x30] sm:$0x8] }
  0x63   : > { %v2393_v50 = vor.u32 %v2392_v41, %v2389_v33  ;;  %v479_v51 = vrot.slane %v477_v42, 5  ;;  %v480_v52 = vshll.u32 %v7137_v25, 16  ;;  %v487_v53 = vshrl.u32 %v225_v35, 16 }
  0x64   : > { %6214 = vmatmul.mubr.msk.bf16.gmra.mrb[12].mxu1 %vm756_vm1, %v5368_v44  ;;  %v2384_v55 = vsel %vm6967_vm3, %v2375_v40, %v2383_v45  ;;  %v2385_v56 = vrot.slane %v2383_v45, 4  ;;  %v474_v57 = vor.u32 %v473_v48, %v470_v47  ;;  %v490_v58 = vshll.u32 %v225_v35, 16  ;;  %v228_v35 = vld [vmem:[%s6945_s27 + $0x78] sm:$0xe] }
  0x65   : > { %v482_v62 = vrot.slane %v480_v52, 6  ;;  %v489_v4 = vrot.slane %v487_v53, 5  ;;  %v5671_v63 = vrot.slane %v5639_v49, 11  ;;  %v3007_v0 = vrot.slane %v6958_v16, 7 }
  0x66   : > { %v2394_v3 = vsel %vm6967_vm3, %v2385_v56, %v2393_v50  ;;  %v475_v7 = vrot.slane %v474_v57, 4  ;;  %v492_v8 = vrot.slane %v490_v58, 6  ;;  %v3010_v9 = vrot.slane %v5640_v54, 7  ;;  %v7182_v50 = vld [vmem:[%s6945_s27 + $0x7c] sm:$0xf] }
  0x67   : > { %v5612_v10 = vcombine.low %v2384_v55, %v2394_v3  ;;  %v483_v11 = vor.u32 %v482_v62, %v479_v51  ;;  %v3008_v12 = vsel %vm7154_vm6, %v5671_v63, %v3007_v0  ;;  %v3009_v13 = vrot.slane %v3007_v0, 4  ;;  %v229_v55 = vld [vmem:[%s6945_s27 + $0x80] sm:$0x3]  ;;  %v5643_v57 = vld [vmem:[%s6945_s27 + $0x3c] sm:$0x8] }
  0x68   : > { %v493_v14 = vor.u32 %v492_v8, %v489_v4  ;;  %v496_v18 = vshrl.u32 %v226_v1, 16  ;;  %v499_v16 = vshll.u32 %v226_v1, 16  ;;  %v505_v19 = vshrl.u32 %v7159_v61, 16  ;;  %v5644_v0 = vld [vmem:[%s6945_s27 + $0x44] sm:$0x7] }
  0x69   : > { %6358 = vmatmul.mubr.msk.bf16.gmra.mrb[12].mxu0 %vm756_vm1, %v5612_v10  ;;  %v484_v20 = vsel %vm6967_vm3, %v475_v7, %v483_v11  ;;  %v485_v21 = vrot.slane %v483_v11, 4  ;;  %v3011_v5 = vsel %vm7154_vm6, %v3009_v13, %v3010_v9  ;;  %v508_v24 = vshll.u32 %v7159_v61, 16  ;;  %v7203_v7 = vld [vmem:[%s6945_s27 + $0x88] sm:$0xf]  ;;  %v230_v8 = vld [vmem:[%s6945_s27 + $0x84] sm:$0xe] }
  0x6a   : > { %v5691_v29 = vcombine.low %v3008_v12, %v3011_v5  ;;  %v498_v30 = vrot.slane %v496_v18, 5  ;;  %v501_v32 = vrot.slane %v499_v16, 6  ;;  %v507_v33 = vrot.slane %v505_v19, 5  ;;  %v7212_v13 = vld [vmem:[%s8572_s1 + $0x70] sm:$0xff]   ;;  %v231_v19 = vld [vmem:[%s6945_s27 + $0x8c] sm:$0x3] }
  0x6b   : > { %v494_v36 = vsel %vm6967_vm3, %v485_v21, %v493_v14  ;;  %v510_v37 = vrot.slane %v508_v24, 6  ;;  %v515_v38 = vshrl.u32 %v227_v17, 16  ;;  %v518_v40 = vshll.u32 %v227_v17, 16 }
  0x6c   : > { %v5369_v41 = vcombine.low %v484_v20, %v494_v36  ;;  %6381 = vmatprep.mubr.msk.bf16.mxu0 %vm756_vm1, %v5691_v29  ;;  %v502_v42 = vor.u32 %v501_v32, %v498_v30  ;;  %v5672_v44 = vrot.slane %v5641_v26, 11  ;;  %v3017_v45 = vrot.slane %v5642_v27, 7  ;;  %v5645_v32 = vld [vmem:[%s6945_s27 + $0x48] sm:$0x8] }
  0x6d   : > { %v511_v47 = vor.u32 %v510_v37, %v507_v33  ;;  %v517_v48 = vrot.slane %v515_v38, 5  ;;  %v520_v49 = vrot.slane %v518_v40, 6  ;;  %v524_v51 = vshrl.u32 %v228_v35, 16  ;;  %v5646_v37 = vld [vmem:[%s6945_s27 + $0x50] sm:$0x7] }
  0x6e   : > { %6217 = vmatprep.mubr.msk.bf16.mxu1 %vm756_vm1, %v5369_v41  ;;  %v503_v52 = vrot.slane %v502_v42, 4  ;;  %v3015_v53 = vsel %vm7154_vm6, %v5672_v44, %v3014_v28  ;;  %v3018_v54 = vsel %vm7154_vm6, %v7000_v39, %v3017_v45  ;;  %v527_v56 = vshll.u32 %v228_v35, 16  ;;  %v7226_v42 = vld [vmem:[%s6945_s27 + $0x94] sm:$0xf] }
  0x6f   : > { %v513_v58 = vrot.slane %v511_v47, 4  ;;  %v521_v62 = vor.u32 %v520_v49, %v517_v48  ;;  %v5692_v4 = vcombine.low %v3015_v53, %v3018_v54  ;;  %v526_v63 = vrot.slane %v524_v51, 5  ;;  %v232_v54 = vld [vmem:[%s6945_s27 + $0x90] sm:$0xe] }
  0x70   : > { %v512_v28 = vsel %vm6967_vm3, %v503_v52, %v511_v47  ;;  %v529_v1 = vrot.slane %v527_v56, 6  ;;  %v533_v3 = vshrl.u32 %v7182_v50, 16  ;;  %v536_v39 = vshll.u32 %v7182_v50, 16 }
  0x71   : > { %v522_v9 = vsel %vm6967_vm3, %v513_v58, %v521_v62  ;;  %6382 = vmatmul.mubr.msk.bf16.vlgmr.msra.gmra.mrb[0].mxu0 %vm756_vm1, %v5692_v4  ;;  %v543_v10 = vshrl.u32 %v229_v55, 16  ;;  %v546_v11 = vshll.u32 %v229_v55, 16  ;;  %v5673_v12 = vrot.slane %v5643_v57, 11 }
  0x72   : > { %v5370_v14 = vcombine.low %v512_v28, %v522_v9  ;;  %6414 = vmatpush3.bf16.msra.mxu0 %v7033_v23  ;;  %v530_v17 = vor.u32 %v529_v1, %v526_v63  ;;  %v535_v18 = vrot.slane %v533_v3, 5  ;;  %v538_v16 = vrot.slane %v536_v39, 6 }
  0x73   : > { %v545_v20 = vrot.slane %v543_v10, 5  ;;  %v548_v21 = vrot.slane %v546_v11, 6  ;;  %v3021_v5 = vrot.slane %v7007_v46, 7  ;;  %v3024_v24 = vrot.slane %v5644_v0, 7  ;;  %6415 = vmatprep.subr.bf16.mxu0 %v6801_v2 }
  0x74   : > { %6218 = vmatmul.mubr.msk.bf16.gmra.mrb[16].mxu1 %vm756_vm1, %v5370_v14  ;;  %v531_v26 = vrot.slane %v530_v17, 4  ;;  %v539_v27 = vor.u32 %v538_v16, %v535_v18  ;;  %v552_v29 = vshrl.u32 %v230_v8, 16  ;;  %v555_v30 = vshll.u32 %v230_v8, 16  ;;  %v5647_v8 = vld [vmem:[%s6945_s27 + $0x54] sm:$0x8] }
  0x75   : > { %v549_v23 = vor.u32 %v548_v21, %v545_v20  ;;  %v3022_v33 = vsel %vm7154_vm6, %v5673_v12, %v3021_v5  ;;  %v3023_v35 = vrot.slane %v3021_v5, 4  ;;  %v561_v36 = vshrl.u32 %v7203_v7, 16 }
  0x76   : > { %v540_v46 = vsel %vm6967_vm3, %v531_v26, %v539_v27  ;;  %v541_v38 = vrot.slane %v539_v27, 4  ;;  %v554_v40 = vrot.slane %v552_v29, 5  ;;  %v557_v41 = vrot.slane %v555_v30, 6  ;;  %6416 = vmatpush3.bf16.msra.mxu0 %v6801_v2  ;;  %v233_v2 = vld [vmem:[%s6945_s27 + $0x98] sm:$0x3] }
  0x77   : > { %v3025_v44 = vsel %vm7154_vm6, %v3023_v35, %v3024_v24  ;;  %v563_v45 = vrot.slane %v561_v36, 5  ;;  %v564_v47 = vshll.u32 %v7203_v7, 16  ;;  %v571_v48 = vshrl.u32 %v231_v19, 16  ;;  %6449 = vmatprep.subr.bf16.mxu0 %v7212_v13 }
  0x78   : > { %v550_v49 = vsel %vm6967_vm3, %v541_v38, %v549_v23  ;;  %v5693_v51 = vcombine.low %v3022_v33, %v3025_v44  ;;  %v558_v52 = vor.u32 %v557_v41, %v554_v40  ;;  %v574_v53 = vshll.u32 %v231_v19, 16  ;;  %v7248_v19 = vld [vmem:[%s6945_s27 + $0xa0] sm:$0xf] }
  0x79   : > { %v5371_v55 = vcombine.low %v540_v46, %v550_v49  ;;  %v566_v56 = vrot.slane %v564_v47, 6  ;;  %v573_v57 = vrot.slane %v571_v48, 5  ;;  %v5674_v58 = vrot.slane %v5645_v32, 11  ;;  %v234_v32 = vld [vmem:[%s6945_s27 + $0x9c] sm:$0xe] }
  0x7a   : > { %6385 = vmatprep.mubr.msk.bf16.mxu0 %vm756_vm1, %v5693_v51  ;;  %v559_v62 = vrot.slane %v558_v52, 4  ;;  %v576_v4 = vrot.slane %v574_v53, 6  ;;  %v3028_v63 = vrot.slane %v7043_v43, 7  ;;  %v3031_v0 = vrot.slane %v5646_v37, 7  ;;  %v5648_v43 = vld [vmem:[%s6945_s27 + $0x5c] sm:$0x7] }
  0x7b   : > { %6221 = vmatprep.mubr.msk.bf16.mxu1 %vm756_vm1, %v5371_v55  ;;  %v567_v28 = vor.u32 %v566_v56, %v563_v45  ;;  %v580_v1 = vshrl.u32 %v232_v54, 16  ;;  %v583_v3 = vshll.u32 %v232_v54, 16  ;;  %v589_v39 = vshrl.u32 %v7226_v42, 16  ;;  %v235_v37 = vld [vmem:[%s6945_s27 + $0xa4] sm:$0x3] }
  0x7c   : > { %v577_v9 = vor.u32 %v576_v4, %v573_v57  ;;  %v3029_v10 = vsel %vm7154_vm6, %v5674_v58, %v3028_v63  ;;  %v3030_v11 = vrot.slane %v3028_v63, 4  ;;  %v592_v12 = vshll.u32 %v7226_v42, 16  ;;  %v5649_v49 = vld [vmem:[%s6945_s27 + $0x60] sm:$0x8] }
  0x7d   : > { %v568_v14 = vsel %vm6967_vm3, %v559_v62, %v567_v28  ;;  %v569_v17 = vrot.slane %v567_v28, 4  ;;  %v582_v18 = vrot.slane %v580_v1, 5  ;;  %v585_v16 = vrot.slane %v583_v3, 6  ;;  %v236_v28 = vld [vmem:[%s6945_s27 + $0xa8] sm:$0xe] }
  0x7e   : > { %v3032_v20 = vsel %vm7154_vm6, %v3030_v11, %v3031_v0  ;;  %v591_v21 = vrot.slane %v589_v39, 5  ;;  %v594_v5 = vrot.slane %v592_v12, 6  ;;  %v599_v24 = vshrl.u32 %v233_v2, 16 }
  0x7f   : > { %v578_v26 = vsel %vm6967_vm3, %v569_v17, %v577_v9  ;;  %v5694_v27 = vcombine.low %v3029_v10, %v3032_v20  ;;  %v586_v29 = vor.u32 %v585_v16, %v582_v18  ;;  %v602_v30 = vshll.u32 %v233_v2, 16  ;;  %v7272_v2 = vld [vmem:[%s6945_s27 + $0xac] sm:$0xf]  ;;  %v237_v9 = vld [vmem:[%s6945_s27 + $0xb0] sm:$0x3] }
  0x80   : > { %v5372_v23 = vcombine.low %v568_v14, %v578_v26  ;;  %v595_v33 = vor.u32 %v594_v5, %v591_v21  ;;  %v601_v35 = vrot.slane %v599_v24, 5  ;;  %v5675_v36 = vrot.slane %v5647_v8, 11  ;;  %v5651_v26 = vld [vmem:[%s6945_s27 + $0x6c] sm:$0x8] }
  0x81   : > { %6386 = vmatmul.mubr.msk.bf16.gmra.mrb[4].mxu0 %vm756_vm1, %v5694_v27  ;;  %v587_v46 = vrot.slane %v586_v29, 4  ;;  %v604_v38 = vrot.slane %v602_v30, 6  ;;  %v3035_v40 = vrot.slane %v7061_v22, 7  ;;  %v3038_v41 = vrot.slane %v5648_v43, 7  ;;  %v5650_v22 = vld [vmem:[%s6945_s27 + $0x68] sm:$0x7] }
  0x82   : > { %6222 = vmatmul.mubr.msk.bf16.gmra.mrb[20].mxu1 %vm756_vm1, %v5372_v23  ;;  %v597_v44 = vrot.slane %v595_v33, 4  ;;  %v608_v45 = vshrl.u32 %v234_v32, 16  ;;  %v611_v47 = vshll.u32 %v234_v32, 16  ;;  %v617_v48 = vshrl.u32 %v7248_v19, 16  ;;  %v5652_v32 = vld [vmem:[%s6945_s27 + $0x74] sm:$0x7] }
  0x83   : > { %v596_v51 = vsel %vm6967_vm3, %v587_v46, %v595_v33  ;;  %v605_v52 = vor.u32 %v604_v38, %v601_v35  ;;  %v3036_v53 = vsel %vm7154_vm6, %v5675_v36, %v3035_v40  ;;  %v3037_v54 = vrot.slane %v3035_v40, 4 }
  0x84   : > { %v610_v55 = vrot.slane %v608_v45, 5  ;;  %v613_v56 = vrot.slane %v611_v47, 6  ;;  %v619_v57 = vrot.slane %v617_v48, 5  ;;  %v620_v58 = vshll.u32 %v7248_v19, 16 }
  0x85   : > { %v606_v62 = vsel %vm6967_vm3, %v597_v44, %v605_v52  ;;  %v3039_v4 = vsel %vm7154_vm6, %v3037_v54, %v3038_v41  ;;  %v627_v63 = vshrl.u32 %v235_v37, 16  ;;  %v630_v0 = vshll.u32 %v235_v37, 16  ;;  %v238_v37 = vld [vmem:[%s6945_s27 + $0xb4] sm:$0xe] }
  0x86   : > { %v5373_v1 = vcombine.low %v596_v51, %v606_v62  ;;  %v5695_v3 = vcombine.low %v3036_v53, %v3039_v4  ;;  %v614_v39 = vor.u32 %v613_v56, %v610_v55  ;;  %v622_v8 = vrot.slane %v620_v58, 6  ;;  %v239_v51 = vld [vmem:[%s6945_s27 + $0xbc] sm:$0x3] }
  0x87   : > { %v629_v10 = vrot.slane %v627_v63, 5  ;;  %v632_v11 = vrot.slane %v630_v0, 6  ;;  %v5676_v12 = vrot.slane %v5649_v49, 11  ;;  %v3042_v43 = vrot.slane %v7081_v15, 7  ;;  %v7293_v49 = vld [vmem:[%s6945_s27 + $0xb8] sm:$0xf] }
  0x88   : > { %6225 = vmatprep.mubr.msk.bf16.mxu1 %vm756_vm1, %v5373_v1  ;;  %6389 = vmatprep.mubr.msk.bf16.mxu0 %vm756_vm1, %v5695_v3  ;;  %v615_v14 = vrot.slane %v614_v39, 4  ;;  %v623_v17 = vor.u32 %v622_v8, %v619_v57  ;;  %v3045_v18 = vrot.slane %v5650_v22, 7  ;;  %v636_v16 = vshrl.u32 %v236_v28, 16  ;;  %v5654_v1 = vld [vmem:[%s6945_s27 + $0x80] sm:$0x7] }
  0x89   : > { %v633_v20 = vor.u32 %v632_v11, %v629_v10  ;;  %v3043_v21 = vsel %vm7154_vm6, %v5676_v12, %v3042_v43  ;;  %v3044_v5 = vrot.slane %v3042_v43, 4  ;;  %v639_v24 = vshll.u32 %v236_v28, 16  ;;  %v5653_v28 = vld [vmem:[%s6945_s27 + $0x78] sm:$0x8] }
  0x8a   : > { %v624_v15 = vsel %vm6967_vm3, %v615_v14, %v623_v17  ;;  %v625_v27 = vrot.slane %v623_v17, 4  ;;  %v638_v29 = vrot.slane %v636_v16, 5  ;;  %v645_v30 = vshrl.u32 %v7272_v2, 16 }
  0x8b   : > { %v3046_v23 = vsel %vm7154_vm6, %v3044_v5, %v3045_v18  ;;  %v641_v33 = vrot.slane %v639_v24, 6  ;;  %v648_v35 = vshll.u32 %v7272_v2, 16  ;;  %v655_v36 = vshrl.u32 %v237_v9, 16 }
  0x8c   : > { %v634_v46 = vsel %vm6967_vm3, %v625_v27, %v633_v20  ;;  %v5696_v38 = vcombine.low %v3043_v21, %v3046_v23  ;;  %v647_v40 = vrot.slane %v645_v30, 5  ;;  %v658_v41 = vshll.u32 %v237_v9, 16  ;;  %v5578_v9 = vld [vmem:[%s6945_s27 + $0x88] sm:$0xf]  ;;  %v5655_v20 = vld [vmem:[%s6945_s27 + $0x84] sm:$0x8] }
  0x8d   : > { %v5374_v44 = vcombine.low %v624_v15, %v634_v46  ;;  %v642_v45 = vor.u32 %v641_v33, %v638_v29  ;;  %v650_v47 = vrot.slane %v648_v35, 6  ;;  %v657_v48 = vrot.slane %v655_v36, 5  ;;  %v5656_v21 = vld [vmem:[%s6945_s27 + $0x8c] sm:$0x7]  ;;  %v172_v33 = vld [vmem:[%s6945_s27] sm:$0xf] }
  0x8e   : > { %6390 = vmatmul.mubr.msk.bf16.gmra.mrb[8].mxu0 %vm756_vm1, %v5696_v38  ;;  %v660_v52 = vrot.slane %v658_v41, 6  ;;  %v5677_v53 = vrot.slane %v5651_v26, 11  ;;  %v3049_v54 = vrot.slane %v7101_v6, 7  ;;  %v3052_v22 = vrot.slane %v5652_v32, 7 }
  0x8f   : > { %6226 = vmatmul.mubr.msk.bf16.gmra.mrb[24].mxu1 %vm756_vm1, %v5374_v44  ;;  %v643_v55 = vrot.slane %v642_v45, 4  ;;  %v651_v56 = vor.u32 %v650_v47, %v647_v40  ;;  %v664_v57 = vshrl.u32 %v238_v37, 16  ;;  %v667_v58 = vshll.u32 %v238_v37, 16  ;;  %v5657_v37 = vld [vmem:[%s6945_s27 + $0x90] sm:$0x8] }
  0x90   : > { %v661_v62 = vor.u32 %v660_v52, %v657_v48  ;;  %v3050_v4 = vsel %vm7154_vm6, %v5677_v53, %v3049_v54  ;;  %v3051_v63 = vrot.slane %v3049_v54, 4  ;;  %v673_v0 = vshrl.u32 %v7293_v49, 16  ;;  %v5581_v48 = vld [vmem:[%s6945_s27 + $0x94] sm:$0xf]  ;;  %v7330_v53 = vld [vmem:[%s6945_s27 + $0x4] sm:$0xf] }
  0x91   : > { %v652_v6 = vsel %vm6967_vm3, %v643_v55, %v651_v56  ;;  %v653_v3 = vrot.slane %v651_v56, 4  ;;  %v666_v39 = vrot.slane %v664_v57, 5  ;;  %v669_v8 = vrot.slane %v667_v58, 6 }
  0x92   : > { %v3053_v10 = vsel %vm7154_vm6, %v3051_v63, %v3052_v22  ;;  %v675_v11 = vrot.slane %v673_v0, 5  ;;  %v676_v12 = vshll.u32 %v7293_v49, 16  ;;  %v683_v43 = vshrl.u32 %v239_v51, 16  ;;  %v5659_v22 = vld [vmem:[%s6945_s27 + $0x9c] sm:$0x8] }
  0x93   : > { %v662_v14 = vsel %vm6967_vm3, %v653_v3, %v661_v62  ;;  %v5697_v17 = vcombine.low %v3050_v4, %v3053_v10  ;;  %v670_v18 = vor.u32 %v669_v8, %v666_v39  ;;  %v686_v16 = vshll.u32 %v239_v51, 16  ;;  %v5658_v51 = vld [vmem:[%s6945_s27 + $0x98] sm:$0x7]  ;;  %v5584_v62 = vld [vmem:[%s6945_s27 + $0xa0] sm:$0xf] }
  0x94   : > { %v5375_v5 = vcombine.low %v652_v6, %v662_v14  ;;  %v678_v24 = vrot.slane %v676_v12, 6  ;;  %v685_v26 = vrot.slane %v683_v43, 5  ;;  %v5678_v15 = vrot.slane %v5653_v28, 11  ;;  %v5660_v4 = vld [vmem:[%s6945_s27 + $0xa4] sm:$0x7] }
  0x95   : > { %6393 = vmatprep.mubr.msk.bf16.mxu0 %vm756_vm1, %v5697_v17  ;;  %v671_v27 = vrot.slane %v670_v18, 4  ;;  %v688_v29 = vrot.slane %v686_v16, 6  ;;  %v3056_v30 = vrot.slane %v7125_v60, 7  ;;  %v3059_v32 = vrot.slane %v5654_v1, 7  ;;  %v174_v28 = vld [vmem:[%s6945_s27 + $0xc] sm:$0xf] }
  0x96   : > { %6229 = vmatprep.mubr.msk.bf16.mxu1 %vm756_vm1, %v5375_v5  ;;  %v679_v23 = vor.u32 %v678_v24, %v675_v11  ;;  %v5679_v35 = vrot.slane %v5655_v20, 11  ;;  %v3063_v36 = vrot.slane %v5578_v9, 7  ;;  %v3066_v41 = vrot.slane %v5656_v21, 7  ;;  %v5587_v1 = vld [vmem:[%s6945_s27 + $0xac] sm:$0xf] }
  0x97   : > { %v689_v46 = vor.u32 %v688_v29, %v685_v26  ;;  %v3057_v38 = vsel %vm7154_vm6, %v5678_v15, %v3056_v30  ;;  %v3058_v40 = vrot.slane %v3056_v30, 4  ;;  %v5395_v54 = vcombine.low %v172_v33, %v7330_v53  ;;  %v5661_v8 = vld [vmem:[%s6945_s27 + $0xa8] sm:$0x8]  ;;  %v176_v9 = vld [vmem:[%s6945_s27 + $0x18] sm:$0xf] }
  0x98   : > { %v680_v60 = vsel %vm6967_vm3, %v671_v27, %v679_v23  ;;  %v681_v44 = vrot.slane %v679_v23, 4  ;;  %v3064_v45 = vsel %vm7154_vm6, %v5679_v35, %v3063_v36  ;;  %v3065_v47 = vrot.slane %v3063_v36, 4  ;;  %v5662_v12 = vld [vmem:[%s6945_s27 + $0xb0] sm:$0x7]  ;;  %v5590_v18 = vld [vmem:[%s6945_s27 + $0xb8] sm:$0xf] }
  0x99   : > { %v3060_v52 = vsel %vm7154_vm6, %v3058_v40, %v3059_v32  ;;  %v5680_v58 = vrot.slane %v5657_v37, 11  ;;  %v3070_v6 = vrot.slane %v5581_v48, 7  ;;  %v3073_v3 = vrot.slane %v5658_v51, 7  ;;  %v5663_v21 = vld [vmem:[%s6945_s27 + $0xb4] sm:$0x8] }
  0x9a   : > { %v690_v55 = vsel %vm6967_vm3, %v681_v44, %v689_v46  ;;  %v5698_v56 = vcombine.low %v3057_v38, %v3060_v52  ;;  %v3067_v57 = vsel %vm7154_vm6, %v3065_v47, %v3066_v41  ;;  %v5681_v39 = vrot.slane %v5659_v22, 11  ;;  %v5664_v5 = vld [vmem:[%s6945_s27 + $0xbc] sm:$0x7]  ;;  %v7357_v24 = vld [vmem:[%s6945_s27 + $0x10] sm:$0xf]  ;;  %v6810_v44 = vld [vmem:[%s8572_s1 + $0x28] sm:$0xff]  }
  0x9b   : > { %v5376_v63 = vcombine.low %v680_v60, %v690_v55  ;;  %v5699_v0 = vcombine.low %v3064_v45, %v3067_v57  ;;  %v3077_v10 = vrot.slane %v5584_v62, 7  ;;  %v3080_v11 = vrot.slane %v5660_v4, 7  ;;  %v7365_v35 = vld [vmem:[%s6945_s27 + $0x1c] sm:$0xf]  ;;  %v5593_v40 = vld [vmem:[%s6945_s27 + $0xc4] sm:$0xf] }
  0x9c   : > { %6394 = vmatmul.mubr.msk.bf16.gmra.mrb[12].mxu0 %vm756_vm1, %v5698_v56  ;;  %v3071_v43 = vsel %vm7154_vm6, %v5680_v58, %v3070_v6  ;;  %v3072_v14 = vrot.slane %v3070_v6, 4  ;;  %v3084_v17 = vrot.slane %v5587_v1, 7  ;;  %v5396_v26 = vcombine.low %v174_v28, %v7357_v24  ;;  %v5596_v60 = vld [vmem:[%s6945_s27 + $0xd0] sm:$0xf]  ;;  %v178_v45 = vld [vmem:[%s6945_s27 + $0x24] sm:$0xf] }
  0x9d   : > { %6230 = vmatmul.mubr.msk.bf16.gmra.mrb[28].mxu1 %vm756_vm1, %v5376_v63  ;;  %6397 = vmatprep.mubr.msk.bf16.mxu0 %vm756_vm1, %v5699_v0  ;;  %v3078_v16 = vsel %vm7154_vm6, %v5681_v39, %v3077_v10  ;;  %v3079_v20 = vrot.slane %v3077_v10, 4  ;;  %v5682_v27 = vrot.slane %v5661_v8, 11  ;;  %v3087_v29 = vrot.slane %v5662_v12, 7  ;;  %v6859_v52 = vld [vmem:[%s8572_s1 + $0x20] sm:$0xff]   ;;  %v5666_v56 = vld [vmem:[%s6945_s27 + $0xc8] sm:$0x7] }
  0x9e   : > { %6237 = vmatprep.mubr.msk.bf16.mxu1 %vm756_vm1, %v5395_v54  ;;  %v3074_v15 = vsel %vm7154_vm6, %v3072_v14, %v3073_v3  ;;  %v3086_v23 = vrot.slane %v3084_v17, 4  ;;  %v3091_v33 = vrot.slane %v5590_v18, 7  ;;  %v5397_v36 = vcombine.low %v176_v9, %v7365_v35  ;;  %v5665_v55 = vld [vmem:[%s6945_s27 + $0xc0] sm:$0x8]  ;;  %v7394_v58 = vld [vmem:[%s8572_s1 + $0x30] sm:$0xff]  }
  0x9f   : > { %v5700_v30 = vcombine.low %v3071_v43, %v3074_v15  ;;  %v3081_v32 = vsel %vm7154_vm6, %v3079_v20, %v3080_v11  ;;  %v5683_v46 = vrot.slane %v5663_v21, 11  ;;  %v3094_v38 = vrot.slane %v5664_v5, 7  ;;  %v180_v62 = vld [vmem:[%s6945_s27 + $0x30] sm:$0xf]  ;;  %v5667_v4 = vld [vmem:[%s6945_s27 + $0xcc] sm:$0x8] }
  0xa0   : > { %v5701_v37 = vcombine.low %v3078_v16, %v3081_v32  ;;  %v3093_v41 = vrot.slane %v3091_v33, 4  ;;  %v3085_v47 = vsel %vm7154_vm6, %v5682_v27, %v3084_v17  ;;  %v3088_v48 = vsel %vm7154_vm6, %v3086_v23, %v3087_v29  ;;  %v5668_v63 = vld [vmem:[%s6945_s27 + $0xd4] sm:$0x7]  ;;  %v7400_v0 = vld [vmem:[%s6945_s27 + $0x28] sm:$0xf] }
  0xa1   : > { %v3098_v51 = vrot.slane %v5593_v40, 7  ;;  %v3092_v54 = vsel %vm7154_vm6, %v5683_v46, %v3091_v33  ;;  %v3105_v57 = vrot.slane %v5596_v60, 7  ;;  %v5398_v28 = vcombine.low %v178_v45, %v7400_v0  ;;  %v7404_v9 = vld [vmem:[%s6945_s27 + $0x34] sm:$0xf]  ;;  %v5599_v14 = vld [vmem:[%s6945_s27 + $0xdc] sm:$0xf] }
  0xa2   : > { %v3095_v22 = vsel %vm7154_vm6, %v3093_v41, %v3094_v38  ;;  %v5702_v1 = vcombine.low %v3085_v47, %v3088_v48  ;;  %v5684_v3 = vrot.slane %v5665_v55, 11  ;;  %v3101_v8 = vrot.slane %v5666_v56, 7  ;;  %v182_v17 = vld [vmem:[%s6945_s27 + $0x3c] sm:$0xf]  ;;  %v5670_v15 = vld [vmem:[%s6945_s27 + $0xe0] sm:$0x7] }
  0xa3   : > { %v5703_v6 = vcombine.low %v3092_v54, %v3095_v22  ;;  %v3100_v39 = vrot.slane %v3098_v51, 4  ;;  %v5399_v10 = vcombine.low %v180_v62, %v7404_v9  ;;  %v5685_v11 = vrot.slane %v5667_v4, 11  ;;  %v184_v27 = vld [vmem:[%s6945_s27 + $0x48] sm:$0xf]  ;;  %v7426_v29 = vld [vmem:[%s6945_s27 + $0x40] sm:$0xf] }
  0xa4   : > { %6398 = vmatmul.mubr.msk.bf16.gmra.mrb[16].mxu0 %vm756_vm1, %v5700_v30  ;;  %v3107_v12 = vrot.slane %v3105_v57, 4  ;;  %v3108_v43 = vrot.slane %v5668_v63, 7  ;;  %v3099_v18 = vsel %vm7154_vm6, %v5684_v3, %v3098_v51  ;;  %v3112_v20 = vrot.slane %v5599_v14, 7  ;;  %v7430_v46 = vld [vmem:[%s6945_s27 + $0x4c] sm:$0xf] }
  0xa5   : > { %6238 = vmatmul.mubr.msk.bf16.vlgmr.msra.gmra.mrb[0].mxu1 %vm756_vm1, %v5396_v26  ;;  %6401 = vmatprep.mubr.msk.bf16.mxu0 %vm756_vm1, %v5701_v37  ;;  %v3102_v16 = vsel %vm7154_vm6, %v3100_v39, %v3101_v8  ;;  %v3106_v21 = vsel %vm7154_vm6, %v5685_v11, %v3105_v57  ;;  %v5669_v26 = vld [vmem:[%s6945_s27 + $0xd8] sm:$0x8]  ;;  %v5400_v30 = vcombine.low %v182_v17, %v7426_v29  ;;  %v3115_v37 = vrot.slane %v5670_v15, 7  ;;  %v186_v60 = vld [vmem:[%s6945_s27 + $0x54] sm:$0xf]  ;;  %v6811_v48 = vld [vmem:[%s6945_s27 + $0x48] sm:$0xff]  }
  0xa6   : > { %6270 = vmatpush3.bf16.msra.mxu1 %v6859_v52  ;;  %6241 = vmatprep.mubr.msk.bf16.mxu1 %vm756_vm1, %v5397_v36  ;;  %v3109_v5 = vsel %vm7154_vm6, %v3107_v12, %v3108_v43  ;;  %v5704_v32 = vcombine.low %v3099_v18, %v3102_v16  ;;  %v5686_v33 = vrot.slane %v5669_v26, 11  ;;  %v3114_v36 = vrot.slane %v3112_v20, 4  ;;  %v190_v52 = vld [vmem:[%s6945_s27 + $0x6c] sm:$0xf]  ;;  %v192_v54 = vld [vmem:[%s6945_s27 + $0x78] sm:$0xf] }
  0xa7   : > { %6271 = vmatprep.subr.bf16.mxu1 %v6810_v44  ;;  %v5705_v23 = vcombine.low %v3106_v21, %v3109_v5  ;;  %v5401_v38 = vcombine.low %v184_v27, %v7430_v46  ;;  %v5402_v47 = vcombine.low %v186_v60, %v7113_v34  ;;  %v7449_v22 = vld [vmem:[%s6945_s27 + $0x84] sm:$0xf]  ;;  %v1267_v55 = vld [vmem:[%s6945_s27] sm:$0x8]  ;;  %v1268_v56 = vld [vmem:[%s6945_s27 + $0x8] sm:$0x7]  ;;  %v5404_v39 = vcombine.low %v190_v52, %v7159_v61 }
  0xa8   : > { %v3113_v40 = vsel %vm7154_vm6, %v5686_v33, %v3112_v20  ;;  %v3116_v41 = vsel %vm7154_vm6, %v3114_v36, %v3115_v37  ;;  %v1269_v57 = vld [vmem:[%s6945_s27 + $0xc] sm:$0x8]  ;;  %v1270_v62 = vld [vmem:[%s6945_s27 + $0x14] sm:$0x7]  ;;  %v1336_v34 = vrot.slane %v7330_v53, 7  ;;  %v1357_v53 = vrot.slane %v7400_v0, 7 }
  0xa9   : > { %v5706_v45 = vcombine.low %v3113_v40, %v3116_v41  ;;  %v1272_v4 = vld [vmem:[%s6945_s27 + $0x20] sm:$0x7]  ;;  %v7463_v63 = vld [vmem:[%s6945_s27 + $0x90] sm:$0xf]  ;;  %v1274_v3 = vld [vmem:[%s6945_s27 + $0x2c] sm:$0x7]  ;;  %v5406_v12 = vcombine.low %v7449_v22, %v7203_v7 }
  0xaa   : > { %6272 = vmatpush3.bf16.msra.mxu1 %v6810_v44  ;;  %v188_v44 = vld [vmem:[%s6945_s27 + $0x60] sm:$0xf]  ;;  %v6814_v8 = vld [vmem:[%s6945_s27 + $0x54] sm:$0xff]   ;;  %v5429_v43 = vrot.slane %v1267_v55, 11  ;;  %v1339_v14 = vrot.slane %v1268_v56, 7  ;;  %v1338_v17 = vrot.slane %v1336_v34, 4  ;;  %v5407_v15 = vcombine.low %v7463_v63, %v7226_v42 }
  0xab   : > { %6305 = vmatprep.subr.bf16.mxu1 %v7394_v58  ;;  %v5403_v51 = vcombine.low %v188_v44, %v7137_v25  ;;  %v1271_v25 = vld [vmem:[%s6945_s27 + $0x18] sm:$0x8]  ;;  %v6816_v11 = vld [vmem:[%s6945_s27 + $0x60] sm:$0xff]   ;;  %v5430_v18 = vrot.slane %v1269_v57, 11  ;;  %v1346_v16 = vrot.slane %v1270_v62, 7  ;;  %v1353_v0 = vrot.slane %v1272_v4, 7 }
  0xac   : > { %6402 = vmatmul.mubr.msk.bf16.gmra.mrb[20].mxu0 %vm756_vm1, %v5702_v1  ;;  %v1350_v1 = vrot.slane %v7365_v35, 7  ;;  %v1364_v35 = vrot.slane %v7404_v9, 7  ;;  %v5431_v61 = vrot.slane %v1271_v25, 11  ;;  %v1276_v20 = vld [vmem:[%s6945_s27 + $0x38] sm:$0x7]  ;;  %v1359_v9 = vrot.slane %v1357_v53, 4 }
  0xad   : > { %6242 = vmatmul.mubr.msk.bf16.gmra.mrb[4].mxu1 %vm756_vm1, %v5398_v28  ;;  %6405 = vmatprep.mubr.msk.bf16.mxu0 %vm756_vm1, %v5703_v6  ;;  %v1343_v28 = vrot.slane %v7357_v24, 7  ;;  %v1273_v6 = vld [vmem:[%s6945_s27 + $0x24] sm:$0x8]  ;;  %v1275_v24 = vld [vmem:[%s6945_s27 + $0x30] sm:$0x8]  ;;  %v6829_v27 = vld [vmem:[%s8572_s1 + $0x78] sm:$0xff]   ;;  %v7491_v33 = vsel %vm7154_vm6, %v5429_v43, %v1336_v34  ;;  %v7499_v41 = vsel %vm7154_vm6, %v1338_v17, %v1339_v14 }
  0xae   : > { %6245 = vmatprep.mubr.msk.bf16.mxu1 %vm756_vm1, %v5399_v10  ;;  %v5405_v10 = vcombine.low %v192_v54, %v7182_v50  ;;  %v1352_v21 = vrot.slane %v1350_v1, 4  ;;  %v5432_v5 = vrot.slane %v1273_v6, 11  ;;  %v1277_v26 = vld [vmem:[%s6945_s27 + $0x3c] sm:$0x8]  ;;  %v1366_v36 = vrot.slane %v1364_v35, 4  ;;  %v6818_v25 = vld [vmem:[%s6945_s27 + $0x6c] sm:$0xff]  }
  0xaf   : > { %v1345_v50 = vrot.slane %v1343_v28, 4  ;;  %v1367_v37 = vrot.slane %v1276_v20, 7  ;;  %v1371_v40 = vrot.slane %v7426_v29, 7  ;;  %v7503_v60 = vsel %vm7154_vm6, %v5430_v18, %v1343_v28  ;;  %v7518_v29 = vld [vmem:[%s6945_s27 + $0xa8] sm:$0xf] }
  0xb0   : > { %v7507_v44 = vsel %vm7154_vm6, %v5431_v61, %v1350_v1  ;;  %v7533_v52 = vsel %vm7154_vm6, %v5432_v5, %v1357_v53  ;;  %v5434_v56 = vrot.slane %v1277_v26, 11  ;;  %v1280_v62 = vld [vmem:[%s6945_s27 + $0x50] sm:$0x7]  ;;  %v1281_v34 = vld [vmem:[%s6945_s27 + $0x54] sm:$0x8]  ;;  %v1378_v6 = vrot.slane %v7430_v46, 7 }
  0xb1   : > { %v7548_v4 = vsel %vm7154_vm6, %v1366_v36, %v1367_v37  ;;  %v1373_v28 = vrot.slane %v1371_v40, 4  ;;  %v1283_v14 = vld [vmem:[%s6945_s27 + $0x60] sm:$0x8]  ;;  %v5449_v46 = vcombine.low %v7491_v33, %v7499_v41  ;;  %v7570_v18 = vld [vmem:[%s6945_s27 + $0x68] sm:$0x7] }
  0xb2   : > { %v7578_v20 = vsel %vm7154_vm6, %v5434_v56, %v1371_v40  ;;  %v5798_v5 = vld [vmem:[%s6945_s27 + $0x54] sm:$0xe]  ;;  %v1395_v56 = vrot.slane %v7570_v18, 7  ;;  %v5797_v7 = vld [vmem:[%s6945_s27 + $0x50] sm:$0x3] }
  0xb4   : > { %6406 = vmatmul.mubr.msk.bf16.gmra.mrb[24].mxu0 %vm756_vm1, %v5704_v32  ;;  %v5433_v32 = vrot.slane %v1275_v24, 11 }
  0xb5   : > { %6246 = vmatmul.mubr.msk.bf16.gmra.mrb[8].mxu1 %vm756_vm1, %v5400_v30  ;;  %6409 = vmatprep.mubr.msk.bf16.mxu0 %vm756_vm1, %v5705_v23  ;;  %v1360_v30 = vrot.slane %v1274_v3, 7  ;;  %v7487_v23 = vld [vmem:[%s6945_s27 + $0x9c] sm:$0xf] }
  0xb6   : > { %6249 = vmatprep.mubr.msk.bf16.mxu1 %vm756_vm1, %v5401_v38  ;;  %v1278_v38 = vld [vmem:[%s6945_s27 + $0x44] sm:$0x7]  ;;  %v7541_v55 = vsel %vm7154_vm6, %v5433_v32, %v1364_v35  ;;  %v1282_v3 = vld [vmem:[%s6945_s27 + $0x5c] sm:$0x7]  ;;  %v5799_v32 = vld [vmem:[%s6945_s27 + $0x58] sm:$0xf] }
  0xb7   : > { %v7537_v54 = vsel %vm7154_vm6, %v1359_v9, %v1360_v30  ;;  %v1374_v57 = vrot.slane %v1278_v38, 7  ;;  %v1380_v9 = vrot.slane %v1378_v6, 4  ;;  %v5437_v30 = vrot.slane %v1283_v14, 11  ;;  %v6865_v38 = vld [vmem:[%s6945_s27 + $0x64] sm:$0xf] }
  0xb8   : > { %v1388_v37 = vrot.slane %v1282_v3, 7  ;;  %v1392_v40 = vrot.slane %v6865_v38, 7  ;;  %v3883_v3 = vshll.u32 %v5799_v32, 16  ;;  %v5802_v38 = vld [vmem:[%s6945_s27 + $0x64] sm:$0xf] }
  0xb9   : > { %v7585_v26 = vsel %vm7154_vm6, %v1373_v28, %v1374_v57  ;;  %v3874_v28 = vshll.u32 %v5798_v5, 16  ;;  %v5804_v35 = vld [vmem:[%s6945_s27 + $0x6c] sm:$0xe] }
  0xba   : > { %v1394_v18 = vrot.slane %v1392_v40, 4 }
  0xbc   : > { %6410 = vmatmul.mubr.msk.bf16.gmra.mrb[28].mxu0 %vm756_vm1, %v5706_v45  ;;  %v1279_v45 = vld [vmem:[%s6945_s27 + $0x48] sm:$0x8] }
  0xbd   : > { %6250 = vmatmul.mubr.msk.bf16.gmra.mrb[12].mxu1 %vm756_vm1, %v5402_v47  ;;  %6417 = vmatprep.mubr.msk.bf16.mxu0 %vm756_vm1, %v6811_v48  ;;  %v7521_v47 = vld [vmem:[%s6945_s27 + $0xb4] sm:$0xf]  ;;  %v7525_v48 = vsel %vm7154_vm6, %v1345_v50, %v1346_v16  ;;  %v5435_v1 = vrot.slane %v1279_v45, 11  ;;  %v5795_v16 = vld [vmem:[%s6945_s27 + $0x48] sm:$0xe]  ;;  %v1381_v50 = vrot.slane %v1280_v62, 7 }
  0xbe   : > { %6253 = vmatprep.mubr.msk.bf16.mxu1 %vm756_vm1, %v5403_v51  ;;  %v7529_v51 = vsel %vm7154_vm6, %v1352_v21, %v1353_v0  ;;  %v5410_v53 = vcombine.low %v7521_v47, %v7293_v49  ;;  %v5450_v24 = vcombine.low %v7503_v60, %v7525_v48  ;;  %v5436_v21 = vrot.slane %v1281_v34, 11  ;;  %v5796_v0 = vld [vmem:[%s6945_s27 + $0x4c] sm:$0xf]  ;;  %v5800_v34 = vld [vmem:[%s6945_s27 + $0x5c] sm:$0x3] }
  0xbf   : > { %v3843_v45 = vshrl.u32 %v5795_v16, 16  ;;  %v3846_v22 = vshll.u32 %v5795_v16, 16  ;;  %v3855_v57 = vshll.u32 %v5796_v0, 16  ;;  %v7610_v42 = vsel %vm7154_vm6, %v1380_v9, %v1381_v50  ;;  %v7627_v50 = vld [vmem:[%s6945_s27 + $0x6c] sm:$0x8] }
  0xc0   : > { %v3876_v62 = vrot.slane %v3874_v28, 6  ;;  %v3890_v61 = vshrl.u32 %v5800_v34, 16  ;;  %v1287_v28 = vld [vmem:[%s6945_s27 + $0x78] sm:$0x8]  ;;  %v8579_v60 = vcombine.low %v7507_v44, %v7529_v51  ;;  %v6832_v44 = vld [vmem:[%s6945_s27 + $0xcc] sm:$0xff]  }
  0xc1   : > { %v3845_v16 = vrot.slane %v3843_v45, 5 }
  0xc4   : > { %6418 = vmatmul.mubr.msk.bf16.vlgmr.msra.gmra.mrb[0].mxu0 %vm756_vm1, %v6814_v8  ;;  %v5408_v8 = vcombine.low %v7487_v23, %v7248_v19 }
  0xc5   : > { %6254 = vmatmul.mubr.msk.bf16.gmra.mrb[16].mxu1 %vm756_vm1, %v5404_v39  ;;  %6450 = vmatpush3.bf16.msra.mxu0 %v7212_v13  ;;  %v7513_v13 = vld [vmem:[%s8572_s1 + $0x80] sm:$0xff]   ;;  %v6820_v39 = vld [vmem:[%s6945_s27 + $0x78] sm:$0xff]  }
  0xc6   : > { %6257 = vmatprep.mubr.msk.bf16.mxu1 %vm756_vm1, %v5405_v10  ;;  %6421 = vmatprep.mubr.msk.bf16.mxu0 %vm756_vm1, %v6816_v11  ;;  %v5409_v10 = vcombine.low %v7518_v29, %v7272_v2  ;;  %v6864_v11 = vld [vmem:[%s6945_s27 + $0x58] sm:$0xf] }
  0xc7   : > { %6451 = vmatprep.subr.bf16.mxu0 %v6829_v27  ;;  %v1385_v43 = vrot.slane %v6864_v11, 7  ;;  %v6824_v11 = vld [vmem:[%s6945_s27 + $0x90] sm:$0xff]  }
  0xc9   : > { %6452 = vmatpush3.bf16.msra.mxu0 %v6829_v27  ;;  %v7589_v27 = vsel %vm7154_vm6, %v5435_v1, %v1378_v6  ;;  %v1387_v36 = vrot.slane %v1385_v43, 4  ;;  %v3880_v1 = vshrl.u32 %v5799_v32, 16  ;;  %v6822_v6 = vld [vmem:[%s6945_s27 + $0x84] sm:$0xff]   ;;  %v7614_v63 = vsel %vm7154_vm6, %v5436_v21, %v1385_v43 }
  0xca   : > { %6485 = vmatprep.subr.bf16.mxu0 %v7513_v13  ;;  %v3857_v43 = vrot.slane %v3855_v57, 6  ;;  %v3865_v21 = vshll.u32 %v5797_v7, 16  ;;  %v3908_v57 = vshrl.u32 %v5802_v38, 16 }
  0xcb   : > { %v7624_v14 = vsel %vm7154_vm6, %v1387_v36, %v1388_v37  ;;  %v3882_v32 = vrot.slane %v3880_v1, 5  ;;  %v3885_v36 = vrot.slane %v3883_v3, 6  ;;  %v3893_v37 = vshll.u32 %v5800_v34, 16  ;;  %v5803_v1 = vld [vmem:[%s6945_s27 + $0x68] sm:$0x3] }
  0xcc   : > { %6422 = vmatmul.mubr.msk.bf16.gmra.mrb[4].mxu0 %vm756_vm1, %v6818_v25  ;;  %v3871_v25 = vshrl.u32 %v5798_v5, 16  ;;  %v3848_v5 = vrot.slane %v3846_v22, 6  ;;  %v3911_v34 = vshll.u32 %v5802_v38, 16  ;;  %v3867_v3 = vrot.slane %v3865_v21, 6  ;;  %v6828_v38 = vld [vmem:[%s6945_s27 + $0xa8] sm:$0xff]  }
  0xcd   : > { %6258 = vmatmul.mubr.msk.bf16.gmra.mrb[20].mxu1 %vm756_vm1, %v5406_v12  ;;  %6425 = vmatprep.mubr.msk.bf16.mxu0 %vm756_vm1, %v6820_v39  ;;  %v3852_v12 = vshrl.u32 %v5796_v0, 16  ;;  %v5801_v39 = vld [vmem:[%s6945_s27 + $0x60] sm:$0xe]  ;;  %v3862_v0 = vshrl.u32 %v5797_v7, 16  ;;  %v7638_v7 = vsel %vm7154_vm6, %v1394_v18, %v1395_v56  ;;  %v6867_v18 = vld [vmem:[%s6945_s27 + $0x7c] sm:$0xf]  ;;  %v7654_v2 = vor.u32 %v3885_v36, %v3882_v32 }
  0xce   : > { %6261 = vmatprep.mubr.msk.bf16.mxu1 %vm756_vm1, %v5407_v15  ;;  %v7618_v15 = vsel %vm7154_vm6, %v5437_v30, %v1392_v40  ;;  %v3873_v30 = vrot.slane %v3871_v25, 5  ;;  %v3899_v40 = vshrl.u32 %v5801_v39, 16  ;;  %v3902_v45 = vshll.u32 %v5801_v39, 16  ;;  %v6866_v25 = vld [vmem:[%s6945_s27 + $0x70] sm:$0xf] }
  0xcf   : > { %v3854_v9 = vrot.slane %v3852_v12, 5  ;;  %v3864_v22 = vrot.slane %v3862_v0, 5  ;;  %v1286_v12 = vld [vmem:[%s6945_s27 + $0x74] sm:$0x7]  ;;  %v3849_v19 = vor.u32 %v3848_v5, %v3845_v16  ;;  %v1399_v56 = vrot.slane %v6866_v25, 7 }
  0xd0   : > { %v3877_v39 = vor.u32 %v3876_v62, %v3873_v30  ;;  %v1406_v0 = vrot.slane %v6867_v18, 7  ;;  %v3895_v29 = vrot.slane %v3893_v37, 6  ;;  %v3901_v16 = vrot.slane %v3899_v40, 5  ;;  %v1289_v37 = vld [vmem:[%s6945_s27 + $0x84] sm:$0x8] }
  0xd1   : > { %v7645_v23 = vor.u32 %v3857_v43, %v3854_v9  ;;  %v3904_v5 = vrot.slane %v3902_v45, 6  ;;  %v3913_v9 = vrot.slane %v3911_v34, 6  ;;  %v3918_v43 = vshrl.u32 %v5803_v1, 16  ;;  %v6868_v34 = vld [vmem:[%s6945_s27 + $0x88] sm:$0xf] }
  0xd2   : > { %v3921_v25 = vshll.u32 %v5803_v1, 16  ;;  %v3850_v17 = vrot.slane %v3849_v19, 4  ;;  %v1402_v21 = vrot.slane %v1286_v12, 7  ;;  %v3868_v30 = vor.u32 %v3867_v3, %v3864_v22 }
  0xd3   : > { %v3860_v62 = vrot.slane %v7645_v23, 4  ;;  %v3878_v18 = vrot.slane %v3877_v39, 4  ;;  %v5439_v32 = vrot.slane %v1287_v28, 11  ;;  %v3888_v40 = vrot.slane %v7654_v2, 4 }
  0xd4   : > { %6426 = vmatmul.mubr.msk.bf16.gmra.mrb[8].mxu0 %vm756_vm1, %v6822_v6  ;;  %v6826_v6 = vld [vmem:[%s6945_s27 + $0x9c] sm:$0xff]   ;;  %v1413_v1 = vrot.slane %v6868_v34, 7  ;;  %v3905_v22 = vor.u32 %v3904_v5, %v3901_v16  ;;  %v3920_v19 = vrot.slane %v3918_v43, 5  ;;  %v3923_v28 = vrot.slane %v3921_v25, 6  ;;  %v5810_v34 = vld [vmem:[%s6945_s27 + $0x84] sm:$0xe] }
  0xd5   : > { %6262 = vmatmul.mubr.msk.bf16.gmra.mrb[24].mxu1 %vm756_vm1, %v5408_v8  ;;  %6429 = vmatprep.mubr.msk.bf16.mxu0 %vm756_vm1, %v6824_v11  ;;  %v5438_v8 = vrot.slane %v7627_v50, 11  ;;  %v3892_v11 = vrot.slane %v3890_v61, 5  ;;  %v3910_v50 = vrot.slane %v3908_v57, 5  ;;  %v1401_v61 = vrot.slane %v1399_v56, 4 }
  0xd6   : > { %6265 = vmatprep.mubr.msk.bf16.mxu1 %vm756_vm1, %v5409_v10  ;;  %v1288_v10 = vld [vmem:[%s6945_s27 + $0x80] sm:$0x7]  ;;  %v1408_v57 = vrot.slane %v1406_v0, 4  ;;  %v3930_v3 = vshll.u32 %v5804_v35, 16  ;;  %v3859_v39 = vsel %vm6967_vm3, %v3850_v17, %v7645_v23  ;;  %v3869_v33 = vsel %vm6967_vm3, %v3860_v62, %v3868_v30 }
  0xd7   : > { %v1409_v36 = vrot.slane %v1288_v10, 7  ;;  %v3896_v45 = vor.u32 %v3895_v29, %v3892_v11  ;;  %v7668_v12 = vor.u32 %v3913_v9, %v3910_v50  ;;  %v7677_v49 = vsel %vm7154_vm6, %v5438_v8, %v1399_v56  ;;  %v7696_v8 = vld [vmem:[%s6945_s27 + $0x70] sm:$0xf]  ;;  %v6830_v56 = vld [vmem:[%s6945_s27 + $0xb4] sm:$0xff]  }
  0xd8   : > { %v7681_v47 = vsel %vm7154_vm6, %v1401_v61, %v1402_v21  ;;  %v3887_v41 = vsel %vm6967_vm3, %v3878_v18, %v7654_v2  ;;  %v5440_v11 = vrot.slane %v1289_v37, 11  ;;  %v1415_v17 = vrot.slane %v1413_v1, 4  ;;  %v6837_v21 = vld [vmem:[%s8572_s1 + $0x38] sm:$0xff]  }
  0xd9   : > { %v3897_v29 = vsel %vm6967_vm3, %v3888_v40, %v3896_v45  ;;  %v3906_v10 = vrot.slane %v3905_v22, 4  ;;  %v3916_v2 = vrot.slane %v7668_v12, 4  ;;  %v3924_v16 = vor.u32 %v3923_v28, %v3920_v19  ;;  %v7735_v40 = vld [vmem:[%s6945_s27 + $0x90] sm:$0x8]  ;;  %v5807_v45 = vld [vmem:[%s6945_s27 + $0x78] sm:$0xe] }
  0xda   : > { %v3932_v50 = vrot.slane %v3930_v3, 6  ;;  %v3936_v9 = vshrl.u32 %v7696_v8, 16  ;;  %v3939_v43 = vshll.u32 %v7696_v8, 16  ;;  %v5455_v25 = vcombine.low %v7589_v27, %v7610_v42  ;;  %v5809_v3 = vld [vmem:[%s6945_s27 + $0x80] sm:$0x3] }
  0xdb   : > { %v5456_v62 = vcombine.low %v7614_v63, %v7624_v14  ;;  %v5457_v61 = vcombine.low %v7618_v15, %v7638_v7  ;;  %v5458_v30 = vcombine.low %v7677_v49, %v7681_v47  ;;  %v7722_v18 = vcombine.low %v3859_v39, %v3869_v33  ;;  %v7761_v39 = vld [vmem:[%s6945_s27 + $0x88] sm:$0xf] }
  0xdc   : > { %6430 = vmatmul.mubr.msk.bf16.gmra.mrb[12].mxu0 %vm756_vm1, %v6826_v6  ;;  %v1290_v6 = vld [vmem:[%s6945_s27 + $0x8c] sm:$0x7]  ;;  %v3915_v22 = vsel %vm6967_vm3, %v3906_v10, %v7668_v12  ;;  %v3925_v19 = vsel %vm6967_vm3, %v3916_v2, %v3924_v16  ;;  %v3955_v33 = vshrl.u32 %v5807_v45, 16  ;;  %v3992_v10 = vshrl.u32 %v7761_v39, 16  ;;  %v6835_v12 = vld [vmem:[%s6945_s27 + $0xf0] sm:$0xff]  }
  0xdd   : > { %6266 = vmatmul.mubr.msk.bf16.gmra.mrb[28].mxu1 %vm756_vm1, %v5410_v53  ;;  %6433 = vmatprep.mubr.msk.bf16.mxu0 %vm756_vm1, %v6828_v38  ;;  %v3927_v53 = vshrl.u32 %v5804_v35, 16  ;;  %v7701_v35 = vsel %vm7154_vm6, %v1408_v57, %v1409_v36  ;;  %v1416_v23 = vrot.slane %v1290_v6, 7  ;;  %v6831_v38 = vld [vmem:[%s6945_s27 + $0xc0] sm:$0xff]   ;;  %v7728_v36 = vsel %vm7154_vm6, %v5440_v11, %v1413_v1  ;;  %v7739_v57 = vld [vmem:[%s6945_s27 + $0x7c] sm:$0xf] }
  0xde   : > { %6273 = vmatprep.mubr.msk.bf16.mxu1 %vm756_vm1, %v5449_v46  ;;  %v7693_v46 = vsel %vm7154_vm6, %v5439_v32, %v1406_v0  ;;  %v5806_v0 = vld [vmem:[%s6945_s27 + $0x74] sm:$0x3]  ;;  %v7747_v1 = vcombine.low %v3887_v41, %v3897_v29  ;;  %v3941_v6 = vrot.slane %v3939_v43, 6  ;;  %v3958_v41 = vshll.u32 %v5807_v45, 16  ;;  %v5812_v43 = vld [vmem:[%s6945_s27 + $0x8c] sm:$0x3] }
  0xdf   : > { %v3929_v5 = vrot.slane %v3927_v53, 5  ;;  %v7732_v37 = vsel %vm7154_vm6, %v1415_v17, %v1416_v23  ;;  %v3946_v28 = vshrl.u32 %v5806_v0, 16  ;;  %v3949_v53 = vshll.u32 %v5806_v0, 16  ;;  %v6833_v23 = vld [vmem:[%s6945_s27 + $0xd8] sm:$0xff]  }
  0xe0   : > { %v7767_v51 = vcombine.low %v3915_v22, %v3925_v19  ;;  %v3983_v11 = vshrl.u32 %v5810_v34, 16  ;;  %v3986_v17 = vshll.u32 %v5810_v34, 16  ;;  %v5441_v29 = vrot.slane %v7735_v40, 11  ;;  %v1292_v45 = vld [vmem:[%s6945_s27 + $0x98] sm:$0x7]  ;;  %v7784_v40 = vld [vmem:[%s8572_s1 + $0x40] sm:$0xff]  }
  0xe1   : > { %v3933_v48 = vor.u32 %v3932_v50, %v3929_v5  ;;  %v3995_v2 = vshll.u32 %v7761_v39, 16  ;;  %v3951_v5 = vrot.slane %v3949_v53, 6  ;;  %v6869_v50 = vld [vmem:[%s6945_s27 + $0x94] sm:$0xf]  ;;  %v3957_v34 = vrot.slane %v3955_v33, 5 }
  0xe2   : > { %v3960_v22 = vrot.slane %v3958_v41, 6  ;;  %v1293_v53 = vld [vmem:[%s6945_s27 + $0x9c] sm:$0x8]  ;;  %v3994_v33 = vrot.slane %v3992_v10, 5 }
  0xe3   : > { %v7774_v16 = vrot.slane %v3933_v48, 4  ;;  %v3985_v48 = vrot.slane %v3983_v11, 5  ;;  %v3997_v41 = vrot.slane %v3995_v2, 6  ;;  %v1423_v11 = vrot.slane %v1292_v45, 7 }
  0xe4   : > { %6434 = vmatmul.mubr.msk.bf16.gmra.mrb[16].mxu0 %vm756_vm1, %v6830_v56  ;;  %v3967_v56 = vshll.u32 %v7739_v57, 16  ;;  %v3961_v10 = vor.u32 %v3960_v22, %v3957_v34  ;;  %v5442_v45 = vrot.slane %v1293_v53, 11 }
  0xe5   : > { %6274 = vmatmul.mubr.msk.bf16.vlgmr.msra.gmra.mrb[0].mxu1 %vm756_vm1, %v5450_v24  ;;  %6437 = vmatprep.mubr.msk.bf16.mxu0 %vm756_vm1, %v6831_v38  ;;  %v3938_v24 = vrot.slane %v3936_v9, 5  ;;  %v3948_v38 = vrot.slane %v3946_v28, 5  ;;  %v1420_v9 = vrot.slane %v6869_v50, 7  ;;  %v3974_v28 = vshrl.u32 %v5809_v3, 16  ;;  %v5813_v50 = vld [vmem:[%s6945_s27 + $0x90] sm:$0xe] }
  0xe6   : > { %6306 = vmatpush3.bf16.msra.mxu1 %v7394_v58  ;;  %6277 = vmatprep.mubr.msk.bf16.mxu1 %vm756_vm1, %v8579_v60  ;;  %v3964_v58 = vshrl.u32 %v7739_v57, 16  ;;  %v3977_v60 = vshll.u32 %v5809_v3, 16  ;;  %v8581_v3 = vcombine.low %v7541_v55, %v7548_v4  ;;  %v1294_v55 = vld [vmem:[%s6945_s27 + $0xa4] sm:$0x7]  ;;  %v6871_v4 = vld [vmem:[%s6945_s27 + $0xa0] sm:$0xf] }
  0xe7   : > { %6307 = vmatprep.subr.bf16.mxu1 %v6837_v21  ;;  %v7776_v0 = vor.u32 %v3941_v6, %v3938_v24  ;;  %v3988_v24 = vrot.slane %v3986_v17, 6  ;;  %v8580_v6 = vcombine.low %v7533_v52, %v7537_v54  ;;  %v3952_v54 = vor.u32 %v3951_v5, %v3948_v38 }
  0xe8   : > { %v3966_v19 = vrot.slane %v3964_v58, 5  ;;  %v4002_v58 = vshrl.u32 %v5812_v43, 16  ;;  %v1427_v2 = vrot.slane %v6871_v4, 7  ;;  %v3976_v38 = vrot.slane %v3974_v28, 5  ;;  %v1296_v4 = vld [vmem:[%s6945_s27 + $0xb0] sm:$0x7] }
  0xe9   : > { %v3944_v52 = vrot.slane %v7776_v0, 4  ;;  %v3943_v17 = vsel %vm6967_vm3, %v7774_v16, %v7776_v0  ;;  %v3979_v5 = vrot.slane %v3977_v60, 6  ;;  %v3989_v32 = vor.u32 %v3988_v24, %v3985_v48  ;;  %v5815_v60 = vld [vmem:[%s6945_s27 + $0x98] sm:$0x3] }
  0xea   : > { %6308 = vmatpush3.bf16.msra.mxu1 %v6837_v21  ;;  %v3969_v21 = vrot.slane %v3967_v56, 6  ;;  %v1422_v56 = vrot.slane %v1420_v9, 4  ;;  %v3998_v16 = vor.u32 %v3997_v41, %v3994_v33  ;;  %v4004_v0 = vrot.slane %v4002_v58, 5  ;;  %v1295_v58 = vld [vmem:[%s6945_s27 + $0xa8] sm:$0x8] }
  0xeb   : > { %6521 = vmatprep.subr.bf16.mxu1 %v7784_v40  ;;  %v4011_v22 = vshrl.u32 %v5813_v50, 16  ;;  %v1429_v28 = vrot.slane %v1427_v2, 4  ;;  %v3962_v53 = vrot.slane %v3961_v10, 4  ;;  %v3980_v41 = vor.u32 %v3979_v5, %v3976_v38  ;;  %v6836_v5 = vld [vmem:[%s6945_s27 + $0xfc] sm:$0xff]  }
  0xec   : > { %6438 = vmatmul.mubr.msk.bf16.gmra.mrb[20].mxu0 %vm756_vm1, %v6832_v44  ;;  %v4005_v44 = vshll.u32 %v5812_v43, 16  ;;  %v6834_v43 = vld [vmem:[%s6945_s27 + $0xe4] sm:$0xff]   ;;  %v7819_v34 = vsel %vm7154_vm6, %v1422_v56, %v1423_v11  ;;  %v7834_v56 = vsel %vm7154_vm6, %v5442_v45, %v1427_v2  ;;  %v3990_v11 = vrot.slane %v3989_v32, 4 }
  0xed   : > { %6278 = vmatmul.mubr.msk.bf16.gmra.mrb[4].mxu1 %vm756_vm1, %v8580_v6  ;;  %6441 = vmatprep.mubr.msk.bf16.mxu0 %vm756_vm1, %v6833_v23  ;;  %v7805_v23 = vsel %vm7154_vm6, %v5441_v29, %v1420_v9  ;;  %v3970_v6 = vor.u32 %v3969_v21, %v3966_v19  ;;  %v3953_v9 = vsel %vm6967_vm3, %v3944_v52, %v3952_v54  ;;  %v4014_v19 = vshll.u32 %v5813_v50, 16 }
  0xee   : > { %6281 = vmatprep.mubr.msk.bf16.mxu1 %vm756_vm1, %v8581_v3  ;;  %v7812_v3 = vld [vmem:[%s6945_s27 + $0x94] sm:$0xf]  ;;  %v4007_v29 = vrot.slane %v4005_v44, 6  ;;  %v1430_v21 = vrot.slane %v1294_v55, 7  ;;  %v6872_v44 = vld [vmem:[%s6945_s27 + $0xac] sm:$0xf]  ;;  %v8582_v54 = vcombine.low %v7578_v20, %v7585_v26 }
  0xef   : > { %v4020_v48 = vshrl.u32 %v7812_v3, 16  ;;  %v4023_v24 = vshll.u32 %v7812_v3, 16  ;;  %v3972_v33 = vrot.slane %v3970_v6, 4  ;;  %v1434_v52 = vrot.slane %v6872_v44, 7 }
  0xf0   : > { %v4000_v55 = vrot.slane %v3998_v16, 4  ;;  %v4008_v10 = vor.u32 %v4007_v29, %v4004_v0  ;;  %v4013_v50 = vrot.slane %v4011_v22, 5  ;;  %v4016_v20 = vrot.slane %v4014_v19, 6 }
  0xf1   : > { %v4030_v26 = vshrl.u32 %v5815_v60, 16  ;;  %v5443_v2 = vrot.slane %v1295_v58, 11  ;;  %v4022_v38 = vrot.slane %v4020_v48, 5  ;;  %v4025_v32 = vrot.slane %v4023_v24, 6  ;;  %v6873_v58 = vld [vmem:[%s6945_s27 + $0xb8] sm:$0xf] }
  0xf2   : > { %v3971_v27 = vsel %vm6967_vm3, %v3962_v53, %v3970_v6  ;;  %v3981_v42 = vsel %vm6967_vm3, %v3972_v33, %v3980_v41  ;;  %v1437_v45 = vrot.slane %v1296_v4, 7  ;;  %v7850_v0 = vcombine.low %v3943_v17, %v3953_v9  ;;  %v5816_v6 = vld [vmem:[%s6945_s27 + $0x9c] sm:$0xe]  ;;  %v7862_v17 = vld [vmem:[%s6945_s27 + $0xa0] sm:$0xf] }
  0xf3   : > { %v5461_v29 = vcombine.low %v7805_v23, %v7819_v34  ;;  %v3999_v22 = vsel %vm6967_vm3, %v3990_v11, %v3998_v16  ;;  %v4009_v19 = vsel %vm6967_vm3, %v4000_v55, %v4008_v10  ;;  %v5819_v9 = vld [vmem:[%s6945_s27 + $0xa8] sm:$0xe]  ;;  %v7865_v24 = vcombine.low %v3971_v27, %v3981_v42  ;;  %v1297_v33 = vld [vmem:[%s6945_s27 + $0xb4] sm:$0x8]  ;;  %v1298_v41 = vld [vmem:[%s6945_s27 + $0xbc] sm:$0x7] }
  0xf4   : > { %6442 = vmatmul.mubr.msk.bf16.gmra.mrb[24].mxu0 %vm756_vm1, %v6834_v43  ;;  %v4033_v43 = vshll.u32 %v5815_v60, 16  ;;  %v4032_v60 = vrot.slane %v4030_v26, 5  ;;  %v7869_v16 = vsel %vm7154_vm6, %v5443_v2, %v1434_v52  ;;  %v7871_v53 = vor.u32 %v4025_v32, %v4022_v38  ;;  %v7884_v4 = vld [vmem:[%s6945_s27 + $0xac] sm:$0xf]  ;;  %v5821_v32 = vld [vmem:[%s6945_s27 + $0xb0] sm:$0x3] }
  0xf5   : > { %6282 = vmatmul.mubr.msk.bf16.gmra.mrb[8].mxu1 %vm756_vm1, %v8582_v54  ;;  %6445 = vmatprep.mubr.msk.bf16.mxu0 %vm756_vm1, %v6835_v12  ;;  %v7843_v12 = vsel %vm7154_vm6, %v1429_v28, %v1430_v21  ;;  %v4017_v21 = vor.u32 %v4016_v20, %v4013_v50  ;;  %v1441_v44 = vrot.slane %v6873_v58, 7  ;;  %v7877_v54 = vcombine.low %v3999_v22, %v4009_v19 }
  0xf6   : > { %6285 = vmatprep.mubr.msk.bf16.mxu1 %vm756_vm1, %v5455_v25  ;;  %v1436_v25 = vrot.slane %v1434_v52, 4  ;;  %v5462_v28 = vcombine.low %v7834_v56, %v7843_v12  ;;  %v4035_v48 = vrot.slane %v4033_v43, 6  ;;  %v4039_v55 = vshrl.u32 %v5816_v6, 16  ;;  %v5818_v52 = vld [vmem:[%s6945_s27 + $0xa4] sm:$0x3] }
  0xf7   : > { %v4042_v10 = vshll.u32 %v5816_v6, 16  ;;  %v4048_v50 = vshrl.u32 %v7862_v17, 16  ;;  %v4051_v20 = vshll.u32 %v7862_v17, 16  ;;  %v4067_v26 = vshrl.u32 %v5819_v9, 16  ;;  %v5834_v56 = vld [vmem:[%s6945_s27 + $0xe4] sm:$0xe] }
  0xf8   : > { %v7881_v11 = vsel %vm7154_vm6, %v1436_v25, %v1437_v45  ;;  %v4070_v43 = vshll.u32 %v5819_v9, 16  ;;  %v7899_v2 = vrot.slane %v4017_v21, 4  ;;  %v4036_v63 = vor.u32 %v4035_v48, %v4032_v60  ;;  %v5822_v9 = vld [vmem:[%s6945_s27 + $0xb4] sm:$0xe] }
  0xf9   : > { %v5444_v14 = vrot.slane %v1297_v33, 11  ;;  %v4028_v38 = vrot.slane %v7871_v53, 4  ;;  %v4079_v27 = vshll.u32 %v7884_v4, 16  ;;  %v4041_v42 = vrot.slane %v4039_v55, 5 }
  0xfa   : > { %v4044_v25 = vrot.slane %v4042_v10, 6  ;;  %v4058_v45 = vshrl.u32 %v5818_v52, 16  ;;  %v4061_v15 = vshll.u32 %v5818_v52, 16  ;;  %v4050_v7 = vrot.slane %v4048_v50, 5  ;;  %v6840_v10 = vld [vmem:[%s8572_s1 + $0x88] sm:$0xff]  }
  0xfb   : > { %v4069_v22 = vrot.slane %v4067_v26, 5  ;;  %v4072_v19 = vrot.slane %v4070_v43, 6  ;;  %v5463_v6 = vcombine.low %v7869_v16, %v7881_v11  ;;  %v4027_v21 = vsel %vm6967_vm3, %v7899_v2, %v7871_v53  ;;  %v7924_v52 = vld [vmem:[%s6945_s27 + $0xb8] sm:$0xf]  ;;  %v5825_v26 = vld [vmem:[%s6945_s27 + $0xc0] sm:$0xe] }
  0xfc   : > { %6446 = vmatmul.mubr.msk.bf16.gmra.mrb[28].mxu0 %vm756_vm1, %v6836_v5  ;;  %v4076_v5 = vshrl.u32 %v7884_v4, 16  ;;  %v7913_v60 = vsel %vm7154_vm6, %v5444_v14, %v1441_v44  ;;  %v4086_v48 = vshrl.u32 %v5821_v32, 16  ;;  %v4081_v58 = vrot.slane %v4079_v27, 6 }
  0xfd   : > { %6286 = vmatmul.mubr.msk.bf16.gmra.mrb[12].mxu1 %vm756_vm1, %v5456_v62  ;;  %6453 = vmatprep.mubr.msk.bf16.mxu0 %vm756_vm1, %v7722_v18  ;;  %v1444_v62 = vrot.slane %v1298_v41, 7  ;;  %v1443_v18 = vrot.slane %v1441_v44, 4  ;;  %v4089_v55 = vshll.u32 %v5821_v32, 16  ;;  %v4037_v53 = vsel %vm6967_vm3, %v4028_v38, %v4036_v63  ;;  %v5824_v32 = vld [vmem:[%s6945_s27 + $0xbc] sm:$0x3] }
  0xfe   : > { %6289 = vmatprep.mubr.msk.bf16.mxu1 %vm756_vm1, %v5457_v61  ;;  %v4053_v61 = vrot.slane %v4051_v20, 6  ;;  %v4078_v41 = vrot.slane %v4076_v5, 5  ;;  %v4045_v44 = vor.u32 %v4044_v25, %v4041_v42  ;;  %v4060_v50 = vrot.slane %v4058_v45, 5 }
  0xff   : > { %v7918_v33 = vsel %vm7154_vm6, %v1443_v18, %v1444_v62  ;;  %v4063_v20 = vrot.slane %v4061_v15, 6  ;;  %v4073_v2 = vor.u32 %v4072_v19, %v4069_v22  ;;  %v4095_v14 = vshrl.u32 %v5822_v9, 16  ;;  %v7939_v62 = vld [vmem:[%s6945_s27 + $0xc4] sm:$0xf] }
 0x100   : > { %v7936_v43 = vor.u32 %v4053_v61, %v4050_v7  ;;  %v8583_v63 = vcombine.low %v7693_v46, %v7701_v35  ;;  %v5464_v49 = vcombine.low %v7913_v60, %v7918_v33  ;;  %v4088_v47 = vrot.slane %v4086_v48, 5  ;;  %v5827_v61 = vld [vmem:[%s6945_s27 + $0xc8] sm:$0x3]  ;;  %v5840_v60 = vld [vmem:[%s6945_s27 + $0xfc] sm:$0xe] }
 0x101   : > { %v7951_v38 = vor.u32 %v4081_v58, %v4078_v41  ;;  %v4091_v18 = vrot.slane %v4089_v55, 6  ;;  %v4123_v46 = vshrl.u32 %v5825_v26, 16  ;;  %v4126_v35 = vshll.u32 %v5825_v26, 16 }
 0x102   : > { %v7954_v5 = vrot.slane %v4045_v44, 4  ;;  %v4064_v27 = vor.u32 %v4063_v20, %v4060_v50  ;;  %v4135_v42 = vshll.u32 %v7939_v62, 16  ;;  %v4056_v25 = vrot.slane %v7936_v43, 4  ;;  %v5828_v50 = vld [vmem:[%s6945_s27 + $0xcc] sm:$0xe] }
 0x103   : > { %v7959_v45 = vrot.slane %v4073_v2, 4  ;;  %v4097_v15 = vrot.slane %v4095_v14, 5  ;;  %v4114_v48 = vshrl.u32 %v5824_v32, 16  ;;  %v4084_v41 = vrot.slane %v7951_v38, 4 }
 0x104   : > { %6454 = vmatmul.mubr.msk.bf16.vlgmr.msra.gmra.mrb[0].mxu0 %vm756_vm1, %v7747_v1  ;;  %v4098_v1 = vshll.u32 %v5822_v9, 16  ;;  %v4117_v9 = vshll.u32 %v5824_v32, 16  ;;  %v4092_v58 = vor.u32 %v4091_v18, %v4088_v47  ;;  %v4125_v55 = vrot.slane %v4123_v46, 5  ;;  %v7977_v47 = vld [vmem:[%s6945_s27 + $0xd0] sm:$0xf] }
 0x105   : > { %6290 = vmatmul.mubr.msk.bf16.gmra.mrb[16].mxu1 %vm756_vm1, %v5458_v30  ;;  %6486 = vmatpush3.bf16.msra.mxu0 %v7513_v13  ;;  %v4104_v13 = vshrl.u32 %v7924_v52, 16  ;;  %v4107_v30 = vshll.u32 %v7924_v52, 16  ;;  %v4128_v44 = vrot.slane %v4126_v35, 6  ;;  %v4137_v26 = vrot.slane %v4135_v42, 6  ;;  %v7995_v46 = vld [vmem:[%s6945_s27 + $0xdc] sm:$0xf] }
 0x106   : > { %6293 = vmatprep.mubr.msk.bf16.mxu1 %vm756_vm1, %v8583_v63  ;;  %6457 = vmatprep.mubr.msk.bf16.mxu0 %vm756_vm1, %v7767_v51  ;;  %v4132_v51 = vshrl.u32 %v7939_v62, 16  ;;  %v4100_v7 = vrot.slane %v4098_v1, 6  ;;  %v4142_v2 = vshrl.u32 %v5827_v61, 16  ;;  %v8584_v14 = vcombine.low %v7728_v36, %v7732_v37  ;;  %v5830_v35 = vld [vmem:[%s6945_s27 + $0xd4] sm:$0x3] }
 0x107   : > { %6487 = vmatprep.subr.bf16.mxu0 %v6840_v10  ;;  %v4106_v22 = vrot.slane %v4104_v13, 5  ;;  %v4109_v19 = vrot.slane %v4107_v30, 6  ;;  %v5853_v1 = vcombine.low %v4027_v21, %v4037_v53  ;;  %v4055_v63 = vsel %vm6967_vm3, %v7954_v5, %v7936_v43  ;;  %v5831_v53 = vld [vmem:[%s6945_s27 + $0xd8] sm:$0xe] }
 0x108   : > { %v4134_v20 = vrot.slane %v4132_v51, 5  ;;  %v4116_v37 = vrot.slane %v4114_v48, 5  ;;  %v4151_v21 = vshrl.u32 %v5828_v50, 16  ;;  %v4065_v13 = vsel %vm6967_vm3, %v4056_v25, %v4064_v27 }
 0x109   : > { %6488 = vmatpush3.bf16.msra.mxu0 %v6840_v10  ;;  %v4145_v10 = vshll.u32 %v5827_v61, 16  ;;  %v7983_v36 = vor.u32 %v4109_v19, %v4106_v22  ;;  %v4083_v43 = vsel %vm6967_vm3, %v7959_v45, %v7951_v38  ;;  %v4129_v30 = vor.u32 %v4128_v44, %v4125_v55  ;;  %v5833_v22 = vld [vmem:[%s6945_s27 + $0xe0] sm:$0x3] }
 0x10a   : > { %v4154_v18 = vshll.u32 %v5828_v50, 16  ;;  %v4093_v23 = vsel %vm6967_vm3, %v4084_v41, %v4092_v58  ;;  %v4138_v34 = vor.u32 %v4137_v26, %v4134_v20  ;;  %v4160_v5 = vshrl.u32 %v7977_v47, 16 }
 0x10b   : > { %v4147_v32 = vrot.slane %v4145_v10, 6  ;;  %v4163_v27 = vshll.u32 %v7977_v47, 16  ;;  %v4179_v51 = vshrl.u32 %v5831_v53, 16  ;;  %v4182_v42 = vshll.u32 %v5831_v53, 16 }
 0x10c   : > { %6458 = vmatmul.mubr.msk.bf16.gmra.mrb[4].mxu0 %vm756_vm1, %v7850_v0  ;;  %v4101_v0 = vor.u32 %v4100_v7, %v4097_v15  ;;  %v4112_v38 = vrot.slane %v7983_v36, 4  ;;  %v4153_v15 = vrot.slane %v4151_v21, 5  ;;  %v4130_v7 = vrot.slane %v4129_v30, 4  ;;  %v6839_v30 = vld [vmem:[%s6945_s27 + $0x24] sm:$0xff]  }
 0x10d   : > { %6294 = vmatmul.mubr.msk.bf16.gmra.mrb[20].mxu1 %vm756_vm1, %v8584_v14  ;;  %6461 = vmatprep.mubr.msk.bf16.mxu0 %vm756_vm1, %v7865_v24  ;;  %v4119_v24 = vrot.slane %v4117_v9, 6  ;;  %v4156_v61 = vrot.slane %v4154_v18, 6  ;;  %v4188_v19 = vshrl.u32 %v7995_v46, 16  ;;  %v4191_v48 = vshll.u32 %v7995_v46, 16 }
 0x10e   : > { %6297 = vmatprep.mubr.msk.bf16.mxu1 %vm756_vm1, %v5461_v29  ;;  %v4144_v29 = vrot.slane %v4142_v2, 5  ;;  %v4102_v25 = vrot.slane %v4101_v0, 4  ;;  %v4140_v9 = vrot.slane %v4138_v34, 4  ;;  %v4170_v58 = vshrl.u32 %v5830_v35, 16 }
 0x10f   : > { %v4120_v45 = vor.u32 %v4119_v24, %v4116_v37  ;;  %v4173_v55 = vshll.u32 %v5830_v35, 16  ;;  %v4162_v44 = vrot.slane %v4160_v5, 5  ;;  %v4165_v50 = vrot.slane %v4163_v27, 6  ;;  %v8020_v37 = vld [vmem:[%s6945_s27 + $0xe8] sm:$0xf] }
 0x110   : > { %v4148_v41 = vor.u32 %v4147_v32, %v4144_v29  ;;  %v4181_v20 = vrot.slane %v4179_v51, 5  ;;  %v4184_v26 = vrot.slane %v4182_v42, 6  ;;  %v5855_v2 = vcombine.low %v4083_v43, %v4093_v23  ;;  %v8032_v43 = vld [vmem:[%s6945_s27 + $0xf4] sm:$0xf]  ;;  %v5836_v42 = vld [vmem:[%s6945_s27 + $0xec] sm:$0x3] }
 0x111   : > { %v4198_v10 = vshrl.u32 %v5833_v22, 16  ;;  %v4201_v14 = vshll.u32 %v5833_v22, 16  ;;  %v4111_v12 = vsel %vm6967_vm3, %v4102_v25, %v7983_v36  ;;  %v4193_v0 = vrot.slane %v4191_v48, 6  ;;  %v5839_v22 = vld [vmem:[%s6945_s27 + $0xf8] sm:$0x3] }
 0x112   : > { %v4121_v16 = vsel %vm6967_vm3, %v4112_v38, %v4120_v45  ;;  %v4139_v11 = vsel %vm6967_vm3, %v4130_v7, %v4138_v34  ;;  %v4149_v24 = vsel %vm6967_vm3, %v4140_v9, %v4148_v41  ;;  %v8028_v21 = vor.u32 %v4165_v50, %v4162_v44  ;;  %v8056_v50 = vld [vmem:[%s6945_s27 + $0x100] sm:$0xf] }
 0x113   : > { %v4185_v36 = vor.u32 %v4184_v26, %v4181_v20  ;;  %v4207_v53 = vshrl.u32 %v5834_v56, 16  ;;  %v4200_v18 = vrot.slane %v4198_v10, 5  ;;  %v4203_v23 = vrot.slane %v4201_v14, 6  ;;  %v6841_v10 = vld [vmem:[%s6945_s27 + $0x30] sm:$0xff]  }
 0x114   : > { %6462 = vmatmul.mubr.msk.bf16.gmra.mrb[8].mxu0 %vm756_vm1, %v7877_v54  ;;  %v5854_v54 = vcombine.low %v4055_v63, %v4065_v13  ;;  %v4175_v63 = vrot.slane %v4173_v55, 6  ;;  %v5837_v13 = vld [vmem:[%s6945_s27 + $0xf0] sm:$0xe]  ;;  %v4210_v29 = vshll.u32 %v5834_v56, 16  ;;  %v4216_v32 = vshrl.u32 %v8020_v37, 16 }
 0x115   : > { %6298 = vmatmul.mubr.msk.bf16.gmra.mrb[24].mxu1 %vm756_vm1, %v5462_v28  ;;  %6465 = vmatprep.mubr.msk.bf16.mxu0 %vm756_vm1, %v5853_v1  ;;  %v4157_v28 = vor.u32 %v4156_v61, %v4153_v15  ;;  %v4190_v1 = vrot.slane %v4188_v19, 5  ;;  %v5856_v34 = vcombine.low %v4111_v12, %v4121_v16  ;;  %v4219_v27 = vshll.u32 %v8020_v37, 16 }
 0x116   : > { %6301 = vmatprep.mubr.msk.bf16.mxu1 %vm756_vm1, %v5463_v6  ;;  %v4172_v6 = vrot.slane %v4170_v58, 5  ;;  %v5857_v51 = vcombine.low %v4139_v11, %v4149_v24  ;;  %v4235_v25 = vshrl.u32 %v5837_v13, 16  ;;  %v4238_v38 = vshll.u32 %v5837_v13, 16  ;;  %v5842_v13 = vld [vmem:[%s6945_s27 + $0x104] sm:$0x3] }
 0x117   : > { %v8036_v35 = vrot.slane %v4157_v28, 4  ;;  %v8038_v5 = vor.u32 %v4193_v0, %v4190_v1  ;;  %v4244_v45 = vshrl.u32 %v8032_v43, 16  ;;  %v4168_v15 = vrot.slane %v8028_v21, 4  ;;  %v6842_v1 = vld [vmem:[%s6945_s27 + $0x3c] sm:$0xff]  }
 0x118   : > { %v4176_v7 = vor.u32 %v4175_v63, %v4172_v6  ;;  %v4209_v61 = vrot.slane %v4207_v53, 5  ;;  %v4247_v19 = vshll.u32 %v8032_v43, 16  ;;  %v4186_v48 = vrot.slane %v4185_v36, 4 }
 0x119   : > { %v4204_v9 = vor.u32 %v4203_v23, %v4200_v18  ;;  %v4212_v41 = vrot.slane %v4210_v29, 6  ;;  %v4218_v58 = vrot.slane %v4216_v32, 5  ;;  %v4196_v33 = vrot.slane %v8038_v5, 4 }
 0x11a   : > { %v4226_v55 = vshrl.u32 %v5836_v42, 16  ;;  %v4229_v44 = vshll.u32 %v5836_v42, 16  ;;  %v4237_v20 = vrot.slane %v4235_v25, 5  ;;  %v4240_v26 = vrot.slane %v4238_v38, 6 }
 0x11b   : > { %v4249_v14 = vrot.slane %v4247_v19, 6  ;;  %v4257_v56 = vshll.u32 %v5839_v22, 16  ;;  %v4263_v12 = vshrl.u32 %v5840_v60, 16  ;;  %v4266_v28 = vshll.u32 %v5840_v60, 16  ;;  %v6844_v60 = vld [vmem:[%s6945_s27 + $0x54] sm:$0xff]  }
 0x11c   : > { %6466 = vmatmul.mubr.msk.bf16.gmra.mrb[12].mxu0 %vm756_vm1, %v5854_v54  ;;  %v4246_v54 = vrot.slane %v4244_v45, 5  ;;  %v4167_v0 = vsel %vm6967_vm3, %v8036_v35, %v8028_v21  ;;  %v4177_v16 = vsel %vm6967_vm3, %v4168_v15, %v4176_v7  ;;  %v4272_v11 = vshrl.u32 %v8056_v50, 16 }
 0x11d   : > { %6302 = vmatmul.mubr.msk.bf16.gmra.mrb[28].mxu1 %vm756_vm1, %v5464_v49  ;;  %6469 = vmatprep.mubr.msk.bf16.mxu0 %vm756_vm1, %v5855_v2  ;;  %v4221_v49 = vrot.slane %v4219_v27, 6  ;;  %v4254_v2 = vshrl.u32 %v5839_v22, 16  ;;  %v4275_v6 = vshll.u32 %v8056_v50, 16  ;;  %v4195_v63 = vsel %vm6967_vm3, %v4186_v48, %v8038_v5 }
 0x11e   : > { %6309 = vmatprep.mubr.msk.bf16.mxu1 %vm756_vm1, %v6839_v30  ;;  %v4205_v24 = vsel %vm6967_vm3, %v4196_v33, %v4204_v9  ;;  %v4213_v36 = vor.u32 %v4212_v41, %v4209_v61  ;;  %v4228_v53 = vrot.slane %v4226_v55, 5  ;;  %v4231_v30 = vrot.slane %v4229_v44, 6  ;;  %v6843_v61 = vld [vmem:[%s6945_s27 + $0x48] sm:$0xff]  }
 0x11f   : > { %v8075_v21 = vor.u32 %v4221_v49, %v4218_v58  ;;  %v4241_v18 = vor.u32 %v4240_v26, %v4237_v20  ;;  %v4256_v23 = vrot.slane %v4254_v2, 5  ;;  %v8079_v29 = vor.u32 %v4249_v14, %v4246_v54  ;;  %v5881_v9 = vld [vmem:[%s6945_s27 + $0x48] sm:$0x8]  ;;  %v6875_v41 = vld [vmem:[%s6945_s27 + $0x4c] sm:$0xf] }
 0x120   : > { %v4259_v32 = vrot.slane %v4257_v56, 6  ;;  %v4265_v35 = vrot.slane %v4263_v12, 5  ;;  %v4268_v5 = vrot.slane %v4266_v28, 6  ;;  %v4277_v27 = vrot.slane %v4275_v6, 6  ;;  %v5882_v20 = vld [vmem:[%s6945_s27 + $0x50] sm:$0x7] }
 0x121   : > { %v4282_v42 = vshrl.u32 %v5842_v13, 16  ;;  %v4285_v25 = vshll.u32 %v5842_v13, 16  ;;  %v5858_v38 = vcombine.low %v4167_v0, %v4177_v16  ;;  %v4214_v45 = vrot.slane %v4213_v36, 4  ;;  %v6876_v26 = vld [vmem:[%s6945_s27 + $0x94] sm:$0xf] }
 0x122   : > { %v4224_v15 = vrot.slane %v8075_v21, 4  ;;  %v4242_v7 = vrot.slane %v4241_v18, 4  ;;  %v5859_v22 = vcombine.low %v4195_v63, %v4205_v24  ;;  %v4260_v19 = vor.u32 %v4259_v32, %v4256_v23  ;;  %v5883_v2 = vld [vmem:[%s6945_s27 + $0x54] sm:$0x8]  ;;  %v5884_v0 = vld [vmem:[%s6945_s27 + $0x5c] sm:$0x7] }
 0x123   : > { %v4269_v48 = vor.u32 %v4268_v5, %v4265_v35  ;;  %v4678_v58 = vrot.slane %v6875_v41, 7  ;;  %v4252_v33 = vrot.slane %v8079_v29, 4  ;;  %v4284_v55 = vrot.slane %v4282_v42, 5  ;;  %v5885_v18 = vld [vmem:[%s6945_s27 + $0x60] sm:$0x8] }
 0x124   : > { %6470 = vmatmul.mubr.msk.bf16.gmra.mrb[16].mxu0 %vm756_vm1, %v5856_v34  ;;  %v4274_v34 = vrot.slane %v4272_v11, 5  ;;  %v4287_v44 = vrot.slane %v4285_v25, 6  ;;  %v2433_v54 = vshrl.u32 %v6876_v26, 16  ;;  %v2436_v56 = vshll.u32 %v6876_v26, 16  ;;  %v6878_v23 = vld [vmem:[%s6945_s27 + $0x64] sm:$0xf] }
 0x125   : > { %6310 = vmatmul.mubr.msk.bf16.vlgmr.msra.gmra.mrb[0].mxu1 %vm756_vm1, %v6841_v10  ;;  %6473 = vmatprep.mubr.msk.bf16.mxu0 %vm756_vm1, %v5857_v51  ;;  %v6874_v51 = vld [vmem:[%s8572_s1 + $0x48] sm:$0xff]   ;;  %v6877_v10 = vld [vmem:[%s6945_s27 + $0x58] sm:$0xf]  ;;  %v4223_v12 = vsel %vm6967_vm3, %v4214_v45, %v8075_v21  ;;  %v4270_v16 = vrot.slane %v4269_v48, 4  ;;  %v5913_v11 = vrot.slane %v5881_v9, 11  ;;  %v4680_v6 = vrot.slane %v4678_v58, 4 }
 0x126   : > { %6523 = vmatpush3.bf16.msra.mxu1 %v7784_v40  ;;  %6313 = vmatprep.mubr.msk.bf16.mxu1 %vm756_vm1, %v6842_v1  ;;  %v4232_v40 = vor.u32 %v4231_v30, %v4228_v53  ;;  %v4278_v49 = vor.u32 %v4277_v27, %v4274_v34  ;;  %v4685_v14 = vrot.slane %v6877_v10, 7  ;;  %v4251_v1 = vsel %vm6967_vm3, %v4242_v7, %v8079_v29  ;;  %v5886_v34 = vld [vmem:[%s6945_s27 + $0x68] sm:$0x7]  ;;  %v5887_v27 = vld [vmem:[%s6945_s27 + $0x6c] sm:$0x8]  ;;  %v6845_v42 = vld [vmem:[%s6945_s27 + $0x60] sm:$0xff]  }
 0x127   : > { %6522 = vmatprep.subr.bf16.mxu1 %v6874_v51  ;;  %v4681_v63 = vrot.slane %v5882_v20, 7  ;;  %v4261_v24 = vsel %vm6967_vm3, %v4252_v33, %v4260_v19  ;;  %v4288_v53 = vor.u32 %v4287_v44, %v4284_v55  ;;  %v5914_v13 = vrot.slane %v5883_v2, 11  ;;  %v5889_v55 = vld [vmem:[%s6945_s27 + $0x78] sm:$0x8]  ;;  %v8147_v44 = vld [vmem:[%s6945_s27 + $0x80] sm:$0x7] }
 0x128   : > { %v4233_v28 = vsel %vm6967_vm3, %v4224_v15, %v4232_v40  ;;  %v4280_v36 = vrot.slane %v4278_v49, 4  ;;  %v4687_v21 = vrot.slane %v4685_v14, 4  ;;  %v4688_v30 = vrot.slane %v5884_v0, 7  ;;  %v5577_v15 = vld [vmem:[%s6945_s27 + $0x84] sm:$0xe]  ;;  %v6846_v40 = vld [vmem:[%s6945_s27 + $0x6c] sm:$0xff]  }
 0x129   : > { %v4692_v29 = vrot.slane %v6878_v23, 7  ;;  %v2435_v32 = vrot.slane %v2433_v54, 5  ;;  %v2438_v35 = vrot.slane %v2436_v56, 6  ;;  %v5860_v5 = vcombine.low %v4223_v12, %v4233_v28  ;;  %v5579_v26 = vld [vmem:[%s6945_s27 + $0x8c] sm:$0x3]  ;;  %v6847_v0 = vld [vmem:[%s6945_s27 + $0x78] sm:$0xff]  }
 0x12a   : > { %6524 = vmatpush3.bf16.msra.mxu1 %v6874_v51  ;;  %v5861_v25 = vcombine.low %v4251_v1, %v4261_v24  ;;  %v8120_v51 = vsel %vm7154_vm6, %v5913_v11, %v4678_v58  ;;  %v8124_v45 = vsel %vm7154_vm6, %v4680_v6, %v4681_v63  ;;  %v4289_v7 = vsel %vm6967_vm3, %v4280_v36, %v4288_v53  ;;  %v5888_v58 = vld [vmem:[%s6945_s27 + $0x74] sm:$0x7]  ;;  %v6879_v2 = vld [vmem:[%s6945_s27 + $0x88] sm:$0xf]  ;;  %v5891_v24 = vld [vmem:[%s6945_s27 + $0x84] sm:$0x8] }
 0x12b   : > { %v4699_v19 = vrot.slane %v7696_v8, 7  ;;  %v8137_v48 = vsel %vm7154_vm6, %v4687_v21, %v4688_v30  ;;  %v4694_v9 = vrot.slane %v4692_v29, 4  ;;  %v4695_v41 = vrot.slane %v5886_v34, 7  ;;  %v6848_v36 = vld [vmem:[%s6945_s27 + $0x84] sm:$0xff]   ;;  %v5893_v23 = vld [vmem:[%s6945_s27 + $0x90] sm:$0x8] }
 0x12c   : > { %6474 = vmatmul.mubr.msk.bf16.gmra.mrb[20].mxu0 %vm756_vm1, %v5858_v38  ;;  %v4279_v38 = vsel %vm6967_vm3, %v4270_v16, %v4278_v49  ;;  %v8140_v33 = vor.u32 %v2438_v35, %v2435_v32  ;;  %v5933_v49 = vcombine.low %v8120_v51, %v8124_v45  ;;  %v2396_v8 = vshrl.u32 %v5577_v15, 16  ;;  %v5896_v51 = vld [vmem:[%s6945_s27 + $0xa4] sm:$0x7] }
 0x12d   : > { %6314 = vmatmul.mubr.msk.bf16.gmra.mrb[4].mxu1 %vm756_vm1, %v6843_v61  ;;  %6477 = vmatprep.mubr.msk.bf16.mxu0 %vm756_vm1, %v5859_v22  ;;  %v8132_v61 = vsel %vm7154_vm6, %v5914_v13, %v4685_v14  ;;  %v5915_v22 = vrot.slane %v5885_v18, 11  ;;  %v5862_v20 = vcombine.low %v4279_v38, %v4289_v7  ;;  %v2399_v54 = vshll.u32 %v5577_v15, 16  ;;  %v5892_v13 = vld [vmem:[%s6945_s27 + $0x8c] sm:$0x7]  ;;  %v5895_v38 = vld [vmem:[%s6945_s27 + $0x9c] sm:$0x8] }
 0x12e   : > { %6317 = vmatprep.mubr.msk.bf16.mxu1 %vm756_vm1, %v6844_v60  ;;  %v5916_v60 = vrot.slane %v5887_v27, 11  ;;  %v2405_v10 = vshrl.u32 %v6879_v2, 16  ;;  %v2408_v14 = vshll.u32 %v6879_v2, 16  ;;  %v5934_v56 = vcombine.low %v8132_v61, %v8137_v48 }
 0x12f   : > { %v8158_v12 = vsel %vm7154_vm6, %v5915_v22, %v4692_v29  ;;  %v4701_v28 = vrot.slane %v4699_v19, 4  ;;  %v4702_v1 = vrot.slane %v5888_v58, 7  ;;  %v8163_v16 = vsel %vm7154_vm6, %v4694_v9, %v4695_v41  ;;  %v5894_v29 = vld [vmem:[%s6945_s27 + $0x98] sm:$0x7]  ;;  %v5897_v22 = vld [vmem:[%s6945_s27 + $0xa8] sm:$0x8] }
 0x130   : > { %v8167_v11 = vsel %vm7154_vm6, %v5916_v60, %v4699_v19  ;;  %v5917_v6 = vrot.slane %v5889_v55, 11  ;;  %v4706_v63 = vrot.slane %v7739_v57, 7  ;;  %v4709_v53 = vrot.slane %v8147_v44, 7  ;;  %v5580_v57 = vld [vmem:[%s6945_s27 + $0x90] sm:$0xe] }
 0x131   : > { %v4713_v21 = vrot.slane %v7761_v39, 7  ;;  %v2398_v30 = vrot.slane %v2396_v8, 5  ;;  %v2415_v18 = vshrl.u32 %v5579_v26, 16  ;;  %v2401_v32 = vrot.slane %v2399_v54, 6  ;;  %v5898_v41 = vld [vmem:[%s6945_s27 + $0xb0] sm:$0x7] }
 0x132   : > { %v2407_v35 = vrot.slane %v2405_v10, 5  ;;  %v2418_v34 = vshll.u32 %v5579_v26, 16  ;;  %v5935_v27 = vcombine.low %v8158_v12, %v8163_v16  ;;  %v4720_v39 = vrot.slane %v7812_v3, 7 }
 0x133   : > { %v8189_v45 = vsel %vm7154_vm6, %v5917_v6, %v4706_v63  ;;  %v4708_v15 = vrot.slane %v4706_v63, 4  ;;  %v4727_v7 = vrot.slane %v7862_v17, 7  ;;  %v4715_v19 = vrot.slane %v4713_v21, 4  ;;  %v5582_v17 = vld [vmem:[%s6945_s27 + $0x98] sm:$0x3]  ;;  %v6849_v6 = vld [vmem:[%s6945_s27 + $0x90] sm:$0xff]  }
 0x134   : > { %6478 = vmatmul.mubr.msk.bf16.gmra.mrb[24].mxu0 %vm756_vm1, %v5860_v5  ;;  %v2410_v5 = vrot.slane %v2408_v14, 6  ;;  %v2417_v9 = vrot.slane %v2415_v18, 5  ;;  %v2424_v58 = vshrl.u32 %v5580_v57, 16  ;;  %v2427_v60 = vshll.u32 %v5580_v57, 16  ;;  %v5583_v57 = vld [vmem:[%s6945_s27 + $0x9c] sm:$0xe] }
 0x135   : > { %6318 = vmatmul.mubr.msk.bf16.gmra.mrb[8].mxu1 %vm756_vm1, %v6845_v42  ;;  %6481 = vmatprep.mubr.msk.bf16.mxu0 %vm756_vm1, %v5861_v25  ;;  %v8182_v42 = vsel %vm7154_vm6, %v4701_v28, %v4702_v1  ;;  %v5918_v25 = vrot.slane %v5891_v24, 11  ;;  %v2402_v3 = vor.u32 %v2401_v32, %v2398_v30  ;;  %v2420_v44 = vrot.slane %v2418_v34, 6  ;;  %v5900_v34 = vld [vmem:[%s6945_s27 + $0xbc] sm:$0x7] }
 0x136   : > { %6321 = vmatprep.mubr.msk.bf16.mxu1 %vm756_vm1, %v6846_v40  ;;  %v4716_v40 = vrot.slane %v5892_v13, 7  ;;  %v8197_v55 = vor.u32 %v2410_v5, %v2407_v35  ;;  %v4734_v8 = vrot.slane %v7884_v4, 7  ;;  %v4722_v26 = vrot.slane %v4720_v39, 4  ;;  %v6850_v13 = vld [vmem:[%s6945_s27 + $0x9c] sm:$0xff]  }
 0x137   : > { %v4723_v54 = vrot.slane %v5894_v29, 7  ;;  %v5920_v2 = vrot.slane %v5895_v38, 11  ;;  %v4729_v10 = vrot.slane %v4727_v7, 4  ;;  %v4730_v14 = vrot.slane %v5896_v51, 7  ;;  %v5899_v29 = vld [vmem:[%s6945_s27 + $0xb4] sm:$0x8] }
 0x138   : > { %v5921_v12 = vrot.slane %v5897_v22, 11  ;;  %v2426_v28 = vrot.slane %v2424_v58, 5  ;;  %v2429_v1 = vrot.slane %v2427_v60, 6  ;;  %v2446_v16 = vshll.u32 %v5582_v17, 16 }
 0x139   : > { %v2403_v4 = vrot.slane %v2402_v3, 4  ;;  %v2413_v63 = vrot.slane %v8197_v55, 4  ;;  %v2421_v24 = vor.u32 %v2420_v44, %v2417_v9  ;;  %v4710_v30 = vsel %vm7154_vm6, %v4708_v15, %v4709_v53  ;;  %v6880_v9 = vld [vmem:[%s6945_s27 + $0xa0] sm:$0xf] }
 0x13a   : > { %v8209_v18 = vsel %vm7154_vm6, %v5918_v25, %v4713_v21  ;;  %v4741_v32 = vrot.slane %v7924_v52, 7  ;;  %v8223_v5 = vsel %vm7154_vm6, %v4722_v26, %v4723_v54  ;;  %v8227_v53 = vsel %vm7154_vm6, %v5920_v2, %v4727_v7  ;;  %v5586_v26 = vld [vmem:[%s6945_s27 + $0xa8] sm:$0xe]  ;;  %v6852_v54 = vld [vmem:[%s6945_s27 + $0xb4] sm:$0xff]  }
 0x13b   : > { %v8231_v21 = vsel %vm7154_vm6, %v4729_v10, %v4730_v14  ;;  %v8241_v52 = vsel %vm7154_vm6, %v5921_v12, %v4734_v8  ;;  %v2430_v25 = vor.u32 %v2429_v1, %v2426_v28  ;;  %v2448_v38 = vrot.slane %v2446_v16, 6 }
 0x13c   : > { %6482 = vmatmul.mubr.msk.bf16.gmra.mrb[28].mxu0 %vm756_vm1, %v5862_v20  ;;  %v5919_v20 = vrot.slane %v5893_v23, 11  ;;  %v8213_v23 = vsel %vm7154_vm6, %v4715_v19, %v4716_v40  ;;  %v2412_v51 = vsel %vm6967_vm3, %v2403_v4, %v8197_v55  ;;  %v2422_v61 = vsel %vm6967_vm3, %v2413_v63, %v2421_v24 }
 0x13d   : > { %6322 = vmatmul.mubr.msk.bf16.gmra.mrb[12].mxu1 %vm756_vm1, %v6847_v0  ;;  %6489 = vmatprep.mubr.msk.bf16.mxu0 %vm756_vm1, %v5933_v49  ;;  %v4737_v49 = vrot.slane %v5898_v41, 7  ;;  %v2443_v0 = vshrl.u32 %v5582_v17, 16  ;;  %v4743_v15 = vrot.slane %v4741_v32, 4  ;;  %v4744_v40 = vrot.slane %v5900_v34, 7  ;;  %v6851_v17 = vld [vmem:[%s6945_s27 + $0xa8] sm:$0xff]  }
 0x13e   : > { %6325 = vmatprep.mubr.msk.bf16.mxu1 %vm756_vm1, %v6848_v36  ;;  %v4736_v36 = vrot.slane %v4734_v8, 4  ;;  %v8219_v35 = vsel %vm7154_vm6, %v5919_v20, %v4720_v39  ;;  %v2452_v7 = vshrl.u32 %v5583_v57, 16  ;;  %v2441_v22 = vrot.slane %v8140_v33, 4  ;;  %v5585_v8 = vld [vmem:[%s6945_s27 + $0xa4] sm:$0x3] }
 0x13f   : > { %v2445_v39 = vrot.slane %v2443_v0, 5  ;;  %v5936_v19 = vcombine.low %v8167_v11, %v8182_v42  ;;  %v2461_v41 = vshrl.u32 %v6880_v9, 16  ;;  %v2464_v58 = vshll.u32 %v6880_v9, 16 }
 0x140   : > { %v8252_v48 = vsel %vm7154_vm6, %v4736_v36, %v4737_v49  ;;  %v5937_v60 = vcombine.low %v8189_v45, %v4710_v30  ;;  %v5938_v3 = vcombine.low %v8209_v18, %v8213_v23  ;;  %v8262_v55 = vrot.slane %v2430_v25, 4  ;;  %v5589_v49 = vld [vmem:[%s6945_s27 + $0xb4] sm:$0xe]  ;;  %v5588_v36 = vld [vmem:[%s6945_s27 + $0xb0] sm:$0x3] }
 0x141   : > { %v2449_v44 = vor.u32 %v2448_v38, %v2445_v39  ;;  %v5939_v20 = vcombine.low %v8219_v35, %v8223_v5  ;;  %v5940_v11 = vcombine.low %v8227_v53, %v8231_v21  ;;  %v8270_v42 = vcombine.low %v2412_v51, %v2422_v61  ;;  %v5901_v25 = vld [vmem:[%s6945_s27 + $0xc0] sm:$0x8]  ;;  %v6882_v39 = vld [vmem:[%s6945_s27 + $0xb8] sm:$0xf]  ;;  %v5903_v18 = vld [vmem:[%s6945_s27 + $0xcc] sm:$0x8] }
 0x142   : > { %v5941_v45 = vcombine.low %v8241_v52, %v8252_v48  ;;  %v8282_v10 = vsel %vm7154_vm6, %v4743_v15, %v4744_v40  ;;  %v2454_v14 = vrot.slane %v2452_v7, 5  ;;  %v2463_v28 = vrot.slane %v2461_v41, 5  ;;  %v5591_v7 = vld [vmem:[%s6945_s27 + $0xbc] sm:$0x3]  ;;  %v5904_v23 = vld [vmem:[%s6945_s27 + $0xd4] sm:$0x7] }
 0x143   : > { %v2466_v1 = vrot.slane %v2464_v58, 6  ;;  %v2471_v0 = vshrl.u32 %v5585_v8, 16  ;;  %v2474_v16 = vshll.u32 %v5585_v8, 16  ;;  %v2450_v4 = vsel %vm6967_vm3, %v2441_v22, %v2449_v44  ;;  %v6853_v58 = vld [vmem:[%s6945_s27 + $0xc0] sm:$0xff]  }
 0x144   : > { %6490 = vmatmul.mubr.msk.bf16.vlgmr.msra.gmra.mrb[0].mxu0 %vm756_vm1, %v5934_v56  ;;  %v5922_v56 = vrot.slane %v5899_v29, 11  ;;  %v2480_v63 = vshrl.u32 %v5586_v26, 16  ;;  %v2483_v24 = vshll.u32 %v5586_v26, 16  ;;  %v2511_v34 = vshll.u32 %v5589_v49, 16  ;;  %v5592_v5 = vld [vmem:[%s6945_s27 + $0xc0] sm:$0xe] }
 0x145   : > { %6326 = vmatmul.mubr.msk.bf16.gmra.mrb[16].mxu1 %vm756_vm1, %v6849_v6  ;;  %6493 = vmatprep.mubr.msk.bf16.mxu0 %vm756_vm1, %v5935_v27  ;;  %v2455_v27 = vshll.u32 %v5583_v57, 16  ;;  %v2440_v6 = vsel %vm6967_vm3, %v8262_v55, %v8140_v33  ;;  %v2517_v38 = vshrl.u32 %v6882_v39, 16  ;;  %v2520_v51 = vshll.u32 %v6882_v39, 16 }
 0x146   : > { %6329 = vmatprep.mubr.msk.bf16.mxu1 %vm756_vm1, %v6850_v13  ;;  %v8278_v2 = vsel %vm7154_vm6, %v5922_v56, %v4741_v32  ;;  %v6881_v13 = vld [vmem:[%s6945_s27 + $0xac] sm:$0xf]  ;;  %v2508_v32 = vshrl.u32 %v5589_v49, 16  ;;  %v8301_v61 = vor.u32 %v2466_v1, %v2463_v28  ;;  %v2473_v56 = vrot.slane %v2471_v0, 5 }
 0x147   : > { %v2457_v12 = vrot.slane %v2455_v27, 6  ;;  %v2489_v30 = vshrl.u32 %v6881_v13, 16  ;;  %v2492_v29 = vshll.u32 %v6881_v13, 16  ;;  %v5942_v33 = vcombine.low %v8278_v2, %v8282_v10  ;;  %v5902_v27 = vld [vmem:[%s6945_s27 + $0xc8] sm:$0x7] }
 0x148   : > { %v2476_v15 = vrot.slane %v2474_v16, 6  ;;  %v4748_v40 = vrot.slane %v7939_v62, 7  ;;  %v2482_v22 = vrot.slane %v2480_v63, 5  ;;  %v2499_v9 = vshrl.u32 %v5588_v36, 16 }
 0x149   : > { %v2458_v57 = vor.u32 %v2457_v12, %v2454_v14  ;;  %v2502_v41 = vshll.u32 %v5588_v36, 16  ;;  %v2494_v55 = vrot.slane %v2492_v29, 6  ;;  %v2510_v44 = vrot.slane %v2508_v32, 5 }
 0x14a   : > { %v2513_v8 = vrot.slane %v2511_v34, 6  ;;  %v2519_v26 = vrot.slane %v2517_v38, 5  ;;  %v2527_v14 = vshrl.u32 %v5591_v7, 16  ;;  %v2530_v12 = vshll.u32 %v5591_v7, 16  ;;  %v5905_v34 = vld [vmem:[%s6945_s27 + $0xd8] sm:$0x8] }
 0x14b   : > { %v8308_v49 = vrot.slane %v2458_v57, 4  ;;  %v5923_v62 = vrot.slane %v5901_v25, 11  ;;  %v4750_v28 = vrot.slane %v4748_v40, 4  ;;  %v4751_v1 = vrot.slane %v5902_v27, 7 }
 0x14c   : > { %6494 = vmatmul.mubr.msk.bf16.gmra.mrb[4].mxu0 %vm756_vm1, %v5936_v19  ;;  %v2485_v19 = vrot.slane %v2483_v24, 6  ;;  %v8314_v0 = vcombine.low %v2440_v6, %v2450_v4  ;;  %v2501_v63 = vrot.slane %v2499_v9, 5  ;;  %v2504_v24 = vrot.slane %v2502_v41, 6 }
 0x14d   : > { %6330 = vmatmul.mubr.msk.bf16.gmra.mrb[20].mxu1 %vm756_vm1, %v6851_v17  ;;  %6497 = vmatprep.mubr.msk.bf16.mxu0 %vm756_vm1, %v5937_v60  ;;  %v2491_v60 = vrot.slane %v2489_v30, 5  ;;  %v6854_v17 = vld [vmem:[%s6945_s27 + $0xcc] sm:$0xff]   ;;  %v2469_v36 = vrot.slane %v8301_v61, 4  ;;  %v2514_v6 = vor.u32 %v2513_v8, %v2510_v44  ;;  %v2477_v4 = vor.u32 %v2476_v15, %v2473_v56  ;;  %v5906_v56 = vld [vmem:[%s6945_s27 + $0xe0] sm:$0x7]  ;;  %v6855_v15 = vld [vmem:[%s6945_s27 + $0xd8] sm:$0xff]  }
 0x14e   : > { %6333 = vmatprep.mubr.msk.bf16.mxu1 %vm756_vm1, %v6852_v54  ;;  %v2522_v54 = vrot.slane %v2520_v51, 6  ;;  %v2486_v16 = vor.u32 %v2485_v19, %v2482_v22  ;;  %v2529_v29 = vrot.slane %v2527_v14, 5  ;;  %v2532_v35 = vrot.slane %v2530_v12, 6  ;;  %v5595_v44 = vld [vmem:[%s6945_s27 + $0xcc] sm:$0xe] }
 0x14f   : > { %v8322_v13 = vor.u32 %v2494_v55, %v2491_v60  ;;  %v8335_v32 = vsel %vm7154_vm6, %v5923_v62, %v4748_v40  ;;  %v4762_v57 = vrot.slane %v7995_v46, 7  ;;  %v2505_v39 = vor.u32 %v2504_v24, %v2501_v63  ;;  %v5594_v12 = vld [vmem:[%s6945_s27 + $0xc8] sm:$0x3] }
 0x150   : > { %v2523_v30 = vor.u32 %v2522_v54, %v2519_v26  ;;  %v2487_v25 = vrot.slane %v2486_v16, 4  ;;  %v5924_v38 = vrot.slane %v5903_v18, 11  ;;  %v4758_v51 = vrot.slane %v5904_v23, 7  ;;  %v6883_v26 = vld [vmem:[%s6945_s27 + $0xc4] sm:$0xf] }
 0x151   : > { %v2515_v40 = vrot.slane %v2514_v6, 4  ;;  %v2536_v27 = vshrl.u32 %v5592_v5, 16  ;;  %v2478_v22 = vsel %vm6967_vm3, %v2469_v36, %v2477_v4  ;;  %v2533_v9 = vor.u32 %v2532_v35, %v2529_v29  ;;  %v6884_v16 = vld [vmem:[%s6945_s27 + $0xd0] sm:$0xf]  ;;  %v5597_v23 = vld [vmem:[%s6945_s27 + $0xd4] sm:$0x3] }
 0x152   : > { %v2525_v19 = vrot.slane %v2523_v30, 4  ;;  %v2539_v41 = vshll.u32 %v5592_v5, 16  ;;  %v4764_v60 = vrot.slane %v4762_v57, 4  ;;  %v4765_v55 = vrot.slane %v5906_v56, 7  ;;  %v5907_v5 = vld [vmem:[%s6945_s27 + $0xe4] sm:$0x8] }
 0x153   : > { %v2496_v8 = vsel %vm6967_vm3, %v2487_v25, %v8322_v13  ;;  %v2545_v54 = vshrl.u32 %v6883_v26, 16  ;;  %v2548_v14 = vshll.u32 %v6883_v26, 16  ;;  %v2567_v62 = vshll.u32 %v5595_v44, 16 }
 0x154   : > { %6498 = vmatmul.mubr.msk.bf16.gmra.mrb[8].mxu0 %vm756_vm1, %v5938_v3  ;;  %v4755_v3 = vrot.slane %v7977_v47, 7  ;;  %v8339_v47 = vsel %vm7154_vm6, %v4750_v28, %v4751_v1  ;;  %v2534_v52 = vsel %vm6967_vm3, %v2525_v19, %v2533_v9  ;;  %v2541_v48 = vrot.slane %v2539_v41, 6  ;;  %v5910_v19 = vld [vmem:[%s6945_s27 + $0xf8] sm:$0x7]  ;;  %v6885_v9 = vld [vmem:[%s6945_s27 + $0xdc] sm:$0xf] }
 0x155   : > { %6334 = vmatmul.mubr.msk.bf16.gmra.mrb[24].mxu1 %vm756_vm1, %v6853_v58  ;;  %6501 = vmatprep.mubr.msk.bf16.mxu0 %vm756_vm1, %v5939_v20  ;;  %v2468_v20 = vsel %vm6967_vm3, %v8308_v49, %v8301_v61  ;;  %v2497_v61 = vrot.slane %v8322_v13, 4  ;;  %v5943_v46 = vcombine.low %v8335_v32, %v8339_v47  ;;  %v5925_v58 = vrot.slane %v5905_v34, 11  ;;  %v5598_v34 = vld [vmem:[%s6945_s27 + $0xd8] sm:$0xe] }
 0x156   : > { %6337 = vmatprep.mubr.msk.bf16.mxu1 %vm756_vm1, %v6854_v17  ;;  %v4757_v7 = vrot.slane %v4755_v3, 4  ;;  %v8360_v17 = vsel %vm7154_vm6, %v5924_v38, %v4755_v3  ;;  %v2538_v49 = vrot.slane %v2536_v27, 5  ;;  %v8387_v1 = vsel %vm7154_vm6, %v4764_v60, %v4765_v55 }
 0x157   : > { %v2506_v53 = vsel %vm6967_vm3, %v2497_v61, %v2505_v39  ;;  %v8383_v28 = vsel %vm7154_vm6, %v5925_v58, %v4762_v57  ;;  %v2573_v63 = vshrl.u32 %v6884_v16, 16  ;;  %v2576_v24 = vshll.u32 %v6884_v16, 16  ;;  %v5908_v57 = vld [vmem:[%s6945_s27 + $0xec] sm:$0x7] }
 0x158   : > { %v8372_v21 = vsel %vm7154_vm6, %v4757_v7, %v4758_v51  ;;  %v2550_v36 = vrot.slane %v2548_v14, 6  ;;  %v2555_v13 = vshrl.u32 %v5594_v12, 16  ;;  %v2558_v18 = vshll.u32 %v5594_v12, 16 }
 0x159   : > { %v5615_v3 = vcombine.low %v2468_v20, %v2478_v22  ;;  %v5616_v6 = vcombine.low %v2496_v8, %v2506_v53  ;;  %v5944_v4 = vcombine.low %v8360_v17, %v8372_v21  ;;  %v5945_v29 = vcombine.low %v8383_v28, %v8387_v1 }
 0x15a   : > { %v2542_v35 = vor.u32 %v2541_v48, %v2538_v49  ;;  %v2569_v47 = vrot.slane %v2567_v62, 6  ;;  %v2575_v25 = vrot.slane %v2573_v63, 5  ;;  %v2578_v39 = vrot.slane %v2576_v24, 6 }
 0x15b   : > { %v2583_v38 = vshrl.u32 %v5597_v23, 16  ;;  %v2586_v51 = vshll.u32 %v5597_v23, 16  ;;  %v2557_v56 = vrot.slane %v2555_v13, 5  ;;  %v4769_v61 = vrot.slane %v8020_v37, 7 }
 0x15c   : > { %6502 = vmatmul.mubr.msk.bf16.gmra.mrb[12].mxu0 %vm756_vm1, %v5940_v11  ;;  %v2524_v11 = vsel %vm6967_vm3, %v2515_v40, %v2523_v30  ;;  %v5926_v7 = vrot.slane %v5907_v5, 11  ;;  %v5909_v40 = vld [vmem:[%s6945_s27 + $0xf0] sm:$0x8]  ;;  %v4776_v27 = vrot.slane %v8032_v43, 7  ;;  %v2592_v2 = vshrl.u32 %v5598_v34, 16 }
 0x15d   : > { %6338 = vmatmul.mubr.msk.bf16.gmra.mrb[28].mxu1 %vm756_vm1, %v6855_v15  ;;  %6505 = vmatprep.mubr.msk.bf16.mxu0 %vm756_vm1, %v5941_v45  ;;  %v2564_v45 = vshrl.u32 %v5595_v44, 16  ;;  %v5617_v30 = vcombine.low %v2524_v11, %v2534_v52  ;;  %v2560_v15 = vrot.slane %v2558_v18, 6  ;;  %v2595_v10 = vshll.u32 %v5598_v34, 16 }
 0x15e   : > { %6361 = vmatprep.mubr.msk.bf16.mxu1 %vm756_vm1, %v8270_v42  ;;  %v2547_v42 = vrot.slane %v2545_v54, 5  ;;  %v4772_v22 = vrot.slane %v5908_v57, 7  ;;  %v2601_v41 = vshrl.u32 %v6885_v9, 16  ;;  %v2604_v37 = vshll.u32 %v6885_v9, 16 }
 0x15f   : > { %v2566_v32 = vrot.slane %v2564_v45, 5  ;;  %v2579_v60 = vor.u32 %v2578_v39, %v2575_v25  ;;  %v2588_v55 = vrot.slane %v2586_v51, 6  ;;  %v2561_v8 = vor.u32 %v2560_v15, %v2557_v56 }
 0x160   : > { %v2551_v20 = vor.u32 %v2550_v36, %v2547_v42  ;;  %v4771_v17 = vrot.slane %v4769_v61, 4  ;;  %v5927_v26 = vrot.slane %v5909_v40, 11  ;;  %v4778_v43 = vrot.slane %v4776_v27, 4 }
 0x161   : > { %v2570_v58 = vor.u32 %v2569_v47, %v2566_v32  ;;  %v4779_v54 = vrot.slane %v5910_v19, 7  ;;  %v2594_v14 = vrot.slane %v2592_v2, 5  ;;  %v2597_v53 = vrot.slane %v2595_v10, 6 }
 0x162   : > { %v2553_v44 = vrot.slane %v2551_v20, 4  ;;  %v2603_v21 = vrot.slane %v2601_v41, 5  ;;  %v2606_v11 = vrot.slane %v2604_v37, 6  ;;  %v2581_v48 = vrot.slane %v2579_v60, 4 }
 0x163   : > { %v2571_v52 = vrot.slane %v2570_v58, 4  ;;  %v4770_v28 = vsel %vm7154_vm6, %v5926_v7, %v4769_v61  ;;  %v4773_v1 = vsel %vm7154_vm6, %v4771_v17, %v4772_v22  ;;  %v4777_v63 = vsel %vm7154_vm6, %v5927_v26, %v4776_v27 }
 0x164   : > { %6506 = vmatmul.mubr.msk.bf16.gmra.mrb[16].mxu0 %vm756_vm1, %v5942_v33  ;;  %v2543_v33 = vrot.slane %v2542_v35, 4  ;;  %v2562_v16 = vsel %vm6967_vm3, %v2553_v44, %v2561_v8  ;;  %v4780_v24 = vsel %vm7154_vm6, %v4778_v43, %v4779_v54  ;;  %v4783_v42 = vrot.slane %v8056_v50, 7 }
 0x165   : > { %6362 = vmatmul.mubr.msk.bf16.vlgmr.msra.gmra.mrb[16].mxu1 %vm756_vm1, %v8314_v0  ;;  %6509 = vmatprep.mubr.msk.bf16.mxu0 %vm756_vm1, %v5943_v46  ;;  %v2585_v0 = vrot.slane %v2583_v38, 5  ;;  %v5600_v46 = vld [vmem:[%s6945_s27 + $0xe0] sm:$0x3]  ;;  %v2598_v36 = vor.u32 %v2597_v53, %v2594_v14  ;;  %v2607_v13 = vor.u32 %v2606_v11, %v2603_v21  ;;  %v5946_v5 = vcombine.low %v4770_v28, %v4773_v1 }
 0x166   : > { %6365 = vmatprep.mubr.msk.bf16.mxu1 %vm756_vm1, %v5615_v3  ;;  %v2611_v12 = vshrl.u32 %v5600_v46, 16  ;;  %v2614_v49 = vshll.u32 %v5600_v46, 16  ;;  %v2552_v62 = vsel %vm6967_vm3, %v2543_v33, %v2551_v20  ;;  %v5911_v3 = vld [vmem:[%s6945_s27 + $0xfc] sm:$0x8]  ;;  %v5947_v32 = vcombine.low %v4777_v63, %v4780_v24  ;;  %v8460_v46 = vld [vmem:[%s8573_s2] ss:$0 sm:$0xff] }
 0x167   : > { %v2589_v45 = vor.u32 %v2588_v55, %v2585_v0  ;;  %v5618_v35 = vcombine.low %v2552_v62, %v2562_v16  ;;  %v5928_v47 = vrot.slane %v5911_v3, 11  ;;  %v4785_v34 = vrot.slane %v4783_v42, 4 }
 0x168   : > { %v2613_v18 = vrot.slane %v2611_v12, 5  ;;  %v2616_v23 = vrot.slane %v2614_v49, 6  ;;  %v2609_v25 = vrot.slane %v2607_v13, 4 }
 0x169   : > { %v4784_v38 = vsel %vm7154_vm6, %v5928_v47, %v4783_v42 }
 0x16a   : > { %v2617_v39 = vor.u32 %v2616_v23, %v2613_v18 }
 0x16c   : > { %6510 = vmatmul.mubr.msk.bf16.gmra.mrb[20].mxu0 %vm756_vm1, %v5944_v4  ;;  %v2580_v4 = vsel %vm6967_vm3, %v2571_v52, %v2579_v60  ;;  %v2618_v56 = vsel %vm6967_vm3, %v2609_v25, %v2617_v39 }
 0x16d   : > { %6366 = vmatmul.mubr.msk.bf16.gmra.mrb[20].mxu1 %vm756_vm1, %v5616_v6  ;;  %6513 = vmatprep.mubr.msk.bf16.mxu0 %vm756_vm1, %v5945_v29  ;;  %v5912_v6 = vld [vmem:[%s6945_s27 + $0x104] sm:$0x7]  ;;  %v2590_v29 = vsel %vm6967_vm3, %v2581_v48, %v2589_v45 }
 0x16e   : > { %6369 = vmatprep.mubr.msk.bf16.mxu1 %vm756_vm1, %v5617_v30  ;;  %v4786_v50 = vrot.slane %v5912_v6, 7  ;;  %v5619_v57 = vcombine.low %v2580_v4, %v2590_v29  ;;  %v2599_v30 = vrot.slane %v2598_v36, 4 }
 0x170   : > { %v4787_v51 = vsel %vm7154_vm6, %v4785_v34, %v4786_v50  ;;  %v2608_v20 = vsel %vm6967_vm3, %v2599_v30, %v2607_v13 }
 0x171   : > { %v5948_v15 = vcombine.low %v4784_v38, %v4787_v51  ;;  %v5620_v61 = vcombine.low %v2608_v20, %v2618_v56 }
 0x174   : > { %6514 = vmatmul.mubr.msk.bf16.gmra.mrb[24].mxu0 %vm756_vm1, %v5946_v5 }
 0x175   : > { %6370 = vmatmul.mubr.msk.bf16.gmra.mrb[24].mxu1 %vm756_vm1, %v5618_v35  ;;  %6517 = vmatprep.mubr.msk.bf16.mxu0 %vm756_vm1, %v5947_v32 }
 0x176   : > { %6373 = vmatprep.mubr.msk.bf16.mxu1 %vm756_vm1, %v5619_v57 }
 0x17c   : > { %6518 = vmatmul.mubr.msk.bf16.gmra.mrb[28].mxu0 %vm756_vm1, %v5948_v15 }
 0x17d   : > { %6374 = vmatmul.mubr.msk.bf16.gmra.mrb[28].mxu1 %vm756_vm1, %v5620_v61 }
 0x1f8   : > { %v6311_v7 = vpop.f32.mrb[0].mxu1 }
 0x1f9   : > { %v1964_v40 = vpop.f32.mrb[1].mxu1 }
 0x1fa   : > { %v6312_v27 = vpop.f32.mrb[2].mxu1 }
 0x1fb   : > { %v1967_v59 = vpop.f32.mrb[3].mxu1 }
 0x200   : > { %v6315_v2 = vpop.f32.mrb[4].mxu1 }
 0x201   : > { %v1980_v10 = vpop.f32.mrb[5].mxu1 }
 0x202   : > { %v6316_v33 = vpop.f32.mrb[6].mxu1 }
 0x203   : > { %v1983_v22 = vpop.f32.mrb[7].mxu1 }
 0x208   : > { %v6319_v19 = vpop.f32.mrb[8].mxu1 }
 0x209   : > { %v1996_v9 = vpop.f32.mrb[9].mxu1 }
 0x20a   : > { %v6320_v41 = vpop.f32.mrb[10].mxu1 }
 0x20b   : > { %v1999_v31 = vpop.f32.mrb[11].mxu1 }
 0x210   : > { %v8449_v37 = vpop.f32.mrb[12].mxu1 }
 0x211   : > { %v8451_v58 = vpop.f32.mrb[13].mxu1 }
 0x212   : > { %v8453_v60 = vpop.f32.mrb[14].mxu1 }
 0x213   : > { %v8455_v0 = vpop.f32.mrb[15].mxu1 }
 0x217   : > { %v6491_v55 = vpop.f32.mrb[0].mxu0 }
 0x218   : > { %v6525_v44 = vadd.f32 %v6491_v55, %v6311_v7  ;;  %v4935_v8 = vpop.f32.mrb[1].mxu0 }
 0x219   : > { %v6526_v17 = vadd.f32 %v4935_v8, %v1964_v40  ;;  %v6492_v26 = vpop.f32.mrb[2].mxu0 }
 0x21a   : > { %v5103_v43 = vadd.f32 %v6525_v44, %v8460_v46  ;;  %v6527_v54 = vadd.f32 %v6492_v26, %v6312_v27  ;;  %v4938_v14 = vpop.f32.mrb[3].mxu0 }
 0x21b   : > { %v5101_v53 = vadd.f32 %v6526_v17, %v8460_v46  ;;  %v6528_v21 = vadd.f32 %v4938_v14, %v1967_v59 }
 0x21c   : > { %v6005_v11 = vpack.c.bf16 %v5103_v43, %v5103_v43  ;;  %v5104_v12 = vadd.f32 %v6527_v54, %v8460_v46 }
 0x21d   : > { %v6003_v49 = vpack.c.bf16 %v5101_v53, %v5101_v53  ;;  %v5102_v52 = vadd.f32 %v6528_v21, %v8460_v46 }
 0x21e   : > { %5264 = vst.msk [vmem:[%s8467_s15 + $0x8] sm:$0xf] %vm5261_vm7, %v6005_v11  ;;  %v6006_v48 = vpack.c.bf16 %v5104_v12, %v5104_v12 }
 0x21f   : > { %5262 = vst.msk [vmem:[%s8467_s15] sm:$0xf] %vm5261_vm7, %v6003_v49  ;;  %v6004_v45 = vpack.c.bf16 %v5102_v52, %v5102_v52  ;;  %v6495_v62 = vpop.f32.mrb[4].mxu0 }
 0x220   : > { %5265 = vst.msk [vmem:[%s8467_s15 + $0xc] sm:$0xf] %vm5261_vm7, %v6006_v48  ;;  %v6529_v28 = vadd.f32 %v6495_v62, %v6315_v2  ;;  %v4951_v1 = vpop.f32.mrb[5].mxu0 }
 0x221   : > { %5263 = vst.msk [vmem:[%s8467_s15 + $0x4] sm:$0xf] %vm5261_vm7, %v6004_v45  ;;  %v6530_v16 = vadd.f32 %v4951_v1, %v1980_v10  ;;  %v6496_v63 = vpop.f32.mrb[6].mxu0 }
 0x222   : > { %v5107_v24 = vadd.f32 %v6529_v28, %v8460_v46  ;;  %v6531_v42 = vadd.f32 %v6496_v63, %v6316_v33  ;;  %v4954_v36 = vpop.f32.mrb[7].mxu0 }
 0x223   : > { %v5105_v13 = vadd.f32 %v6530_v16, %v8460_v46  ;;  %v6532_v18 = vadd.f32 %v4954_v36, %v1983_v22 }
 0x224   : > { %v6009_v23 = vpack.c.bf16 %v5107_v24, %v5107_v24  ;;  %v5108_v3 = vadd.f32 %v6531_v42, %v8460_v46 }
 0x225   : > { %v6007_v6 = vpack.c.bf16 %v5105_v13, %v5105_v13  ;;  %v5106_v4 = vadd.f32 %v6532_v18, %v8460_v46 }
 0x226   : > { %5268 = vst.msk [vmem:[%s8467_s15 + $0x18] sm:$0xf] %vm5261_vm7, %v6009_v23  ;;  %v6010_v29 = vpack.c.bf16 %v5108_v3, %v5108_v3 }
 0x227   : > { %5266 = vst.msk [vmem:[%s8467_s15 + $0x10] sm:$0xf] %vm5261_vm7, %v6007_v6  ;;  %v6008_v35 = vpack.c.bf16 %v5106_v4, %v5106_v4  ;;  %v6499_v5 = vpop.f32.mrb[8].mxu0 }
 0x228   : > { %5269 = vst.msk [vmem:[%s8467_s15 + $0x1c] sm:$0xf] %vm5261_vm7, %v6010_v29  ;;  %v6533_v32 = vadd.f32 %v6499_v5, %v6319_v19  ;;  %v4967_v47 = vpop.f32.mrb[9].mxu0 }
 0x229   : > { %5267 = vst.msk [vmem:[%s8467_s15 + $0x14] sm:$0xf] %vm5261_vm7, %v6008_v35  ;;  %v6534_v34 = vadd.f32 %v4967_v47, %v1996_v9  ;;  %v6500_v50 = vpop.f32.mrb[10].mxu0 }
 0x22a   : > { %v5111_v57 = vadd.f32 %v6533_v32, %v8460_v46  ;;  %v6535_v30 = vadd.f32 %v6500_v50, %v6320_v41  ;;  %v4970_v25 = vpop.f32.mrb[11].mxu0 }
 0x22b   : > { %v5109_v39 = vadd.f32 %v6534_v34, %v8460_v46  ;;  %v6536_v38 = vadd.f32 %v4970_v25, %v1999_v31 }
 0x22c   : > { %v6013_v51 = vpack.c.bf16 %v5111_v57, %v5111_v57  ;;  %v5112_v20 = vadd.f32 %v6535_v30, %v8460_v46 }
 0x22d   : > { %v6011_v56 = vpack.c.bf16 %v5109_v39, %v5109_v39  ;;  %v5110_v15 = vadd.f32 %v6536_v38, %v8460_v46 }
 0x22e   : > { %5272 = vst.msk [vmem:[%s8467_s15 + $0x28] sm:$0xf] %vm5261_vm7, %v6013_v51  ;;  %v6014_v61 = vpack.c.bf16 %v5112_v20, %v5112_v20 }
 0x22f   : > { %5270 = vst.msk [vmem:[%s8467_s15 + $0x20] sm:$0xf] %vm5261_vm7, %v6011_v56  ;;  %v6012_v7 = vpack.c.bf16 %v5110_v15, %v5110_v15  ;;  %v6503_v40 = vpop.f32.mrb[12].mxu0 }
 0x230   : > { %5273 = vst.msk [vmem:[%s8467_s15 + $0x2c] sm:$0xf] %vm5261_vm7, %v6014_v61  ;;  %v6537_v27 = vadd.f32 %v6503_v40, %v8449_v37  ;;  %v4983_v59 = vpop.f32.mrb[13].mxu0 }
 0x231   : > { %5271 = vst.msk [vmem:[%s8467_s15 + $0x24] sm:$0xf] %vm5261_vm7, %v6012_v7  ;;  %v6538_v2 = vadd.f32 %v4983_v59, %v8451_v58  ;;  %v6504_v10 = vpop.f32.mrb[14].mxu0 }
 0x232   : > { %v5115_v33 = vadd.f32 %v6537_v27, %v8460_v46  ;;  %v6539_v22 = vadd.f32 %v6504_v10, %v8453_v60  ;;  %v4986_v19 = vpop.f32.mrb[15].mxu0 }
 0x233   : > { %v5113_v9 = vadd.f32 %v6538_v2, %v8460_v46  ;;  %v6540_v41 = vadd.f32 %v4986_v19, %v8455_v0 }
 0x234   : > { %v6017_v31 = vpack.c.bf16 %v5115_v33, %v5115_v33  ;;  %v5116_v37 = vadd.f32 %v6539_v22, %v8460_v46 }
 0x235   : > { %v6015_v55 = vpack.c.bf16 %v5113_v9, %v5113_v9  ;;  %v5114_v44 = vadd.f32 %v6540_v41, %v8460_v46 }
 0x236   : > { %5276 = vst.msk [vmem:[%s8467_s15 + $0x38] sm:$0xf] %vm5261_vm7, %v6017_v31  ;;  %v6018_v58 = vpack.c.bf16 %v5116_v37, %v5116_v37 }
 0x237   : > { %5274 = vst.msk [vmem:[%s8467_s15 + $0x30] sm:$0xf] %vm5261_vm7, %v6015_v55  ;;  %v6016_v8 = vpack.c.bf16 %v5114_v44, %v5114_v44  ;;  %v6507_v17 = vpop.f32.mrb[16].mxu0 }
 0x238   : > { %5277 = vst.msk [vmem:[%s8467_s15 + $0x3c] sm:$0xf] %vm5261_vm7, %v6018_v58  ;;  %v6363_v60 = vpop.f32.mrb[16].mxu1  ;;  %v4999_v26 = vpop.f32.mrb[17].mxu0 }
 0x239   : > { %5275 = vst.msk [vmem:[%s8467_s15 + $0x34] sm:$0xf] %vm5261_vm7, %v6016_v8  ;;  %v6541_v0 = vadd.f32 %v6507_v17, %v6363_v60  ;;  %v2830_v43 = vpop.f32.mrb[17].mxu1  ;;  %v6508_v54 = vpop.f32.mrb[18].mxu0 }
 0x23a   : > { %v6542_v14 = vadd.f32 %v4999_v26, %v2830_v43  ;;  %v6364_v53 = vpop.f32.mrb[18].mxu1  ;;  %v5002_v21 = vpop.f32.mrb[19].mxu0 }
 0x23b   : > { %v5119_v11 = vadd.f32 %v6541_v0, %v8460_v46  ;;  %v6543_v12 = vadd.f32 %v6508_v54, %v6364_v53  ;;  %v2833_v49 = vpop.f32.mrb[19].mxu1 }
 0x23c   : > { %v5117_v52 = vadd.f32 %v6542_v14, %v8460_v46  ;;  %v6544_v48 = vadd.f32 %v5002_v21, %v2833_v49 }
 0x23d   : > { %v6021_v45 = vpack.c.bf16 %v5119_v11, %v5119_v11  ;;  %v5120_v62 = vadd.f32 %v6543_v12, %v8460_v46 }
 0x23e   : > { %v6019_v28 = vpack.c.bf16 %v5117_v52, %v5117_v52  ;;  %v5118_v1 = vadd.f32 %v6544_v48, %v8460_v46 }
 0x23f   : > { %5280 = vst.msk [vmem:[%s8467_s15 + $0x48] sm:$0xf] %vm5261_vm7, %v6021_v45  ;;  %v6022_v16 = vpack.c.bf16 %v5120_v62, %v5120_v62  ;;  %v6511_v63 = vpop.f32.mrb[20].mxu0 }
 0x240   : > { %5278 = vst.msk [vmem:[%s8467_s15 + $0x40] sm:$0xf] %vm5261_vm7, %v6019_v28  ;;  %v6020_v24 = vpack.c.bf16 %v5118_v1, %v5118_v1  ;;  %v6367_v42 = vpop.f32.mrb[20].mxu1  ;;  %v5015_v36 = vpop.f32.mrb[21].mxu0 }
 0x241   : > { %5281 = vst.msk [vmem:[%s8467_s15 + $0x4c] sm:$0xf] %vm5261_vm7, %v6022_v16  ;;  %v6545_v13 = vadd.f32 %v6511_v63, %v6367_v42  ;;  %v2846_v18 = vpop.f32.mrb[21].mxu1  ;;  %v6512_v23 = vpop.f32.mrb[22].mxu0 }
 0x242   : > { %5279 = vst.msk [vmem:[%s8467_s15 + $0x44] sm:$0xf] %vm5261_vm7, %v6020_v24  ;;  %v6546_v3 = vadd.f32 %v5015_v36, %v2846_v18  ;;  %v6368_v6 = vpop.f32.mrb[22].mxu1  ;;  %v5018_v4 = vpop.f32.mrb[23].mxu0 }
 0x243   : > { %v5123_v29 = vadd.f32 %v6545_v13, %v8460_v46  ;;  %v6547_v35 = vadd.f32 %v6512_v23, %v6368_v6  ;;  %v2849_v5 = vpop.f32.mrb[23].mxu1 }
 0x244   : > { %v5121_v32 = vadd.f32 %v6546_v3, %v8460_v46  ;;  %v6548_v47 = vadd.f32 %v5018_v4, %v2849_v5 }
 0x245   : > { %v6025_v34 = vpack.c.bf16 %v5123_v29, %v5123_v29  ;;  %v5124_v50 = vadd.f32 %v6547_v35, %v8460_v46 }
 0x246   : > { %v6023_v57 = vpack.c.bf16 %v5121_v32, %v5121_v32  ;;  %v5122_v30 = vadd.f32 %v6548_v47, %v8460_v46 }
 0x247   : > { %5284 = vst.msk [vmem:[%s8467_s15 + $0x58] sm:$0xf] %vm5261_vm7, %v6025_v34  ;;  %v6026_v25 = vpack.c.bf16 %v5124_v50, %v5124_v50  ;;  %v6515_v39 = vpop.f32.mrb[24].mxu0 }
 0x248   : > { %5282 = vst.msk [vmem:[%s8467_s15 + $0x50] sm:$0xf] %vm5261_vm7, %v6023_v57  ;;  %v6024_v38 = vpack.c.bf16 %v5122_v30, %v5122_v30  ;;  %v6371_v51 = vpop.f32.mrb[24].mxu1  ;;  %v5031_v20 = vpop.f32.mrb[25].mxu0 }
 0x249   : > { %5285 = vst.msk [vmem:[%s8467_s15 + $0x5c] sm:$0xf] %vm5261_vm7, %v6026_v25  ;;  %v6549_v56 = vadd.f32 %v6515_v39, %v6371_v51  ;;  %v2862_v15 = vpop.f32.mrb[25].mxu1  ;;  %v6516_v61 = vpop.f32.mrb[26].mxu0 }
 0x24a   : > { %5283 = vst.msk [vmem:[%s8467_s15 + $0x54] sm:$0xf] %vm5261_vm7, %v6024_v38  ;;  %v6550_v7 = vadd.f32 %v5031_v20, %v2862_v15  ;;  %v6372_v40 = vpop.f32.mrb[26].mxu1  ;;  %v5034_v27 = vpop.f32.mrb[27].mxu0 }
 0x24b   : > { %v5127_v59 = vadd.f32 %v6549_v56, %v8460_v46  ;;  %v6551_v2 = vadd.f32 %v6516_v61, %v6372_v40  ;;  %v2865_v10 = vpop.f32.mrb[27].mxu1 }
 0x24c   : > { %v5125_v33 = vadd.f32 %v6550_v7, %v8460_v46  ;;  %v6552_v22 = vadd.f32 %v5034_v27, %v2865_v10 }
 0x24d   : > { %v6029_v19 = vpack.c.bf16 %v5127_v59, %v5127_v59  ;;  %v5128_v9 = vadd.f32 %v6551_v2, %v8460_v46 }
 0x24e   : > { %v6027_v41 = vpack.c.bf16 %v5125_v33, %v5125_v33  ;;  %v5126_v31 = vadd.f32 %v6552_v22, %v8460_v46 }
 0x24f   : > { %5288 = vst.msk [vmem:[%s8467_s15 + $0x68] sm:$0xf] %vm5261_vm7, %v6029_v19  ;;  %v6030_v37 = vpack.c.bf16 %v5128_v9, %v5128_v9  ;;  %v6519_v55 = vpop.f32.mrb[28].mxu0 }
 0x250   : > { %5286 = vst.msk [vmem:[%s8467_s15 + $0x60] sm:$0xf] %vm5261_vm7, %v6027_v41  ;;  %v6028_v44 = vpack.c.bf16 %v5126_v31, %v5126_v31  ;;  %v6375_v58 = vpop.f32.mrb[28].mxu1  ;;  %v5047_v8 = vpop.f32.mrb[29].mxu0 }
 0x251   : > { %5289 = vst.msk [vmem:[%s8467_s15 + $0x6c] sm:$0xf] %vm5261_vm7, %v6030_v37  ;;  %v6553_v17 = vadd.f32 %v6519_v55, %v6375_v58  ;;  %v2878_v60 = vpop.f32.mrb[29].mxu1  ;;  %v6520_v26 = vpop.f32.mrb[30].mxu0 }
 0x252   : > { %5287 = vst.msk [vmem:[%s8467_s15 + $0x64] sm:$0xf] %vm5261_vm7, %v6028_v44  ;;  %v6554_v0 = vadd.f32 %v5047_v8, %v2878_v60  ;;  %v6376_v43 = vpop.f32.mrb[30].mxu1  ;;  %v5050_v54 = vpop.f32.mrb[31].mxu0 }
 0x253   : > { %v5131_v14 = vadd.f32 %v6553_v17, %v8460_v46  ;;  %v6555_v53 = vadd.f32 %v6520_v26, %v6376_v43  ;;  %v2881_v21 = vpop.f32.mrb[31].mxu1 }
 0x254   : > { %v5129_v11 = vadd.f32 %v6554_v0, %v8460_v46  ;;  %v6556_v12 = vadd.f32 %v5050_v54, %v2881_v21 }
 0x255   : > { %v6033_v49 = vpack.c.bf16 %v5131_v14, %v5131_v14  ;;  %v5132_v52 = vadd.f32 %v6555_v53, %v8460_v46 }
 0x256   : > { %v6031_v48 = vpack.c.bf16 %v5129_v11, %v5129_v11  ;;  %v5130_v45 = vadd.f32 %v6556_v12, %v8460_v46 }
 0x257   : > { %5292 = vst.msk [vmem:[%s8467_s15 + $0x78] sm:$0xf] %vm5261_vm7, %v6033_v49  ;;  %v6034_v62 = vpack.c.bf16 %v5132_v52, %v5132_v52 }
 0x258   : > { %5290 = vst.msk [vmem:[%s8467_s15 + $0x70] sm:$0xf] %vm5261_vm7, %v6031_v48  ;;  %v6032_v28 = vpack.c.bf16 %v5130_v45, %v5130_v45 }
 0x259   : > { %5293 = vst.msk [vmem:[%s8467_s15 + $0x7c] sm:$0xf] %vm5261_vm7, %v6034_v62 }
 0x25a   : > { %5291 = vst.msk [vmem:[%s8467_s15 + $0x74] sm:$0xf] %vm5261_vm7, %v6032_v28 }
 0x25b PF: > { %s13_s12 = sadd.s32 1, %s6892_s12  }
 0x25c   : > { %p10_p4 = scmp.ge.s32.totalorder %s13_s12, 4  }
 0x25e   :  { %12 = sbr.rel (!%p10_p4) target bundleno = 1 (0x1), region = 72 }

</bundles_post_ra>
